<compile_context>
chip_gen: v5e
topology: v5e:2x2
jax: 0.10.0
libtpu: 0.0.40
codegen_flags: <defaults>
</compile_context>

<pallas_src>
import functools

import jax
import jax.numpy as jnp
from jax.experimental import pallas as pl
from jax.experimental.pallas import tpu as pltpu


# ---------------------------------------------------------------------------
# helpers
# ---------------------------------------------------------------------------
def _round_up(x, m):
    return (x + m - 1) // m * m


def _tiles(mp, kp, fp):
    """Tile sizes for (M, K, F).  All padded dims are multiples of 128."""
    tm = 256 if (mp % 256 == 0 and mp >= 512) else 128   # >=2 M blocks for v7x
    if kp % 512 == 0:
        tk = 512
    elif kp % 256 == 0:
        tk = 256
    else:
        tk = 128
    tf = 256 if fp % 256 == 0 else 128
    assert mp % tm == 0 and kp % tk == 0 and fp % tf == 0
    return tm, tk, tf


GCN_DIMS = [(1505, 512), (512, 256), (256, 64)]
BN_EPS = 1e-5
FUSED_MAX_NP = 1024          # VMEM-resident single-kernel path (fits v7x 64MiB)
TILED_VMEM_LIMIT = 32 * 1024 * 1024
FUSED_VMEM_LIMIT = 48 * 1024 * 1024


# ---------------------------------------------------------------------------
# Pallas kernel 1 (tiled path): bf16 matmul, f32 scratch accumulate,
# single (bf16 or f32) store on the last K step.  No bias (folded elsewhere).
# ---------------------------------------------------------------------------
def _mm_kernel(x_ref, w_ref, o_ref, acc_ref):
    k = pl.program_id(2)

    @pl.when(k == 0)
    def _():
        acc_ref[...] = jnp.zeros_like(acc_ref)

    acc_ref[...] += jnp.dot(x_ref[...], w_ref[...],
                            preferred_element_type=jnp.float32)

    @pl.when(k == pl.num_programs(2) - 1)
    def _():
        o_ref[...] = acc_ref[...].astype(o_ref.dtype)


def matmul_bf16(x, w, out_dtype=jnp.bfloat16):
    """x: bf16 [Mp, Kp], w: bf16 [Kp, Fp] (both pre-padded to 128 multiples)."""
    mp, kp = x.shape
    kp2, fp = w.shape
    assert kp == kp2
    tm, tk, tf = _tiles(mp, kp, fp)
    return pl.pallas_call(
        _mm_kernel,
        out_shape=jax.ShapeDtypeStruct((mp, fp), out_dtype),
        grid_spec=pltpu.PrefetchScalarGridSpec(
            num_scalar_prefetch=0,
            grid=(mp // tm, fp // tf, kp // tk),
            in_specs=[
                pl.BlockSpec((tm, tk), lambda i, j, k: (i, k)),
                pl.BlockSpec((tk, tf), lambda i, j, k: (k, j)),
            ],
            out_specs=pl.BlockSpec((tm, tf), lambda i, j, k: (i, j)),
            scratch_shapes=[pltpu.VMEM((tm, tf), jnp.float32)],
        ),
        compiler_params=pltpu.CompilerParams(
            dimension_semantics=("parallel", "parallel", "arbitrary"),
            vmem_limit_bytes=TILED_VMEM_LIMIT),
    )(x, w)


# ---------------------------------------------------------------------------
# Pallas kernel 2 (tiled path): GCN aggregation fused with (bias-folded)
# BatchNorm + LeakyReLU.  bf16 A, bf16 XW, f32 scratch accumulate, bf16 out.
#   epilogue (last k): o = leaky_relu(acc * scale + shift, 0.01)
#   where scale = gamma / sqrt(var+eps), shift = beta - (mean - gcn_bias)*scale
# ---------------------------------------------------------------------------
def _agg_bn_lrelu_kernel(a_ref, xw_ref, scale_ref, shift_ref, o_ref, acc_ref):
    k = pl.program_id(2)

    @pl.when(k == 0)
    def _():
        acc_ref[...] = jnp.zeros_like(acc_ref)

    acc_ref[...] += jnp.dot(a_ref[...], xw_ref[...],
                            preferred_element_type=jnp.float32)

    @pl.when(k == pl.num_programs(2) - 1)
    def _():
        y = acc_ref[...] * scale_ref[...] + shift_ref[...]
        o_ref[...] = jnp.where(y > 0, y, 0.01 * y).astype(o_ref.dtype)


def gcn_agg_bn_lrelu(a_norm, xw, scale, shift):
    """a_norm: bf16 [Np, Np], xw: bf16 [Np, Fp], scale/shift: f32 [1, Fp]."""
    np_, np2 = a_norm.shape
    assert np_ == np2
    _, fp = xw.shape
    tm, tk, tf = _tiles(np_, np_, fp)
    return pl.pallas_call(
        _agg_bn_lrelu_kernel,
        out_shape=jax.ShapeDtypeStruct((np_, fp), jnp.bfloat16),
        grid_spec=pltpu.PrefetchScalarGridSpec(
            num_scalar_prefetch=0,
            grid=(np_ // tm, fp // tf, np_ // tk),
            in_specs=[
                pl.BlockSpec((tm, tk), lambda i, j, k: (i, k)),
                pl.BlockSpec((tk, tf), lambda i, j, k: (k, j)),
                pl.BlockSpec((1, tf), lambda i, j, k: (0, j)),
                pl.BlockSpec((1, tf), lambda i, j, k: (0, j)),
            ],
            out_specs=pl.BlockSpec((tm, tf), lambda i, j, k: (i, j)),
            scratch_shapes=[pltpu.VMEM((tm, tf), jnp.float32)],
        ),
        compiler_params=pltpu.CompilerParams(
            dimension_semantics=("parallel", "parallel", "arbitrary"),
            vmem_limit_bytes=TILED_VMEM_LIMIT),
    )(a_norm, xw, scale, shift)


# ---------------------------------------------------------------------------
# Pallas kernel 3 (small-graph fast path): whole forward in ONE kernel.
# All weights + adjacency + features are full VMEM-resident arrays.
# ---------------------------------------------------------------------------
def _fused_forward_kernel(h0_ref, a_ref,
                          w1_ref, sc1_ref, sh1_ref,
                          w2_ref, sc2_ref, sh2_ref,
                          w3_ref, sc3_ref, sh3_ref,
                          wf_ref, y_ref):
    a = a_ref[...]                                           # bf16 [Np, Np]

    def gcn_layer(x_bf16, w_ref, sc_ref, sh_ref):
        xw = jnp.dot(x_bf16, w_ref[...],
                     preferred_element_type=jnp.float32)     # f32 accumulate
        agg = jnp.dot(a, xw.astype(jnp.bfloat16),
                      preferred_element_type=jnp.float32)
        y = agg * sc_ref[...] + sh_ref[...]                  # BN (bias folded)
        return jnp.where(y > 0, y, 0.01 * y).astype(jnp.bfloat16)  # LeakyReLU

    h = gcn_layer(h0_ref[...], w1_ref, sc1_ref, sh1_ref)
    h = gcn_layer(h, w2_ref, sc2_ref, sh2_ref)
    h = gcn_layer(h, w3_ref, sc3_ref, sh3_ref)
    # fused output heads: [color_picker | classification_head] in one matmul
    y_ref[...] = jnp.dot(h, wf_ref[...], preferred_element_type=jnp.float32)


def fused_forward(h0, a_norm, params):
    np_ = h0.shape[0]
    ins = [h0, a_norm]
    for l in range(len(GCN_DIMS)):
        ins += [params["W"][l], params["scale"][l], params["shift"][l]]
    ins.append(params["Wf"])
    vmem_spec = pl.BlockSpec(memory_space=pltpu.MemorySpace.VMEM)
    return pl.pallas_call(
        _fused_forward_kernel,
        out_shape=jax.ShapeDtypeStruct((np_, 128), jnp.float32),
        in_specs=[vmem_spec] * len(ins),
        out_specs=vmem_spec,
        compiler_params=pltpu.CompilerParams(
            vmem_limit_bytes=FUSED_VMEM_LIMIT),
    )(*ins)


# ---------------------------------------------------------------------------
# parameters: padded + bf16 + GCN bias folded into BN affine, all done ONCE
# ---------------------------------------------------------------------------
def _glorot(key, shape):
    fan_in, fan_out = shape
    lim = (6.0 / (fan_in + fan_out)) ** 0.5
    return jax.random.uniform(key, shape, jnp.float32, -lim, lim)


def init_params(key):
    ks = iter(jax.random.split(key, 32))
    p = {
        "emb_color": jax.random.normal(next(ks), (256, 85), jnp.float32) * 0.1,
        "emb_rel": jax.random.normal(next(ks), (11, 250), jnp.float32) * 0.1,
        "W": [], "scale": [], "shift": [],
    }
    for din, dout in GCN_DIMS:
        kp, fp = _round_up(din, 128), _round_up(dout, 128)
        w = _glorot(next(ks), (din, dout))
        bias = jax.random.normal(next(ks), (dout,), jnp.float32) * 0.01
        gamma = jax.random.uniform(next(ks), (dout,), jnp.float32, 0.5, 1.5)
        beta = jax.random.normal(next(ks), (dout,), jnp.float32) * 0.1
        mean = jax.random.normal(next(ks), (dout,), jnp.float32) * 0.1
        var = jax.random.uniform(next(ks), (dout,), jnp.float32, 0.5, 1.5)

        wp = jnp.zeros((kp, fp), jnp.float32).at[:din, :dout].set(w)
        p["W"].append(wp.astype(jnp.bfloat16))

        scale = gamma * jax.lax.rsqrt(var + BN_EPS)
        shift = beta - (mean - bias) * scale          # GCN bias folded into BN
        p["scale"].append(jnp.zeros((1, fp), jnp.float32).at[0, :dout].set(scale))
        p["shift"].append(jnp.zeros((1, fp), jnp.float32).at[0, :dout].set(shift))

    # output heads fused into one lane-dense matmul: [64, 3+3] padded to [128,128]
    wc = _glorot(next(ks), (64, 3))
    bc = jax.random.normal(next(ks), (3,), jnp.float32) * 0.05
    wcls = _glorot(next(ks), (64, 3))
    bcls = jax.random.normal(next(ks), (3,), jnp.float32) * 0.05
    wf = jnp.concatenate([wc, wcls], axis=1)                      # [64, 6]
    p["Wf"] = (jnp.zeros((128, 128), jnp.float32)
               .at[:64, :6].set(wf)).astype(jnp.bfloat16)
    p["bf"] = jnp.concatenate([bc, bcls]).astype(jnp.float32)     # [6], glue add
    return p


# ---------------------------------------------------------------------------
# plain-JAX glue: embeddings + dense GCN-normalized adjacency with self loops
# ---------------------------------------------------------------------------
def _build_features(params, x):
    n = x.shape[0]
    resnet = x[:, 1:1001]                                            # [N,1000]
    rel_idx = jnp.clip(jnp.round(x[:, 1001] * 10.0).astype(jnp.int32), 0, 10)
    rel_e = params["emb_rel"][rel_idx]                               # [N,250]
    col_idx = jnp.clip(x[:, -3:].astype(jnp.int32), 0, 255)
    col_e = params["emb_color"][col_idx].reshape(n, -1)              # [N,255]
    return jnp.concatenate([resnet, rel_e, col_e], axis=1)           # [N,1505]


def _build_adjacency(edge_index, edge_attr, n, np_):
    """Dense D^-1/2 (A + I) D^-1/2 with add_remaining_self_loops semantics."""
    src, dst = edge_index[0], edge_index[1]
    ew = edge_attr.reshape(-1).astype(jnp.float32)
    is_self = src == dst
    a = jnp.zeros((np_, np_), jnp.float32).at[dst, src].add(
        jnp.where(is_self, 0.0, ew))
    self_w = jnp.zeros((np_,), jnp.float32).at[src].add(
        jnp.where(is_self, ew, 0.0))
    has_self = jnp.zeros((np_,), jnp.float32).at[src].add(
        jnp.where(is_self, 1.0, 0.0)) > 0
    ii = jnp.arange(n)
    diag = jnp.where(has_self[:n], self_w[:n], 1.0)
    a = a.at[ii, ii].set(diag)
    deg = jnp.sum(a, axis=1)
    dinv = jnp.where(deg > 0, jax.lax.rsqrt(jnp.maximum(deg, 1e-12)), 0.0)
    return (dinv[:, None] * a) * dinv[None, :]                       # [Np,Np]


# ---------------------------------------------------------------------------
# full forward (eval mode: dropout = identity, BatchNorm uses running stats)
# ---------------------------------------------------------------------------
def forward(params, x, edge_index, edge_attr, force_tiled=False):
    n = x.shape[0]
    np_ = _round_up(max(n, 128), 128)      # 128-multiple -> lane-dense A blocks

    feats = _build_features(params, x)                               # f32 [N,1505]
    k0p = params["W"][0].shape[0]                                    # 1536
    h0 = jnp.zeros((np_, k0p), jnp.float32).at[:n, :feats.shape[1]].set(feats)
    h0 = h0.astype(jnp.bfloat16)

    a_norm = _build_adjacency(edge_index, edge_attr, n, np_).astype(jnp.bfloat16)

    if (np_ <= FUSED_MAX_NP) and not force_tiled:
        # single VMEM-resident kernel: 3x (X@W -> A@XW -> BN+LeakyReLU) + heads
        y = fused_forward(h0, a_norm, params)                        # f32 [Np,128]
    else:
        h = h0
        for l in range(len(GCN_DIMS)):
            xw = matmul_bf16(h, params["W"][l])                      # bf16 X@W
            h = gcn_agg_bn_lrelu(a_norm, xw,
                                 params["scale"][l], params["shift"][l])
        y = matmul_bf16(h, params["Wf"], out_dtype=jnp.float32)      # f32 [Np,128]

    out = y[:n, 0:3] + params["bf"][0:3]
    classification = jax.nn.softmax(y[:n, 3:6] + params["bf"][3:6], axis=1)
    return out, classification


# ---------------------------------------------------------------------------
# pure-JAX reference (mirrors the kernels' bf16-operand / f32-accumulate
# numerics so the comparison validates the Pallas plumbing tightly; the bf16
# storage itself introduces only small drift vs a pure-f32 PyTorch run)
# ---------------------------------------------------------------------------
def reference_forward(params, x, edge_index, edge_attr):
    n = x.shape[0]
    np_ = _round_up(max(n, 128), 128)
    feats = _build_features(params, x)
    k0p = params["W"][0].shape[0]
    h = jnp.zeros((np_, k0p), jnp.float32).at[:n, :feats.shape[1]].set(feats)
    h = h.astype(jnp.bfloat16).astype(jnp.float32)
    a = _build_adjacency(edge_index, edge_attr, n, np_)
    a = a.astype(jnp.bfloat16).astype(jnp.float32)
    for l in range(len(GCN_DIMS)):
        xw = (h @ params["W"][l].astype(jnp.float32))
        xw = xw.astype(jnp.bfloat16).astype(jnp.float32)
        z = a @ xw
        z = z * params["scale"][l] + params["shift"][l]
        h = jnp.where(z > 0, z, 0.01 * z)
        h = h.astype(jnp.bfloat16).astype(jnp.float32)
    y = h @ params["Wf"].astype(jnp.float32)
    out = y[:n, 0:3] + params["bf"][0:3]
    cls = jax.nn.softmax(y[:n, 3:6] + params["bf"][3:6], axis=1)
    return out, cls


# ---------------------------------------------------------------------------
if __name__ == "__main__":
    key = jax.random.PRNGKey(0)
    kp, kx, kres, krel, kcol, kea = jax.random.split(key, 6)

    params = init_params(kp)

    # small graph: N=8 nodes, E=12 directed edges, feature_size=1005
    N, E, FEAT = 8, 12, 1005
    col0 = jax.random.uniform(kx, (N, 1), jnp.float32)               # unused col
    resnet = jax.random.uniform(kres, (N, 1000), jnp.float32)
    rel = jax.random.uniform(krel, (N, 1), jnp.float32)              # round(10x) in 0..10
    colors = jax.random.randint(kcol, (N, 3), 0, 256).astype(jnp.float32)
    x = jnp.concatenate([col0, resnet, rel, colors], axis=1)
    assert x.shape == (N, FEAT)

    src = jnp.array([0, 1, 2, 3, 4, 5, 6, 7, 0, 2, 4, 6], jnp.int32)
    dst = jnp.array([1, 2, 3, 4, 5, 6, 7, 0, 3, 5, 7, 1], jnp.int32)
    edge_index = jnp.stack([src, dst])                               # [2,12]
    edge_attr = jax.random.uniform(kea, (E, 1), jnp.float32) + 0.1   # edge weights

    fwd_fused = jax.jit(lambda a, b, c: forward(params, a, b, c))
    fwd_tiled = jax.jit(lambda a, b, c: forward(params, a, b, c, force_tiled=True))
    ref_fn = jax.jit(lambda a, b, c: reference_forward(params, a, b, c))

    out_f, cls_f = fwd_fused(x, edge_index, edge_attr)
    out_t, cls_t = fwd_tiled(x, edge_index, edge_attr)
    out_r, cls_r = ref_fn(x, edge_index, edge_attr)
    jax.block_until_ready((out_f, cls_f, out_t, cls_t, out_r, cls_r))

    # shape / sanity checks
    assert out_f.shape == (N, 3) and cls_f.shape == (N, 3)
    assert out_t.shape == (N, 3) and cls_t.shape == (N, 3)
    assert bool(jnp.all(jnp.isfinite(out_f))) and bool(jnp.all(jnp.isfinite(cls_f)))
    assert bool(jnp.all(jnp.isfinite(out_t))) and bool(jnp.all(jnp.isfinite(cls_t)))
    assert bool(jnp.allclose(jnp.sum(cls_f, axis=1), 1.0, atol=1e-4))
    assert bool(jnp.allclose(jnp.sum(cls_t, axis=1), 1.0, atol=1e-4))

    # both Pallas paths agree with each other and with the pure-JAX reference
    assert bool(jnp.allclose(out_f, out_t, atol=1e-2, rtol=1e-2))
    assert bool(jnp.allclose(cls_f, cls_t, atol=1e-2, rtol=1e-2))
    assert bool(jnp.allclose(out_f, out_r, atol=2e-2, rtol=2e-2))
    assert bool(jnp.allclose(cls_f, cls_r, atol=2e-2, rtol=2e-2))
    assert bool(jnp.allclose(out_t, out_r, atol=2e-2, rtol=2e-2))
    assert bool(jnp.allclose(cls_t, cls_r, atol=2e-2, rtol=2e-2))

    print("KERNEL_OK")
</pallas_src>

<mosaic_0001>
module attributes {stable_mosaic.version = 11 : i64} {
  func.func @_fused_forward_kernel(%arg0: memref<128x1536xbf16, #tpu.memory_space<vmem>>, %arg1: memref<128x128xbf16, #tpu.memory_space<vmem>>, %arg2: memref<1536x512xbf16, #tpu.memory_space<vmem>>, %arg3: memref<1x512xf32, #tpu.memory_space<vmem>>, %arg4: memref<1x512xf32, #tpu.memory_space<vmem>>, %arg5: memref<512x256xbf16, #tpu.memory_space<vmem>>, %arg6: memref<1x256xf32, #tpu.memory_space<vmem>>, %arg7: memref<1x256xf32, #tpu.memory_space<vmem>>, %arg8: memref<256x128xbf16, #tpu.memory_space<vmem>>, %arg9: memref<1x128xf32, #tpu.memory_space<vmem>>, %arg10: memref<1x128xf32, #tpu.memory_space<vmem>>, %arg11: memref<128x128xbf16, #tpu.memory_space<vmem>>, %arg12: memref<128x128xf32, #tpu.memory_space<vmem>>) attributes {dimension_semantics = [], scalar_prefetch = 0 : i64, scratch_operands = 0 : i64, tpu.core_type = #tpu.core_type<tc>} {
    %c0 = arith.constant 0 : index
    %c0_0 = arith.constant 0 : index
    %0 = vector.load %arg1[%c0, %c0_0] : memref<128x128xbf16, #tpu.memory_space<vmem>>, vector<128x128xbf16>
    %c0_1 = arith.constant 0 : index
    %c0_2 = arith.constant 0 : index
    %1 = vector.load %arg0[%c0_1, %c0_2] : memref<128x1536xbf16, #tpu.memory_space<vmem>>, vector<128x1536xbf16>
    %c0_3 = arith.constant 0 : index
    %c0_4 = arith.constant 0 : index
    %2 = vector.load %arg2[%c0_3, %c0_4] : memref<1536x512xbf16, #tpu.memory_space<vmem>>, vector<1536x512xbf16>
    %cst = arith.constant dense<0.000000e+00> : vector<128x512xf32>
    %3 = tpu.matmul %1, %2, %cst {dimension_numbers = #tpu.dot_dimension_numbers<[1], [0], [0], [1], [0, 0, 1, 1], [], []>} : vector<128x1536xbf16>, vector<1536x512xbf16>, vector<128x512xf32> -> vector<128x512xf32>
    %4 = arith.truncf %3 : vector<128x512xf32> to vector<128x512xbf16>
    %cst_5 = arith.constant dense<0.000000e+00> : vector<128x512xf32>
    %5 = tpu.matmul %0, %4, %cst_5 {dimension_numbers = #tpu.dot_dimension_numbers<[1], [0], [0], [1], [0, 0, 1, 1], [], []>} : vector<128x128xbf16>, vector<128x512xbf16>, vector<128x512xf32> -> vector<128x512xf32>
    %c0_6 = arith.constant 0 : index
    %c0_7 = arith.constant 0 : index
    %6 = vector.load %arg3[%c0_6, %c0_7] : memref<1x512xf32, #tpu.memory_space<vmem>>, vector<1x512xf32>
    %7 = vector.broadcast %6 : vector<1x512xf32> to vector<128x512xf32>
    %8 = arith.mulf %5, %7 : vector<128x512xf32>
    %c0_8 = arith.constant 0 : index
    %c0_9 = arith.constant 0 : index
    %9 = vector.load %arg4[%c0_8, %c0_9] : memref<1x512xf32, #tpu.memory_space<vmem>>, vector<1x512xf32>
    %10 = vector.broadcast %9 : vector<1x512xf32> to vector<128x512xf32>
    %11 = arith.addf %8, %10 : vector<128x512xf32>
    %cst_10 = arith.constant 0.000000e+00 : f32
    %12 = vector.broadcast %cst_10 : f32 to vector<128x512xf32>
    %13 = arith.cmpf ogt, %11, %12 : vector<128x512xf32>
    %cst_11 = arith.constant 0.00999999977 : f32
    %14 = vector.broadcast %cst_11 : f32 to vector<128x512xf32>
    %15 = arith.mulf %14, %11 : vector<128x512xf32>
    %16 = arith.select %13, %11, %15 : vector<128x512xi1>, vector<128x512xf32>
    %17 = arith.truncf %16 : vector<128x512xf32> to vector<128x512xbf16>
    %c0_12 = arith.constant 0 : index
    %c0_13 = arith.constant 0 : index
    %18 = vector.load %arg5[%c0_12, %c0_13] : memref<512x256xbf16, #tpu.memory_space<vmem>>, vector<512x256xbf16>
    %cst_14 = arith.constant dense<0.000000e+00> : vector<128x256xf32>
    %19 = tpu.matmul %17, %18, %cst_14 {dimension_numbers = #tpu.dot_dimension_numbers<[1], [0], [0], [1], [0, 0, 1, 1], [], []>} : vector<128x512xbf16>, vector<512x256xbf16>, vector<128x256xf32> -> vector<128x256xf32>
    %20 = arith.truncf %19 : vector<128x256xf32> to vector<128x256xbf16>
    %cst_15 = arith.constant dense<0.000000e+00> : vector<128x256xf32>
    %21 = tpu.matmul %0, %20, %cst_15 {dimension_numbers = #tpu.dot_dimension_numbers<[1], [0], [0], [1], [0, 0, 1, 1], [], []>} : vector<128x128xbf16>, vector<128x256xbf16>, vector<128x256xf32> -> vector<128x256xf32>
    %c0_16 = arith.constant 0 : index
    %c0_17 = arith.constant 0 : index
    %22 = vector.load %arg6[%c0_16, %c0_17] : memref<1x256xf32, #tpu.memory_space<vmem>>, vector<1x256xf32>
    %23 = vector.broadcast %22 : vector<1x256xf32> to vector<128x256xf32>
    %24 = arith.mulf %21, %23 : vector<128x256xf32>
    %c0_18 = arith.constant 0 : index
    %c0_19 = arith.constant 0 : index
    %25 = vector.load %arg7[%c0_18, %c0_19] : memref<1x256xf32, #tpu.memory_space<vmem>>, vector<1x256xf32>
    %26 = vector.broadcast %25 : vector<1x256xf32> to vector<128x256xf32>
    %27 = arith.addf %24, %26 : vector<128x256xf32>
    %cst_20 = arith.constant 0.000000e+00 : f32
    %28 = vector.broadcast %cst_20 : f32 to vector<128x256xf32>
    %29 = arith.cmpf ogt, %27, %28 : vector<128x256xf32>
    %cst_21 = arith.constant 0.00999999977 : f32
    %30 = vector.broadcast %cst_21 : f32 to vector<128x256xf32>
    %31 = arith.mulf %30, %27 : vector<128x256xf32>
    %32 = arith.select %29, %27, %31 : vector<128x256xi1>, vector<128x256xf32>
    %33 = arith.truncf %32 : vector<128x256xf32> to vector<128x256xbf16>
    %c0_22 = arith.constant 0 : index
    %c0_23 = arith.constant 0 : index
    %34 = vector.load %arg8[%c0_22, %c0_23] : memref<256x128xbf16, #tpu.memory_space<vmem>>, vector<256x128xbf16>
    %cst_24 = arith.constant dense<0.000000e+00> : vector<128x128xf32>
    %35 = tpu.matmul %33, %34, %cst_24 {dimension_numbers = #tpu.dot_dimension_numbers<[1], [0], [0], [1], [0, 0, 1, 1], [], []>} : vector<128x256xbf16>, vector<256x128xbf16>, vector<128x128xf32> -> vector<128x128xf32>
    %36 = arith.truncf %35 : vector<128x128xf32> to vector<128x128xbf16>
    %cst_25 = arith.constant dense<0.000000e+00> : vector<128x128xf32>
    %37 = tpu.matmul %0, %36, %cst_25 {dimension_numbers = #tpu.dot_dimension_numbers<[1], [0], [0], [1], [0, 0, 1, 1], [], []>} : vector<128x128xbf16>, vector<128x128xbf16>, vector<128x128xf32> -> vector<128x128xf32>
    %c0_26 = arith.constant 0 : index
    %c0_27 = arith.constant 0 : index
    %38 = vector.load %arg9[%c0_26, %c0_27] : memref<1x128xf32, #tpu.memory_space<vmem>>, vector<1x128xf32>
    %39 = vector.broadcast %38 : vector<1x128xf32> to vector<128x128xf32>
    %40 = arith.mulf %37, %39 : vector<128x128xf32>
    %c0_28 = arith.constant 0 : index
    %c0_29 = arith.constant 0 : index
    %41 = vector.load %arg10[%c0_28, %c0_29] : memref<1x128xf32, #tpu.memory_space<vmem>>, vector<1x128xf32>
    %42 = vector.broadcast %41 : vector<1x128xf32> to vector<128x128xf32>
    %43 = arith.addf %40, %42 : vector<128x128xf32>
    %cst_30 = arith.constant 0.000000e+00 : f32
    %44 = vector.broadcast %cst_30 : f32 to vector<128x128xf32>
    %45 = arith.cmpf ogt, %43, %44 : vector<128x128xf32>
    %cst_31 = arith.constant 0.00999999977 : f32
    %46 = vector.broadcast %cst_31 : f32 to vector<128x128xf32>
    %47 = arith.mulf %46, %43 : vector<128x128xf32>
    %48 = arith.select %45, %43, %47 : vector<128x128xi1>, vector<128x128xf32>
    %49 = arith.truncf %48 : vector<128x128xf32> to vector<128x128xbf16>
    %c0_32 = arith.constant 0 : index
    %c0_33 = arith.constant 0 : index
    %50 = vector.load %arg11[%c0_32, %c0_33] : memref<128x128xbf16, #tpu.memory_space<vmem>>, vector<128x128xbf16>
    %cst_34 = arith.constant dense<0.000000e+00> : vector<128x128xf32>
    %51 = tpu.matmul %49, %50, %cst_34 {dimension_numbers = #tpu.dot_dimension_numbers<[1], [0], [0], [1], [0, 0, 1, 1], [], []>} : vector<128x128xbf16>, vector<128x128xbf16>, vector<128x128xf32> -> vector<128x128xf32>
    %c0_35 = arith.constant 0 : index
    %c0_36 = arith.constant 0 : index
    %52 = vector.load %arg12[%c0_35, %c0_36] : memref<128x128xf32, #tpu.memory_space<vmem>>, vector<128x128xf32>
    tpu.vector_store %arg12[%c0_35, %c0_36], %51 {strides = array<i32>} : memref<128x128xf32, #tpu.memory_space<vmem>>, vector<128x128xf32>,
    return
  }
}

</mosaic_0001>

<bundles_post_ra>
// kernel: _lambda_.1
= control target key start
LH: loop header
LB: loop body
LE: loop exit
PB: predicated region body
PF: predicated region fallthrough
CT: control target
= control target key end

     0   :  { %s16130_s2 = inlined_call_operand.vmem [shape: bf16[1536,512], index: 2, kind: input, shape index: {}]   ;;  %s16131_s0 = inlined_call_operand.vmem [shape: bf16[128,1536], index: 0, kind: input, shape index: {}]   ;;  %s16132_s1 = inlined_call_operand.vmem [shape: bf16[128,128], index: 1, kind: input, shape index: {}]   ;;  %s16133_s5 = inlined_call_operand.vmem [shape: bf16[512,256], index: 5, kind: input, shape index: {}]   ;;  %s16134_s3 = inlined_call_operand.vmem [shape: f32[1,512], index: 3, kind: input, shape index: {}]   ;;  %s16135_s4 = inlined_call_operand.vmem [shape: f32[1,512], index: 4, kind: input, shape index: {}]   ;;  %s16136_s8 = inlined_call_operand.vmem [shape: bf16[256,128], index: 8, kind: input, shape index: {}]   ;;  %s16137_s6 = inlined_call_operand.vmem [shape: f32[1,256], index: 6, kind: input, shape index: {}]   ;;  %s16138_s7 = inlined_call_operand.vmem [shape: f32[1,256], index: 7, kind: input, shape index: {}]   ;;  %s16139_s9 = inlined_call_operand.vmem [shape: f32[1,128], index: 9, kind: input, shape index: {}]   ;;  %s16140_s10 = inlined_call_operand.vmem [shape: f32[1,128], index: 10, kind: input, shape index: {}]   ;;  %s16141_s11 = inlined_call_operand.vmem [shape: bf16[128,128], index: 11, kind: input, shape index: {}]   ;;  %s16142_s12 = inlined_call_operand.vmem [shape: f32[128,128], index: 12, kind: output, shape index: {}]  }
   0x1   :  { %v8025_v0 = vld [vmem:[%s16130_s2 + $0xe0] sm:$0xf]  ;;  %v9965_v1 = vld [vmem:[%s16130_s2 + $0xec] sm:$0xf0]  ;;  %v9839_v51 = vld [vmem:[%s16131_s0 + $0x4] sm:$0xf] }
   0x2   :  { %v8153_v2 = vld [vmem:[%s16130_s2 + $0x1e0] sm:$0xf]  ;;  %v8026_v3 = vor.u32 %v9965_v1, %v8025_v0  ;;  %v9997_v4 = vld [vmem:[%s16130_s2 + $0x1ec] sm:$0xf0]  ;;  %v7531_v53 = vld [vmem:[%s16131_s0 + $0x30] sm:$0xf0] }
   0x3   :  { %v8009_v5 = vld [vmem:[%s16130_s2 + $0xc0] sm:$0xf]  ;;  %v9961_v6 = vld [vmem:[%s16130_s2 + $0xcc] sm:$0xf0]  ;;  %v8154_v7 = vor.u32 %v9997_v4, %v8153_v2  ;;  %v9887_v54 = vld [vmem:[%s16131_s0 + $0x184] sm:$0xf]  ;;  %v10627_v58 = vor.u32 %v9839_v51, %v7531_v53 }
   0x4   :  { %v8137_v8 = vld [vmem:[%s16130_s2 + $0x1c0] sm:$0xf]  ;;  %v9993_v9 = vld [vmem:[%s16130_s2 + $0x1cc] sm:$0xf0]  ;;  %2937 = vmatpush.bf16.msra.mxu0 %v8026_v3  ;;  %10407 = vmatpush.bf16.msra.mxu2 %v8026_v3  ;;  %v8010_v10 = vor.u32 %v9961_v6, %v8009_v5  ;;  %v7723_v55 = vld [vmem:[%s16131_s0 + $0x1b0] sm:$0xf0] }
   0x5   :  { %2986 = vmatpush.bf16.msra.mxu1 %v8154_v7  ;;  %10415 = vmatpush.bf16.msra.mxu3 %v8154_v7  ;;  %v8138_v11 = vor.u32 %v9993_v9, %v8137_v8  ;;  %v7993_v12 = vld [vmem:[%s16130_s2 + $0xa0] sm:$0xf]  ;;  %v9957_v13 = vld [vmem:[%s16130_s2 + $0xac] sm:$0xf0]  ;;  %v10629_v59 = vor.u32 %v9887_v54, %v7723_v55 }
   0x6   :  { %v8121_v14 = vld [vmem:[%s16130_s2 + $0x1a0] sm:$0xf]  ;;  %v9989_v15 = vld [vmem:[%s16130_s2 + $0x1ac] sm:$0xf0]  ;;  %v7994_v16 = vor.u32 %v9957_v13, %v7993_v12 }
   0x7   :  { %v8122_v17 = vor.u32 %v9989_v15, %v8121_v14  ;;  %v7977_v18 = vld [vmem:[%s16130_s2 + $0x80] sm:$0xf]  ;;  %v9953_v19 = vld [vmem:[%s16130_s2 + $0x8c] sm:$0xf0]  ;;  %16326 = vst [vmem:[#allocation3_spill] sm:$0xff] %v10629_v59 }
   0x8   :  { %2938 = vmatpush.bf16.msra.mxu0 %v8010_v10  ;;  %10408 = vmatpush.bf16.msra.mxu2 %v8010_v10  ;;  %v8105_v20 = vld [vmem:[%s16130_s2 + $0x180] sm:$0xf]  ;;  %v9985_v21 = vld [vmem:[%s16130_s2 + $0x18c] sm:$0xf0]  ;;  %v7978_v22 = vor.u32 %v9953_v19, %v7977_v18 }
   0x9   :  { %2987 = vmatpush.bf16.msra.mxu1 %v8138_v11  ;;  %10416 = vmatpush.bf16.msra.mxu3 %v8138_v11  ;;  %v8106_v23 = vor.u32 %v9985_v21, %v8105_v20  ;;  %v7961_v24 = vld [vmem:[%s16130_s2 + $0x60] sm:$0xf]  ;;  %v9949_v25 = vld [vmem:[%s16130_s2 + $0x6c] sm:$0xf0] }
   0xa   :  { %v8089_v26 = vld [vmem:[%s16130_s2 + $0x160] sm:$0xf]  ;;  %v9981_v27 = vld [vmem:[%s16130_s2 + $0x16c] sm:$0xf0]  ;;  %v7962_v28 = vor.u32 %v9949_v25, %v7961_v24 }
   0xb   :  { %v8090_v29 = vor.u32 %v9981_v27, %v8089_v26  ;;  %v7945_v30 = vld [vmem:[%s16130_s2 + $0x40] sm:$0xf]  ;;  %v9945_v31 = vld [vmem:[%s16130_s2 + $0x4c] sm:$0xf0] }
   0xc   :  { %2939 = vmatpush.bf16.msra.mxu0 %v7994_v16  ;;  %10409 = vmatpush.bf16.msra.mxu2 %v7994_v16  ;;  %v8073_v32 = vld [vmem:[%s16130_s2 + $0x140] sm:$0xf]  ;;  %v9977_v33 = vld [vmem:[%s16130_s2 + $0x14c] sm:$0xf0]  ;;  %v7946_v34 = vor.u32 %v9945_v31, %v7945_v30 }
   0xd   :  { %2988 = vmatpush.bf16.msra.mxu1 %v8122_v17  ;;  %10417 = vmatpush.bf16.msra.mxu3 %v8122_v17  ;;  %v8074_v35 = vor.u32 %v9977_v33, %v8073_v32  ;;  %v7929_v36 = vld [vmem:[%s16130_s2 + $0x20] sm:$0xf]  ;;  %v9941_v37 = vld [vmem:[%s16130_s2 + $0x2c] sm:$0xf0] }
   0xe   :  { %v8057_v38 = vld [vmem:[%s16130_s2 + $0x120] sm:$0xf]  ;;  %v9973_v39 = vld [vmem:[%s16130_s2 + $0x12c] sm:$0xf0]  ;;  %v7930_v40 = vor.u32 %v9941_v37, %v7929_v36  ;;  %v9851_v37 = vld [vmem:[%s16131_s0 + $0x64] sm:$0xf] }
   0xf   :  { %v8058_v41 = vor.u32 %v9973_v39, %v8057_v38  ;;  %v7913_v42 = vld [vmem:[%s16130_s2] sm:$0xf]  ;;  %v9937_v43 = vld [vmem:[%s16130_s2 + $0xc] sm:$0xf0]  ;;  %v7579_v38 = vld [vmem:[%s16131_s0 + $0x90] sm:$0xf0] }
  0x10   :  { %2940 = vmatpush.bf16.msra.mxu0 %v7978_v22  ;;  %10410 = vmatpush.bf16.msra.mxu2 %v7978_v22  ;;  %v8041_v44 = vld [vmem:[%s16130_s2 + $0x100] sm:$0xf]  ;;  %v9969_v45 = vld [vmem:[%s16130_s2 + $0x10c] sm:$0xf0]  ;;  %v7914_v48 = vor.u32 %v9937_v43, %v7913_v42  ;;  %v10759_v51 = vor.u32 %v9851_v37, %v7579_v38  ;;  %v9911_v37 = vld [vmem:[%s16131_s0 + $0x244] sm:$0xf] }
  0x11   :  { %2989 = vmatpush.bf16.msra.mxu1 %v8106_v23  ;;  %10418 = vmatpush.bf16.msra.mxu3 %v8106_v23  ;;  %v7529_v46 = vld [vmem:[%s16131_s0] sm:$0xf]  ;;  %v9845_v47 = vld [vmem:[%s16131_s0 + $0x2c] sm:$0xf0]  ;;  %v8042_v52 = vor.u32 %v9969_v45, %v8041_v44  ;;  %v7819_v38 = vld [vmem:[%s16131_s0 + $0x270] sm:$0xf0] }
  0x12   :  { %v7721_v49 = vld [vmem:[%s16131_s0 + $0x180] sm:$0xf]  ;;  %v9893_v50 = vld [vmem:[%s16131_s0 + $0x1ac] sm:$0xf0]  ;;  %v10623_v56 = vor.u32 %v9845_v47, %v7529_v46 }
  0x13   :  { %v10625_v57 = vor.u32 %v9893_v50, %v7721_v49  ;;  %v8281_v60 = vld [vmem:[%s16130_s2 + $0x2e0] sm:$0xf]  ;;  %v10029_v61 = vld [vmem:[%s16130_s2 + $0x2ec] sm:$0xf0] }
  0x14   :  { %2941 = vmatpush.bf16.msra.mxu0 %v7962_v28  ;;  %10411 = vmatpush.bf16.msra.mxu2 %v7962_v28  ;;  %v8409_v62 = vld [vmem:[%s16130_s2 + $0x3e0] sm:$0xf]  ;;  %v8282_v63 = vor.u32 %v10029_v61, %v8281_v60  ;;  %v10061_v0 = vld [vmem:[%s16130_s2 + $0x3ec] sm:$0xf0] }
  0x15   :  { %2990 = vmatpush.bf16.msra.mxu1 %v8090_v29  ;;  %10419 = vmatpush.bf16.msra.mxu3 %v8090_v29  ;;  %16325 = vst [vmem:[#allocation2_spill] sm:$0xff] %v10625_v57  ;;  %v8537_v1 = vld [vmem:[%s16130_s2 + $0x4e0] sm:$0xf]  ;;  %v10093_v2 = vld [vmem:[%s16130_s2 + $0x4ec] sm:$0xf0]  ;;  %v8410_v3 = vor.u32 %v10061_v0, %v8409_v62 }
  0x16   :  { %v8538_v4 = vor.u32 %v10093_v2, %v8537_v1  ;;  %v8665_v5 = vld [vmem:[%s16130_s2 + $0x5e0] sm:$0xf]  ;;  %v10125_v6 = vld [vmem:[%s16130_s2 + $0x5ec] sm:$0xf0] }
  0x17   :  { %v8265_v7 = vld [vmem:[%s16130_s2 + $0x2c0] sm:$0xf]  ;;  %v8666_v8 = vor.u32 %v10125_v6, %v8665_v5  ;;  %v10025_v9 = vld [vmem:[%s16130_s2 + $0x2cc] sm:$0xf0] }
  0x18   :  { %2942 = vmatpush.bf16.msra.mxu0 %v7946_v34  ;;  %10412 = vmatpush.bf16.msra.mxu2 %v7946_v34  ;;  %v8393_v10 = vld [vmem:[%s16130_s2 + $0x3c0] sm:$0xf]  ;;  %v10057_v11 = vld [vmem:[%s16130_s2 + $0x3cc] sm:$0xf0]  ;;  %v8266_v12 = vor.u32 %v10025_v9, %v8265_v7 }
  0x19   :  { %2991 = vmatpush.bf16.msra.mxu1 %v8074_v35  ;;  %10420 = vmatpush.bf16.msra.mxu3 %v8074_v35  ;;  %v8394_v13 = vor.u32 %v10057_v11, %v8393_v10  ;;  %v8521_v14 = vld [vmem:[%s16130_s2 + $0x4c0] sm:$0xf]  ;;  %v10089_v15 = vld [vmem:[%s16130_s2 + $0x4cc] sm:$0xf0] }
  0x1a   :  { %v8649_v16 = vld [vmem:[%s16130_s2 + $0x5c0] sm:$0xf]  ;;  %v8522_v17 = vor.u32 %v10089_v15, %v8521_v14  ;;  %v10121_v18 = vld [vmem:[%s16130_s2 + $0x5cc] sm:$0xf0] }
  0x1b   :  { %v8249_v19 = vld [vmem:[%s16130_s2 + $0x2a0] sm:$0xf]  ;;  %v10021_v20 = vld [vmem:[%s16130_s2 + $0x2ac] sm:$0xf0]  ;;  %v8650_v21 = vor.u32 %v10121_v18, %v8649_v16 }
  0x1c   :  { %2943 = vmatpush.bf16.msra.mxu0 %v7930_v40  ;;  %10413 = vmatpush.bf16.msra.mxu2 %v7930_v40  ;;  %v8377_v22 = vld [vmem:[%s16130_s2 + $0x3a0] sm:$0xf]  ;;  %v10053_v23 = vld [vmem:[%s16130_s2 + $0x3ac] sm:$0xf0]  ;;  %v8250_v27 = vor.u32 %v10021_v20, %v8249_v19  ;;  %v9899_v40 = vld [vmem:[%s16131_s0 + $0x1e4] sm:$0xf] }
  0x1d   :  { %2992 = vmatpush.bf16.msra.mxu1 %v8058_v41  ;;  %10421 = vmatpush.bf16.msra.mxu3 %v8058_v41  ;;  %v8505_v24 = vld [vmem:[%s16130_s2 + $0x4a0] sm:$0xf]  ;;  %v9857_v26 = vld [vmem:[%s16131_s0 + $0x8c] sm:$0xf0]  ;;  %v8378_v32 = vor.u32 %v10053_v23, %v8377_v22  ;;  %v7771_v41 = vld [vmem:[%s16131_s0 + $0x210] sm:$0xf0] }
  0x1e   :  { %v7577_v25 = vld [vmem:[%s16131_s0 + $0x60] sm:$0xf]  ;;  %v10085_v28 = vld [vmem:[%s16130_s2 + $0x4ac] sm:$0xf0] }
  0x1f   :  { %v8633_v29 = vld [vmem:[%s16130_s2 + $0x5a0] sm:$0xf]  ;;  %v10117_v30 = vld [vmem:[%s16130_s2 + $0x5ac] sm:$0xf0]  ;;  %v8506_v33 = vor.u32 %v10085_v28, %v8505_v24  ;;  %v10749_v47 = vor.u32 %v9857_v26, %v7577_v25 }
  0x20   :  { %2944 = vmatpush.bf16.msra.mxu0 %v7914_v48  ;;  %10414 = vmatpush.bf16.msra.mxu2 %v7914_v48  ;;  %v7769_v31 = vld [vmem:[%s16131_s0 + $0x1e0] sm:$0xf]  ;;  %v10017_v35 = vld [vmem:[%s16130_s2 + $0x28c] sm:$0xf0]  ;;  %v8634_v39 = vor.u32 %v10117_v30, %v8633_v29 }
  0x21   :  { %2993 = vmatpush.bf16.msra.mxu1 %v8042_v52  ;;  %10422 = vmatpush.bf16.msra.mxu3 %v8042_v52  ;;  %v8233_v34 = vld [vmem:[%s16130_s2 + $0x280] sm:$0xf]  ;;  %v9905_v36 = vld [vmem:[%s16131_s0 + $0x20c] sm:$0xf0]  ;;  %v10761_v52 = vor.u32 %v9899_v40, %v7771_v41 }
  0x22   :  { %v8361_v42 = vld [vmem:[%s16130_s2 + $0x380] sm:$0xf]  ;;  %v8234_v43 = vor.u32 %v10017_v35, %v8233_v34  ;;  %v10049_v44 = vld [vmem:[%s16130_s2 + $0x38c] sm:$0xf0]  ;;  %v10751_v48 = vor.u32 %v9905_v36, %v7769_v31  ;;  %v9863_v35 = vld [vmem:[%s16131_s0 + $0xc4] sm:$0xf] }
  0x23   :  { %2945 = vmatmul.bf16.vlgmr.msra.gmra.mxu0 %v10623_v56  ;;  %2965 = vmatmul.bf16.vlgmr.msra.gmra.mxu2 %v10625_v57  ;;  %v8489_v45 = vld [vmem:[%s16130_s2 + $0x480] sm:$0xf]  ;;  %v10081_v46 = vld [vmem:[%s16130_s2 + $0x48c] sm:$0xf0]  ;;  %16328 = vst [vmem:[#allocation5_spill] sm:$0xff] %v10761_v52  ;;  %v8362_v53 = vor.u32 %v10049_v44, %v8361_v42 }
  0x24   :  { %2994 = vmatmul.bf16.vlgmr.msra.gmra.mxu1 %v10627_v58  ;;  %3014 = vmatmul.bf16.vlgmr.msra.gmra.mxu3 %v10629_v59  ;;  %16327 = vst [vmem:[#allocation4_spill] sm:$0xff] %v10751_v48  ;;  %v8617_v49 = vld [vmem:[%s16130_s2 + $0x580] sm:$0xf]  ;;  %v10113_v50 = vld [vmem:[%s16130_s2 + $0x58c] sm:$0xf0]  ;;  %v8490_v54 = vor.u32 %v10081_v46, %v8489_v45 }
  0x25   :  { %3035 = vmatpush.bf16.msrb.mxu2 %v8282_v63  ;;  %3084 = vmatpush.bf16.msrb.mxu3 %v8410_v3  ;;  %v8618_v55 = vor.u32 %v10113_v50, %v8617_v49  ;;  %v8217_v60 = vld [vmem:[%s16130_s2 + $0x260] sm:$0xf]  ;;  %v10013_v61 = vld [vmem:[%s16130_s2 + $0x26c] sm:$0xf0]  ;;  %v7627_v36 = vld [vmem:[%s16131_s0 + $0xf0] sm:$0xf0] }
  0x26   :  { %3133 = vmatpush.bf16.msrb.mxu0 %v8538_v4  ;;  %3182 = vmatpush.bf16.msrb.mxu1 %v8666_v8  ;;  %v8345_v62 = vld [vmem:[%s16130_s2 + $0x360] sm:$0xf]  ;;  %v8218_v63 = vor.u32 %v10013_v61, %v8217_v60  ;;  %v10045_v0 = vld [vmem:[%s16130_s2 + $0x36c] sm:$0xf0]  ;;  %v10893_v60 = vor.u32 %v9911_v37, %v7819_v38  ;;  %v9870_v37 = vld [vmem:[%s16131_s0 + $0xf4] sm:$0xf0] }
  0x27   :  { %v8473_v1 = vld [vmem:[%s16130_s2 + $0x460] sm:$0xf]  ;;  %v10077_v2 = vld [vmem:[%s16130_s2 + $0x46c] sm:$0xf0]  ;;  %v8346_v3 = vor.u32 %v10045_v0, %v8345_v62  ;;  %v9864_v38 = vld [vmem:[%s16131_s0 + $0xcc] sm:$0xf] }
  0x28   :  { %v8474_v4 = vor.u32 %v10077_v2, %v8473_v1  ;;  %v8601_v5 = vld [vmem:[%s16130_s2 + $0x560] sm:$0xf]  ;;  %v10109_v6 = vld [vmem:[%s16130_s2 + $0x56c] sm:$0xf0]  ;;  %16330 = vst [vmem:[#allocation7_spill] sm:$0xff] %v10893_v60 }
  0x29   :  { %3036 = vmatpush.bf16.msrb.mxu2 %v8266_v12  ;;  %3085 = vmatpush.bf16.msrb.mxu3 %v8394_v13  ;;  %v8201_v7 = vld [vmem:[%s16130_s2 + $0x240] sm:$0xf]  ;;  %v8602_v8 = vor.u32 %v10109_v6, %v8601_v5  ;;  %v10009_v9 = vld [vmem:[%s16130_s2 + $0x24c] sm:$0xf0]  ;;  %v7675_v5 = vld [vmem:[%s16131_s0 + $0x150] sm:$0xf0] }
  0x2a   :  { %3134 = vmatpush.bf16.msrb.mxu0 %v8522_v17  ;;  %3183 = vmatpush.bf16.msrb.mxu1 %v8650_v21  ;;  %v8329_v10 = vld [vmem:[%s16130_s2 + $0x340] sm:$0xf]  ;;  %v10041_v11 = vld [vmem:[%s16130_s2 + $0x34c] sm:$0xf0]  ;;  %v8202_v12 = vor.u32 %v10009_v9, %v8201_v7  ;;  %v9923_v6 = vld [vmem:[%s16131_s0 + $0x2a4] sm:$0xf] }
  0x2b   :  { %v8457_v13 = vld [vmem:[%s16130_s2 + $0x440] sm:$0xf]  ;;  %v10073_v14 = vld [vmem:[%s16130_s2 + $0x44c] sm:$0xf0]  ;;  %v8330_v19 = vor.u32 %v10041_v11, %v8329_v10  ;;  %v7867_v7 = vld [vmem:[%s16131_s0 + $0x2d0] sm:$0xf0] }
  0x2c   :  { %v8585_v15 = vld [vmem:[%s16130_s2 + $0x540] sm:$0xf]  ;;  %v10105_v16 = vld [vmem:[%s16130_s2 + $0x54c] sm:$0xf0]  ;;  %v8458_v20 = vor.u32 %v10073_v14, %v8457_v13  ;;  %v10929_v11 = vor.u32 %v9923_v6, %v7867_v7  ;;  %v9846_v13 = vld [vmem:[%s16131_s0 + $0x34] sm:$0xf0] }
  0x2d   :  { %3037 = vmatpush.bf16.msrb.mxu2 %v8250_v27  ;;  %3086 = vmatpush.bf16.msrb.mxu3 %v8378_v32  ;;  %v8185_v17 = vld [vmem:[%s16130_s2 + $0x220] sm:$0xf]  ;;  %v10005_v18 = vld [vmem:[%s16130_s2 + $0x22c] sm:$0xf0]  ;;  %v8586_v26 = vor.u32 %v10105_v16, %v8585_v15  ;;  %v9840_v14 = vld [vmem:[%s16131_s0 + $0xc] sm:$0xf] }
  0x2e   :  { %3135 = vmatpush.bf16.msrb.mxu0 %v8506_v33  ;;  %3184 = vmatpush.bf16.msrb.mxu1 %v8634_v39  ;;  %v8313_v21 = vld [vmem:[%s16130_s2 + $0x320] sm:$0xf]  ;;  %v10037_v22 = vld [vmem:[%s16130_s2 + $0x32c] sm:$0xf0]  ;;  %v8186_v27 = vor.u32 %v10005_v18, %v8185_v17  ;;  %16333 = vst [vmem:[#allocation10_spill] sm:$0xff] %v10929_v11 }
  0x2f   :  { %v7625_v23 = vld [vmem:[%s16131_s0 + $0xc0] sm:$0xf]  ;;  %v9869_v24 = vld [vmem:[%s16131_s0 + $0xec] sm:$0xf0]  ;;  %v8314_v39 = vor.u32 %v10037_v22, %v8313_v21  ;;  %v7539_v17 = vld [vmem:[%s16131_s0 + $0x38] sm:$0xf0] }
  0x30   :  { %v7817_v25 = vld [vmem:[%s16131_s0 + $0x240] sm:$0xf]  ;;  %v10069_v29 = vld [vmem:[%s16130_s2 + $0x42c] sm:$0xf0]  ;;  %v10881_v49 = vor.u32 %v9869_v24, %v7625_v23  ;;  %v9841_v18 = vld [vmem:[%s16131_s0 + $0x14] sm:$0xf]  ;;  %v10963_v22 = vor.u32 %v9840_v14, %v7539_v17 }
  0x31   :  { %3038 = vmatpush.bf16.msrb.mxu2 %v8234_v43  ;;  %3087 = vmatpush.bf16.msrb.mxu3 %v8362_v53  ;;  %v8441_v28 = vld [vmem:[%s16130_s2 + $0x420] sm:$0xf]  ;;  %v10101_v31 = vld [vmem:[%s16130_s2 + $0x52c] sm:$0xf0]  ;;  %v7585_v24 = vld [vmem:[%s16131_s0 + $0x68] sm:$0xf] }
  0x32   :  { %3136 = vmatpush.bf16.msrb.mxu0 %v8490_v54  ;;  %3185 = vmatpush.bf16.msrb.mxu1 %v8618_v55  ;;  %v8569_v30 = vld [vmem:[%s16130_s2 + $0x520] sm:$0xf]  ;;  %v10001_v33 = vld [vmem:[%s16130_s2 + $0x20c] sm:$0xf0]  ;;  %v8442_v40 = vor.u32 %v10069_v29, %v8441_v28  ;;  %v10891_v55 = vor.u32 %v9863_v35, %v7627_v36  ;;  %v7587_v29 = vld [vmem:[%s16131_s0 + $0x98] sm:$0xf0] }
  0x33   :  { %2950 = vmatmul.bf16.gmra.mxu0 %v10749_v47  ;;  %2970 = vmatmul.bf16.gmra.mxu2 %v10751_v48  ;;  %v8169_v32 = vld [vmem:[%s16130_s2 + $0x200] sm:$0xf]  ;;  %v9917_v34 = vld [vmem:[%s16131_s0 + $0x26c] sm:$0xf0]  ;;  %v8570_v42 = vor.u32 %v10101_v31, %v8569_v30  ;;  %v9853_v30 = vld [vmem:[%s16131_s0 + $0x74] sm:$0xf] }
  0x34   :  { %2999 = vmatmul.bf16.gmra.mxu1 %v10759_v51  ;;  %3019 = vmatmul.bf16.gmra.mxu3 %v10761_v52  ;;  %v8297_v41 = vld [vmem:[%s16130_s2 + $0x300] sm:$0xf]  ;;  %v8170_v43 = vor.u32 %v10001_v33, %v8169_v32  ;;  %v10033_v44 = vld [vmem:[%s16130_s2 + $0x30c] sm:$0xf0]  ;;  %v10883_v50 = vor.u32 %v9917_v34, %v7817_v25  ;;  %16329 = vst [vmem:[#allocation6_spill] sm:$0xff] %v10891_v55 }
  0x35   :  { %3039 = vmatpush.bf16.msrb.mxu2 %v8218_v63  ;;  %3088 = vmatpush.bf16.msrb.mxu3 %v8346_v3  ;;  %v8425_v45 = vld [vmem:[%s16130_s2 + $0x400] sm:$0xf]  ;;  %v10065_v46 = vld [vmem:[%s16130_s2 + $0x40c] sm:$0xf0]  ;;  %v8298_v61 = vor.u32 %v10033_v44, %v8297_v41  ;;  %v9858_v25 = vld [vmem:[%s16131_s0 + $0x94] sm:$0xf0] }
  0x36   :  { %3137 = vmatpush.bf16.msrb.mxu0 %v8474_v4  ;;  %3186 = vmatpush.bf16.msrb.mxu1 %v8602_v8  ;;  %v8553_v53 = vld [vmem:[%s16130_s2 + $0x500] sm:$0xf]  ;;  %v10097_v54 = vld [vmem:[%s16130_s2 + $0x50c] sm:$0xf0]  ;;  %v8426_v62 = vor.u32 %v10065_v46, %v8425_v45  ;;  %v9875_v4 = vld [vmem:[%s16131_s0 + $0x124] sm:$0xf]  ;;  %v10995_v32 = vor.u32 %v9858_v25, %v7585_v24 }
  0x37   :  { %v8554_v63 = vor.u32 %v10097_v54, %v8553_v53  ;;  %v7673_v0 = vld [vmem:[%s16131_s0 + $0x120] sm:$0xf]  ;;  %v9881_v1 = vld [vmem:[%s16131_s0 + $0x14c] sm:$0xf0]  ;;  %v10927_v10 = vor.u32 %v9875_v4, %v7675_v5  ;;  %v7595_v31 = vld [vmem:[%s16131_s0 + $0xa0] sm:$0xf0] }
  0x38   :  { %v7865_v2 = vld [vmem:[%s16131_s0 + $0x2a0] sm:$0xf]  ;;  %v9929_v3 = vld [vmem:[%s16131_s0 + $0x2cc] sm:$0xf0]  ;;  %v10923_v8 = vor.u32 %v9881_v1, %v7673_v0  ;;  %16335 = vst [vmem:[#allocation12_spill] sm:$0xff] %v10995_v32  ;;  %v11001_v35 = vor.u32 %v9853_v30, %v7595_v31 }
  0x39   :  { %3040 = vmatpush.bf16.msrb.mxu2 %v8202_v12  ;;  %3089 = vmatpush.bf16.msrb.mxu3 %v8330_v19  ;;  %v10925_v9 = vor.u32 %v9929_v3, %v7865_v2  ;;  %16332 = vst [vmem:[#allocation9_spill] sm:$0xff] %v10927_v10  ;;  %v7537_v12 = vld [vmem:[%s16131_s0 + $0x8] sm:$0xf]  ;;  %v7545_v15 = vld [vmem:[%s16131_s0 + $0x10] sm:$0xf] }
  0x3a   :  { %3138 = vmatpush.bf16.msrb.mxu0 %v8458_v20  ;;  %3187 = vmatpush.bf16.msrb.mxu1 %v8586_v26  ;;  %16331 = vst [vmem:[#allocation8_spill] sm:$0xff] %v10923_v8  ;;  %v9847_v16 = vld [vmem:[%s16131_s0 + $0x3c] sm:$0xf0]  ;;  %v7547_v19 = vld [vmem:[%s16131_s0 + $0x40] sm:$0xf0]  ;;  %v10959_v20 = vor.u32 %v9846_v13, %v7537_v12 }
  0x3b   :  { %v10961_v21 = vor.u32 %v9847_v16, %v7545_v15  ;;  %v10965_v23 = vor.u32 %v9841_v18, %v7547_v19  ;;  %v9852_v26 = vld [vmem:[%s16131_s0 + $0x6c] sm:$0xf]  ;;  %v9859_v28 = vld [vmem:[%s16131_s0 + $0x9c] sm:$0xf0]  ;;  %16338 = vst [vmem:[#allocation15_spill] sm:$0xff] %v11001_v35 }
  0x3c   :  { %v10999_v34 = vor.u32 %v9852_v26, %v7587_v29  ;;  %v7633_v36 = vld [vmem:[%s16131_s0 + $0xc8] sm:$0xf]  ;;  %v7635_v41 = vld [vmem:[%s16131_s0 + $0xf8] sm:$0xf0]  ;;  %v9883_v0 = vld [vmem:[%s16131_s0 + $0x15c] sm:$0xf0] }
  0x3d   :  { %3041 = vmatpush.bf16.msrb.mxu2 %v8186_v27  ;;  %3090 = vmatpush.bf16.msrb.mxu3 %v8314_v39  ;;  %16334 = vst [vmem:[#allocation11_spill] sm:$0xff] %v10965_v23  ;;  %v7593_v27 = vld [vmem:[%s16131_s0 + $0x70] sm:$0xf]  ;;  %v11031_v44 = vor.u32 %v9870_v37, %v7633_v36  ;;  %v11035_v46 = vor.u32 %v9864_v38, %v7635_v41  ;;  %v7681_v54 = vld [vmem:[%s16131_s0 + $0x128] sm:$0xf] }
  0x3e   :  { %3139 = vmatpush.bf16.msrb.mxu0 %v8442_v40  ;;  %3188 = vmatpush.bf16.msrb.mxu1 %v8570_v42  ;;  %v10997_v33 = vor.u32 %v9859_v28, %v7593_v27  ;;  %16337 = vst [vmem:[#allocation14_spill] sm:$0xff] %v10999_v34  ;;  %v7641_v39 = vld [vmem:[%s16131_s0 + $0xd0] sm:$0xf]  ;;  %v9871_v40 = vld [vmem:[%s16131_s0 + $0xfc] sm:$0xf0] }
  0x3f   :  { %v9865_v42 = vld [vmem:[%s16131_s0 + $0xd4] sm:$0xf]  ;;  %16339 = vst [vmem:[#allocation16_spill] sm:$0xff] %v11031_v44  ;;  %v11033_v45 = vor.u32 %v9871_v40, %v7641_v39  ;;  %v7683_v1 = vld [vmem:[%s16131_s0 + $0x158] sm:$0xf0] }
  0x40   :  { %16336 = vst [vmem:[#allocation13_spill] sm:$0xff] %v10997_v33  ;;  %v9877_v2 = vld [vmem:[%s16131_s0 + $0x134] sm:$0xf]  ;;  %v7691_v3 = vld [vmem:[%s16131_s0 + $0x160] sm:$0xf0] }
  0x41   :  { %3042 = vmatpush.bf16.msrb.mxu2 %v8170_v43  ;;  %3091 = vmatpush.bf16.msrb.mxu3 %v8298_v61  ;;  %v7643_v43 = vld [vmem:[%s16131_s0 + $0x100] sm:$0xf0]  ;;  %16340 = vst [vmem:[#allocation17_spill] sm:$0xff] %v11033_v45  ;;  %v9882_v61 = vld [vmem:[%s16131_s0 + $0x154] sm:$0xf0]  ;;  %v11073_v7 = vor.u32 %v9877_v2, %v7691_v3 }
  0x42   :  { %3140 = vmatpush.bf16.msrb.mxu0 %v8426_v62  ;;  %3189 = vmatpush.bf16.msrb.mxu1 %v8554_v63  ;;  %16341 = vst [vmem:[#allocation18_spill] sm:$0xff] %v11035_v46  ;;  %v11037_v53 = vor.u32 %v9865_v42, %v7643_v43  ;;  %v9876_v62 = vld [vmem:[%s16131_s0 + $0x12c] sm:$0xf]  ;;  %v7689_v63 = vld [vmem:[%s16131_s0 + $0x130] sm:$0xf]  ;;  %v11067_v4 = vor.u32 %v9882_v61, %v7681_v54 }
  0x43   :  { %2955 = vmatmul.bf16.gmra.mxu0 %v10881_v49  ;;  %2975 = vmatmul.bf16.gmra.mxu2 %v10883_v50  ;;  %v11069_v5 = vor.u32 %v9883_v0, %v7689_v63  ;;  %v11071_v6 = vor.u32 %v9876_v62, %v7683_v1  ;;  %16346 = vst [vmem:[#allocation23_spill] sm:$0xff] %v11073_v7  ;;  %v7729_v12 = vld [vmem:[%s16131_s0 + $0x188] sm:$0xf]  ;;  %v9894_v13 = vld [vmem:[%s16131_s0 + $0x1b4] sm:$0xf0] }
  0x44   :  { %3004 = vmatmul.bf16.gmra.mxu1 %v10891_v55  ;;  %3024 = vmatmul.bf16.gmra.mxu3 %v10893_v60  ;;  %16342 = vst [vmem:[#allocation19_spill] sm:$0xff] %v11037_v53  ;;  %v9888_v14 = vld [vmem:[%s16131_s0 + $0x18c] sm:$0xf]  ;;  %v7737_v15 = vld [vmem:[%s16131_s0 + $0x190] sm:$0xf]  ;;  %v11103_v24 = vor.u32 %v9894_v13, %v7729_v12 }
  0x45   :  { %16343 = vst [vmem:[#allocation20_spill] sm:$0xff] %v11067_v4  ;;  %v9895_v16 = vld [vmem:[%s16131_s0 + $0x1bc] sm:$0xf0]  ;;  %v7731_v17 = vld [vmem:[%s16131_s0 + $0x1b8] sm:$0xf0] }
  0x46   :  { %16344 = vst [vmem:[#allocation21_spill] sm:$0xff] %v11069_v5  ;;  %v9889_v18 = vld [vmem:[%s16131_s0 + $0x194] sm:$0xf]  ;;  %v7739_v19 = vld [vmem:[%s16131_s0 + $0x1c0] sm:$0xf0]  ;;  %v11105_v25 = vor.u32 %v9895_v16, %v7737_v15  ;;  %v11107_v26 = vor.u32 %v9888_v14, %v7731_v17 }
  0x47   :  { %16345 = vst [vmem:[#allocation22_spill] sm:$0xff] %v11071_v6  ;;  %v11109_v27 = vor.u32 %v9889_v18, %v7739_v19  ;;  %v8793_v31 = vld [vmem:[%s16130_s2 + $0x6e0] sm:$0xf]  ;;  %v10157_v36 = vld [vmem:[%s16130_s2 + $0x6ec] sm:$0xf0] }
  0x48   :  { %16347 = vst [vmem:[#allocation24_spill] sm:$0xff] %v11103_v24  ;;  %v8921_v37 = vld [vmem:[%s16130_s2 + $0x7e0] sm:$0xf]  ;;  %v8794_v38 = vor.u32 %v10157_v36, %v8793_v31  ;;  %v10189_v39 = vld [vmem:[%s16130_s2 + $0x7ec] sm:$0xf0] }
  0x49   :  { %16348 = vst [vmem:[#allocation25_spill] sm:$0xff] %v11105_v25  ;;  %v9049_v40 = vld [vmem:[%s16130_s2 + $0x8e0] sm:$0xf]  ;;  %v10221_v41 = vld [vmem:[%s16130_s2 + $0x8ec] sm:$0xf0]  ;;  %v8922_v42 = vor.u32 %v10189_v39, %v8921_v37 }
  0x4a   :  { %16349 = vst [vmem:[#allocation26_spill] sm:$0xff] %v11107_v26  ;;  %v9050_v43 = vor.u32 %v10221_v41, %v9049_v40  ;;  %v9177_v54 = vld [vmem:[%s16130_s2 + $0x9e0] sm:$0xf]  ;;  %v10253_v61 = vld [vmem:[%s16130_s2 + $0x9ec] sm:$0xf0]  ;;  %3231 = vmatpush.bf16.msra.mxu2 %v8794_v38 }
  0x4b   :  { %16350 = vst [vmem:[#allocation27_spill] sm:$0xff] %v11109_v27  ;;  %v9178_v63 = vor.u32 %v10253_v61, %v9177_v54  ;;  %v8777_v0 = vld [vmem:[%s16130_s2 + $0x6c0] sm:$0xf]  ;;  %v10153_v1 = vld [vmem:[%s16130_s2 + $0x6cc] sm:$0xf0]  ;;  %3280 = vmatpush.bf16.msra.mxu3 %v8922_v42 }
  0x4c   :  { %v8905_v2 = vld [vmem:[%s16130_s2 + $0x7c0] sm:$0xf]  ;;  %3329 = vmatpush.bf16.msra.mxu0 %v9050_v43  ;;  %v8778_v12 = vor.u32 %v10153_v1, %v8777_v0  ;;  %v10185_v13 = vld [vmem:[%s16130_s2 + $0x7cc] sm:$0xf0] }
  0x4d   :  { %v9033_v14 = vld [vmem:[%s16130_s2 + $0x8c0] sm:$0xf]  ;;  %v10217_v15 = vld [vmem:[%s16130_s2 + $0x8cc] sm:$0xf0]  ;;  %3378 = vmatpush.bf16.msra.mxu1 %v9178_v63  ;;  %v8906_v18 = vor.u32 %v10185_v13, %v8905_v2  ;;  %v9906_v63 = vld [vmem:[%s16131_s0 + $0x214] sm:$0xf0] }
  0x4e   :  { %v9034_v19 = vor.u32 %v10217_v15, %v9033_v14  ;;  %v8761_v31 = vld [vmem:[%s16130_s2 + $0x6a0] sm:$0xf]  ;;  %v10149_v38 = vld [vmem:[%s16130_s2 + $0x6ac] sm:$0xf0]  ;;  %3232 = vmatpush.bf16.msra.mxu2 %v8778_v12  ;;  %v7779_v15 = vld [vmem:[%s16131_s0 + $0x218] sm:$0xf0] }
  0x4f   :  { %v8889_v39 = vld [vmem:[%s16130_s2 + $0x7a0] sm:$0xf]  ;;  %v10181_v40 = vld [vmem:[%s16130_s2 + $0x7ac] sm:$0xf0]  ;;  %v8762_v42 = vor.u32 %v10149_v38, %v8761_v31  ;;  %3281 = vmatpush.bf16.msra.mxu3 %v8906_v18  ;;  %v7787_v18 = vld [vmem:[%s16131_s0 + $0x220] sm:$0xf0] }
  0x50   :  { %v9017_v43 = vld [vmem:[%s16130_s2 + $0x8a0] sm:$0xf]  ;;  %v10213_v54 = vld [vmem:[%s16130_s2 + $0x8ac] sm:$0xf0]  ;;  %3330 = vmatpush.bf16.msra.mxu0 %v9034_v19  ;;  %v8890_v0 = vor.u32 %v10181_v40, %v8889_v39 }
  0x51   :  { %v9145_v61 = vld [vmem:[%s16130_s2 + $0x9a0] sm:$0xf]  ;;  %v9018_v1 = vor.u32 %v10213_v54, %v9017_v43  ;;  %v10245_v2 = vld [vmem:[%s16130_s2 + $0x9ac] sm:$0xf0] }
  0x52   :  { %v7785_v12 = vld [vmem:[%s16131_s0 + $0x1f0] sm:$0xf]  ;;  %v9907_v13 = vld [vmem:[%s16131_s0 + $0x21c] sm:$0xf0]  ;;  %v9146_v14 = vor.u32 %v10245_v2, %v9145_v61  ;;  %3233 = vmatpush.bf16.msra.mxu2 %v8762_v42 }
  0x53   :  { %2960 = vmatmul.bf16.gmra.mxu0 %v10923_v8  ;;  %2980 = vmatmul.bf16.gmra.mxu2 %v10925_v9  ;;  %v8873_v31 = vld [vmem:[%s16130_s2 + $0x780] sm:$0xf]  ;;  %v11228_v38 = vor.u32 %v9907_v13, %v7785_v12  ;;  %v10177_v40 = vld [vmem:[%s16130_s2 + $0x78c] sm:$0xf0] }
  0x54   :  { %3009 = vmatmul.bf16.gmra.mxu1 %v10927_v10  ;;  %3029 = vmatmul.bf16.gmra.mxu3 %v10929_v11  ;;  %v9001_v42 = vld [vmem:[%s16130_s2 + $0x880] sm:$0xf]  ;;  %v10209_v43 = vld [vmem:[%s16130_s2 + $0x88c] sm:$0xf0]  ;;  %v8874_v12 = vor.u32 %v10177_v40, %v8873_v31 }
  0x55   :  { %16352 = vst [vmem:[#allocation29_spill] sm:$0xff] %v11228_v38  ;;  %3282 = vmatpush.bf16.msra.mxu3 %v8890_v0  ;;  %3331 = vmatpush.bf16.msra.mxu0 %v9018_v1  ;;  %v9129_v0 = vld [vmem:[%s16130_s2 + $0x980] sm:$0xf]  ;;  %v10241_v1 = vld [vmem:[%s16130_s2 + $0x98c] sm:$0xf0]  ;;  %v9002_v13 = vor.u32 %v10209_v43, %v9001_v42 }
  0x56   :  { %v10237_v40 = vld [vmem:[%s16130_s2 + $0x96c] sm:$0xf0] }
  0x59   :  { %3283 = vmatpush.bf16.msra.mxu3 %v8874_v12  ;;  %3332 = vmatpush.bf16.msra.mxu0 %v9002_v13 }
  0x63   :  { %3043 = vmatmul.bf16.vlgmr.msrb.gmra.mxu2 %v10959_v20  ;;  %3141 = vmatmul.bf16.vlgmr.msrb.gmra.mxu0 %v10961_v21 }
  0x64   :  { %3092 = vmatmul.bf16.vlgmr.msrb.gmra.mxu3 %v10963_v22  ;;  %3190 = vmatmul.bf16.vlgmr.msrb.gmra.mxu1 %v10965_v23  ;;  %v10257_v23 = vld [vmem:[%s16130_s2 + $0xa0c] sm:$0xf0] }
  0x73   :  { %3048 = vmatmul.bf16.gmra.mxu2 %v10995_v32  ;;  %3146 = vmatmul.bf16.gmra.mxu0 %v10997_v33  ;;  %v9193_v32 = vld [vmem:[%s16130_s2 + $0xa00] sm:$0xf] }
  0x74   :  { %3097 = vmatmul.bf16.gmra.mxu3 %v10999_v34  ;;  %3195 = vmatmul.bf16.gmra.mxu1 %v11001_v35  ;;  %v7979_v35 = vld [vmem:[%s16130_s2 + $0x90] sm:$0xf0] }
  0x83   :  { %3053 = vmatmul.bf16.gmra.mxu2 %v11031_v44  ;;  %3151 = vmatmul.bf16.gmra.mxu0 %v11033_v45 }
  0x84   :  { %3102 = vmatmul.bf16.gmra.mxu3 %v11035_v46  ;;  %3200 = vmatmul.bf16.gmra.mxu1 %v11037_v53 }
  0x93   :  { %3058 = vmatmul.bf16.gmra.mxu2 %v11067_v4  ;;  %3156 = vmatmul.bf16.gmra.mxu0 %v11069_v5 }
  0x94   :  { %3107 = vmatmul.bf16.gmra.mxu3 %v11071_v6  ;;  %3205 = vmatmul.bf16.gmra.mxu1 %v11073_v7 }
  0xa0   :  { %v2946_v28 = vpop.f32.mrf.mxu0 }
  0xa1   :  { %v2995_v29 = vpop.f32.mrf.mxu1 }
  0xa2   :  { %v11111_v30 = vadd.f32 %v2995_v29, %v2946_v28  ;;  %v9161_v28 = vld [vmem:[%s16130_s2 + $0x9c0] sm:$0xf]  ;;  %v10249_v29 = vld [vmem:[%s16130_s2 + $0x9cc] sm:$0xf0] }
  0xa3   :  { %3063 = vmatmul.bf16.gmra.mxu2 %v11103_v24  ;;  %3161 = vmatmul.bf16.gmra.mxu0 %v11105_v25  ;;  %v9162_v37 = vor.u32 %v10249_v29, %v9161_v28  ;;  %v8745_v28 = vld [vmem:[%s16130_s2 + $0x680] sm:$0xf]  ;;  %v10145_v29 = vld [vmem:[%s16130_s2 + $0x68c] sm:$0xf0] }
  0xa4   :  { %3112 = vmatmul.bf16.gmra.mxu3 %v11107_v26  ;;  %3210 = vmatmul.bf16.gmra.mxu1 %v11109_v27  ;;  %v8746_v39 = vor.u32 %v10145_v29, %v8745_v28  ;;  %v8985_v29 = vld [vmem:[%s16130_s2 + $0x860] sm:$0xf]  ;;  %v10129_v25 = vld [vmem:[%s16130_s2 + $0x60c] sm:$0xf0] }
  0xa5   :  { %3379 = vmatpush.bf16.msra.mxu1 %v9162_v37  ;;  %v8681_v26 = vld [vmem:[%s16130_s2 + $0x600] sm:$0xf] }
  0xa6   :  { %v2966_v62 = vpop.f32.mrf.mxu2  ;;  %3234 = vmatpush.bf16.msra.mxu2 %v8746_v39  ;;  %v9113_v39 = vld [vmem:[%s16130_s2 + $0x960] sm:$0xf] }
  0xa7   :  { %v3015_v3 = vpop.f32.mrf.mxu3  ;;  %v8809_v24 = vld [vmem:[%s16130_s2 + $0x700] sm:$0xf] }
  0xa8   :  { %v11159_v16 = vadd.f32 %v3015_v3, %v2966_v62  ;;  %v2948_v17 = vpop.f32.mrf.mxu0  ;;  %v7777_v62 = vld [vmem:[%s16131_s0 + $0x1e8] sm:$0xf]  ;;  %v9900_v3 = vld [vmem:[%s16131_s0 + $0x1ec] sm:$0xf] }
  0xa9   :  { %v2997_v36 = vpop.f32.mrf.mxu1  ;;  %v11226_v37 = vor.u32 %v9906_v63, %v7777_v62  ;;  %v11241_v61 = vor.u32 %v9900_v3, %v7779_v15  ;;  %3380 = vmatpush.bf16.msra.mxu1 %v9146_v14  ;;  %v9130_v3 = vor.u32 %v10241_v1, %v9129_v0  ;;  %v8729_v14 = vld [vmem:[%s16130_s2 + $0x660] sm:$0xf]  ;;  %v10141_v15 = vld [vmem:[%s16130_s2 + $0x66c] sm:$0xf0] }
  0xaa   :  { %v11179_v41 = vadd.f32 %v2997_v36, %v2948_v17  ;;  %v9901_v17 = vld [vmem:[%s16131_s0 + $0x1f4] sm:$0xf]  ;;  %v8713_v0 = vld [vmem:[%s16130_s2 + $0x640] sm:$0xf]  ;;  %v10137_v1 = vld [vmem:[%s16130_s2 + $0x64c] sm:$0xf0] }
  0xab   :  { %16351 = vst [vmem:[#allocation28_spill] sm:$0xff] %v11226_v37  ;;  %v11243_v62 = vor.u32 %v9901_v17, %v7787_v18  ;;  %v8730_v17 = vor.u32 %v10141_v15, %v8729_v14  ;;  %v8857_v18 = vld [vmem:[%s16130_s2 + $0x760] sm:$0xf]  ;;  %v8714_v13 = vor.u32 %v10137_v1, %v8713_v0  ;;  %v10201_v15 = vld [vmem:[%s16130_s2 + $0x84c] sm:$0xf0] }
  0xac   :  { %16353 = vst [vmem:[#allocation30_spill] sm:$0xff] %v11241_v61  ;;  %v8969_v14 = vld [vmem:[%s16130_s2 + $0x840] sm:$0xf] }
  0xad   :  { %16354 = vst [vmem:[#allocation31_spill] sm:$0xff] %v11243_v62  ;;  %3381 = vmatpush.bf16.msra.mxu1 %v9130_v3  ;;  %3235 = vmatpush.bf16.msra.mxu2 %v8730_v17  ;;  %v10169_v3 = vld [vmem:[%s16130_s2 + $0x74c] sm:$0xf0]  ;;  %v8970_v0 = vor.u32 %v10201_v15, %v8969_v14  ;;  %v8825_v1 = vld [vmem:[%s16130_s2 + $0x720] sm:$0xf] }
  0xae   :  { %v2968_v19 = vpop.f32.mrf.mxu2  ;;  %v10197_v14 = vld [vmem:[%s16130_s2 + $0x82c] sm:$0xf0]  ;;  %v9918_v15 = vld [vmem:[%s16131_s0 + $0x274] sm:$0xf0] }
  0xaf   :  { %v3017_v36 = vpop.f32.mrf.mxu3 }
  0xb0   :  { %v11239_v54 = vadd.f32 %v3017_v36, %v2968_v19  ;;  %v2951_v63 = vpop.f32.mrf.mxu0  ;;  %v10173_v19 = vld [vmem:[%s16130_s2 + $0x76c] sm:$0xf0] }
  0xb1   :  { %v3000_v2 = vpop.f32.mrf.mxu1  ;;  %v8858_v31 = vor.u32 %v10173_v19, %v8857_v18  ;;  %v10205_v36 = vld [vmem:[%s16130_s2 + $0x86c] sm:$0xf0]  ;;  %v9097_v19 = vld [vmem:[%s16130_s2 + $0x940] sm:$0xf]  ;;  %3236 = vmatpush.bf16.msra.mxu2 %v8714_v13 }
  0xb2   :  { %v11251_v28 = vadd.f32 %v3000_v2, %v2951_v63  ;;  %v8986_v43 = vor.u32 %v10205_v36, %v8985_v29  ;;  %v9114_v63 = vor.u32 %v10237_v40, %v9113_v39  ;;  %v8841_v2 = vld [vmem:[%s16130_s2 + $0x740] sm:$0xf]  ;;  %v10233_v29 = vld [vmem:[%s16130_s2 + $0x94c] sm:$0xf0] }
  0xb3   :  { %3068 = vmatmul.bf16.gmra.mxu2 %v11226_v37  ;;  %3166 = vmatmul.bf16.gmra.mxu0 %v11228_v38  ;;  %v8697_v36 = vld [vmem:[%s16130_s2 + $0x620] sm:$0xf]  ;;  %v8842_v40 = vor.u32 %v10169_v3, %v8841_v2  ;;  %v10165_v2 = vld [vmem:[%s16130_s2 + $0x72c] sm:$0xf0] }
  0xb4   :  { %3117 = vmatmul.bf16.gmra.mxu3 %v11241_v61  ;;  %3215 = vmatmul.bf16.gmra.mxu1 %v11243_v62  ;;  %v8953_v3 = vld [vmem:[%s16130_s2 + $0x820] sm:$0xf]  ;;  %v10229_v13 = vld [vmem:[%s16130_s2 + $0x92c] sm:$0xf0]  ;;  %v8826_v61 = vor.u32 %v10165_v2, %v8825_v1 }
  0xb5   :  { %3284 = vmatpush.bf16.msra.mxu3 %v8858_v31  ;;  %3333 = vmatpush.bf16.msra.mxu0 %v8986_v43  ;;  %v9098_v31 = vor.u32 %v10233_v29, %v9097_v19  ;;  %v7833_v19 = vld [vmem:[%s16131_s0 + $0x250] sm:$0xf]  ;;  %v9919_v29 = vld [vmem:[%s16131_s0 + $0x27c] sm:$0xf0]  ;;  %v8954_v38 = vor.u32 %v10197_v14, %v8953_v3 }
  0xb6   :  { %v2971_v42 = vpop.f32.mrf.mxu2  ;;  %3382 = vmatpush.bf16.msra.mxu1 %v9114_v63  ;;  %v9081_v63 = vld [vmem:[%s16130_s2 + $0x920] sm:$0xf]  ;;  %v11368_v1 = vor.u32 %v9919_v29, %v7833_v19  ;;  %v10193_v3 = vld [vmem:[%s16130_s2 + $0x80c] sm:$0xf0] }
  0xb7   :  { %v3020_v12 = vpop.f32.mrf.mxu3  ;;  %v9082_v27 = vor.u32 %v10229_v13, %v9081_v63  ;;  %v8937_v2 = vld [vmem:[%s16130_s2 + $0x800] sm:$0xf] }
  0xb8   :  { %v11299_v17 = vadd.f32 %v3020_v12, %v2971_v42  ;;  %v2953_v18 = vpop.f32.mrf.mxu0  ;;  %v10133_v42 = vld [vmem:[%s16130_s2 + $0x62c] sm:$0xf0]  ;;  %v7825_v12 = vld [vmem:[%s16131_s0 + $0x248] sm:$0xf]  ;;  %16356 = vst [vmem:[#allocation33_spill] sm:$0xff] %v11368_v1  ;;  %v8938_v29 = vor.u32 %v10193_v3, %v8937_v2 }
  0xb9   :  { %v3002_v39 = vpop.f32.mrf.mxu1  ;;  %v8698_v43 = vor.u32 %v10133_v42, %v8697_v36  ;;  %v7827_v36 = vld [vmem:[%s16131_s0 + $0x278] sm:$0xf0]  ;;  %v7835_v42 = vld [vmem:[%s16131_s0 + $0x280] sm:$0xf0]  ;;  %3285 = vmatpush.bf16.msra.mxu3 %v8842_v40  ;;  %3334 = vmatpush.bf16.msra.mxu0 %v8970_v0  ;;  %v11366_v0 = vor.u32 %v9918_v15, %v7825_v12  ;;  %v9931_v2 = vld [vmem:[%s16131_s0 + $0x2dc] sm:$0xf0] }
  0xba   :  { %v11319_v62 = vadd.f32 %v3002_v39, %v2953_v18  ;;  %v9912_v18 = vld [vmem:[%s16131_s0 + $0x24c] sm:$0xf]  ;;  %v9913_v39 = vld [vmem:[%s16131_s0 + $0x254] sm:$0xf]  ;;  %3383 = vmatpush.bf16.msra.mxu1 %v9098_v31  ;;  %v8682_v31 = vor.u32 %v10129_v25, %v8681_v26  ;;  %v9065_v25 = vld [vmem:[%s16130_s2 + $0x900] sm:$0xf] }
  0xbb   :  { %3237 = vmatpush.bf16.msra.mxu2 %v8698_v43  ;;  %16355 = vst [vmem:[#allocation32_spill] sm:$0xff] %v11366_v0  ;;  %v10161_v43 = vld [vmem:[%s16130_s2 + $0x70c] sm:$0xf0]  ;;  %v11381_v63 = vor.u32 %v9912_v18, %v7827_v36  ;;  %v11383_v12 = vor.u32 %v9913_v39, %v7835_v42  ;;  %v7873_v42 = vld [vmem:[%s16131_s0 + $0x2a8] sm:$0xf] }
  0xbc   :  { %v10225_v26 = vld [vmem:[%s16130_s2 + $0x90c] sm:$0xf0]  ;;  %v8810_v19 = vor.u32 %v10161_v43, %v8809_v24  ;;  %v7875_v3 = vld [vmem:[%s16131_s0 + $0x2d8] sm:$0xf0] }
  0xbd   :  { %16357 = vst [vmem:[#allocation34_spill] sm:$0xff] %v11381_v63  ;;  %3286 = vmatpush.bf16.msra.mxu3 %v8826_v61  ;;  %3335 = vmatpush.bf16.msra.mxu0 %v8954_v38  ;;  %v9066_v18 = vor.u32 %v10225_v26, %v9065_v25  ;;  %v7881_v43 = vld [vmem:[%s16131_s0 + $0x2b0] sm:$0xf]  ;;  %v7883_v25 = vld [vmem:[%s16131_s0 + $0x2e0] sm:$0xf0] }
  0xbe   :  { %v2973_v37 = vpop.f32.mrf.mxu2  ;;  %16358 = vst [vmem:[#allocation35_spill] sm:$0xff] %v11383_v12  ;;  %3384 = vmatpush.bf16.msra.mxu1 %v9082_v27 }
  0xbf   :  { %v3022_v40 = vpop.f32.mrf.mxu3  ;;  %3238 = vmatpush.bf16.msra.mxu2 %v8682_v31  ;;  %v9924_v31 = vld [vmem:[%s16131_s0 + $0x2ac] sm:$0xf] }
  0xc0   :  { %v11379_v14 = vadd.f32 %v3022_v40, %v2973_v37  ;;  %v2956_v15 = vpop.f32.mrf.mxu0  ;;  %v9930_v40 = vld [vmem:[%s16131_s0 + $0x2d4] sm:$0xf0] }
  0xc1   :  { %v3005_v13 = vpop.f32.mrf.mxu1  ;;  %3287 = vmatpush.bf16.msra.mxu3 %v8810_v19  ;;  %3336 = vmatpush.bf16.msra.mxu0 %v8938_v29  ;;  %v11425_v19 = vor.u32 %v9930_v40, %v7873_v42  ;;  %v11427_v29 = vor.u32 %v9931_v2, %v7881_v43 }
  0xc2   :  { %v11391_v37 = vadd.f32 %v3005_v13, %v2956_v15  ;;  %3385 = vmatpush.bf16.msra.mxu1 %v9066_v18  ;;  %v9925_v15 = vld [vmem:[%s16131_s0 + $0x2b4] sm:$0xf] }
  0xc3   :  { %3073 = vmatmul.bf16.gmra.mxu2 %v11366_v0  ;;  %3171 = vmatmul.bf16.gmra.mxu0 %v11368_v1  ;;  %16359 = vst [vmem:[#allocation36_spill] sm:$0xff] %v11425_v19 }
  0xc4   :  { %3122 = vmatmul.bf16.gmra.mxu3 %v11381_v63  ;;  %3220 = vmatmul.bf16.gmra.mxu1 %v11383_v12  ;;  %16360 = vst [vmem:[#allocation37_spill] sm:$0xff] %v11427_v29 }
  0xc6   :  { %v2976_v36 = vpop.f32.mrf.mxu2 }
  0xc7   :  { %v3025_v38 = vpop.f32.mrf.mxu3 }
  0xc8   :  { %v11397_v24 = vadd.f32 %v3025_v38, %v2976_v36  ;;  %v2958_v61 = vpop.f32.mrf.mxu0  ;;  %v11431_v36 = vor.u32 %v9924_v31, %v7875_v3  ;;  %v11433_v38 = vor.u32 %v9925_v15, %v7883_v25  ;;  %v7553_v15 = vld [vmem:[%s16131_s0 + $0x18] sm:$0xf]  ;;  %v9848_v25 = vld [vmem:[%s16131_s0 + $0x44] sm:$0xf0] }
  0xc9   :  { %v3007_v39 = vpop.f32.mrf.mxu1 }
  0xca   :  { %v11399_v27 = vadd.f32 %v3007_v39, %v2958_v61  ;;  %16361 = vst [vmem:[#allocation38_spill] sm:$0xff] %v11431_v36 }
  0xcb   :  { %16362 = vst [vmem:[#allocation39_spill] sm:$0xff] %v11433_v38 }
  0xce   :  { %v2978_v26 = vpop.f32.mrf.mxu2 }
  0xcf   :  { %v3027_v13 = vpop.f32.mrf.mxu3 }
  0xd0   :  { %v11429_v18 = vadd.f32 %v3027_v13, %v2978_v26  ;;  %v2961_v61 = vpop.f32.mrf.mxu0  ;;  %v9842_v26 = vld [vmem:[%s16131_s0 + $0x1c] sm:$0xf]  ;;  %v7561_v13 = vld [vmem:[%s16131_s0 + $0x20] sm:$0xf] }
  0xd1   :  { %v3010_v39 = vpop.f32.mrf.mxu1 }
  0xd2   :  { %v11435_v12 = vadd.f32 %v3010_v39, %v2961_v61  ;;  %v9849_v61 = vld [vmem:[%s16131_s0 + $0x4c] sm:$0xf0]  ;;  %v7555_v39 = vld [vmem:[%s16131_s0 + $0x48] sm:$0xf0] }
  0xd3   :  { %3078 = vmatmul.bf16.gmra.mxu2 %v11425_v19  ;;  %3176 = vmatmul.bf16.gmra.mxu0 %v11427_v29  ;;  %v11475_v19 = vor.u32 %v9842_v26, %v7555_v39 }
  0xd4   :  { %3127 = vmatmul.bf16.gmra.mxu3 %v11431_v36  ;;  %3225 = vmatmul.bf16.gmra.mxu1 %v11433_v38  ;;  %v11469_v38 = vor.u32 %v9848_v25, %v7553_v15  ;;  %v11471_v36 = vor.u32 %v9849_v61, %v7561_v13 }
  0xd5   :  { %16365 = vst [vmem:[#allocation42_spill] sm:$0xff] %v11475_v19 }
  0xd6   :  { %v2981_v42 = vpop.f32.mrf.mxu2  ;;  %16363 = vst [vmem:[#allocation40_spill] sm:$0xff] %v11469_v38 }
  0xd7   :  { %v3030_v40 = vpop.f32.mrf.mxu3  ;;  %16364 = vst [vmem:[#allocation41_spill] sm:$0xff] %v11471_v36 }
  0xd8   :  { %v11441_v43 = vadd.f32 %v3030_v40, %v2981_v42  ;;  %v2963_v31 = vpop.f32.mrf.mxu0  ;;  %v9843_v42 = vld [vmem:[%s16131_s0 + $0x24] sm:$0xf]  ;;  %v7563_v40 = vld [vmem:[%s16131_s0 + $0x50] sm:$0xf0] }
  0xd9   :  { %v3012_v2 = vpop.f32.mrf.mxu1  ;;  %v11477_v63 = vor.u32 %v9843_v42, %v7563_v40  ;;  %v7601_v42 = vld [vmem:[%s16131_s0 + $0x78] sm:$0xf]  ;;  %v9860_v40 = vld [vmem:[%s16131_s0 + $0xa4] sm:$0xf0] }
  0xda   :  { %v11443_v3 = vadd.f32 %v3012_v2, %v2963_v31 }
  0xdb   :  { %16366 = vst [vmem:[#allocation43_spill] sm:$0xff] %v11477_v63 }
  0xde   :  { %v2983_v31 = vpop.f32.mrf.mxu2 }
  0xdf   :  { %v3032_v2 = vpop.f32.mrf.mxu3 }
  0xe0   :  { %v11473_v29 = vadd.f32 %v3032_v2, %v2983_v31  ;;  %v3142_v1 = vpop.f32.mrf.mxu0  ;;  %v9854_v2 = vld [vmem:[%s16131_s0 + $0x7c] sm:$0xf] }
  0xe1   :  { %v3191_v0 = vpop.f32.mrf.mxu1 }
  0xe3   :  { %3239 = vmatmul.bf16.vlgmr.msra.gmra.mxu2 %v11469_v38  ;;  %3337 = vmatmul.bf16.vlgmr.msra.gmra.mxu0 %v11471_v36  ;;  %v11511_v38 = vor.u32 %v9860_v40, %v7601_v42 }
  0xe4   :  { %3288 = vmatmul.bf16.vlgmr.msra.gmra.mxu3 %v11475_v19  ;;  %3386 = vmatmul.bf16.vlgmr.msra.gmra.mxu1 %v11477_v63 }
  0xe5   :  { %16367 = vst [vmem:[#allocation44_spill] sm:$0xff] %v11511_v38 }
  0xe6   :  { %v3044_v15 = vpop.f32.mrf.mxu2 }
  0xe7   :  { %v3045_v25 = vadd.f32 %v3044_v15, %v11111_v30  ;;  %v3093_v13 = vpop.f32.mrf.mxu3  ;;  %v7609_v30 = vld [vmem:[%s16131_s0 + $0x80] sm:$0xf] }
  0xe8   :  { %v3144_v61 = vpop.f32.mrf.mxu0 }
  0xe9   :  { %v3094_v31 = vadd.f32 %v3093_v13, %v3045_v25  ;;  %v3193_v26 = vpop.f32.mrf.mxu1  ;;  %v7603_v25 = vld [vmem:[%s16131_s0 + $0xa8] sm:$0xf0]  ;;  %v9855_v13 = vld [vmem:[%s16131_s0 + $0x84] sm:$0xf] }
  0xeb   :  { %v3143_v39 = vadd.f32 %v3142_v1, %v3094_v31  ;;  %v9861_v1 = vld [vmem:[%s16131_s0 + $0xac] sm:$0xf0]  ;;  %v7611_v31 = vld [vmem:[%s16131_s0 + $0xb0] sm:$0xf0] }
  0xec   :  { %v11517_v7 = vor.u32 %v9855_v13, %v7611_v31  ;;  %v7659_v13 = vld [vmem:[%s16131_s0 + $0x110] sm:$0xf0] }
  0xed   :  { %v11499_v15 = vadd.f32 %v3191_v0, %v3143_v39  ;;  %v11513_v0 = vor.u32 %v9861_v1, %v7609_v30  ;;  %v11515_v39 = vor.u32 %v9854_v2, %v7603_v25  ;;  %v9867_v25 = vld [vmem:[%s16131_s0 + $0xe4] sm:$0xf] }
  0xee   :  { %v3046_v63 = vpop.f32.mrf.mxu2  ;;  %16370 = vst [vmem:[#allocation47_spill] sm:$0xff] %v11517_v7 }
  0xef   :  { %v3047_v19 = vadd.f32 %v3046_v63, %v11179_v41  ;;  %v3095_v36 = vpop.f32.mrf.mxu3  ;;  %16368 = vst [vmem:[#allocation45_spill] sm:$0xff] %v11513_v0 }
  0xf0   :  { %16369 = vst [vmem:[#allocation46_spill] sm:$0xff] %v11515_v39  ;;  %v3147_v6 = vpop.f32.mrf.mxu0 }
  0xf1   :  { %v3096_v5 = vadd.f32 %v3095_v36, %v3047_v19  ;;  %v3196_v4 = vpop.f32.mrf.mxu1  ;;  %v9872_v36 = vld [vmem:[%s16131_s0 + $0x104] sm:$0xf0] }
  0xf3   :  { %v3145_v53 = vadd.f32 %v3144_v61, %v3096_v5  ;;  %3244 = vmatmul.bf16.gmra.mxu2 %v11511_v38  ;;  %3342 = vmatmul.bf16.gmra.mxu0 %v11513_v0  ;;  %v7649_v5 = vld [vmem:[%s16131_s0 + $0xd8] sm:$0xf] }
  0xf4   :  { %3293 = vmatmul.bf16.gmra.mxu3 %v11515_v39  ;;  %3391 = vmatmul.bf16.gmra.mxu1 %v11517_v7 }
  0xf5   :  { %v11523_v41 = vadd.f32 %v3193_v26, %v3145_v53  ;;  %v9866_v53 = vld [vmem:[%s16131_s0 + $0xdc] sm:$0xf]  ;;  %v7651_v26 = vld [vmem:[%s16131_s0 + $0x108] sm:$0xf0] }
  0xf6   :  { %v3049_v63 = vpop.f32.mrf.mxu2 }
  0xf7   :  { %v3050_v42 = vadd.f32 %v3049_v63, %v11251_v28  ;;  %v3098_v40 = vpop.f32.mrf.mxu3  ;;  %v7657_v28 = vld [vmem:[%s16131_s0 + $0xe0] sm:$0xf] }
  0xf8   :  { %v3149_v2 = vpop.f32.mrf.mxu0 }
  0xf9   :  { %v3099_v30 = vadd.f32 %v3098_v40, %v3050_v42  ;;  %v3198_v1 = vpop.f32.mrf.mxu1  ;;  %v11553_v40 = vor.u32 %v9872_v36, %v7649_v5 }
  0xfb   :  { %v3148_v19 = vadd.f32 %v3147_v6, %v3099_v30  ;;  %v9873_v6 = vld [vmem:[%s16131_s0 + $0x10c] sm:$0xf0]  ;;  %16371 = vst [vmem:[#allocation48_spill] sm:$0xff] %v11553_v40  ;;  %v11557_v30 = vor.u32 %v9866_v53, %v7651_v26 }
  0xfd   :  { %v11541_v61 = vadd.f32 %v3196_v4, %v3148_v19  ;;  %v11555_v4 = vor.u32 %v9873_v6, %v7657_v28  ;;  %16373 = vst [vmem:[#allocation50_spill] sm:$0xff] %v11557_v30  ;;  %v11559_v19 = vor.u32 %v9867_v25, %v7659_v13  ;;  %v7699_v13 = vld [vmem:[%s16131_s0 + $0x168] sm:$0xf0] }
  0xfe   :  { %v3051_v31 = vpop.f32.mrf.mxu2 }
  0xff   :  { %v3052_v63 = vadd.f32 %v3051_v31, %v11319_v62  ;;  %v3100_v42 = vpop.f32.mrf.mxu3  ;;  %16372 = vst [vmem:[#allocation49_spill] sm:$0xff] %v11555_v4  ;;  %v9879_v31 = vld [vmem:[%s16131_s0 + $0x144] sm:$0xf] }
 0x100   :  { %16374 = vst [vmem:[#allocation51_spill] sm:$0xff] %v11559_v19  ;;  %v3152_v7 = vpop.f32.mrf.mxu0 }
 0x101   :  { %v3101_v39 = vadd.f32 %v3100_v42, %v3052_v63  ;;  %v3201_v0 = vpop.f32.mrf.mxu1  ;;  %v7707_v63 = vld [vmem:[%s16131_s0 + $0x170] sm:$0xf0] }
 0x103   :  { %v3150_v38 = vadd.f32 %v3149_v2, %v3101_v39  ;;  %3249 = vmatmul.bf16.gmra.mxu2 %v11553_v40  ;;  %3347 = vmatmul.bf16.gmra.mxu0 %v11555_v4  ;;  %v7697_v39 = vld [vmem:[%s16131_s0 + $0x138] sm:$0xf]  ;;  %v9884_v2 = vld [vmem:[%s16131_s0 + $0x164] sm:$0xf0] }
 0x104   :  { %3298 = vmatmul.bf16.gmra.mxu3 %v11557_v30  ;;  %3396 = vmatmul.bf16.gmra.mxu1 %v11559_v19 }
 0x105   :  { %v11565_v62 = vadd.f32 %v3198_v1, %v3150_v38  ;;  %v9878_v38 = vld [vmem:[%s16131_s0 + $0x13c] sm:$0xf] }
 0x106   :  { %v3054_v5 = vpop.f32.mrf.mxu2 }
 0x107   :  { %v3055_v36 = vadd.f32 %v3054_v5, %v11391_v37  ;;  %v3103_v53 = vpop.f32.mrf.mxu3  ;;  %v7705_v37 = vld [vmem:[%s16131_s0 + $0x140] sm:$0xf] }
 0x108   :  { %v3154_v28 = vpop.f32.mrf.mxu0 }
 0x109   :  { %v3104_v6 = vadd.f32 %v3103_v53, %v3055_v36  ;;  %v3203_v26 = vpop.f32.mrf.mxu1  ;;  %v11595_v53 = vor.u32 %v9884_v2, %v7697_v39 }
 0x10b   :  { %v3153_v25 = vadd.f32 %v3152_v7, %v3104_v6  ;;  %v9885_v7 = vld [vmem:[%s16131_s0 + $0x16c] sm:$0xf0]  ;;  %16375 = vst [vmem:[#allocation52_spill] sm:$0xff] %v11595_v53  ;;  %v11599_v6 = vor.u32 %v9878_v38, %v7699_v13 }
 0x10d   :  { %v11583_v1 = vadd.f32 %v3201_v0, %v3153_v25  ;;  %v11597_v0 = vor.u32 %v9885_v7, %v7705_v37  ;;  %16377 = vst [vmem:[#allocation54_spill] sm:$0xff] %v11599_v6  ;;  %v11601_v25 = vor.u32 %v9879_v31, %v7707_v63  ;;  %v7747_v63 = vld [vmem:[%s16131_s0 + $0x1c8] sm:$0xf0] }
 0x10e   :  { %v3056_v42 = vpop.f32.mrf.mxu2 }
 0x10f   :  { %v3057_v5 = vadd.f32 %v3056_v42, %v11399_v27  ;;  %v3105_v36 = vpop.f32.mrf.mxu3  ;;  %16376 = vst [vmem:[#allocation53_spill] sm:$0xff] %v11597_v0  ;;  %v9891_v42 = vld [vmem:[%s16131_s0 + $0x1a4] sm:$0xf] }
 0x110   :  { %16378 = vst [vmem:[#allocation55_spill] sm:$0xff] %v11601_v25  ;;  %v3157_v19 = vpop.f32.mrf.mxu0 }
 0x111   :  { %v3106_v30 = vadd.f32 %v3105_v36, %v3057_v5  ;;  %v3206_v4 = vpop.f32.mrf.mxu1  ;;  %v7755_v5 = vld [vmem:[%s16131_s0 + $0x1d0] sm:$0xf0] }
 0x113   :  { %v3155_v40 = vadd.f32 %v3154_v28, %v3106_v30  ;;  %3254 = vmatmul.bf16.gmra.mxu2 %v11595_v53  ;;  %3352 = vmatmul.bf16.gmra.mxu0 %v11597_v0  ;;  %v7745_v30 = vld [vmem:[%s16131_s0 + $0x198] sm:$0xf]  ;;  %v9896_v28 = vld [vmem:[%s16131_s0 + $0x1c4] sm:$0xf0] }
 0x114   :  { %3303 = vmatmul.bf16.gmra.mxu3 %v11599_v6  ;;  %3401 = vmatmul.bf16.gmra.mxu1 %v11601_v25 }
 0x115   :  { %v11607_v27 = vadd.f32 %v3203_v26, %v3155_v40  ;;  %v9890_v40 = vld [vmem:[%s16131_s0 + $0x19c] sm:$0xf] }
 0x116   :  { %v3059_v39 = vpop.f32.mrf.mxu2 }
 0x117   :  { %v3060_v2 = vadd.f32 %v3059_v39, %v11435_v12  ;;  %v3108_v38 = vpop.f32.mrf.mxu3  ;;  %v7753_v12 = vld [vmem:[%s16131_s0 + $0x1a0] sm:$0xf] }
 0x118   :  { %v3159_v37 = vpop.f32.mrf.mxu0 }
 0x119   :  { %v3109_v7 = vadd.f32 %v3108_v38, %v3060_v2  ;;  %v3208_v13 = vpop.f32.mrf.mxu1  ;;  %v11637_v38 = vor.u32 %v9896_v28, %v7745_v30  ;;  %v10285_v30 = vld [vmem:[%s16130_s2 + $0xaec] sm:$0xf0] }
 0x11b   :  { %v3158_v31 = vadd.f32 %v3157_v19, %v3109_v7  ;;  %v9897_v19 = vld [vmem:[%s16131_s0 + $0x1cc] sm:$0xf0]  ;;  %16379 = vst [vmem:[#allocation56_spill] sm:$0xff] %v11637_v38  ;;  %v11641_v7 = vor.u32 %v9890_v40, %v7747_v63  ;;  %v8027_v63 = vld [vmem:[%s16130_s2 + $0xf0] sm:$0xf0] }
 0x11d   :  { %v11625_v26 = vadd.f32 %v3206_v4, %v3158_v31  ;;  %v11639_v4 = vor.u32 %v9897_v19, %v7753_v12  ;;  %16381 = vst [vmem:[#allocation58_spill] sm:$0xff] %v11641_v7  ;;  %v11643_v31 = vor.u32 %v9891_v42, %v7755_v5  ;;  %v9963_v19 = vld [vmem:[%s16130_s2 + $0xe4] sm:$0xf] }
 0x11e   :  { %v3061_v36 = vpop.f32.mrf.mxu2  ;;  %v9995_v42 = vld [vmem:[%s16130_s2 + $0x1e4] sm:$0xf] }
 0x11f   :  { %v3062_v39 = vadd.f32 %v3061_v36, %v11443_v3  ;;  %v3110_v2 = vpop.f32.mrf.mxu3  ;;  %16380 = vst [vmem:[#allocation57_spill] sm:$0xff] %v11639_v4  ;;  %v9305_v3 = vld [vmem:[%s16130_s2 + $0xae0] sm:$0xf]  ;;  %v8030_v36 = vor.u32 %v9963_v19, %v8027_v63  ;;  %v10313_v19 = vld [vmem:[%s16130_s2 + $0xbcc] sm:$0xf0] }
 0x120   :  { %16382 = vst [vmem:[#allocation59_spill] sm:$0xff] %v11643_v31  ;;  %v3162_v25 = vpop.f32.mrf.mxu0  ;;  %v9306_v40 = vor.u32 %v10285_v30, %v9305_v3  ;;  %v9959_v63 = vld [vmem:[%s16130_s2 + $0xc4] sm:$0xf] }
 0x121   :  { %v3111_v6 = vadd.f32 %v3110_v2, %v3062_v39  ;;  %v3211_v0 = vpop.f32.mrf.mxu1  ;;  %v10281_v39 = vld [vmem:[%s16130_s2 + $0xacc] sm:$0xf0]  ;;  %3525 = vmatpush.bf16.msrb.mxu0 %v8030_v36  ;;  %v7793_v36 = vld [vmem:[%s16131_s0 + $0x1f8] sm:$0xf] }
 0x122   :  { %3427 = vmatpush.bf16.msrb.mxu2 %v9306_v40  ;;  %v8011_v40 = vld [vmem:[%s16130_s2 + $0xd0] sm:$0xf0] }
 0x123   :  { %v3160_v53 = vadd.f32 %v3159_v37, %v3111_v6  ;;  %3259 = vmatmul.bf16.gmra.mxu2 %v11637_v38  ;;  %3357 = vmatmul.bf16.gmra.mxu0 %v11639_v4  ;;  %v9433_v6 = vld [vmem:[%s16130_s2 + $0xbe0] sm:$0xf]  ;;  %v10317_v37 = vld [vmem:[%s16130_s2 + $0xbec] sm:$0xf0]  ;;  %v7995_v4 = vld [vmem:[%s16130_s2 + $0xb0] sm:$0xf0] }
 0x124   :  { %3308 = vmatmul.bf16.gmra.mxu3 %v11641_v7  ;;  %3406 = vmatmul.bf16.gmra.mxu1 %v11643_v31  ;;  %v9434_v12 = vor.u32 %v10317_v37, %v9433_v6  ;;  %v9417_v37 = vld [vmem:[%s16130_s2 + $0xbc0] sm:$0xf]  ;;  %v9955_v7 = vld [vmem:[%s16130_s2 + $0xa4] sm:$0xf]  ;;  %v7795_v38 = vld [vmem:[%s16131_s0 + $0x228] sm:$0xf0] }
 0x125   :  { %v11661_v28 = vadd.f32 %v3208_v13, %v3160_v53  ;;  %v8155_v53 = vld [vmem:[%s16130_s2 + $0x1f0] sm:$0xf0]  ;;  %v9289_v13 = vld [vmem:[%s16130_s2 + $0xac0] sm:$0xf] }
 0x126   :  { %v3064_v5 = vpop.f32.mrf.mxu2  ;;  %3476 = vmatpush.bf16.msrb.mxu3 %v9434_v12  ;;  %v8158_v30 = vor.u32 %v9995_v42, %v8155_v53  ;;  %v9290_v6 = vor.u32 %v10281_v39, %v9289_v13  ;;  %v9991_v12 = vld [vmem:[%s16130_s2 + $0x1c4] sm:$0xf]  ;;  %v8139_v42 = vld [vmem:[%s16130_s2 + $0x1d0] sm:$0xf0]  ;;  %v8014_v13 = vor.u32 %v9959_v63, %v8011_v40  ;;  %v9902_v40 = vld [vmem:[%s16131_s0 + $0x1fc] sm:$0xf] }
 0x127   :  { %v3065_v2 = vadd.f32 %v3064_v5, %v11159_v16  ;;  %v3113_v3 = vpop.f32.mrf.mxu3  ;;  %v9418_v16 = vor.u32 %v10313_v19, %v9417_v37  ;;  %v8142_v39 = vor.u32 %v9991_v12, %v8139_v42  ;;  %v9908_v37 = vld [vmem:[%s16131_s0 + $0x224] sm:$0xf0]  ;;  %v7801_v19 = vld [vmem:[%s16131_s0 + $0x200] sm:$0xf]  ;;  %v10309_v42 = vld [vmem:[%s16130_s2 + $0xbac] sm:$0xf0] }
 0x128   :  { %v11691_v31 = vpop.f32.mrf.mxu0  ;;  %3574 = vmatpush.bf16.msrb.mxu1 %v8158_v30  ;;  %v9401_v30 = vld [vmem:[%s16130_s2 + $0xba0] sm:$0xf]  ;;  %3428 = vmatpush.bf16.msrb.mxu2 %v9290_v6  ;;  %v11764_v44 = vor.u32 %v9908_v37, %v7793_v36 }
 0x129   :  { %v3114_v5 = vadd.f32 %v3113_v3, %v3065_v2  ;;  %v11702_v53 = vpop.f32.mrf.mxu1  ;;  %v9273_v2 = vld [vmem:[%s16130_s2 + $0xaa0] sm:$0xf]  ;;  %v10277_v3 = vld [vmem:[%s16130_s2 + $0xaac] sm:$0xf0]  ;;  %3526 = vmatpush.bf16.msrb.mxu0 %v8014_v13  ;;  %v9402_v6 = vor.u32 %v10309_v42, %v9401_v30  ;;  %v9903_v13 = vld [vmem:[%s16131_s0 + $0x204] sm:$0xf] }
 0x12a   :  { %3477 = vmatpush.bf16.msrb.mxu3 %v9418_v16  ;;  %v9274_v12 = vor.u32 %v10277_v3, %v9273_v2  ;;  %v7998_v16 = vor.u32 %v9955_v7, %v7995_v4  ;;  %v8123_v2 = vld [vmem:[%s16130_s2 + $0x1b0] sm:$0xf0]  ;;  %v9385_v42 = vld [vmem:[%s16130_s2 + $0xb80] sm:$0xf]  ;;  %16383 = vst [vmem:[#allocation60_spill] sm:$0xff] %v11764_v44 }
 0x12b   :  { %v3163_v63 = vadd.f32 %v3162_v25, %v3114_v5  ;;  %v9909_v25 = vld [vmem:[%s16131_s0 + $0x22c] sm:$0xf0]  ;;  %v9987_v5 = vld [vmem:[%s16130_s2 + $0x1a4] sm:$0xf]  ;;  %v7803_v4 = vld [vmem:[%s16131_s0 + $0x230] sm:$0xf0] }
 0x12c   :  { %3575 = vmatpush.bf16.msrb.mxu1 %v8142_v39  ;;  %v8126_v7 = vor.u32 %v9987_v5, %v8123_v2  ;;  %v11766_v39 = vor.u32 %v9909_v25, %v7801_v19  ;;  %3429 = vmatpush.bf16.msrb.mxu2 %v9274_v12  ;;  %v10305_v5 = vld [vmem:[%s16130_s2 + $0xb8c] sm:$0xf0]  ;;  %v9951_v2 = vld [vmem:[%s16130_s2 + $0x84] sm:$0xf]  ;;  %v11779_v36 = vor.u32 %v9903_v13, %v7803_v4  ;;  %v8107_v12 = vld [vmem:[%s16130_s2 + $0x190] sm:$0xf0] }
 0x12d   :  { %v11743_v3 = vadd.f32 %v3211_v0, %v3163_v63  ;;  %v9257_v0 = vld [vmem:[%s16130_s2 + $0xa80] sm:$0xf]  ;;  %v10273_v63 = vld [vmem:[%s16130_s2 + $0xa8c] sm:$0xf0]  ;;  %3527 = vmatpush.bf16.msrb.mxu0 %v7998_v16  ;;  %v9983_v19 = vld [vmem:[%s16130_s2 + $0x184] sm:$0xf]  ;;  %v9386_v34 = vor.u32 %v10305_v5, %v9385_v42 }
 0x12e   :  { %v3066_v30 = vpop.f32.mrf.mxu2  ;;  %16384 = vst [vmem:[#allocation61_spill] sm:$0xff] %v11766_v39  ;;  %3478 = vmatpush.bf16.msrb.mxu3 %v9402_v6  ;;  %v9241_v16 = vld [vmem:[%s16130_s2 + $0xa60] sm:$0xf]  ;;  %v9979_v42 = vld [vmem:[%s16130_s2 + $0x164] sm:$0xf] }
 0x12f   :  { %v3067_v46 = vadd.f32 %v3066_v30, %v11239_v54  ;;  %v3115_v45 = vpop.f32.mrf.mxu3  ;;  %v11777_v54 = vor.u32 %v9902_v40, %v7795_v38  ;;  %16386 = vst [vmem:[#allocation63_spill] sm:$0xff] %v11779_v36  ;;  %v9258_v30 = vor.u32 %v10273_v63, %v9257_v0  ;;  %v7982_v38 = vor.u32 %v9951_v2, %v7979_v35  ;;  %v9369_v35 = vld [vmem:[%s16130_s2 + $0xb60] sm:$0xf]  ;;  %v9947_v0 = vld [vmem:[%s16130_s2 + $0x64] sm:$0xf] }
 0x130   :  { %v3167_v37 = vpop.f32.mrf.mxu0  ;;  %3576 = vmatpush.bf16.msrb.mxu1 %v8126_v7  ;;  %v8110_v40 = vor.u32 %v9983_v19, %v8107_v12  ;;  %v7963_v63 = vld [vmem:[%s16130_s2 + $0x70] sm:$0xf0]  ;;  %v9225_v2 = vld [vmem:[%s16130_s2 + $0xa40] sm:$0xf]  ;;  %v10265_v19 = vld [vmem:[%s16130_s2 + $0xa4c] sm:$0xf0] }
 0x131   :  { %16385 = vst [vmem:[#allocation62_spill] sm:$0xff] %v11777_v54  ;;  %v3116_v25 = vadd.f32 %v3115_v45, %v3067_v46  ;;  %v11787_v6 = vpop.f32.mrf.mxu1  ;;  %v10269_v45 = vld [vmem:[%s16130_s2 + $0xa6c] sm:$0xf0]  ;;  %3430 = vmatpush.bf16.msrb.mxu2 %v9258_v30  ;;  %3528 = vmatpush.bf16.msrb.mxu0 %v7982_v38  ;;  %v9353_v38 = vld [vmem:[%s16130_s2 + $0xb40] sm:$0xf] }
 0x132   :  { %v10301_v46 = vld [vmem:[%s16130_s2 + $0xb6c] sm:$0xf0]  ;;  %3479 = vmatpush.bf16.msrb.mxu3 %v9386_v34  ;;  %v9242_v4 = vor.u32 %v10269_v45, %v9241_v16  ;;  %v8091_v34 = vld [vmem:[%s16130_s2 + $0x170] sm:$0xf0]  ;;  %v9975_v45 = vld [vmem:[%s16130_s2 + $0x144] sm:$0xf] }
 0x133   :  { %v3165_v13 = vadd.f32 %v11691_v31, %v3116_v25  ;;  %3264 = vmatmul.bf16.gmra.mxu2 %v11764_v44  ;;  %3362 = vmatmul.bf16.gmra.mxu0 %v11766_v39  ;;  %v9370_v7 = vor.u32 %v10301_v46, %v9369_v35  ;;  %v8094_v30 = vor.u32 %v9979_v42, %v8091_v34  ;;  %v8075_v35 = vld [vmem:[%s16130_s2 + $0x150] sm:$0xf0]  ;;  %v9920_v34 = vld [vmem:[%s16131_s0 + $0x284] sm:$0xf0] }
 0x134   :  { %3313 = vmatmul.bf16.gmra.mxu3 %v11777_v54  ;;  %3411 = vmatmul.bf16.gmra.mxu1 %v11779_v36  ;;  %v7849_v36 = vld [vmem:[%s16131_s0 + $0x260] sm:$0xf]  ;;  %v7851_v54 = vld [vmem:[%s16131_s0 + $0x290] sm:$0xf0] }
 0x135   :  { %v11807_v31 = vadd.f32 %v11702_v53, %v3165_v13  ;;  %3577 = vmatpush.bf16.msrb.mxu1 %v8110_v40  ;;  %v7966_v53 = vor.u32 %v9947_v0, %v7963_v63  ;;  %v10297_v40 = vld [vmem:[%s16130_s2 + $0xb4c] sm:$0xf0]  ;;  %v9943_v13 = vld [vmem:[%s16130_s2 + $0x44] sm:$0xf]  ;;  %3431 = vmatpush.bf16.msrb.mxu2 %v9242_v4  ;;  %v9226_v63 = vor.u32 %v10265_v19, %v9225_v2  ;;  %v9209_v4 = vld [vmem:[%s16130_s2 + $0xa20] sm:$0xf] }
 0x136   :  { %v3069_v5 = vpop.f32.mrf.mxu2  ;;  %3480 = vmatpush.bf16.msrb.mxu3 %v9370_v7  ;;  %v9354_v42 = vor.u32 %v10297_v40, %v9353_v38  ;;  %v10261_v7 = vld [vmem:[%s16130_s2 + $0xa2c] sm:$0xf0]  ;;  %v9337_v2 = vld [vmem:[%s16130_s2 + $0xb20] sm:$0xf]  ;;  %v9939_v38 = vld [vmem:[%s16130_s2 + $0x24] sm:$0xf] }
 0x137   :  { %v3070_v12 = vadd.f32 %v3069_v5, %v11299_v17  ;;  %v3118_v25 = vpop.f32.mrf.mxu3  ;;  %v7947_v17 = vld [vmem:[%s16130_s2 + $0x50] sm:$0xf0]  ;;  %v7841_v5 = vld [vmem:[%s16131_s0 + $0x258] sm:$0xf]  ;;  %3529 = vmatpush.bf16.msrb.mxu0 %v7966_v53  ;;  %v9914_v53 = vld [vmem:[%s16131_s0 + $0x25c] sm:$0xf]  ;;  %v9210_v39 = vor.u32 %v10261_v7, %v9209_v4 }
 0x138   :  { %v11837_v16 = vpop.f32.mrf.mxu0  ;;  %v7931_v40 = vld [vmem:[%s16130_s2 + $0x30] sm:$0xf0]  ;;  %v11911_v7 = vor.u32 %v9920_v34, %v7841_v5 }
 0x139   :  { %v3119_v46 = vadd.f32 %v3118_v25, %v3070_v12  ;;  %v11848_v0 = vpop.f32.mrf.mxu1  ;;  %3578 = vmatpush.bf16.msrb.mxu1 %v8094_v30  ;;  %v7950_v12 = vor.u32 %v9943_v13, %v7947_v17  ;;  %v8078_v25 = vor.u32 %v9975_v45, %v8075_v35  ;;  %v10293_v30 = vld [vmem:[%s16130_s2 + $0xb2c] sm:$0xf0]  ;;  %v9971_v13 = vld [vmem:[%s16130_s2 + $0x124] sm:$0xf]  ;;  %v8059_v17 = vld [vmem:[%s16130_s2 + $0x130] sm:$0xf0]  ;;  %3432 = vmatpush.bf16.msrb.mxu2 %v9226_v63 }
 0x13a   :  { %v7843_v35 = vld [vmem:[%s16131_s0 + $0x288] sm:$0xf0]  ;;  %3481 = vmatpush.bf16.msrb.mxu3 %v9354_v42  ;;  %v9338_v44 = vor.u32 %v10293_v30, %v9337_v2  ;;  %v9321_v63 = vld [vmem:[%s16130_s2 + $0xb00] sm:$0xf]  ;;  %v9935_v2 = vld [vmem:[%s16130_s2 + $0x4] sm:$0xf] }
 0x13b   :  { %v3168_v19 = vadd.f32 %v3167_v37, %v3119_v46  ;;  %v9921_v37 = vld [vmem:[%s16131_s0 + $0x28c] sm:$0xf0]  ;;  %v9915_v46 = vld [vmem:[%s16131_s0 + $0x264] sm:$0xf]  ;;  %3530 = vmatpush.bf16.msrb.mxu0 %v7950_v12  ;;  %v7915_v30 = vld [vmem:[%s16130_s2 + $0x10] sm:$0xf0] }
 0x13c   :  { %v11913_v12 = vor.u32 %v9921_v37, %v7849_v36  ;;  %v9967_v36 = vld [vmem:[%s16130_s2 + $0x104] sm:$0xf]  ;;  %v8043_v5 = vld [vmem:[%s16130_s2 + $0x110] sm:$0xf0]  ;;  %v9194_v37 = vor.u32 %v10257_v23, %v9193_v32 }
 0x13d   :  { %v11890_v45 = vadd.f32 %v11787_v6, %v3168_v19  ;;  %3579 = vmatpush.bf16.msrb.mxu1 %v8078_v25  ;;  %v7934_v6 = vor.u32 %v9939_v38, %v7931_v40  ;;  %v8062_v19 = vor.u32 %v9971_v13, %v8059_v17  ;;  %v10289_v25 = vld [vmem:[%s16130_s2 + $0xb0c] sm:$0xf0]  ;;  %v11924_v38 = vor.u32 %v9914_v53, %v7843_v35 }
 0x13e   :  { %v3071_v33 = vpop.f32.mrf.mxu2  ;;  %3433 = vmatpush.bf16.msrb.mxu2 %v9210_v39  ;;  %3482 = vmatpush.bf16.msrb.mxu3 %v9338_v44  ;;  %v9322_v13 = vor.u32 %v10289_v25, %v9321_v63  ;;  %v7918_v53 = vor.u32 %v9935_v2, %v7915_v30  ;;  %v9926_v63 = vld [vmem:[%s16131_s0 + $0x2bc] sm:$0xf]  ;;  %v7891_v25 = vld [vmem:[%s16131_s0 + $0x2e8] sm:$0xf0]  ;;  %v9927_v2 = vld [vmem:[%s16131_s0 + $0x2c4] sm:$0xf] }
 0x13f   :  { %v3072_v42 = vadd.f32 %v3071_v33, %v11379_v14  ;;  %v3120_v4 = vpop.f32.mrf.mxu3  ;;  %16387 = vst [vmem:[#allocation64_spill] sm:$0xff] %v11924_v38  ;;  %v11926_v33 = vor.u32 %v9915_v46, %v7851_v54  ;;  %3531 = vmatpush.bf16.msrb.mxu0 %v7934_v6  ;;  %v8046_v54 = vor.u32 %v9967_v36, %v8043_v5  ;;  %v7899_v30 = vld [vmem:[%s16131_s0 + $0x2f0] sm:$0xf0] }
 0x140   :  { %v3172_v14 = vpop.f32.mrf.mxu0 }
 0x141   :  { %16388 = vst [vmem:[#allocation65_spill] sm:$0xff] %v11926_v33  ;;  %v3121_v34 = vadd.f32 %v3120_v4, %v3072_v42  ;;  %v3221_v40 = vpop.f32.mrf.mxu1  ;;  %3580 = vmatpush.bf16.msrb.mxu1 %v8062_v19  ;;  %v7889_v19 = vld [vmem:[%s16131_s0 + $0x2b8] sm:$0xf]  ;;  %v9933_v42 = vld [vmem:[%s16131_s0 + $0x2ec] sm:$0xf0] }
 0x142   :  { %3434 = vmatpush.bf16.msrb.mxu2 %v9194_v37  ;;  %3483 = vmatpush.bf16.msrb.mxu3 %v9322_v13  ;;  %v11974_v37 = vor.u32 %v9926_v63, %v7891_v25  ;;  %v11976_v13 = vor.u32 %v9927_v2, %v7899_v30 }
 0x143   :  { %v3170_v17 = vadd.f32 %v11837_v16, %v3121_v34  ;;  %3269 = vmatmul.bf16.gmra.mxu2 %v11911_v7  ;;  %3367 = vmatmul.bf16.gmra.mxu0 %v11913_v12 }
 0x144   :  { %3318 = vmatmul.bf16.gmra.mxu3 %v11924_v38  ;;  %3416 = vmatmul.bf16.gmra.mxu1 %v11926_v33 }
 0x145   :  { %v11940_v35 = vadd.f32 %v11848_v0, %v3170_v17  ;;  %3532 = vmatpush.bf16.msrb.mxu0 %v7918_v53  ;;  %3581 = vmatpush.bf16.msrb.mxu1 %v8046_v54  ;;  %v9932_v0 = vld [vmem:[%s16131_s0 + $0x2e4] sm:$0xf0] }
 0x146   :  { %v3074_v23 = vpop.f32.mrf.mxu2  ;;  %v11970_v34 = vor.u32 %v9932_v0, %v7889_v19 }
 0x147   :  { %v3075_v32 = vadd.f32 %v3074_v23, %v11397_v24  ;;  %v3123_v44 = vpop.f32.mrf.mxu3  ;;  %v7897_v24 = vld [vmem:[%s16131_s0 + $0x2c0] sm:$0xf] }
 0x148   :  { %v3174_v39 = vpop.f32.mrf.mxu0 }
 0x149   :  { %v3124_v16 = vadd.f32 %v3123_v44, %v3075_v32  ;;  %v3223_v46 = vpop.f32.mrf.mxu1 }
 0x14b   :  { %v3173_v6 = vadd.f32 %v3172_v14, %v3124_v16 }
 0x14d   :  { %v11958_v4 = vadd.f32 %v3221_v40, %v3173_v6  ;;  %v11972_v40 = vor.u32 %v9933_v42, %v7897_v24  ;;  %v9850_v24 = vld [vmem:[%s16131_s0 + $0x54] sm:$0xf0] }
 0x14e   :  { %v3076_v14 = vpop.f32.mrf.mxu2 }
 0x14f   :  { %v3077_v36 = vadd.f32 %v3076_v14, %v11429_v18  ;;  %v3125_v5 = vpop.f32.mrf.mxu3 }
 0x150   :  { %v3177_v53 = vpop.f32.mrf.mxu0 }
 0x151   :  { %v3126_v54 = vadd.f32 %v3125_v5, %v3077_v36  ;;  %v3226_v17 = vpop.f32.mrf.mxu1 }
 0x153   :  { %v3175_v23 = vadd.f32 %v3174_v39, %v3126_v54  ;;  %3274 = vmatmul.bf16.gmra.mxu2 %v11970_v34  ;;  %3372 = vmatmul.bf16.gmra.mxu0 %v11972_v40  ;;  %v7569_v39 = vld [vmem:[%s16131_s0 + $0x28] sm:$0xf] }
 0x154   :  { %3323 = vmatmul.bf16.gmra.mxu3 %v11974_v37  ;;  %3421 = vmatmul.bf16.gmra.mxu1 %v11976_v13  ;;  %v12000_v14 = vor.u32 %v9850_v24, %v7569_v39  ;;  %v9862_v24 = vld [vmem:[%s16131_s0 + $0xb4] sm:$0xf0] }
 0x155   :  { %v11982_v18 = vadd.f32 %v3223_v46, %v3175_v23  ;;  %v9844_v46 = vld [vmem:[%s16131_s0 + $0x2c] sm:$0xf] }
 0x156   :  { %v3079_v32 = vpop.f32.mrf.mxu2 }
 0x157   :  { %v3080_v44 = vadd.f32 %v3079_v32, %v11441_v43  ;;  %v3128_v16 = vpop.f32.mrf.mxu3  ;;  %v7571_v43 = vld [vmem:[%s16131_s0 + $0x58] sm:$0xf0] }
 0x158   :  { %v3179_v6 = vpop.f32.mrf.mxu0  ;;  %v12002_v36 = vor.u32 %v9844_v46, %v7571_v43 }
 0x159   :  { %v3129_v19 = vadd.f32 %v3128_v16, %v3080_v44  ;;  %v3228_v0 = vpop.f32.mrf.mxu1 }
 0x15b   :  { %v3178_v63 = vadd.f32 %v3177_v53, %v3129_v19 }
 0x15d   :  { %v11991_v42 = vadd.f32 %v3226_v17, %v3178_v63 }
 0x15e   :  { %v3081_v25 = vpop.f32.mrf.mxu2 }
 0x15f   :  { %v3082_v2 = vadd.f32 %v3081_v25, %v11473_v29  ;;  %v3130_v30 = vpop.f32.mrf.mxu3 }
 0x160   :  { %v3338_v5 = vpop.f32.mrf.mxu0 }
 0x161   :  { %v3131_v53 = vadd.f32 %v3130_v30, %v3082_v2  ;;  %v3387_v54 = vpop.f32.mrf.mxu1 }
 0x163   :  { %v3180_v17 = vadd.f32 %v3179_v6, %v3131_v53  ;;  %3435 = vmatmul.bf16.vlgmr.msrb.gmra.mxu2 %v12000_v14  ;;  %3533 = vmatmul.bf16.vlgmr.msrb.gmra.mxu0 %v10623_v56  ;;  %v7617_v6 = vld [vmem:[%s16131_s0 + $0x88] sm:$0xf] }
 0x164   :  { %3484 = vmatmul.bf16.vlgmr.msrb.gmra.mxu3 %v12002_v36  ;;  %3582 = vmatmul.bf16.vlgmr.msrb.gmra.mxu1 %v10627_v58  ;;  %v12026_v30 = vor.u32 %v9862_v24, %v7617_v6 }
 0x165   :  { %v12008_v23 = vadd.f32 %v3228_v0, %v3180_v17  ;;  %v9856_v0 = vld [vmem:[%s16131_s0 + $0x8c] sm:$0xf] }
 0x166   :  { %v3240_v29 = vpop.f32.mrf.mxu2 }
 0x167   :  { %v3241_v32 = vadd.f32 %v3240_v29, %v11499_v15  ;;  %v3289_v44 = vpop.f32.mrf.mxu3  ;;  %v7619_v15 = vld [vmem:[%s16131_s0 + $0xb8] sm:$0xf0] }
 0x168   :  { %v3340_v16 = vpop.f32.mrf.mxu0 }
 0x169   :  { %v3290_v19 = vadd.f32 %v3289_v44, %v3241_v32  ;;  %v3389_v63 = vpop.f32.mrf.mxu1 }
 0x16b   :  { %v3339_v39 = vadd.f32 %v3338_v5, %v3290_v19  ;;  %v12028_v5 = vor.u32 %v9856_v0, %v7619_v15  ;;  %v9874_v15 = vld [vmem:[%s16131_s0 + $0x114] sm:$0xf0] }
 0x16d   :  { %v12017_v46 = vadd.f32 %v3387_v54, %v3339_v39 }
 0x16e   :  { %v3242_v43 = vpop.f32.mrf.mxu2 }
 0x16f   :  { %v3243_v25 = vadd.f32 %v3242_v43, %v11523_v41  ;;  %v3291_v2 = vpop.f32.mrf.mxu3 }
 0x170   :  { %v3343_v53 = vpop.f32.mrf.mxu0 }
 0x171   :  { %v3292_v17 = vadd.f32 %v3291_v2, %v3243_v25  ;;  %v3392_v54 = vpop.f32.mrf.mxu1 }
 0x173   :  { %v3341_v29 = vadd.f32 %v3340_v16, %v3292_v17  ;;  %3440 = vmatmul.bf16.gmra.mxu2 %v12026_v30  ;;  %3538 = vmatmul.bf16.gmra.mxu0 %v10749_v47  ;;  %v7665_v16 = vld [vmem:[%s16131_s0 + $0xe8] sm:$0xf] }
 0x174   :  { %3489 = vmatmul.bf16.gmra.mxu3 %v12028_v5  ;;  %3587 = vmatmul.bf16.gmra.mxu1 %v10759_v51  ;;  %v12052_v17 = vor.u32 %v9874_v15, %v7665_v16 }
 0x175   :  { %v12034_v32 = vadd.f32 %v3389_v63, %v3341_v29  ;;  %v9868_v63 = vld [vmem:[%s16131_s0 + $0xec] sm:$0xf] }
 0x176   :  { %v3245_v41 = vpop.f32.mrf.mxu2 }
 0x177   :  { %v3246_v44 = vadd.f32 %v3245_v41, %v11541_v61  ;;  %v3294_v19 = vpop.f32.mrf.mxu3  ;;  %v7667_v61 = vld [vmem:[%s16131_s0 + $0x118] sm:$0xf0] }
 0x178   :  { %v3345_v39 = vpop.f32.mrf.mxu0  ;;  %v12054_v29 = vor.u32 %v9868_v63, %v7667_v61 }
 0x179   :  { %v3295_v6 = vadd.f32 %v3294_v19, %v3246_v44  ;;  %v3394_v24 = vpop.f32.mrf.mxu1 }
 0x17b   :  { %v3344_v0 = vadd.f32 %v3343_v53, %v3295_v6 }
 0x17d   :  { %v12043_v43 = vadd.f32 %v3392_v54, %v3344_v0 }
 0x17e   :  { %v3247_v25 = vpop.f32.mrf.mxu2 }
 0x17f   :  { %v3248_v2 = vadd.f32 %v3247_v25, %v11565_v62  ;;  %v3296_v53 = vpop.f32.mrf.mxu3 }
 0x180   :  { %v3348_v41 = vpop.f32.mrf.mxu0 }
 0x181   :  { %v3297_v44 = vadd.f32 %v3296_v53, %v3248_v2  ;;  %v3397_v54 = vpop.f32.mrf.mxu1  ;;  %v9886_v2 = vld [vmem:[%s16131_s0 + $0x174] sm:$0xf0] }
 0x183   :  { %v3346_v19 = vadd.f32 %v3345_v39, %v3297_v44  ;;  %3445 = vmatmul.bf16.gmra.mxu2 %v12052_v17  ;;  %3543 = vmatmul.bf16.gmra.mxu0 %v10881_v49  ;;  %v7713_v39 = vld [vmem:[%s16131_s0 + $0x148] sm:$0xf] }
 0x184   :  { %3494 = vmatmul.bf16.gmra.mxu3 %v12054_v29  ;;  %3592 = vmatmul.bf16.gmra.mxu1 %v10891_v55 }
 0x185   :  { %v12060_v6 = vadd.f32 %v3394_v24, %v3346_v19  ;;  %v9880_v24 = vld [vmem:[%s16131_s0 + $0x14c] sm:$0xf] }
 0x186   :  { %v3250_v62 = vpop.f32.mrf.mxu2 }
 0x187   :  { %v3251_v0 = vadd.f32 %v3250_v62, %v11583_v1  ;;  %v3299_v16 = vpop.f32.mrf.mxu3  ;;  %v7715_v1 = vld [vmem:[%s16131_s0 + $0x178] sm:$0xf0]  ;;  %v12078_v62 = vor.u32 %v9886_v2, %v7713_v39 }
 0x188   :  { %v3350_v15 = vpop.f32.mrf.mxu0 }
 0x189   :  { %v3300_v63 = vadd.f32 %v3299_v16, %v3251_v0  ;;  %v3399_v61 = vpop.f32.mrf.mxu1  ;;  %16389 = vst [vmem:[#allocation66_spill] sm:$0xff] %v12078_v62  ;;  %v12080_v0 = vor.u32 %v9880_v24, %v7715_v1 }
 0x18b   :  { %v3349_v25 = vadd.f32 %v3348_v41, %v3300_v63  ;;  %16390 = vst [vmem:[#allocation67_spill] sm:$0xff] %v12080_v0 }
 0x18d   :  { %v12069_v53 = vadd.f32 %v3397_v54, %v3349_v25 }
 0x18e   :  { %v3252_v44 = vpop.f32.mrf.mxu2 }
 0x18f   :  { %v3253_v41 = vadd.f32 %v3252_v44, %v11607_v27  ;;  %v3301_v19 = vpop.f32.mrf.mxu3 }
 0x190   :  { %v3353_v16 = vpop.f32.mrf.mxu0 }
 0x191   :  { %v3302_v63 = vadd.f32 %v3301_v19, %v3253_v41  ;;  %v3402_v54 = vpop.f32.mrf.mxu1  ;;  %v9898_v19 = vld [vmem:[%s16131_s0 + $0x1d4] sm:$0xf0] }
 0x193   :  { %v3351_v25 = vadd.f32 %v3350_v15, %v3302_v63  ;;  %3450 = vmatmul.bf16.gmra.mxu2 %v12078_v62  ;;  %3548 = vmatmul.bf16.gmra.mxu0 %v10923_v8  ;;  %v7761_v15 = vld [vmem:[%s16131_s0 + $0x1a8] sm:$0xf] }
 0x194   :  { %3499 = vmatmul.bf16.gmra.mxu3 %v12080_v0  ;;  %3597 = vmatmul.bf16.gmra.mxu1 %v10927_v10  ;;  %v8283_v0 = vld [vmem:[%s16130_s2 + $0x2f0] sm:$0xf0] }
 0x195   :  { %v12086_v55 = vadd.f32 %v3399_v61, %v3351_v25  ;;  %v9892_v61 = vld [vmem:[%s16131_s0 + $0x1ac] sm:$0xf] }
 0x196   :  { %v3255_v27 = vpop.f32.mrf.mxu2 }
 0x197   :  { %v3256_v39 = vadd.f32 %v3255_v27, %v11625_v26  ;;  %v3304_v2 = vpop.f32.mrf.mxu3  ;;  %v7763_v26 = vld [vmem:[%s16131_s0 + $0x1d8] sm:$0xf0] }
 0x198   :  { %v3355_v24 = vpop.f32.mrf.mxu0 }
 0x199   :  { %v3305_v1 = vadd.f32 %v3304_v2, %v3256_v39  ;;  %v3404_v44 = vpop.f32.mrf.mxu1  ;;  %v12104_v39 = vor.u32 %v9898_v19, %v7761_v15  ;;  %v12106_v2 = vor.u32 %v9892_v61, %v7763_v26  ;;  %v10059_v15 = vld [vmem:[%s16130_s2 + $0x3e4] sm:$0xf]  ;;  %v8411_v19 = vld [vmem:[%s16130_s2 + $0x3f0] sm:$0xf0] }
 0x19a   :  { %v10091_v61 = vld [vmem:[%s16130_s2 + $0x4e4] sm:$0xf]  ;;  %v8667_v26 = vld [vmem:[%s16130_s2 + $0x5f0] sm:$0xf0] }
 0x19b   :  { %v3354_v41 = vadd.f32 %v3353_v16, %v3305_v1  ;;  %16391 = vst [vmem:[#allocation68_spill] sm:$0xff] %v12104_v39 }
 0x19c   :  { %16392 = vst [vmem:[#allocation69_spill] sm:$0xff] %v12106_v2 }
 0x19d   :  { %v12095_v63 = vadd.f32 %v3402_v54, %v3354_v41  ;;  %v10027_v41 = vld [vmem:[%s16130_s2 + $0x2e4] sm:$0xf] }
 0x19e   :  { %v3257_v25 = vpop.f32.mrf.mxu2 }
 0x19f   :  { %v3258_v16 = vadd.f32 %v3257_v25, %v11661_v28  ;;  %v3306_v27 = vpop.f32.mrf.mxu3  ;;  %v8286_v28 = vor.u32 %v10027_v41, %v8283_v0  ;;  %v8539_v0 = vld [vmem:[%s16130_s2 + $0x4f0] sm:$0xf0] }
 0x1a0   :  { %v3358_v1 = vpop.f32.mrf.mxu0 }
 0x1a1   :  { %v3307_v10 = vadd.f32 %v3306_v27, %v3258_v16  ;;  %v3407_v54 = vpop.f32.mrf.mxu1  ;;  %3623 = vmatpush.bf16.msra.mxu2 %v8286_v28  ;;  %v8542_v16 = vor.u32 %v10091_v61, %v8539_v0  ;;  %v8395_v61 = vld [vmem:[%s16130_s2 + $0x3d0] sm:$0xf0] }
 0x1a2   :  { %v8523_v0 = vld [vmem:[%s16130_s2 + $0x4d0] sm:$0xf0] }
 0x1a3   :  { %v3356_v8 = vadd.f32 %v3355_v24, %v3307_v10  ;;  %3455 = vmatmul.bf16.gmra.mxu2 %v12104_v39  ;;  %3553 = vmatmul.bf16.gmra.mxu0 %v10625_v57  ;;  %v8414_v10 = vor.u32 %v10059_v15, %v8411_v19  ;;  %v10123_v24 = vld [vmem:[%s16130_s2 + $0x5e4] sm:$0xf]  ;;  %v8267_v19 = vld [vmem:[%s16130_s2 + $0x2d0] sm:$0xf0] }
 0x1a4   :  { %3504 = vmatmul.bf16.gmra.mxu3 %v12106_v2  ;;  %3602 = vmatmul.bf16.gmra.mxu1 %v10629_v59  ;;  %v8670_v27 = vor.u32 %v10123_v24, %v8667_v26  ;;  %v10023_v15 = vld [vmem:[%s16130_s2 + $0x2c4] sm:$0xf] }
 0x1a5   :  { %v12136_v25 = vadd.f32 %v3404_v44, %v3356_v8  ;;  %3672 = vmatpush.bf16.msra.mxu3 %v8414_v10  ;;  %v10055_v59 = vld [vmem:[%s16130_s2 + $0x3c4] sm:$0xf]  ;;  %3721 = vmatpush.bf16.msra.mxu0 %v8542_v16  ;;  %v8270_v28 = vor.u32 %v10023_v15, %v8267_v19  ;;  %v8651_v16 = vld [vmem:[%s16130_s2 + $0x5d0] sm:$0xf0]  ;;  %v7809_v19 = vld [vmem:[%s16131_s0 + $0x208] sm:$0xf] }
 0x1a6   :  { %v3260_v41 = vpop.f32.mrf.mxu2  ;;  %3770 = vmatpush.bf16.msra.mxu1 %v8670_v27  ;;  %v10087_v10 = vld [vmem:[%s16130_s2 + $0x4c4] sm:$0xf]  ;;  %v8398_v26 = vor.u32 %v10055_v59, %v8395_v61  ;;  %v8251_v61 = vld [vmem:[%s16130_s2 + $0x2b0] sm:$0xf0] }
 0x1a7   :  { %v3261_v8 = vadd.f32 %v3260_v41, %v11743_v3  ;;  %v3309_v44 = vpop.f32.mrf.mxu3  ;;  %v8526_v2 = vor.u32 %v10087_v10, %v8523_v0  ;;  %v10119_v3 = vld [vmem:[%s16130_s2 + $0x5c4] sm:$0xf]  ;;  %3624 = vmatpush.bf16.msra.mxu2 %v8270_v28  ;;  %v8379_v10 = vld [vmem:[%s16130_s2 + $0x3b0] sm:$0xf0] }
 0x1a8   :  { %v3360_v24 = vpop.f32.mrf.mxu0  ;;  %v8654_v15 = vor.u32 %v10119_v3, %v8651_v16  ;;  %v10019_v59 = vld [vmem:[%s16130_s2 + $0x2a4] sm:$0xf]  ;;  %v9910_v3 = vld [vmem:[%s16131_s0 + $0x234] sm:$0xf0] }
 0x1a9   :  { %v3310_v27 = vadd.f32 %v3309_v44, %v3261_v8  ;;  %v12163_v41 = vpop.f32.mrf.mxu1  ;;  %3673 = vmatpush.bf16.msra.mxu3 %v8398_v26  ;;  %v10051_v8 = vld [vmem:[%s16130_s2 + $0x3a4] sm:$0xf]  ;;  %3722 = vmatpush.bf16.msra.mxu0 %v8526_v2  ;;  %v8254_v28 = vor.u32 %v10019_v59, %v8251_v61  ;;  %v8507_v26 = vld [vmem:[%s16130_s2 + $0x4b0] sm:$0xf0]  ;;  %v9904_v59 = vld [vmem:[%s16131_s0 + $0x20c] sm:$0xf]  ;;  %v12213_v39 = vor.u32 %v9910_v3, %v7809_v19 }
 0x1aa   :  { %3771 = vmatpush.bf16.msra.mxu1 %v8654_v15  ;;  %v10083_v0 = vld [vmem:[%s16130_s2 + $0x4a4] sm:$0xf]  ;;  %v7811_v61 = vld [vmem:[%s16131_s0 + $0x238] sm:$0xf0] }
 0x1ab   :  { %v3359_v44 = vadd.f32 %v3358_v1, %v3310_v27  ;;  %v8382_v1 = vor.u32 %v10051_v8, %v8379_v10  ;;  %v8510_v2 = vor.u32 %v10083_v0, %v8507_v26  ;;  %v10115_v16 = vld [vmem:[%s16130_s2 + $0x5a4] sm:$0xf]  ;;  %v8635_v27 = vld [vmem:[%s16130_s2 + $0x5b0] sm:$0xf0]  ;;  %3625 = vmatpush.bf16.msra.mxu2 %v8254_v28  ;;  %16393 = vst [vmem:[#allocation70_spill] sm:$0xff] %v12213_v39 }
 0x1ac   :  { %v8638_v8 = vor.u32 %v10115_v16, %v8635_v27  ;;  %v10015_v0 = vld [vmem:[%s16130_s2 + $0x284] sm:$0xf]  ;;  %v8491_v27 = vld [vmem:[%s16130_s2 + $0x490] sm:$0xf0]  ;;  %v12224_v62 = vor.u32 %v9904_v59, %v7811_v61 }
 0x1ad   :  { %v12195_v15 = vadd.f32 %v3407_v54, %v3359_v44  ;;  %3674 = vmatpush.bf16.msra.mxu3 %v8382_v1  ;;  %v8235_v54 = vld [vmem:[%s16130_s2 + $0x290] sm:$0xf0]  ;;  %v10047_v44 = vld [vmem:[%s16130_s2 + $0x384] sm:$0xf]  ;;  %3723 = vmatpush.bf16.msra.mxu0 %v8510_v2 }
 0x1ae   :  { %v3262_v10 = vpop.f32.mrf.mxu2  ;;  %3772 = vmatpush.bf16.msra.mxu1 %v8638_v8  ;;  %v8238_v28 = vor.u32 %v10015_v0, %v8235_v54  ;;  %v8363_v1 = vld [vmem:[%s16130_s2 + $0x390] sm:$0xf0]  ;;  %v10079_v16 = vld [vmem:[%s16130_s2 + $0x484] sm:$0xf]  ;;  %16394 = vst [vmem:[#allocation71_spill] sm:$0xff] %v12224_v62 }
 0x1af   :  { %v3263_v26 = vadd.f32 %v3262_v10, %v11807_v31  ;;  %v3311_v57 = vpop.f32.mrf.mxu3  ;;  %v8366_v19 = vor.u32 %v10047_v44, %v8363_v1  ;;  %v10111_v3 = vld [vmem:[%s16130_s2 + $0x584] sm:$0xf]  ;;  %v8619_v2 = vld [vmem:[%s16130_s2 + $0x590] sm:$0xf0]  ;;  %v8494_v0 = vor.u32 %v10079_v16, %v8491_v27 }
 0x1b0   :  { %v3363_v31 = vpop.f32.mrf.mxu0  ;;  %3626 = vmatpush.bf16.msra.mxu2 %v8238_v28  ;;  %v8622_v54 = vor.u32 %v10111_v3, %v8619_v2  ;;  %v10011_v59 = vld [vmem:[%s16130_s2 + $0x264] sm:$0xf]  ;;  %v8219_v61 = vld [vmem:[%s16130_s2 + $0x270] sm:$0xf0] }
 0x1b1   :  { %v3312_v8 = vadd.f32 %v3311_v57, %v3263_v26  ;;  %v3412_v10 = vpop.f32.mrf.mxu1  ;;  %3675 = vmatpush.bf16.msra.mxu3 %v8366_v19  ;;  %v8222_v1 = vor.u32 %v10011_v59, %v8219_v61  ;;  %v10043_v57 = vld [vmem:[%s16130_s2 + $0x364] sm:$0xf]  ;;  %v8347_v26 = vld [vmem:[%s16130_s2 + $0x370] sm:$0xf0]  ;;  %3724 = vmatpush.bf16.msra.mxu0 %v8494_v0 }
 0x1b2   :  { %v10075_v28 = vld [vmem:[%s16130_s2 + $0x464] sm:$0xf]  ;;  %v8475_v16 = vld [vmem:[%s16130_s2 + $0x470] sm:$0xf0]  ;;  %3773 = vmatpush.bf16.msra.mxu1 %v8622_v54 }
 0x1b3   :  { %v3361_v44 = vadd.f32 %v3360_v24, %v3312_v8  ;;  %3460 = vmatmul.bf16.gmra.mxu2 %v12213_v39  ;;  %3558 = vmatmul.bf16.gmra.mxu0 %v10751_v48  ;;  %v8350_v24 = vor.u32 %v10043_v57, %v8347_v26  ;;  %v10107_v27 = vld [vmem:[%s16130_s2 + $0x564] sm:$0xf]  ;;  %v8603_v19 = vld [vmem:[%s16130_s2 + $0x570] sm:$0xf0]  ;;  %v8478_v2 = vor.u32 %v10075_v28, %v8475_v16 }
 0x1b4   :  { %3509 = vmatmul.bf16.gmra.mxu3 %v12224_v62  ;;  %3607 = vmatmul.bf16.gmra.mxu1 %v10761_v52  ;;  %v8606_v8 = vor.u32 %v10107_v27, %v8603_v19  ;;  %v10007_v61 = vld [vmem:[%s16130_s2 + $0x244] sm:$0xf]  ;;  %v8203_v57 = vld [vmem:[%s16130_s2 + $0x250] sm:$0xf0]  ;;  %v7857_v52 = vld [vmem:[%s16131_s0 + $0x268] sm:$0xf] }
 0x1b5   :  { %v12261_v3 = vadd.f32 %v12163_v41, %v3361_v44  ;;  %3627 = vmatpush.bf16.msra.mxu2 %v8222_v1  ;;  %3676 = vmatpush.bf16.msra.mxu3 %v8350_v24  ;;  %v10039_v41 = vld [vmem:[%s16130_s2 + $0x344] sm:$0xf]  ;;  %v8206_v44 = vor.u32 %v10007_v61, %v8203_v57  ;;  %v8331_v1 = vld [vmem:[%s16130_s2 + $0x350] sm:$0xf0] }
 0x1b6   :  { %v3265_v59 = vpop.f32.mrf.mxu2  ;;  %v10071_v26 = vld [vmem:[%s16130_s2 + $0x444] sm:$0xf]  ;;  %v8459_v28 = vld [vmem:[%s16130_s2 + $0x450] sm:$0xf0]  ;;  %v8334_v16 = vor.u32 %v10039_v41, %v8331_v1  ;;  %3725 = vmatpush.bf16.msra.mxu0 %v8478_v2  ;;  %3774 = vmatpush.bf16.msra.mxu1 %v8606_v8 }
 0x1b7   :  { %v3266_v0 = vadd.f32 %v3265_v59, %v11890_v45  ;;  %v3314_v54 = vpop.f32.mrf.mxu3  ;;  %v10103_v45 = vld [vmem:[%s16130_s2 + $0x544] sm:$0xf]  ;;  %v8587_v27 = vld [vmem:[%s16130_s2 + $0x550] sm:$0xf0]  ;;  %v8462_v61 = vor.u32 %v10071_v26, %v8459_v28  ;;  %v9922_v28 = vld [vmem:[%s16131_s0 + $0x294] sm:$0xf0] }
 0x1b8   :  { %v3365_v24 = vpop.f32.mrf.mxu0  ;;  %v8590_v57 = vor.u32 %v10103_v45, %v8587_v27  ;;  %v10003_v41 = vld [vmem:[%s16130_s2 + $0x224] sm:$0xf]  ;;  %v8187_v1 = vld [vmem:[%s16130_s2 + $0x230] sm:$0xf0] }
 0x1b9   :  { %v3315_v19 = vadd.f32 %v3314_v54, %v3266_v0  ;;  %v3414_v59 = vpop.f32.mrf.mxu1  ;;  %3628 = vmatpush.bf16.msra.mxu2 %v8206_v44  ;;  %3677 = vmatpush.bf16.msra.mxu3 %v8334_v16  ;;  %v10035_v2 = vld [vmem:[%s16130_s2 + $0x324] sm:$0xf]  ;;  %v8190_v0 = vor.u32 %v10003_v41, %v8187_v1  ;;  %v8315_v54 = vld [vmem:[%s16130_s2 + $0x330] sm:$0xf0]  ;;  %v7859_v41 = vld [vmem:[%s16131_s0 + $0x298] sm:$0xf0] }
 0x1ba   :  { %v10067_v44 = vld [vmem:[%s16130_s2 + $0x424] sm:$0xf]  ;;  %v8443_v26 = vld [vmem:[%s16130_s2 + $0x430] sm:$0xf0]  ;;  %v8318_v16 = vor.u32 %v10035_v2, %v8315_v54  ;;  %3726 = vmatpush.bf16.msra.mxu0 %v8462_v61  ;;  %3775 = vmatpush.bf16.msra.mxu1 %v8590_v57 }
 0x1bb   :  { %v3364_v8 = vadd.f32 %v3363_v31, %v3315_v19  ;;  %v10099_v31 = vld [vmem:[%s16130_s2 + $0x524] sm:$0xf]  ;;  %v8571_v45 = vld [vmem:[%s16130_s2 + $0x530] sm:$0xf0]  ;;  %v9916_v19 = vld [vmem:[%s16131_s0 + $0x26c] sm:$0xf]  ;;  %v8446_v1 = vor.u32 %v10067_v44, %v8443_v26  ;;  %v12336_v44 = vor.u32 %v9922_v28, %v7857_v52 }
 0x1bc   :  { %v8574_v2 = vor.u32 %v10099_v31, %v8571_v45  ;;  %v10031_v62 = vld [vmem:[%s16130_s2 + $0x304] sm:$0xf]  ;;  %v8427_v31 = vld [vmem:[%s16130_s2 + $0x410] sm:$0xf0]  ;;  %v12347_v45 = vor.u32 %v9916_v19, %v7859_v41 }
 0x1bd   :  { %v12318_v27 = vadd.f32 %v3412_v10, %v3364_v8  ;;  %3629 = vmatpush.bf16.msra.mxu2 %v8190_v0  ;;  %3678 = vmatpush.bf16.msra.mxu3 %v8318_v16  ;;  %v9999_v10 = vld [vmem:[%s16130_s2 + $0x204] sm:$0xf]  ;;  %v8171_v8 = vld [vmem:[%s16130_s2 + $0x210] sm:$0xf0]  ;;  %16395 = vst [vmem:[#allocation72_spill] sm:$0xff] %v12336_v44 }
 0x1be   :  { %v3267_v54 = vpop.f32.mrf.mxu2  ;;  %v8174_v26 = vor.u32 %v9999_v10, %v8171_v8  ;;  %v8299_v0 = vld [vmem:[%s16130_s2 + $0x310] sm:$0xf0]  ;;  %v10063_v16 = vld [vmem:[%s16130_s2 + $0x404] sm:$0xf]  ;;  %16396 = vst [vmem:[#allocation73_spill] sm:$0xff] %v12347_v45  ;;  %3727 = vmatpush.bf16.msra.mxu0 %v8446_v1  ;;  %3776 = vmatpush.bf16.msra.mxu1 %v8574_v2 }
 0x1bf   :  { %v3268_v61 = vadd.f32 %v3267_v54, %v11940_v35  ;;  %v3316_v57 = vpop.f32.mrf.mxu3  ;;  %v8302_v35 = vor.u32 %v10031_v62, %v8299_v0  ;;  %v10095_v52 = vld [vmem:[%s16130_s2 + $0x504] sm:$0xf]  ;;  %v8555_v28 = vld [vmem:[%s16130_s2 + $0x510] sm:$0xf0]  ;;  %v8430_v8 = vor.u32 %v10063_v16, %v8427_v31  ;;  %v7905_v0 = vld [vmem:[%s16131_s0 + $0x2c8] sm:$0xf] }
 0x1c0   :  { %v3368_v48 = vpop.f32.mrf.mxu0  ;;  %v8558_v39 = vor.u32 %v10095_v52, %v8555_v28  ;;  %v9934_v16 = vld [vmem:[%s16131_s0 + $0x2f4] sm:$0xf0] }
 0x1c1   :  { %v3317_v54 = vadd.f32 %v3316_v57, %v3268_v61  ;;  %v3417_v10 = vpop.f32.mrf.mxu1  ;;  %3630 = vmatpush.bf16.msra.mxu2 %v8174_v26  ;;  %3679 = vmatpush.bf16.msra.mxu3 %v8302_v35  ;;  %v12377_v52 = vor.u32 %v9934_v16, %v7905_v0 }
 0x1c2   :  { %3728 = vmatpush.bf16.msra.mxu0 %v8430_v8  ;;  %3777 = vmatpush.bf16.msra.mxu1 %v8558_v39  ;;  %v9928_v39 = vld [vmem:[%s16131_s0 + $0x2cc] sm:$0xf] }
 0x1c3   :  { %v3366_v19 = vadd.f32 %v3365_v24, %v3317_v54  ;;  %3465 = vmatmul.bf16.gmra.mxu2 %v12336_v44  ;;  %3563 = vmatmul.bf16.gmra.mxu0 %v10883_v50  ;;  %16397 = vst [vmem:[#allocation74_spill] sm:$0xff] %v12377_v52 }
 0x1c4   :  { %3514 = vmatmul.bf16.gmra.mxu3 %v12347_v45  ;;  %3612 = vmatmul.bf16.gmra.mxu1 %v10893_v60 }
 0x1c5   :  { %v12359_v62 = vadd.f32 %v3414_v59, %v3366_v19 }
 0x1c6   :  { %v3270_v41 = vpop.f32.mrf.mxu2 }
 0x1c7   :  { %v3271_v1 = vadd.f32 %v3270_v41, %v11958_v4  ;;  %v3319_v2 = vpop.f32.mrf.mxu3  ;;  %v7907_v4 = vld [vmem:[%s16131_s0 + $0x2f8] sm:$0xf0] }
 0x1c8   :  { %v3370_v61 = vpop.f32.mrf.mxu0  ;;  %v12379_v28 = vor.u32 %v9928_v39, %v7907_v4 }
 0x1c9   :  { %v3320_v57 = vadd.f32 %v3319_v2, %v3271_v1  ;;  %v3419_v26 = vpop.f32.mrf.mxu1 }
 0x1ca   :  { %16398 = vst [vmem:[#allocation75_spill] sm:$0xff] %v12379_v28 }
 0x1cb   :  { %v3369_v24 = vadd.f32 %v3368_v48, %v3320_v57 }
 0x1cd   :  { %v12368_v59 = vadd.f32 %v3417_v10, %v3369_v24 }
 0x1ce   :  { %v3272_v31 = vpop.f32.mrf.mxu2 }
 0x1cf   :  { %v3273_v48 = vadd.f32 %v3272_v31, %v11982_v18  ;;  %v3321_v35 = vpop.f32.mrf.mxu3 }
 0x1d0   :  { %v3373_v54 = vpop.f32.mrf.mxu0 }
 0x1d1   :  { %v3322_v8 = vadd.f32 %v3321_v35, %v3273_v48  ;;  %v3422_v10 = vpop.f32.mrf.mxu1 }
 0x1d3   :  { %v3371_v19 = vadd.f32 %v3370_v61, %v3322_v8  ;;  %3470 = vmatmul.bf16.gmra.mxu2 %v12377_v52  ;;  %3568 = vmatmul.bf16.gmra.mxu0 %v10925_v9 }
 0x1d4   :  { %3519 = vmatmul.bf16.gmra.mxu3 %v12379_v28  ;;  %3617 = vmatmul.bf16.gmra.mxu1 %v10929_v11 }
 0x1d5   :  { %v12385_v41 = vadd.f32 %v3419_v26, %v3371_v19 }
 0x1d6   :  { %v3275_v18 = vpop.f32.mrf.mxu2 }
 0x1d7   :  { %v3276_v1 = vadd.f32 %v3275_v18, %v11991_v42  ;;  %v3324_v2 = vpop.f32.mrf.mxu3  ;;  %v16399_v42 = vld [vmem:[#allocation11_spill] sm:$0xff] }
 0x1d8   :  { %v3375_v57 = vpop.f32.mrf.mxu0 }
 0x1d9   :  { %v3325_v24 = vadd.f32 %v3324_v2, %v3276_v1  ;;  %v3424_v0 = vpop.f32.mrf.mxu1 }
 0x1db   :  { %v3374_v16 = vadd.f32 %v3373_v54, %v3325_v24 }
 0x1dd   :  { %v12388_v39 = vadd.f32 %v3422_v10, %v3374_v16 }
 0x1de   :  { %v3277_v61 = vpop.f32.mrf.mxu2 }
 0x1df   :  { %v3278_v4 = vadd.f32 %v3277_v61, %v12008_v23  ;;  %v3326_v31 = vpop.f32.mrf.mxu3 }
 0x1e0   :  { %v3534_v48 = vpop.f32.mrf.mxu0 }
 0x1e1   :  { %v3327_v35 = vadd.f32 %v3326_v31, %v3278_v4  ;;  %v3583_v8 = vpop.f32.mrf.mxu1 }
 0x1e2   :  { %v12391_v11 = vadd.f32 %v3583_v8, %v3534_v48  ;;  %v16403_v8 = vld [vmem:[#allocation13_spill] sm:$0xff] }
 0x1e3   :  { %v3376_v26 = vadd.f32 %v3375_v57, %v3327_v35  ;;  %3631 = vmatmul.bf16.vlgmr.msra.gmra.mxu2 %v10959_v20  ;;  %3729 = vmatmul.bf16.vlgmr.msra.gmra.mxu0 %v10961_v21  ;;  %v16402_v35 = vld [vmem:[#allocation12_spill] sm:$0xff] }
 0x1e4   :  { %3680 = vmatmul.bf16.vlgmr.msra.gmra.mxu3 %v10963_v22  ;;  %3778 = vmatmul.bf16.vlgmr.msra.gmra.mxu1 %v16399_v42  ;;  %v16435_v42 = vld [vmem:[#allocation35_spill] sm:$0xff] }
 0x1e5   :  { %v12397_v54 = vadd.f32 %v3424_v0, %v3376_v26  ;;  %v16404_v26 = vld [vmem:[#allocation14_spill] sm:$0xff] }
 0x1e6   :  { %v3436_v10 = vpop.f32.mrf.mxu2 }
 0x1e7   :  { %v3437_v23 = vadd.f32 %v3436_v10, %v12017_v46  ;;  %v3485_v19 = vpop.f32.mrf.mxu3  ;;  %v16405_v10 = vld [vmem:[#allocation15_spill] sm:$0xff] }
 0x1e8   :  { %v3536_v18 = vpop.f32.mrf.mxu0 }
 0x1e9   :  { %v12400_v1 = vadd.f32 %v3485_v19, %v3437_v23  ;;  %v3585_v2 = vpop.f32.mrf.mxu1 }
 0x1ea   :  { %v12402_v24 = vadd.f32 %v3585_v2, %v3536_v18 }
 0x1eb   :  { %16400 = vst [vmem:[#allocation76_spill] sm:$0xff] %v12400_v1 }
 0x1ee   :  { %v3438_v57 = vpop.f32.mrf.mxu2 }
 0x1ef   :  { %v3439_v16 = vadd.f32 %v3438_v57, %v12034_v32  ;;  %v3487_v61 = vpop.f32.mrf.mxu3 }
 0x1f0   :  { %v3539_v4 = vpop.f32.mrf.mxu0 }
 0x1f1   :  { %v12405_v31 = vadd.f32 %v3487_v61, %v3439_v16  ;;  %v3588_v48 = vpop.f32.mrf.mxu1 }
 0x1f2   :  { %v12407_v0 = vadd.f32 %v3588_v48, %v3539_v4 }
 0x1f3   :  { %16401 = vst [vmem:[#allocation77_spill] sm:$0xff] %v12405_v31  ;;  %3636 = vmatmul.bf16.gmra.mxu2 %v16402_v35  ;;  %3734 = vmatmul.bf16.gmra.mxu0 %v16403_v8 }
 0x1f4   :  { %3685 = vmatmul.bf16.gmra.mxu3 %v16404_v26  ;;  %3783 = vmatmul.bf16.gmra.mxu1 %v16405_v10 }
 0x1f6   :  { %v3441_v23 = vpop.f32.mrf.mxu2 }
 0x1f7   :  { %v3442_v32 = vadd.f32 %v3441_v23, %v12043_v43  ;;  %v3490_v19 = vpop.f32.mrf.mxu3  ;;  %v16408_v23 = vld [vmem:[#allocation16_spill] sm:$0xff] }
 0x1f8   :  { %v3541_v18 = vpop.f32.mrf.mxu0 }
 0x1f9   :  { %v12416_v2 = vadd.f32 %v3490_v19, %v3442_v32  ;;  %v3590_v57 = vpop.f32.mrf.mxu1  ;;  %v16409_v32 = vld [vmem:[#allocation17_spill] sm:$0xff]  ;;  %v16410_v19 = vld [vmem:[#allocation18_spill] sm:$0xff] }
 0x1fa   :  { %v12418_v16 = vadd.f32 %v3590_v57, %v3541_v18  ;;  %v16411_v18 = vld [vmem:[#allocation19_spill] sm:$0xff] }
 0x1fb   :  { %16406 = vst [vmem:[#allocation78_spill] sm:$0xff] %v12416_v2 }
 0x1fe   :  { %v3443_v61 = vpop.f32.mrf.mxu2 }
 0x1ff   :  { %v3444_v4 = vadd.f32 %v3443_v61, %v12060_v6  ;;  %v3492_v48 = vpop.f32.mrf.mxu3 }
 0x200   :  { %v3544_v46 = vpop.f32.mrf.mxu0 }
 0x201   :  { %v12421_v1 = vadd.f32 %v3492_v48, %v3444_v4  ;;  %v3593_v31 = vpop.f32.mrf.mxu1 }
 0x202   :  { %v12423_v26 = vadd.f32 %v3593_v31, %v3544_v46 }
 0x203   :  { %16407 = vst [vmem:[#allocation79_spill] sm:$0xff] %v12421_v1  ;;  %3641 = vmatmul.bf16.gmra.mxu2 %v16408_v23  ;;  %3739 = vmatmul.bf16.gmra.mxu0 %v16409_v32 }
 0x204   :  { %3690 = vmatmul.bf16.gmra.mxu3 %v16410_v19  ;;  %3788 = vmatmul.bf16.gmra.mxu1 %v16411_v18 }
 0x206   :  { %v3446_v57 = vpop.f32.mrf.mxu2 }
 0x207   :  { %v3447_v6 = vadd.f32 %v3446_v57, %v12069_v53  ;;  %v3495_v61 = vpop.f32.mrf.mxu3  ;;  %v16414_v57 = vld [vmem:[#allocation20_spill] sm:$0xff] }
 0x208   :  { %v3546_v4 = vpop.f32.mrf.mxu0 }
 0x209   :  { %v12432_v48 = vadd.f32 %v3495_v61, %v3447_v6  ;;  %v3595_v31 = vpop.f32.mrf.mxu1  ;;  %v16415_v6 = vld [vmem:[#allocation21_spill] sm:$0xff]  ;;  %v16416_v61 = vld [vmem:[#allocation22_spill] sm:$0xff] }
 0x20a   :  { %v12434_v46 = vadd.f32 %v3595_v31, %v3546_v4  ;;  %v16417_v4 = vld [vmem:[#allocation23_spill] sm:$0xff] }
 0x20b   :  { %16412 = vst [vmem:[#allocation80_spill] sm:$0xff] %v12432_v48 }
 0x20e   :  { %v3448_v10 = vpop.f32.mrf.mxu2 }
 0x20f   :  { %v3449_v43 = vadd.f32 %v3448_v10, %v12086_v55  ;;  %v3497_v2 = vpop.f32.mrf.mxu3 }
 0x210   :  { %v3549_v1 = vpop.f32.mrf.mxu0 }
 0x211   :  { %v12437_v32 = vadd.f32 %v3497_v2, %v3449_v43  ;;  %v3598_v19 = vpop.f32.mrf.mxu1 }
 0x212   :  { %v12439_v23 = vadd.f32 %v3598_v19, %v3549_v1 }
 0x213   :  { %16413 = vst [vmem:[#allocation81_spill] sm:$0xff] %v12437_v32  ;;  %3646 = vmatmul.bf16.gmra.mxu2 %v16414_v57  ;;  %3744 = vmatmul.bf16.gmra.mxu0 %v16415_v6 }
 0x214   :  { %3695 = vmatmul.bf16.gmra.mxu3 %v16416_v61  ;;  %3793 = vmatmul.bf16.gmra.mxu1 %v16417_v4  ;;  %v10147_v4 = vld [vmem:[%s16130_s2 + $0x6a4] sm:$0xf] }
 0x216   :  { %v3451_v31 = vpop.f32.mrf.mxu2 }
 0x217   :  { %v3452_v55 = vadd.f32 %v3451_v31, %v12095_v63  ;;  %v3500_v10 = vpop.f32.mrf.mxu3  ;;  %v10155_v63 = vld [vmem:[%s16130_s2 + $0x6e4] sm:$0xf]  ;;  %v8795_v31 = vld [vmem:[%s16130_s2 + $0x6f0] sm:$0xf0] }
 0x218   :  { %v3551_v2 = vpop.f32.mrf.mxu0 }
 0x219   :  { %v12448_v43 = vadd.f32 %v3500_v10, %v3452_v55  ;;  %v3600_v1 = vpop.f32.mrf.mxu1  ;;  %v10187_v55 = vld [vmem:[%s16130_s2 + $0x7e4] sm:$0xf]  ;;  %v9051_v10 = vld [vmem:[%s16130_s2 + $0x8f0] sm:$0xf0] }
 0x21a   :  { %v12450_v19 = vadd.f32 %v3600_v1, %v3551_v2  ;;  %v16422_v2 = vld [vmem:[#allocation26_spill] sm:$0xff]  ;;  %v16423_v1 = vld [vmem:[#allocation27_spill] sm:$0xff] }
 0x21b   :  { %16418 = vst [vmem:[#allocation82_spill] sm:$0xff] %v12448_v43 }
 0x21e   :  { %v3453_v18 = vpop.f32.mrf.mxu2 }
 0x21f   :  { %v3454_v53 = vadd.f32 %v3453_v18, %v12136_v25  ;;  %v3502_v48 = vpop.f32.mrf.mxu3  ;;  %v16420_v18 = vld [vmem:[#allocation24_spill] sm:$0xff] }
 0x220   :  { %v3554_v32 = vpop.f32.mrf.mxu0 }
 0x221   :  { %v12453_v6 = vadd.f32 %v3502_v48, %v3454_v53  ;;  %v3603_v61 = vpop.f32.mrf.mxu1  ;;  %v16421_v48 = vld [vmem:[#allocation25_spill] sm:$0xff]  ;;  %v8923_v53 = vld [vmem:[%s16130_s2 + $0x7f0] sm:$0xf0] }
 0x222   :  { %v12455_v57 = vadd.f32 %v3603_v61, %v3554_v32  ;;  %v8798_v32 = vor.u32 %v10155_v63, %v8795_v31  ;;  %v10219_v61 = vld [vmem:[%s16130_s2 + $0x8e4] sm:$0xf]  ;;  %v8926_v25 = vor.u32 %v10187_v55, %v8923_v53  ;;  %v9179_v31 = vld [vmem:[%s16130_s2 + $0x9f0] sm:$0xf0] }
 0x223   :  { %16419 = vst [vmem:[#allocation83_spill] sm:$0xff] %v12453_v6  ;;  %3651 = vmatmul.bf16.gmra.mxu2 %v16420_v18  ;;  %3749 = vmatmul.bf16.gmra.mxu0 %v16421_v48  ;;  %v9054_v43 = vor.u32 %v10219_v61, %v9051_v10  ;;  %v10251_v63 = vld [vmem:[%s16130_s2 + $0x9e4] sm:$0xf]  ;;  %v8779_v55 = vld [vmem:[%s16130_s2 + $0x6d0] sm:$0xf0] }
 0x224   :  { %3700 = vmatmul.bf16.gmra.mxu3 %v16422_v2  ;;  %3798 = vmatmul.bf16.gmra.mxu1 %v16423_v1  ;;  %v9182_v6 = vor.u32 %v10251_v63, %v9179_v31  ;;  %v10151_v2 = vld [vmem:[%s16130_s2 + $0x6c4] sm:$0xf]  ;;  %v9035_v63 = vld [vmem:[%s16130_s2 + $0x8d0] sm:$0xf0] }
 0x225   :  { %3819 = vmatpush.bf16.msrb.mxu2 %v8798_v32  ;;  %3868 = vmatpush.bf16.msrb.mxu3 %v8926_v25  ;;  %v10183_v53 = vld [vmem:[%s16130_s2 + $0x7c4] sm:$0xf]  ;;  %v8782_v32 = vor.u32 %v10151_v2, %v8779_v55 }
 0x226   :  { %v3456_v48 = vpop.f32.mrf.mxu2  ;;  %3917 = vmatpush.bf16.msrb.mxu0 %v9054_v43  ;;  %3966 = vmatpush.bf16.msrb.mxu1 %v9182_v6  ;;  %v8907_v43 = vld [vmem:[%s16130_s2 + $0x7d0] sm:$0xf0]  ;;  %v10215_v25 = vld [vmem:[%s16130_s2 + $0x8c4] sm:$0xf] }
 0x227   :  { %v3457_v61 = vadd.f32 %v3456_v48, %v12195_v15  ;;  %v3505_v10 = vpop.f32.mrf.mxu3  ;;  %v8910_v1 = vor.u32 %v10183_v53, %v8907_v43  ;;  %v9038_v18 = vor.u32 %v10215_v25, %v9035_v63  ;;  %v10247_v15 = vld [vmem:[%s16130_s2 + $0x9c4] sm:$0xf]  ;;  %v9163_v6 = vld [vmem:[%s16130_s2 + $0x9d0] sm:$0xf0] }
 0x228   :  { %v3556_v31 = vpop.f32.mrf.mxu0  ;;  %v9166_v55 = vor.u32 %v10247_v15, %v9163_v6  ;;  %v8763_v53 = vld [vmem:[%s16130_s2 + $0x6b0] sm:$0xf0]  ;;  %v10179_v43 = vld [vmem:[%s16130_s2 + $0x7a4] sm:$0xf] }
 0x229   :  { %v12512_v48 = vadd.f32 %v3505_v10, %v3457_v61  ;;  %v3605_v2 = vpop.f32.mrf.mxu1  ;;  %3820 = vmatpush.bf16.msrb.mxu2 %v8782_v32  ;;  %3869 = vmatpush.bf16.msrb.mxu3 %v8910_v1  ;;  %v8766_v61 = vor.u32 %v10147_v4, %v8763_v53  ;;  %v8891_v10 = vld [vmem:[%s16130_s2 + $0x7b0] sm:$0xf0]  ;;  %v10211_v32 = vld [vmem:[%s16130_s2 + $0x8a4] sm:$0xf] }
 0x22a   :  { %v12523_v25 = vadd.f32 %v3605_v2, %v3556_v31  ;;  %3918 = vmatpush.bf16.msrb.mxu0 %v9038_v18  ;;  %v9019_v63 = vld [vmem:[%s16130_s2 + $0x8b0] sm:$0xf0]  ;;  %3967 = vmatpush.bf16.msrb.mxu1 %v9166_v55  ;;  %v8894_v15 = vor.u32 %v10179_v43, %v8891_v10  ;;  %v10243_v18 = vld [vmem:[%s16130_s2 + $0x9a4] sm:$0xf] }
 0x22b   :  { %16424 = vst [vmem:[#allocation84_spill] sm:$0xff] %v12512_v48  ;;  %v9022_v6 = vor.u32 %v10211_v32, %v9019_v63  ;;  %v9147_v4 = vld [vmem:[%s16130_s2 + $0x9b0] sm:$0xf0]  ;;  %v10143_v2 = vld [vmem:[%s16130_s2 + $0x684] sm:$0xf] }
 0x22c   :  { %v9150_v1 = vor.u32 %v10243_v18, %v9147_v4  ;;  %v8747_v55 = vld [vmem:[%s16130_s2 + $0x690] sm:$0xf0]  ;;  %v10175_v53 = vld [vmem:[%s16130_s2 + $0x784] sm:$0xf] }
 0x22d   :  { %3821 = vmatpush.bf16.msrb.mxu2 %v8766_v61  ;;  %3870 = vmatpush.bf16.msrb.mxu3 %v8894_v15  ;;  %v8750_v61 = vor.u32 %v10143_v2, %v8747_v55  ;;  %v8875_v32 = vld [vmem:[%s16130_s2 + $0x790] sm:$0xf0]  ;;  %v10207_v63 = vld [vmem:[%s16130_s2 + $0x884] sm:$0xf] }
 0x22e   :  { %v3458_v31 = vpop.f32.mrf.mxu2  ;;  %3919 = vmatpush.bf16.msrb.mxu0 %v9022_v6  ;;  %3968 = vmatpush.bf16.msrb.mxu1 %v9150_v1  ;;  %v9003_v15 = vld [vmem:[%s16130_s2 + $0x890] sm:$0xf0]  ;;  %v8878_v18 = vor.u32 %v10175_v53, %v8875_v32  ;;  %v10139_v53 = vld [vmem:[%s16130_s2 + $0x664] sm:$0xf] }
 0x22f   :  { %v3459_v43 = vadd.f32 %v3458_v31, %v12261_v3  ;;  %v3507_v10 = vpop.f32.mrf.mxu3  ;;  %v9006_v4 = vor.u32 %v10207_v63, %v9003_v15  ;;  %v10239_v3 = vld [vmem:[%s16130_s2 + $0x984] sm:$0xf]  ;;  %v9131_v1 = vld [vmem:[%s16130_s2 + $0x990] sm:$0xf0]  ;;  %v16427_v63 = vld [vmem:[#allocation29_spill] sm:$0xff] }
 0x230   :  { %v3559_v6 = vpop.f32.mrf.mxu0  ;;  %v9134_v55 = vor.u32 %v10239_v3, %v9131_v1  ;;  %v8731_v32 = vld [vmem:[%s16130_s2 + $0x670] sm:$0xf0]  ;;  %v16428_v3 = vld [vmem:[#allocation30_spill] sm:$0xff]  ;;  %v16429_v1 = vld [vmem:[#allocation31_spill] sm:$0xff] }
 0x231   :  { %v12565_v31 = vadd.f32 %v3507_v10, %v3459_v43  ;;  %v3608_v2 = vpop.f32.mrf.mxu1  ;;  %3822 = vmatpush.bf16.msrb.mxu2 %v8750_v61  ;;  %3871 = vmatpush.bf16.msrb.mxu3 %v8878_v18  ;;  %v10171_v43 = vld [vmem:[%s16130_s2 + $0x764] sm:$0xf]  ;;  %v16426_v61 = vld [vmem:[#allocation28_spill] sm:$0xff]  ;;  %v8734_v15 = vor.u32 %v10139_v53, %v8731_v32 }
 0x232   :  { %v12567_v8 = vadd.f32 %v3608_v2, %v3559_v6  ;;  %3920 = vmatpush.bf16.msrb.mxu0 %v9006_v4  ;;  %v8859_v6 = vld [vmem:[%s16130_s2 + $0x770] sm:$0xf0]  ;;  %v10203_v18 = vld [vmem:[%s16130_s2 + $0x864] sm:$0xf]  ;;  %3969 = vmatpush.bf16.msrb.mxu1 %v9134_v55 }
 0x233   :  { %16425 = vst [vmem:[#allocation85_spill] sm:$0xff] %v12565_v31  ;;  %3656 = vmatmul.bf16.gmra.mxu2 %v16426_v61  ;;  %3754 = vmatmul.bf16.gmra.mxu0 %v16427_v63  ;;  %v8987_v4 = vld [vmem:[%s16130_s2 + $0x870] sm:$0xf0]  ;;  %v8862_v2 = vor.u32 %v10171_v43, %v8859_v6  ;;  %v10235_v53 = vld [vmem:[%s16130_s2 + $0x964] sm:$0xf] }
 0x234   :  { %3705 = vmatmul.bf16.gmra.mxu3 %v16428_v3  ;;  %3803 = vmatmul.bf16.gmra.mxu1 %v16429_v1  ;;  %v8990_v10 = vor.u32 %v10203_v18, %v8987_v4  ;;  %v9115_v32 = vld [vmem:[%s16130_s2 + $0x970] sm:$0xf0]  ;;  %v10135_v1 = vld [vmem:[%s16130_s2 + $0x644] sm:$0xf] }
 0x235   :  { %3823 = vmatpush.bf16.msrb.mxu2 %v8734_v15  ;;  %v9118_v48 = vor.u32 %v10235_v53, %v9115_v32  ;;  %3872 = vmatpush.bf16.msrb.mxu3 %v8862_v2  ;;  %v8715_v43 = vld [vmem:[%s16130_s2 + $0x650] sm:$0xf0]  ;;  %v10167_v6 = vld [vmem:[%s16130_s2 + $0x744] sm:$0xf] }
 0x236   :  { %v3461_v31 = vpop.f32.mrf.mxu2  ;;  %3921 = vmatpush.bf16.msrb.mxu0 %v8990_v10  ;;  %v8718_v15 = vor.u32 %v10135_v1, %v8715_v43  ;;  %v8843_v10 = vld [vmem:[%s16130_s2 + $0x750] sm:$0xf0]  ;;  %v10199_v4 = vld [vmem:[%s16130_s2 + $0x844] sm:$0xf] }
 0x237   :  { %v3462_v18 = vadd.f32 %v3461_v31, %v12318_v27  ;;  %v3510_v55 = vpop.f32.mrf.mxu3  ;;  %v8971_v2 = vld [vmem:[%s16130_s2 + $0x850] sm:$0xf0]  ;;  %v8846_v32 = vor.u32 %v10167_v6, %v8843_v10  ;;  %v10231_v27 = vld [vmem:[%s16130_s2 + $0x944] sm:$0xf]  ;;  %3970 = vmatpush.bf16.msrb.mxu1 %v9118_v48 }
 0x238   :  { %v3561_v53 = vpop.f32.mrf.mxu0  ;;  %v8974_v3 = vor.u32 %v10199_v4, %v8971_v2  ;;  %v9099_v31 = vld [vmem:[%s16130_s2 + $0x950] sm:$0xf0]  ;;  %v10131_v61 = vld [vmem:[%s16130_s2 + $0x624] sm:$0xf] }
 0x239   :  { %v12624_v1 = vadd.f32 %v3510_v55, %v3462_v18  ;;  %v3610_v43 = vpop.f32.mrf.mxu1  ;;  %3824 = vmatpush.bf16.msrb.mxu2 %v8718_v15  ;;  %v9102_v63 = vor.u32 %v10231_v27, %v9099_v31  ;;  %v8699_v6 = vld [vmem:[%s16130_s2 + $0x630] sm:$0xf0]  ;;  %v10163_v10 = vld [vmem:[%s16130_s2 + $0x724] sm:$0xf]  ;;  %3873 = vmatpush.bf16.msrb.mxu3 %v8846_v32 }
 0x23a   :  { %v12635_v4 = vadd.f32 %v3610_v43, %v3561_v53  ;;  %3922 = vmatpush.bf16.msrb.mxu0 %v8974_v3  ;;  %v8702_v18 = vor.u32 %v10131_v61, %v8699_v6  ;;  %v8827_v48 = vld [vmem:[%s16130_s2 + $0x730] sm:$0xf0]  ;;  %v10195_v55 = vld [vmem:[%s16130_s2 + $0x824] sm:$0xf] }
 0x23b   :  { %16430 = vst [vmem:[#allocation86_spill] sm:$0xff] %v12624_v1  ;;  %v8955_v15 = vld [vmem:[%s16130_s2 + $0x830] sm:$0xf0]  ;;  %v8830_v2 = vor.u32 %v10163_v10, %v8827_v48  ;;  %v10227_v53 = vld [vmem:[%s16130_s2 + $0x924] sm:$0xf]  ;;  %3971 = vmatpush.bf16.msrb.mxu1 %v9102_v63 }
 0x23c   :  { %v8958_v27 = vor.u32 %v10195_v55, %v8955_v15  ;;  %v9083_v61 = vld [vmem:[%s16130_s2 + $0x930] sm:$0xf0]  ;;  %v10127_v31 = vld [vmem:[%s16130_s2 + $0x604] sm:$0xf] }
 0x23d   :  { %3825 = vmatpush.bf16.msrb.mxu2 %v8702_v18  ;;  %v9086_v3 = vor.u32 %v10227_v53, %v9083_v61  ;;  %3874 = vmatpush.bf16.msrb.mxu3 %v8830_v2  ;;  %v8683_v43 = vld [vmem:[%s16130_s2 + $0x610] sm:$0xf0]  ;;  %v10159_v6 = vld [vmem:[%s16130_s2 + $0x704] sm:$0xf] }
 0x23e   :  { %v3463_v32 = vpop.f32.mrf.mxu2  ;;  %3923 = vmatpush.bf16.msrb.mxu0 %v8958_v27  ;;  %v8686_v18 = vor.u32 %v10127_v31, %v8683_v43  ;;  %v8811_v48 = vld [vmem:[%s16130_s2 + $0x710] sm:$0xf0]  ;;  %v10191_v55 = vld [vmem:[%s16130_s2 + $0x804] sm:$0xf] }
 0x23f   :  { %v3464_v10 = vadd.f32 %v3463_v32, %v12359_v62  ;;  %v3512_v63 = vpop.f32.mrf.mxu3  ;;  %v8939_v15 = vld [vmem:[%s16130_s2 + $0x810] sm:$0xf0]  ;;  %v8814_v27 = vor.u32 %v10159_v6, %v8811_v48  ;;  %v10223_v62 = vld [vmem:[%s16130_s2 + $0x904] sm:$0xf]  ;;  %3972 = vmatpush.bf16.msrb.mxu1 %v9086_v3 }
 0x240   :  { %v3564_v2 = vpop.f32.mrf.mxu0  ;;  %v8942_v53 = vor.u32 %v10191_v55, %v8939_v15  ;;  %v9067_v61 = vld [vmem:[%s16130_s2 + $0x910] sm:$0xf0]  ;;  %v16433_v55 = vld [vmem:[#allocation33_spill] sm:$0xff]  ;;  %v16434_v15 = vld [vmem:[#allocation34_spill] sm:$0xff] }
 0x241   :  { %v12677_v32 = vadd.f32 %v3512_v63, %v3464_v10  ;;  %v3613_v31 = vpop.f32.mrf.mxu1  ;;  %3826 = vmatpush.bf16.msrb.mxu2 %v8686_v18  ;;  %v9070_v43 = vor.u32 %v10223_v62, %v9067_v61  ;;  %3875 = vmatpush.bf16.msrb.mxu3 %v8814_v27  ;;  %v16432_v48 = vld [vmem:[#allocation32_spill] sm:$0xff] }
 0x242   :  { %v12679_v35 = vadd.f32 %v3613_v31, %v3564_v2  ;;  %3924 = vmatpush.bf16.msrb.mxu0 %v8942_v53 }
 0x243   :  { %16431 = vst [vmem:[#allocation87_spill] sm:$0xff] %v12677_v32  ;;  %3661 = vmatmul.bf16.gmra.mxu2 %v16432_v48  ;;  %3759 = vmatmul.bf16.gmra.mxu0 %v16433_v55  ;;  %v16448_v48 = vld [vmem:[#allocation44_spill] sm:$0xff] }
 0x244   :  { %3710 = vmatmul.bf16.gmra.mxu3 %v16434_v15  ;;  %3808 = vmatmul.bf16.gmra.mxu1 %v16435_v42 }
 0x245   :  { %3973 = vmatpush.bf16.msrb.mxu1 %v9070_v43  ;;  %v16438_v43 = vld [vmem:[#allocation36_spill] sm:$0xff] }
 0x246   :  { %v3466_v10 = vpop.f32.mrf.mxu2 }
 0x247   :  { %v3467_v3 = vadd.f32 %v3466_v10, %v12368_v59  ;;  %v3515_v63 = vpop.f32.mrf.mxu3  ;;  %v16439_v10 = vld [vmem:[#allocation37_spill] sm:$0xff] }
 0x248   :  { %v3566_v18 = vpop.f32.mrf.mxu0 }
 0x249   :  { %v12688_v2 = vadd.f32 %v3515_v63, %v3467_v3  ;;  %v3615_v27 = vpop.f32.mrf.mxu1  ;;  %v16440_v3 = vld [vmem:[#allocation38_spill] sm:$0xff]  ;;  %v16441_v63 = vld [vmem:[#allocation39_spill] sm:$0xff] }
 0x24a   :  { %v12690_v53 = vadd.f32 %v3615_v27, %v3566_v18 }
 0x24b   :  { %16436 = vst [vmem:[#allocation88_spill] sm:$0xff] %v12688_v2 }
 0x24e   :  { %v3468_v62 = vpop.f32.mrf.mxu2 }
 0x24f   :  { %v3469_v61 = vadd.f32 %v3468_v62, %v12385_v41  ;;  %v3517_v31 = vpop.f32.mrf.mxu3 }
 0x250   :  { %v3569_v6 = vpop.f32.mrf.mxu0 }
 0x251   :  { %v12693_v1 = vadd.f32 %v3517_v31, %v3469_v61  ;;  %v3618_v32 = vpop.f32.mrf.mxu1 }
 0x252   :  { %v12695_v42 = vadd.f32 %v3618_v32, %v3569_v6 }
 0x253   :  { %16437 = vst [vmem:[#allocation89_spill] sm:$0xff] %v12693_v1  ;;  %3666 = vmatmul.bf16.gmra.mxu2 %v16438_v43  ;;  %3764 = vmatmul.bf16.gmra.mxu0 %v16439_v10  ;;  %v16444_v43 = vld [vmem:[#allocation40_spill] sm:$0xff] }
 0x254   :  { %3715 = vmatmul.bf16.gmra.mxu3 %v16440_v3  ;;  %3813 = vmatmul.bf16.gmra.mxu1 %v16441_v63 }
 0x256   :  { %v3471_v18 = vpop.f32.mrf.mxu2 }
 0x257   :  { %v3472_v41 = vadd.f32 %v3471_v18, %v12388_v39  ;;  %v3520_v27 = vpop.f32.mrf.mxu3  ;;  %v16445_v39 = vld [vmem:[#allocation41_spill] sm:$0xff]  ;;  %v16446_v18 = vld [vmem:[#allocation42_spill] sm:$0xff] }
 0x258   :  { %v3571_v62 = vpop.f32.mrf.mxu0 }
 0x259   :  { %v12704_v61 = vadd.f32 %v3520_v27, %v3472_v41  ;;  %v3620_v32 = vpop.f32.mrf.mxu1  ;;  %v16447_v41 = vld [vmem:[#allocation43_spill] sm:$0xff] }
 0x25a   :  { %v12706_v6 = vadd.f32 %v3620_v32, %v3571_v62 }
 0x25b   :  { %16442 = vst [vmem:[#allocation90_spill] sm:$0xff] %v12704_v61 }
 0x25e   :  { %v3473_v31 = vpop.f32.mrf.mxu2 }
 0x25f   :  { %v3474_v59 = vadd.f32 %v3473_v31, %v12397_v54  ;;  %v3522_v2 = vpop.f32.mrf.mxu3 }
 0x260   :  { %v3730_v1 = vpop.f32.mrf.mxu0 }
 0x261   :  { %v12709_v10 = vadd.f32 %v3522_v2, %v3474_v59  ;;  %v3779_v3 = vpop.f32.mrf.mxu1 }
 0x263   :  { %16443 = vst [vmem:[#allocation91_spill] sm:$0xff] %v12709_v10  ;;  %3827 = vmatmul.bf16.vlgmr.msrb.gmra.mxu2 %v16444_v43  ;;  %3925 = vmatmul.bf16.vlgmr.msrb.gmra.mxu0 %v16445_v39 }
 0x264   :  { %3876 = vmatmul.bf16.vlgmr.msrb.gmra.mxu3 %v16446_v18  ;;  %3974 = vmatmul.bf16.vlgmr.msrb.gmra.mxu1 %v16447_v41  ;;  %v16449_v41 = vld [vmem:[#allocation45_spill] sm:$0xff] }
 0x266   :  { %v3632_v27 = vpop.f32.mrf.mxu2 }
 0x267   :  { %v3633_v62 = vadd.f32 %v3632_v27, %v12391_v11  ;;  %v3681_v54 = vpop.f32.mrf.mxu3  ;;  %v16450_v11 = vld [vmem:[#allocation46_spill] sm:$0xff]  ;;  %v16451_v27 = vld [vmem:[#allocation47_spill] sm:$0xff] }
 0x268   :  { %v3732_v32 = vpop.f32.mrf.mxu0 }
 0x269   :  { %v3682_v31 = vadd.f32 %v3681_v54, %v3633_v62  ;;  %v3781_v2 = vpop.f32.mrf.mxu1 }
 0x26b   :  { %v3731_v59 = vadd.f32 %v3730_v1, %v3682_v31 }
 0x26d   :  { %v12718_v15 = vadd.f32 %v3779_v3, %v3731_v59 }
 0x26e   :  { %v3634_v55 = vpop.f32.mrf.mxu2 }
 0x26f   :  { %v3635_v63 = vadd.f32 %v3634_v55, %v12402_v24  ;;  %v3683_v61 = vpop.f32.mrf.mxu3 }
 0x270   :  { %v3735_v10 = vpop.f32.mrf.mxu0 }
 0x271   :  { %v3684_v39 = vadd.f32 %v3683_v61, %v3635_v63  ;;  %v3784_v43 = vpop.f32.mrf.mxu1 }
 0x273   :  { %v3733_v18 = vadd.f32 %v3732_v32, %v3684_v39  ;;  %3832 = vmatmul.bf16.gmra.mxu2 %v16448_v48  ;;  %3930 = vmatmul.bf16.gmra.mxu0 %v16449_v41 }
 0x274   :  { %3881 = vmatmul.bf16.gmra.mxu3 %v16450_v11  ;;  %3979 = vmatmul.bf16.gmra.mxu1 %v16451_v27 }
 0x275   :  { %v12725_v62 = vadd.f32 %v3781_v2, %v3733_v18  ;;  %v16452_v18 = vld [vmem:[#allocation48_spill] sm:$0xff]  ;;  %v16453_v2 = vld [vmem:[#allocation49_spill] sm:$0xff] }
 0x276   :  { %v3637_v1 = vpop.f32.mrf.mxu2 }
 0x277   :  { %v3638_v3 = vadd.f32 %v3637_v1, %v12407_v0  ;;  %v3686_v54 = vpop.f32.mrf.mxu3  ;;  %v16454_v0 = vld [vmem:[#allocation50_spill] sm:$0xff]  ;;  %v16455_v1 = vld [vmem:[#allocation51_spill] sm:$0xff] }
 0x278   :  { %v3737_v24 = vpop.f32.mrf.mxu0 }
 0x279   :  { %v3687_v55 = vadd.f32 %v3686_v54, %v3638_v3  ;;  %v3786_v31 = vpop.f32.mrf.mxu1 }
 0x27b   :  { %v3736_v63 = vadd.f32 %v3735_v10, %v3687_v55 }
 0x27d   :  { %v12728_v61 = vadd.f32 %v3784_v43, %v3736_v63 }
 0x27e   :  { %v3639_v39 = vpop.f32.mrf.mxu2 }
 0x27f   :  { %v3640_v32 = vadd.f32 %v3639_v39, %v12418_v16  ;;  %v3688_v59 = vpop.f32.mrf.mxu3 }
 0x280   :  { %v3740_v41 = vpop.f32.mrf.mxu0 }
 0x281   :  { %v3689_v11 = vadd.f32 %v3688_v59, %v3640_v32  ;;  %v3789_v48 = vpop.f32.mrf.mxu1 }
 0x283   :  { %v3738_v27 = vadd.f32 %v3737_v24, %v3689_v11  ;;  %3837 = vmatmul.bf16.gmra.mxu2 %v16452_v18  ;;  %3935 = vmatmul.bf16.gmra.mxu0 %v16453_v2 }
 0x284   :  { %3886 = vmatmul.bf16.gmra.mxu3 %v16454_v0  ;;  %3984 = vmatmul.bf16.gmra.mxu1 %v16455_v1 }
 0x285   :  { %v12735_v3 = vadd.f32 %v3786_v31, %v3738_v27  ;;  %v16456_v27 = vld [vmem:[#allocation52_spill] sm:$0xff]  ;;  %v16457_v31 = vld [vmem:[#allocation53_spill] sm:$0xff] }
 0x286   :  { %v3642_v43 = vpop.f32.mrf.mxu2 }
 0x287   :  { %v3643_v10 = vadd.f32 %v3642_v43, %v12423_v26  ;;  %v3691_v54 = vpop.f32.mrf.mxu3  ;;  %v16458_v26 = vld [vmem:[#allocation54_spill] sm:$0xff]  ;;  %v16459_v43 = vld [vmem:[#allocation55_spill] sm:$0xff] }
 0x288   :  { %v3742_v16 = vpop.f32.mrf.mxu0 }
 0x289   :  { %v3692_v55 = vadd.f32 %v3691_v54, %v3643_v10  ;;  %v3791_v63 = vpop.f32.mrf.mxu1 }
 0x28b   :  { %v3741_v39 = vadd.f32 %v3740_v41, %v3692_v55 }
 0x28d   :  { %v12738_v32 = vadd.f32 %v3789_v48, %v3741_v39 }
 0x28e   :  { %v3644_v11 = vpop.f32.mrf.mxu2 }
 0x28f   :  { %v3645_v24 = vadd.f32 %v3644_v11, %v12434_v46  ;;  %v3693_v59 = vpop.f32.mrf.mxu3 }
 0x290   :  { %v3745_v2 = vpop.f32.mrf.mxu0 }
 0x291   :  { %v3694_v0 = vadd.f32 %v3693_v59, %v3645_v24  ;;  %v3794_v18 = vpop.f32.mrf.mxu1 }
 0x293   :  { %v3743_v1 = vadd.f32 %v3742_v16, %v3694_v0  ;;  %3842 = vmatmul.bf16.gmra.mxu2 %v16456_v27  ;;  %3940 = vmatmul.bf16.gmra.mxu0 %v16457_v31 }
 0x294   :  { %3891 = vmatmul.bf16.gmra.mxu3 %v16458_v26  ;;  %3989 = vmatmul.bf16.gmra.mxu1 %v16459_v43 }
 0x295   :  { %v12745_v10 = vadd.f32 %v3791_v63, %v3743_v1  ;;  %v10283_v1 = vld [vmem:[%s16130_s2 + $0xae4] sm:$0xf]  ;;  %v16460_v63 = vld [vmem:[#allocation56_spill] sm:$0xff] }
 0x296   :  { %v3647_v48 = vpop.f32.mrf.mxu2 }
 0x297   :  { %v3648_v41 = vadd.f32 %v3647_v48, %v12439_v23  ;;  %v3696_v54 = vpop.f32.mrf.mxu3  ;;  %v9307_v23 = vld [vmem:[%s16130_s2 + $0xaf0] sm:$0xf0] }
 0x298   :  { %v3747_v46 = vpop.f32.mrf.mxu0  ;;  %v9310_v48 = vor.u32 %v10283_v1, %v9307_v23 }
 0x299   :  { %v3697_v55 = vadd.f32 %v3696_v54, %v3648_v41  ;;  %v3796_v39 = vpop.f32.mrf.mxu1  ;;  %v9435_v41 = vld [vmem:[%s16130_s2 + $0xbf0] sm:$0xf0]  ;;  %v8033_v54 = vld [vmem:[%s16130_s2 + $0xe8] sm:$0xf] }
 0x29a   :  { %4015 = vmatpush.bf16.msra.mxu2 %v9310_v48 }
 0x29b   :  { %v3746_v11 = vadd.f32 %v3745_v2, %v3697_v55  ;;  %v9966_v55 = vld [vmem:[%s16130_s2 + $0xf4] sm:$0xf0] }
 0x29d   :  { %v12748_v24 = vadd.f32 %v3794_v18, %v3746_v11  ;;  %v10315_v18 = vld [vmem:[%s16130_s2 + $0xbe4] sm:$0xf] }
 0x29e   :  { %v3649_v0 = vpop.f32.mrf.mxu2  ;;  %v16462_v11 = vld [vmem:[#allocation58_spill] sm:$0xff] }
 0x29f   :  { %v3650_v16 = vadd.f32 %v3649_v0, %v12450_v19  ;;  %v3698_v59 = vpop.f32.mrf.mxu3  ;;  %v16461_v19 = vld [vmem:[#allocation57_spill] sm:$0xff]  ;;  %v8034_v0 = vor.u32 %v9966_v55, %v8033_v54  ;;  %v10311_v54 = vld [vmem:[%s16130_s2 + $0xbc4] sm:$0xf]  ;;  %v9419_v55 = vld [vmem:[%s16130_s2 + $0xbd0] sm:$0xf0] }
 0x2a0   :  { %v3750_v31 = vpop.f32.mrf.mxu0 }
 0x2a1   :  { %v3699_v26 = vadd.f32 %v3698_v59, %v3650_v16  ;;  %v3799_v27 = vpop.f32.mrf.mxu1  ;;  %v8161_v16 = vld [vmem:[%s16130_s2 + $0x1e8] sm:$0xf]  ;;  %v9998_v59 = vld [vmem:[%s16130_s2 + $0x1f4] sm:$0xf0]  ;;  %4113 = vmatpush.bf16.msra.mxu0 %v8034_v0 }
 0x2a2   :  { %v8162_v23 = vor.u32 %v9998_v59, %v8161_v16  ;;  %v9962_v0 = vld [vmem:[%s16130_s2 + $0xd4] sm:$0xf0]  ;;  %v9422_v59 = vor.u32 %v10311_v54, %v9419_v55  ;;  %v9275_v54 = vld [vmem:[%s16130_s2 + $0xab0] sm:$0xf0]  ;;  %v10307_v55 = vld [vmem:[%s16130_s2 + $0xba4] sm:$0xf] }
 0x2a3   :  { %v3748_v2 = vadd.f32 %v3747_v46, %v3699_v26  ;;  %3847 = vmatmul.bf16.gmra.mxu2 %v16460_v63  ;;  %3945 = vmatmul.bf16.gmra.mxu0 %v16461_v19  ;;  %v16463_v26 = vld [vmem:[#allocation59_spill] sm:$0xff]  ;;  %v9438_v46 = vor.u32 %v10315_v18, %v9435_v41  ;;  %v10279_v18 = vld [vmem:[%s16130_s2 + $0xac4] sm:$0xf]  ;;  %v9291_v41 = vld [vmem:[%s16130_s2 + $0xad0] sm:$0xf0] }
 0x2a4   :  { %3896 = vmatmul.bf16.gmra.mxu3 %v16462_v11  ;;  %3994 = vmatmul.bf16.gmra.mxu1 %v16463_v26  ;;  %v9294_v48 = vor.u32 %v10279_v18, %v9291_v41  ;;  %v10275_v11 = vld [vmem:[%s16130_s2 + $0xaa4] sm:$0xf] }
 0x2a5   :  { %v12779_v1 = vadd.f32 %v3796_v39, %v3748_v2  ;;  %4064 = vmatpush.bf16.msra.mxu3 %v9438_v46  ;;  %4162 = vmatpush.bf16.msra.mxu1 %v8162_v23  ;;  %v8017_v46 = vld [vmem:[%s16130_s2 + $0xc8] sm:$0xf] }
 0x2a6   :  { %v3652_v19 = vpop.f32.mrf.mxu2  ;;  %v8018_v26 = vor.u32 %v9962_v0, %v8017_v46  ;;  %4016 = vmatpush.bf16.msra.mxu2 %v9294_v48  ;;  %v9958_v48 = vld [vmem:[%s16130_s2 + $0xb4] sm:$0xf0] }
 0x2a7   :  { %v3653_v39 = vadd.f32 %v3652_v19, %v12455_v57  ;;  %v3701_v2 = vpop.f32.mrf.mxu3  ;;  %v8145_v57 = vld [vmem:[%s16130_s2 + $0x1c8] sm:$0xf]  ;;  %v9994_v19 = vld [vmem:[%s16130_s2 + $0x1d4] sm:$0xf0] }
 0x2a8   :  { %v3752_v16 = vpop.f32.mrf.mxu0  ;;  %v8146_v41 = vor.u32 %v9994_v19, %v8145_v57  ;;  %4114 = vmatpush.bf16.msra.mxu0 %v8018_v26  ;;  %v8001_v26 = vld [vmem:[%s16130_s2 + $0xa8] sm:$0xf] }
 0x2a9   :  { %v3702_v23 = vadd.f32 %v3701_v2, %v3653_v39  ;;  %v3801_v18 = vpop.f32.mrf.mxu1  ;;  %4065 = vmatpush.bf16.msra.mxu3 %v9422_v59  ;;  %v9278_v39 = vor.u32 %v10275_v11, %v9275_v54  ;;  %v9403_v2 = vld [vmem:[%s16130_s2 + $0xbb0] sm:$0xf0]  ;;  %v8002_v59 = vor.u32 %v9958_v48, %v8001_v26  ;;  %v9990_v11 = vld [vmem:[%s16130_s2 + $0x1b4] sm:$0xf0]  ;;  %v7985_v26 = vld [vmem:[%s16130_s2 + $0x88] sm:$0xf] }
 0x2aa   :  { %4163 = vmatpush.bf16.msra.mxu1 %v8146_v41  ;;  %v9406_v0 = vor.u32 %v10307_v55, %v9403_v2  ;;  %v10271_v41 = vld [vmem:[%s16130_s2 + $0xa84] sm:$0xf]  ;;  %v9259_v54 = vld [vmem:[%s16130_s2 + $0xa90] sm:$0xf0]  ;;  %v9954_v48 = vld [vmem:[%s16130_s2 + $0x94] sm:$0xf0] }
 0x2ab   :  { %v3751_v46 = vadd.f32 %v3750_v31, %v3702_v23  ;;  %v8129_v31 = vld [vmem:[%s16130_s2 + $0x1a8] sm:$0xf]  ;;  %4017 = vmatpush.bf16.msra.mxu2 %v9278_v39  ;;  %v10303_v55 = vld [vmem:[%s16130_s2 + $0xb84] sm:$0xf]  ;;  %v9262_v39 = vor.u32 %v10271_v41, %v9259_v54  ;;  %v9387_v2 = vld [vmem:[%s16130_s2 + $0xb90] sm:$0xf0] }
 0x2ac   :  { %v8130_v19 = vor.u32 %v9990_v11, %v8129_v31  ;;  %4115 = vmatpush.bf16.msra.mxu0 %v8002_v59  ;;  %v9390_v59 = vor.u32 %v10303_v55, %v9387_v2  ;;  %v7986_v31 = vor.u32 %v9954_v48, %v7985_v26  ;;  %v9986_v11 = vld [vmem:[%s16130_s2 + $0x194] sm:$0xf0]  ;;  %v10267_v54 = vld [vmem:[%s16130_s2 + $0xa64] sm:$0xf]  ;;  %v9243_v55 = vld [vmem:[%s16130_s2 + $0xa70] sm:$0xf0] }
 0x2ad   :  { %v12830_v57 = vadd.f32 %v3799_v27, %v3751_v46  ;;  %4066 = vmatpush.bf16.msra.mxu3 %v9406_v0  ;;  %v10299_v2 = vld [vmem:[%s16130_s2 + $0xb64] sm:$0xf]  ;;  %v16464_v48 = vld [vmem:[#allocation60_spill] sm:$0xff] }
 0x2ae   :  { %v3654_v23 = vpop.f32.mrf.mxu2  ;;  %4164 = vmatpush.bf16.msra.mxu1 %v8130_v19 }
 0x2af   :  { %v3655_v27 = vadd.f32 %v3654_v23, %v12523_v25  ;;  %v3703_v46 = vpop.f32.mrf.mxu3  ;;  %v8113_v25 = vld [vmem:[%s16130_s2 + $0x188] sm:$0xf]  ;;  %4018 = vmatpush.bf16.msra.mxu2 %v9262_v39  ;;  %v9371_v39 = vld [vmem:[%s16130_s2 + $0xb70] sm:$0xf0] }
 0x2b0   :  { %v3755_v0 = vpop.f32.mrf.mxu0  ;;  %v8114_v41 = vor.u32 %v9986_v11, %v8113_v25  ;;  %4116 = vmatpush.bf16.msra.mxu0 %v7986_v31  ;;  %v9950_v31 = vld [vmem:[%s16130_s2 + $0x74] sm:$0xf0]  ;;  %v16466_v25 = vld [vmem:[#allocation62_spill] sm:$0xff]  ;;  %v9374_v11 = vor.u32 %v10299_v2, %v9371_v39  ;;  %v9227_v39 = vld [vmem:[%s16130_s2 + $0xa50] sm:$0xf0] }
 0x2b1   :  { %v3704_v19 = vadd.f32 %v3703_v46, %v3655_v27  ;;  %v3804_v23 = vpop.f32.mrf.mxu1  ;;  %4067 = vmatpush.bf16.msra.mxu3 %v9390_v59  ;;  %v16465_v27 = vld [vmem:[#allocation61_spill] sm:$0xff]  ;;  %v9246_v46 = vor.u32 %v10267_v54, %v9243_v55  ;;  %v7969_v59 = vld [vmem:[%s16130_s2 + $0x68] sm:$0xf]  ;;  %v10263_v2 = vld [vmem:[%s16130_s2 + $0xa44] sm:$0xf] }
 0x2b2   :  { %v8097_v54 = vld [vmem:[%s16130_s2 + $0x168] sm:$0xf]  ;;  %v9982_v55 = vld [vmem:[%s16130_s2 + $0x174] sm:$0xf0]  ;;  %4165 = vmatpush.bf16.msra.mxu1 %v8114_v41 }
 0x2b3   :  { %v3753_v26 = vadd.f32 %v3752_v16, %v3704_v19  ;;  %3852 = vmatmul.bf16.gmra.mxu2 %v16464_v48  ;;  %3950 = vmatmul.bf16.gmra.mxu0 %v16465_v27  ;;  %v16467_v16 = vld [vmem:[#allocation63_spill] sm:$0xff]  ;;  %v7970_v19 = vor.u32 %v9950_v31, %v7969_v59  ;;  %v8098_v48 = vor.u32 %v9982_v55, %v8097_v54  ;;  %v10295_v59 = vld [vmem:[%s16130_s2 + $0xb44] sm:$0xf] }
 0x2b4   :  { %3901 = vmatmul.bf16.gmra.mxu3 %v16466_v25  ;;  %3999 = vmatmul.bf16.gmra.mxu1 %v16467_v16  ;;  %v7953_v31 = vld [vmem:[%s16130_s2 + $0x48] sm:$0xf] }
 0x2b5   :  { %v12885_v27 = vadd.f32 %v3801_v18, %v3753_v26  ;;  %4019 = vmatpush.bf16.msra.mxu2 %v9246_v46  ;;  %4068 = vmatpush.bf16.msra.mxu3 %v9374_v11  ;;  %v9230_v26 = vor.u32 %v10263_v2, %v9227_v39  ;;  %v9355_v46 = vld [vmem:[%s16130_s2 + $0xb50] sm:$0xf0]  ;;  %v9946_v11 = vld [vmem:[%s16130_s2 + $0x54] sm:$0xf0] }
 0x2b6   :  { %v3657_v63 = vpop.f32.mrf.mxu2  ;;  %4117 = vmatpush.bf16.msra.mxu0 %v7970_v19  ;;  %v9358_v54 = vor.u32 %v10295_v59, %v9355_v46  ;;  %v7954_v55 = vor.u32 %v9946_v11, %v7953_v31  ;;  %4166 = vmatpush.bf16.msra.mxu1 %v8098_v48  ;;  %v10259_v59 = vld [vmem:[%s16130_s2 + $0xa24] sm:$0xf]  ;;  %v9211_v46 = vld [vmem:[%s16130_s2 + $0xa30] sm:$0xf0] }
 0x2b7   :  { %v3658_v18 = vadd.f32 %v3657_v63, %v12567_v8  ;;  %v3706_v41 = vpop.f32.mrf.mxu3  ;;  %v8081_v8 = vld [vmem:[%s16130_s2 + $0x148] sm:$0xf]  ;;  %v9978_v63 = vld [vmem:[%s16130_s2 + $0x154] sm:$0xf0]  ;;  %v10291_v31 = vld [vmem:[%s16130_s2 + $0xb24] sm:$0xf] }
 0x2b8   :  { %v3757_v19 = vpop.f32.mrf.mxu0  ;;  %v8082_v16 = vor.u32 %v9978_v63, %v8081_v8  ;;  %v9339_v48 = vld [vmem:[%s16130_s2 + $0xb30] sm:$0xf0]  ;;  %v8065_v8 = vld [vmem:[%s16130_s2 + $0x128] sm:$0xf] }
 0x2b9   :  { %v3707_v2 = vadd.f32 %v3706_v41, %v3658_v18  ;;  %v3806_v39 = vpop.f32.mrf.mxu1  ;;  %4020 = vmatpush.bf16.msra.mxu2 %v9230_v26  ;;  %4069 = vmatpush.bf16.msra.mxu3 %v9358_v54  ;;  %v9214_v18 = vor.u32 %v10259_v59, %v9211_v46  ;;  %v7937_v41 = vld [vmem:[%s16130_s2 + $0x28] sm:$0xf]  ;;  %v9942_v26 = vld [vmem:[%s16130_s2 + $0x34] sm:$0xf0]  ;;  %v9342_v54 = vor.u32 %v10291_v31, %v9339_v48  ;;  %v10255_v46 = vld [vmem:[%s16130_s2 + $0xa04] sm:$0xf] }
 0x2ba   :  { %4118 = vmatpush.bf16.msra.mxu0 %v7954_v55  ;;  %v7938_v55 = vor.u32 %v9942_v26, %v7937_v41  ;;  %4167 = vmatpush.bf16.msra.mxu1 %v8082_v16  ;;  %v9195_v31 = vld [vmem:[%s16130_s2 + $0xa10] sm:$0xf0]  ;;  %v10287_v48 = vld [vmem:[%s16130_s2 + $0xb04] sm:$0xf]  ;;  %v7921_v41 = vld [vmem:[%s16130_s2 + $0x8] sm:$0xf] }
 0x2bb   :  { %v3756_v11 = vadd.f32 %v3755_v0, %v3707_v2  ;;  %v9974_v0 = vld [vmem:[%s16130_s2 + $0x134] sm:$0xf0] }
 0x2bc   :  { %v8066_v2 = vor.u32 %v9974_v0, %v8065_v8  ;;  %v9938_v26 = vld [vmem:[%s16130_s2 + $0x14] sm:$0xf0] }
 0x2bd   :  { %v12936_v63 = vadd.f32 %v3804_v23, %v3756_v11  ;;  %4021 = vmatpush.bf16.msra.mxu2 %v9214_v18  ;;  %4070 = vmatpush.bf16.msra.mxu3 %v9342_v54  ;;  %v9198_v11 = vor.u32 %v10255_v46, %v9195_v31  ;;  %v9323_v18 = vld [vmem:[%s16130_s2 + $0xb10] sm:$0xf0]  ;;  %v7922_v8 = vor.u32 %v9938_v26, %v7921_v41  ;;  %v9970_v0 = vld [vmem:[%s16130_s2 + $0x114] sm:$0xf0] }
 0x2be   :  { %v3659_v59 = vpop.f32.mrf.mxu2  ;;  %4119 = vmatpush.bf16.msra.mxu0 %v7938_v55  ;;  %v9326_v55 = vor.u32 %v10287_v48, %v9323_v18  ;;  %4168 = vmatpush.bf16.msra.mxu1 %v8066_v2 }
 0x2bf   :  { %v3660_v23 = vadd.f32 %v3659_v59, %v12635_v4  ;;  %v3708_v16 = vpop.f32.mrf.mxu3  ;;  %v8049_v4 = vld [vmem:[%s16130_s2 + $0x108] sm:$0xf] }
 0x2c0   :  { %v3760_v54 = vpop.f32.mrf.mxu0  ;;  %v8050_v31 = vor.u32 %v9970_v0, %v8049_v4 }
 0x2c1   :  { %v3709_v59 = vadd.f32 %v3708_v16, %v3660_v23  ;;  %v3809_v46 = vpop.f32.mrf.mxu1  ;;  %4022 = vmatpush.bf16.msra.mxu2 %v9198_v11  ;;  %4071 = vmatpush.bf16.msra.mxu3 %v9326_v55 }
 0x2c2   :  { %4120 = vmatpush.bf16.msra.mxu0 %v7922_v8  ;;  %4169 = vmatpush.bf16.msra.mxu1 %v8050_v31 }
 0x2c3   :  { %v3758_v25 = vadd.f32 %v3757_v19, %v3709_v59  ;;  %3857 = vmatmul.bf16.gmra.mxu2 %v11911_v7  ;;  %3955 = vmatmul.bf16.gmra.mxu0 %v11913_v12 }
 0x2c4   :  { %3906 = vmatmul.bf16.gmra.mxu3 %v11924_v38  ;;  %4004 = vmatmul.bf16.gmra.mxu1 %v11926_v33 }
 0x2c5   :  { %v12967_v48 = vadd.f32 %v3806_v39, %v3758_v25 }
 0x2c6   :  { %v3662_v18 = vpop.f32.mrf.mxu2 }
 0x2c7   :  { %v3663_v23 = vadd.f32 %v3662_v18, %v12679_v35  ;;  %v3711_v2 = vpop.f32.mrf.mxu3 }
 0x2c8   :  { %v3762_v16 = vpop.f32.mrf.mxu0 }
 0x2c9   :  { %v3712_v11 = vadd.f32 %v3711_v2, %v3663_v23  ;;  %v3811_v41 = vpop.f32.mrf.mxu1 }
 0x2cb   :  { %v3761_v26 = vadd.f32 %v3760_v54, %v3712_v11 }
 0x2cd   :  { %v12970_v19 = vadd.f32 %v3809_v46, %v3761_v26 }
 0x2ce   :  { %v3664_v55 = vpop.f32.mrf.mxu2 }
 0x2cf   :  { %v3665_v8 = vadd.f32 %v3664_v55, %v12690_v53  ;;  %v3713_v4 = vpop.f32.mrf.mxu3 }
 0x2d0   :  { %v3765_v0 = vpop.f32.mrf.mxu0 }
 0x2d1   :  { %v3714_v59 = vadd.f32 %v3713_v4, %v3665_v8  ;;  %v3814_v33 = vpop.f32.mrf.mxu1 }
 0x2d3   :  { %v3763_v25 = vadd.f32 %v3762_v16, %v3714_v59  ;;  %3862 = vmatmul.bf16.gmra.mxu2 %v11970_v34  ;;  %3960 = vmatmul.bf16.gmra.mxu0 %v11972_v40 }
 0x2d4   :  { %3911 = vmatmul.bf16.gmra.mxu3 %v11974_v37  ;;  %4009 = vmatmul.bf16.gmra.mxu1 %v11976_v13 }
 0x2d5   :  { %v12977_v35 = vadd.f32 %v3811_v41, %v3763_v25 }
 0x2d6   :  { %v3667_v39 = vpop.f32.mrf.mxu2 }
 0x2d7   :  { %v3668_v54 = vadd.f32 %v3667_v39, %v12695_v42  ;;  %v3716_v46 = vpop.f32.mrf.mxu3 }
 0x2d8   :  { %v3767_v53 = vpop.f32.mrf.mxu0 }
 0x2d9   :  { %v3717_v31 = vadd.f32 %v3716_v46, %v3668_v54  ;;  %v3816_v18 = vpop.f32.mrf.mxu1 }
 0x2db   :  { %v3766_v23 = vadd.f32 %v3765_v0, %v3717_v31 }
 0x2dd   :  { %v12980_v2 = vadd.f32 %v3814_v33, %v3766_v23 }
 0x2de   :  { %v3669_v16 = vpop.f32.mrf.mxu2 }
 0x2df   :  { %v3670_v11 = vadd.f32 %v3669_v16, %v12706_v6  ;;  %v3718_v26 = vpop.f32.mrf.mxu3 }
 0x2e0   :  { %v3926_v55 = vpop.f32.mrf.mxu0 }
 0x2e1   :  { %v3719_v8 = vadd.f32 %v3718_v26, %v3670_v11  ;;  %v3975_v4 = vpop.f32.mrf.mxu1 }
 0x2e3   :  { %v3768_v59 = vadd.f32 %v3767_v53, %v3719_v8  ;;  %4023 = vmatmul.bf16.vlgmr.msra.gmra.mxu2 %v12000_v14  ;;  %4121 = vmatmul.bf16.vlgmr.msra.gmra.mxu0 %v10623_v56 }
 0x2e4   :  { %4072 = vmatmul.bf16.vlgmr.msra.gmra.mxu3 %v12002_v36  ;;  %4170 = vmatmul.bf16.vlgmr.msra.gmra.mxu1 %v10627_v58 }
 0x2e5   :  { %v12987_v42 = vadd.f32 %v3816_v18, %v3768_v59 }
 0x2e6   :  { %v3828_v33 = vpop.f32.mrf.mxu2 }
 0x2e7   :  { %v3829_v41 = vadd.f32 %v3828_v33, %v12718_v15  ;;  %v3877_v0 = vpop.f32.mrf.mxu3 }
 0x2e8   :  { %v3928_v6 = vpop.f32.mrf.mxu0 }
 0x2e9   :  { %v3878_v25 = vadd.f32 %v3877_v0, %v3829_v41  ;;  %v3977_v39 = vpop.f32.mrf.mxu1 }
 0x2eb   :  { %v3927_v54 = vadd.f32 %v3926_v55, %v3878_v25 }
 0x2ed   :  { %v12990_v46 = vadd.f32 %v3975_v4, %v3927_v54 }
 0x2ee   :  { %v3830_v53 = vpop.f32.mrf.mxu2 }
 0x2ef   :  { %v3831_v31 = vadd.f32 %v3830_v53, %v12725_v62  ;;  %v3879_v23 = vpop.f32.mrf.mxu3 }
 0x2f0   :  { %v3931_v16 = vpop.f32.mrf.mxu0 }
 0x2f1   :  { %v3880_v11 = vadd.f32 %v3879_v23, %v3831_v31  ;;  %v3980_v26 = vpop.f32.mrf.mxu1 }
 0x2f3   :  { %v3929_v8 = vadd.f32 %v3928_v6, %v3880_v11  ;;  %4028 = vmatmul.bf16.gmra.mxu2 %v12026_v30  ;;  %4126 = vmatmul.bf16.gmra.mxu0 %v10749_v47 }
 0x2f4   :  { %4077 = vmatmul.bf16.gmra.mxu3 %v12028_v5  ;;  %4175 = vmatmul.bf16.gmra.mxu1 %v10759_v51 }
 0x2f5   :  { %v12997_v15 = vadd.f32 %v3977_v39, %v3929_v8 }
 0x2f6   :  { %v3833_v18 = vpop.f32.mrf.mxu2 }
 0x2f7   :  { %v3834_v55 = vadd.f32 %v3833_v18, %v12728_v61  ;;  %v3882_v4 = vpop.f32.mrf.mxu3  ;;  %v16468_v61 = vld [vmem:[#allocation6_spill] sm:$0xff] }
 0x2f8   :  { %v3933_v62 = vpop.f32.mrf.mxu0 }
 0x2f9   :  { %v3883_v59 = vadd.f32 %v3882_v4, %v3834_v55  ;;  %v3982_v33 = vpop.f32.mrf.mxu1 }
 0x2fb   :  { %v3932_v41 = vadd.f32 %v3931_v16, %v3883_v59 }
 0x2fd   :  { %v13000_v0 = vadd.f32 %v3980_v26, %v3932_v41 }
 0x2fe   :  { %v3835_v6 = vpop.f32.mrf.mxu2 }
 0x2ff   :  { %v3836_v25 = vadd.f32 %v3835_v6, %v12735_v3  ;;  %v3884_v54 = vpop.f32.mrf.mxu3 }
 0x300   :  { %v3936_v53 = vpop.f32.mrf.mxu0 }
 0x301   :  { %v3885_v31 = vadd.f32 %v3884_v54, %v3836_v25  ;;  %v3985_v23 = vpop.f32.mrf.mxu1 }
 0x303   :  { %v3934_v11 = vadd.f32 %v3933_v62, %v3885_v31  ;;  %4033 = vmatmul.bf16.gmra.mxu2 %v12052_v17  ;;  %4131 = vmatmul.bf16.gmra.mxu0 %v10881_v49 }
 0x304   :  { %4082 = vmatmul.bf16.gmra.mxu3 %v12054_v29  ;;  %4180 = vmatmul.bf16.gmra.mxu1 %v16468_v61 }
 0x305   :  { %v13007_v39 = vadd.f32 %v3982_v33, %v3934_v11  ;;  %v16469_v33 = vld [vmem:[#allocation66_spill] sm:$0xff]  ;;  %v16470_v11 = vld [vmem:[#allocation8_spill] sm:$0xff] }
 0x306   :  { %v3838_v16 = vpop.f32.mrf.mxu2 }
 0x307   :  { %v3839_v26 = vadd.f32 %v3838_v16, %v12738_v32  ;;  %v3887_v8 = vpop.f32.mrf.mxu3  ;;  %v16471_v32 = vld [vmem:[#allocation67_spill] sm:$0xff]  ;;  %v16472_v16 = vld [vmem:[#allocation9_spill] sm:$0xff] }
 0x308   :  { %v3938_v3 = vpop.f32.mrf.mxu0 }
 0x309   :  { %v3888_v18 = vadd.f32 %v3887_v8, %v3839_v26  ;;  %v3987_v55 = vpop.f32.mrf.mxu1 }
 0x30b   :  { %v3937_v4 = vadd.f32 %v3936_v53, %v3888_v18 }
 0x30d   :  { %v13010_v59 = vadd.f32 %v3985_v23, %v3937_v4 }
 0x30e   :  { %v3840_v62 = vpop.f32.mrf.mxu2 }
 0x30f   :  { %v3841_v41 = vadd.f32 %v3840_v62, %v12745_v10  ;;  %v3889_v6 = vpop.f32.mrf.mxu3 }
 0x310   :  { %v3941_v25 = vpop.f32.mrf.mxu0 }
 0x311   :  { %v3890_v54 = vadd.f32 %v3889_v6, %v3841_v41  ;;  %v3990_v31 = vpop.f32.mrf.mxu1 }
 0x313   :  { %v3939_v61 = vadd.f32 %v3938_v3, %v3890_v54  ;;  %4038 = vmatmul.bf16.gmra.mxu2 %v16469_v33  ;;  %4136 = vmatmul.bf16.gmra.mxu0 %v16470_v11 }
 0x314   :  { %4087 = vmatmul.bf16.gmra.mxu3 %v16471_v32  ;;  %4185 = vmatmul.bf16.gmra.mxu1 %v16472_v16 }
 0x315   :  { %v13017_v26 = vadd.f32 %v3987_v55, %v3939_v61  ;;  %v8289_v61 = vld [vmem:[%s16130_s2 + $0x2e8] sm:$0xf] }
 0x316   :  { %v3843_v53 = vpop.f32.mrf.mxu2  ;;  %v8417_v55 = vld [vmem:[%s16130_s2 + $0x3e8] sm:$0xf] }
 0x317   :  { %v3844_v23 = vadd.f32 %v3843_v53, %v12748_v24  ;;  %v3892_v8 = vpop.f32.mrf.mxu3  ;;  %v10030_v24 = vld [vmem:[%s16130_s2 + $0x2f4] sm:$0xf0] }
 0x318   :  { %v3943_v10 = vpop.f32.mrf.mxu0  ;;  %v8290_v53 = vor.u32 %v10030_v24, %v8289_v61 }
 0x319   :  { %v3893_v18 = vadd.f32 %v3892_v8, %v3844_v23  ;;  %v3992_v4 = vpop.f32.mrf.mxu1  ;;  %v10062_v23 = vld [vmem:[%s16130_s2 + $0x3f4] sm:$0xf0]  ;;  %v8545_v8 = vld [vmem:[%s16130_s2 + $0x4e8] sm:$0xf] }
 0x31a   :  { %4211 = vmatpush.bf16.msrb.mxu2 %v8290_v53 }
 0x31b   :  { %v3942_v62 = vadd.f32 %v3941_v25, %v3893_v18  ;;  %v10094_v18 = vld [vmem:[%s16130_s2 + $0x4f4] sm:$0xf0] }
 0x31d   :  { %v13020_v41 = vadd.f32 %v3990_v31, %v3942_v62  ;;  %v16473_v31 = vld [vmem:[#allocation68_spill] sm:$0xff]  ;;  %v16475_v62 = vld [vmem:[#allocation69_spill] sm:$0xff] }
 0x31e   :  { %v3845_v3 = vpop.f32.mrf.mxu2 }
 0x31f   :  { %v3846_v6 = vadd.f32 %v3845_v3, %v12779_v1  ;;  %v3894_v54 = vpop.f32.mrf.mxu3  ;;  %v16474_v1 = vld [vmem:[#allocation2_spill] sm:$0xff]  ;;  %v8546_v3 = vor.u32 %v10094_v18, %v8545_v8  ;;  %v8401_v8 = vld [vmem:[%s16130_s2 + $0x3c8] sm:$0xf]  ;;  %v10058_v18 = vld [vmem:[%s16130_s2 + $0x3d4] sm:$0xf0] }
 0x320   :  { %v3946_v11 = vpop.f32.mrf.mxu0 }
 0x321   :  { %v3895_v32 = vadd.f32 %v3894_v54, %v3846_v6  ;;  %v3995_v33 = vpop.f32.mrf.mxu1  ;;  %v8673_v6 = vld [vmem:[%s16130_s2 + $0x5e8] sm:$0xf]  ;;  %v10126_v54 = vld [vmem:[%s16130_s2 + $0x5f4] sm:$0xf0]  ;;  %4309 = vmatpush.bf16.msrb.mxu0 %v8546_v3 }
 0x322   :  { %v8674_v24 = vor.u32 %v10126_v54, %v8673_v6  ;;  %v10090_v3 = vld [vmem:[%s16130_s2 + $0x4d4] sm:$0xf0]  ;;  %v8402_v54 = vor.u32 %v10058_v18, %v8401_v8  ;;  %v8385_v18 = vld [vmem:[%s16130_s2 + $0x3a8] sm:$0xf] }
 0x323   :  { %v3944_v25 = vadd.f32 %v3943_v10, %v3895_v32  ;;  %4043 = vmatmul.bf16.gmra.mxu2 %v16473_v31  ;;  %4141 = vmatmul.bf16.gmra.mxu0 %v16474_v1  ;;  %v16476_v32 = vld [vmem:[#allocation3_spill] sm:$0xff]  ;;  %v8418_v10 = vor.u32 %v10062_v23, %v8417_v55  ;;  %v10026_v23 = vld [vmem:[%s16130_s2 + $0x2d4] sm:$0xf0] }
 0x324   :  { %4092 = vmatmul.bf16.gmra.mxu3 %v16475_v62  ;;  %4190 = vmatmul.bf16.gmra.mxu1 %v16476_v32  ;;  %v8273_v55 = vld [vmem:[%s16130_s2 + $0x2c8] sm:$0xf]  ;;  %v10022_v8 = vld [vmem:[%s16130_s2 + $0x2b4] sm:$0xf0] }
 0x325   :  { %v13051_v61 = vadd.f32 %v3992_v4, %v3944_v25  ;;  %4260 = vmatpush.bf16.msrb.mxu3 %v8418_v10  ;;  %4358 = vmatpush.bf16.msrb.mxu1 %v8674_v24  ;;  %v8274_v53 = vor.u32 %v10026_v23, %v8273_v55  ;;  %v8529_v10 = vld [vmem:[%s16130_s2 + $0x4c8] sm:$0xf] }
 0x326   :  { %v3848_v1 = vpop.f32.mrf.mxu2  ;;  %v8530_v32 = vor.u32 %v10090_v3, %v8529_v10  ;;  %v8257_v62 = vld [vmem:[%s16130_s2 + $0x2a8] sm:$0xf] }
 0x327   :  { %v3849_v4 = vadd.f32 %v3848_v1, %v12830_v57  ;;  %v3897_v25 = vpop.f32.mrf.mxu3  ;;  %v8657_v57 = vld [vmem:[%s16130_s2 + $0x5c8] sm:$0xf]  ;;  %v10122_v1 = vld [vmem:[%s16130_s2 + $0x5d4] sm:$0xf0]  ;;  %4212 = vmatpush.bf16.msrb.mxu2 %v8274_v53 }
 0x328   :  { %v3948_v6 = vpop.f32.mrf.mxu0  ;;  %v8658_v23 = vor.u32 %v10122_v1, %v8657_v57  ;;  %4310 = vmatpush.bf16.msrb.mxu0 %v8530_v32  ;;  %v8513_v32 = vld [vmem:[%s16130_s2 + $0x4a8] sm:$0xf]  ;;  %v10086_v53 = vld [vmem:[%s16130_s2 + $0x4b4] sm:$0xf0] }
 0x329   :  { %v3898_v24 = vadd.f32 %v3897_v25, %v3849_v4  ;;  %v3997_v55 = vpop.f32.mrf.mxu1  ;;  %4261 = vmatpush.bf16.msrb.mxu3 %v8402_v54  ;;  %v8258_v4 = vor.u32 %v10022_v8, %v8257_v62  ;;  %v10054_v25 = vld [vmem:[%s16130_s2 + $0x3b4] sm:$0xf0]  ;;  %v8514_v54 = vor.u32 %v10086_v53, %v8513_v32  ;;  %v8497_v32 = vld [vmem:[%s16130_s2 + $0x488] sm:$0xf] }
 0x32a   :  { %4359 = vmatpush.bf16.msrb.mxu1 %v8658_v23  ;;  %v8386_v3 = vor.u32 %v10054_v25, %v8385_v18  ;;  %v10118_v62 = vld [vmem:[%s16130_s2 + $0x5b4] sm:$0xf0]  ;;  %v8241_v23 = vld [vmem:[%s16130_s2 + $0x288] sm:$0xf] }
 0x32b   :  { %v3947_v10 = vadd.f32 %v3946_v11, %v3898_v24  ;;  %v8641_v11 = vld [vmem:[%s16130_s2 + $0x5a8] sm:$0xf]  ;;  %4213 = vmatpush.bf16.msrb.mxu2 %v8258_v4  ;;  %v10018_v8 = vld [vmem:[%s16130_s2 + $0x294] sm:$0xf0] }
 0x32c   :  { %v8642_v1 = vor.u32 %v10118_v62, %v8641_v11  ;;  %4311 = vmatpush.bf16.msrb.mxu0 %v8514_v54  ;;  %v8369_v18 = vld [vmem:[%s16130_s2 + $0x388] sm:$0xf]  ;;  %v8242_v4 = vor.u32 %v10018_v8, %v8241_v23  ;;  %v10050_v25 = vld [vmem:[%s16130_s2 + $0x394] sm:$0xf0] }
 0x32d   :  { %v13102_v57 = vadd.f32 %v3995_v33, %v3947_v10  ;;  %4262 = vmatpush.bf16.msrb.mxu3 %v8386_v3  ;;  %v10082_v53 = vld [vmem:[%s16130_s2 + $0x494] sm:$0xf0]  ;;  %v8370_v54 = vor.u32 %v10050_v25, %v8369_v18  ;;  %v8225_v8 = vld [vmem:[%s16130_s2 + $0x268] sm:$0xf] }
 0x32e   :  { %v3850_v24 = vpop.f32.mrf.mxu2  ;;  %4360 = vmatpush.bf16.msrb.mxu1 %v8642_v1  ;;  %v8498_v11 = vor.u32 %v10082_v53, %v8497_v32  ;;  %v10114_v62 = vld [vmem:[%s16130_s2 + $0x594] sm:$0xf0]  ;;  %v8353_v25 = vld [vmem:[%s16130_s2 + $0x368] sm:$0xf]  ;;  %v16477_v53 = vld [vmem:[#allocation70_spill] sm:$0xff] }
 0x32f   :  { %v3851_v33 = vadd.f32 %v3850_v24, %v12885_v27  ;;  %v3899_v10 = vpop.f32.mrf.mxu3  ;;  %v8625_v27 = vld [vmem:[%s16130_s2 + $0x588] sm:$0xf]  ;;  %4214 = vmatpush.bf16.msrb.mxu2 %v8242_v4  ;;  %v10014_v18 = vld [vmem:[%s16130_s2 + $0x274] sm:$0xf0] }
 0x330   :  { %v3951_v3 = vpop.f32.mrf.mxu0  ;;  %v8626_v23 = vor.u32 %v10114_v62, %v8625_v27  ;;  %4312 = vmatpush.bf16.msrb.mxu0 %v8498_v11  ;;  %v10046_v4 = vld [vmem:[%s16130_s2 + $0x374] sm:$0xf0]  ;;  %v16479_v27 = vld [vmem:[#allocation71_spill] sm:$0xff] }
 0x331   :  { %v3900_v1 = vadd.f32 %v3899_v10, %v3851_v33  ;;  %v4000_v24 = vpop.f32.mrf.mxu1  ;;  %4263 = vmatpush.bf16.msrb.mxu3 %v8370_v54  ;;  %v16478_v33 = vld [vmem:[#allocation4_spill] sm:$0xff]  ;;  %v8226_v10 = vor.u32 %v10014_v18, %v8225_v8  ;;  %v8481_v54 = vld [vmem:[%s16130_s2 + $0x468] sm:$0xf]  ;;  %v10078_v11 = vld [vmem:[%s16130_s2 + $0x474] sm:$0xf0]  ;;  %v8354_v62 = vor.u32 %v10046_v4, %v8353_v25 }
 0x332   :  { %v8609_v8 = vld [vmem:[%s16130_s2 + $0x568] sm:$0xf]  ;;  %v10110_v18 = vld [vmem:[%s16130_s2 + $0x574] sm:$0xf0]  ;;  %4361 = vmatpush.bf16.msrb.mxu1 %v8626_v23 }
 0x333   :  { %v3949_v32 = vadd.f32 %v3948_v6, %v3900_v1  ;;  %4048 = vmatmul.bf16.gmra.mxu2 %v16477_v53  ;;  %4146 = vmatmul.bf16.gmra.mxu0 %v16478_v33  ;;  %v16480_v6 = vld [vmem:[#allocation5_spill] sm:$0xff]  ;;  %v8482_v1 = vor.u32 %v10078_v11, %v8481_v54  ;;  %v8610_v53 = vor.u32 %v10110_v18, %v8609_v8  ;;  %v8209_v25 = vld [vmem:[%s16130_s2 + $0x248] sm:$0xf] }
 0x334   :  { %4097 = vmatmul.bf16.gmra.mxu3 %v16479_v27  ;;  %4195 = vmatmul.bf16.gmra.mxu1 %v16480_v6  ;;  %v10010_v4 = vld [vmem:[%s16130_s2 + $0x254] sm:$0xf0]  ;;  %v8337_v54 = vld [vmem:[%s16130_s2 + $0x348] sm:$0xf] }
 0x335   :  { %v13157_v33 = vadd.f32 %v3997_v55, %v3949_v32  ;;  %4215 = vmatpush.bf16.msrb.mxu2 %v8226_v10  ;;  %4264 = vmatpush.bf16.msrb.mxu3 %v8354_v62  ;;  %v8210_v32 = vor.u32 %v10010_v4, %v8209_v25  ;;  %v10042_v10 = vld [vmem:[%s16130_s2 + $0x354] sm:$0xf0]  ;;  %v8465_v11 = vld [vmem:[%s16130_s2 + $0x448] sm:$0xf] }
 0x336   :  { %v3853_v31 = vpop.f32.mrf.mxu2  ;;  %4313 = vmatpush.bf16.msrb.mxu0 %v8482_v1  ;;  %v10074_v62 = vld [vmem:[%s16130_s2 + $0x454] sm:$0xf0]  ;;  %v8338_v8 = vor.u32 %v10042_v10, %v8337_v54  ;;  %4362 = vmatpush.bf16.msrb.mxu1 %v8610_v53  ;;  %v8193_v54 = vld [vmem:[%s16130_s2 + $0x228] sm:$0xf] }
 0x337   :  { %v3854_v55 = vadd.f32 %v3853_v31, %v12936_v63  ;;  %v3902_v23 = vpop.f32.mrf.mxu3  ;;  %v8466_v18 = vor.u32 %v10074_v62, %v8465_v11  ;;  %v8593_v63 = vld [vmem:[%s16130_s2 + $0x548] sm:$0xf]  ;;  %v10106_v31 = vld [vmem:[%s16130_s2 + $0x554] sm:$0xf0] }
 0x338   :  { %v3953_v1 = vpop.f32.mrf.mxu0  ;;  %v8594_v6 = vor.u32 %v10106_v31, %v8593_v63  ;;  %v10006_v10 = vld [vmem:[%s16130_s2 + $0x234] sm:$0xf0]  ;;  %v8321_v11 = vld [vmem:[%s16130_s2 + $0x328] sm:$0xf] }
 0x339   :  { %v3903_v25 = vadd.f32 %v3902_v23, %v3854_v55  ;;  %v4002_v4 = vpop.f32.mrf.mxu1  ;;  %4216 = vmatpush.bf16.msrb.mxu2 %v8210_v32  ;;  %4265 = vmatpush.bf16.msrb.mxu3 %v8338_v8  ;;  %v8194_v55 = vor.u32 %v10006_v10, %v8193_v54  ;;  %v10038_v53 = vld [vmem:[%s16130_s2 + $0x334] sm:$0xf0]  ;;  %v8449_v23 = vld [vmem:[%s16130_s2 + $0x428] sm:$0xf] }
 0x33a   :  { %4314 = vmatpush.bf16.msrb.mxu0 %v8466_v18  ;;  %v10070_v32 = vld [vmem:[%s16130_s2 + $0x434] sm:$0xf0]  ;;  %v8322_v8 = vor.u32 %v10038_v53, %v8321_v11  ;;  %v8577_v63 = vld [vmem:[%s16130_s2 + $0x528] sm:$0xf]  ;;  %4363 = vmatpush.bf16.msrb.mxu1 %v8594_v6 }
 0x33b   :  { %v3952_v62 = vadd.f32 %v3951_v3, %v3903_v25  ;;  %v8450_v18 = vor.u32 %v10070_v32, %v8449_v23  ;;  %v10102_v3 = vld [vmem:[%s16130_s2 + $0x534] sm:$0xf0]  ;;  %v8177_v10 = vld [vmem:[%s16130_s2 + $0x208] sm:$0xf] }
 0x33c   :  { %v8578_v25 = vor.u32 %v10102_v3, %v8577_v63  ;;  %v10002_v11 = vld [vmem:[%s16130_s2 + $0x214] sm:$0xf0]  ;;  %v8305_v53 = vld [vmem:[%s16130_s2 + $0x308] sm:$0xf] }
 0x33d   :  { %v13208_v31 = vadd.f32 %v4000_v24, %v3952_v62  ;;  %4217 = vmatpush.bf16.msrb.mxu2 %v8194_v55  ;;  %4266 = vmatpush.bf16.msrb.mxu3 %v8322_v8  ;;  %v8178_v62 = vor.u32 %v10002_v11, %v8177_v10  ;;  %v10034_v55 = vld [vmem:[%s16130_s2 + $0x314] sm:$0xf0]  ;;  %v8433_v23 = vld [vmem:[%s16130_s2 + $0x408] sm:$0xf] }
 0x33e   :  { %v3855_v54 = vpop.f32.mrf.mxu2  ;;  %4315 = vmatpush.bf16.msrb.mxu0 %v8450_v18  ;;  %v10066_v32 = vld [vmem:[%s16130_s2 + $0x414] sm:$0xf0]  ;;  %v8306_v18 = vor.u32 %v10034_v55, %v8305_v53  ;;  %4364 = vmatpush.bf16.msrb.mxu1 %v8578_v25 }
 0x33f   :  { %v3856_v24 = vadd.f32 %v3855_v54, %v12967_v48  ;;  %v3904_v6 = vpop.f32.mrf.mxu3  ;;  %v8434_v63 = vor.u32 %v10066_v32, %v8433_v23  ;;  %v8561_v48 = vld [vmem:[%s16130_s2 + $0x508] sm:$0xf]  ;;  %v10098_v3 = vld [vmem:[%s16130_s2 + $0x514] sm:$0xf0] }
 0x340   :  { %v3956_v8 = vpop.f32.mrf.mxu0  ;;  %v8562_v11 = vor.u32 %v10098_v3, %v8561_v48 }
 0x341   :  { %v3905_v54 = vadd.f32 %v3904_v6, %v3856_v24  ;;  %v4005_v10 = vpop.f32.mrf.mxu1  ;;  %4218 = vmatpush.bf16.msrb.mxu2 %v8178_v62  ;;  %4267 = vmatpush.bf16.msrb.mxu3 %v8306_v18 }
 0x342   :  { %4316 = vmatpush.bf16.msrb.mxu0 %v8434_v63  ;;  %4365 = vmatpush.bf16.msrb.mxu1 %v8562_v11 }
 0x343   :  { %v3954_v27 = vadd.f32 %v3953_v1, %v3905_v54  ;;  %4053 = vmatmul.bf16.gmra.mxu2 %v12336_v44  ;;  %4151 = vmatmul.bf16.gmra.mxu0 %v10883_v50 }
 0x344   :  { %4102 = vmatmul.bf16.gmra.mxu3 %v12347_v45  ;;  %4200 = vmatmul.bf16.gmra.mxu1 %v10893_v60 }
 0x345   :  { %v13239_v53 = vadd.f32 %v4002_v4, %v3954_v27 }
 0x346   :  { %v3858_v55 = vpop.f32.mrf.mxu2 }
 0x347   :  { %v3859_v24 = vadd.f32 %v3858_v55, %v12970_v19  ;;  %v3907_v25 = vpop.f32.mrf.mxu3  ;;  %v16481_v19 = vld [vmem:[#allocation10_spill] sm:$0xff] }
 0x348   :  { %v3958_v6 = vpop.f32.mrf.mxu0 }
 0x349   :  { %v3908_v62 = vadd.f32 %v3907_v25, %v3859_v24  ;;  %v4007_v23 = vpop.f32.mrf.mxu1 }
 0x34b   :  { %v3957_v32 = vadd.f32 %v3956_v8, %v3908_v62 }
 0x34d   :  { %v13242_v1 = vadd.f32 %v4005_v10, %v3957_v32 }
 0x34e   :  { %v3860_v18 = vpop.f32.mrf.mxu2 }
 0x34f   :  { %v3861_v63 = vadd.f32 %v3860_v18, %v12977_v35  ;;  %v3909_v48 = vpop.f32.mrf.mxu3 }
 0x350   :  { %v3961_v3 = vpop.f32.mrf.mxu0 }
 0x351   :  { %v3910_v54 = vadd.f32 %v3909_v48, %v3861_v63  ;;  %v4010_v60 = vpop.f32.mrf.mxu1 }
 0x353   :  { %v3959_v27 = vadd.f32 %v3958_v6, %v3910_v54  ;;  %4058 = vmatmul.bf16.gmra.mxu2 %v12377_v52  ;;  %4156 = vmatmul.bf16.gmra.mxu0 %v10925_v9 }
 0x354   :  { %4107 = vmatmul.bf16.gmra.mxu3 %v12379_v28  ;;  %4205 = vmatmul.bf16.gmra.mxu1 %v16481_v19 }
 0x355   :  { %v13249_v4 = vadd.f32 %v4007_v23, %v3959_v27 }
 0x356   :  { %v3863_v8 = vpop.f32.mrf.mxu2 }
 0x357   :  { %v3864_v10 = vadd.f32 %v3863_v8, %v12980_v2  ;;  %v3912_v11 = vpop.f32.mrf.mxu3  ;;  %v16482_v2 = vld [vmem:[#allocation11_spill] sm:$0xff] }
 0x358   :  { %v3963_v35 = vpop.f32.mrf.mxu0 }
 0x359   :  { %v3913_v55 = vadd.f32 %v3912_v11, %v3864_v10  ;;  %v4012_v24 = vpop.f32.mrf.mxu1 }
 0x35b   :  { %v3962_v25 = vadd.f32 %v3961_v3, %v3913_v55 }
 0x35d   :  { %v13252_v62 = vadd.f32 %v4010_v60, %v3962_v25 }
 0x35e   :  { %v3865_v6 = vpop.f32.mrf.mxu2 }
 0x35f   :  { %v3866_v32 = vadd.f32 %v3865_v6, %v12987_v42  ;;  %v3914_v18 = vpop.f32.mrf.mxu3 }
 0x360   :  { %v4122_v63 = vpop.f32.mrf.mxu0 }
 0x361   :  { %v3915_v48 = vadd.f32 %v3914_v18, %v3866_v32  ;;  %v4171_v54 = vpop.f32.mrf.mxu1 }
 0x362   :  { %v13255_v19 = vadd.f32 %v4171_v54, %v4122_v63  ;;  %v16486_v54 = vld [vmem:[#allocation13_spill] sm:$0xff] }
 0x363   :  { %v3964_v23 = vadd.f32 %v3963_v35, %v3915_v48  ;;  %4219 = vmatmul.bf16.vlgmr.msrb.gmra.mxu2 %v10959_v20  ;;  %4317 = vmatmul.bf16.vlgmr.msrb.gmra.mxu0 %v10961_v21  ;;  %v16485_v48 = vld [vmem:[#allocation12_spill] sm:$0xff] }
 0x364   :  { %4268 = vmatmul.bf16.vlgmr.msrb.gmra.mxu3 %v10963_v22  ;;  %4366 = vmatmul.bf16.vlgmr.msrb.gmra.mxu1 %v16482_v2  ;;  %v16518_v2 = vld [vmem:[#allocation35_spill] sm:$0xff] }
 0x365   :  { %v13261_v60 = vadd.f32 %v4012_v24, %v3964_v23  ;;  %v16487_v23 = vld [vmem:[#allocation14_spill] sm:$0xff] }
 0x366   :  { %v4024_v3 = vpop.f32.mrf.mxu2 }
 0x367   :  { %v4025_v42 = vadd.f32 %v4024_v3, %v12990_v46  ;;  %v4073_v27 = vpop.f32.mrf.mxu3  ;;  %v16488_v3 = vld [vmem:[#allocation15_spill] sm:$0xff] }
 0x368   :  { %v4124_v8 = vpop.f32.mrf.mxu0 }
 0x369   :  { %v13264_v10 = vadd.f32 %v4073_v27, %v4025_v42  ;;  %v4173_v11 = vpop.f32.mrf.mxu1 }
 0x36a   :  { %v13266_v55 = vadd.f32 %v4173_v11, %v4124_v8 }
 0x36b   :  { %16483 = vst [vmem:[#allocation55_spill] sm:$0xff] %v13264_v10 }
 0x36e   :  { %v4026_v35 = vpop.f32.mrf.mxu2 }
 0x36f   :  { %v4027_v25 = vadd.f32 %v4026_v35, %v12997_v15  ;;  %v4075_v6 = vpop.f32.mrf.mxu3 }
 0x370   :  { %v4127_v32 = vpop.f32.mrf.mxu0 }
 0x371   :  { %v13269_v18 = vadd.f32 %v4075_v6, %v4027_v25  ;;  %v4176_v63 = vpop.f32.mrf.mxu1 }
 0x372   :  { %v13271_v24 = vadd.f32 %v4176_v63, %v4127_v32 }
 0x373   :  { %16484 = vst [vmem:[#allocation9_spill] sm:$0xff] %v13269_v18  ;;  %4224 = vmatmul.bf16.gmra.mxu2 %v16485_v48  ;;  %4322 = vmatmul.bf16.gmra.mxu0 %v16486_v54 }
 0x374   :  { %4273 = vmatmul.bf16.gmra.mxu3 %v16487_v23  ;;  %4371 = vmatmul.bf16.gmra.mxu1 %v16488_v3 }
 0x376   :  { %v4029_v42 = vpop.f32.mrf.mxu2 }
 0x377   :  { %v4030_v15 = vadd.f32 %v4029_v42, %v13000_v0  ;;  %v4078_v27 = vpop.f32.mrf.mxu3  ;;  %v16491_v42 = vld [vmem:[#allocation16_spill] sm:$0xff] }
 0x378   :  { %v4129_v8 = vpop.f32.mrf.mxu0 }
 0x379   :  { %v13280_v11 = vadd.f32 %v4078_v27, %v4030_v15  ;;  %v4178_v35 = vpop.f32.mrf.mxu1  ;;  %v16492_v15 = vld [vmem:[#allocation17_spill] sm:$0xff]  ;;  %v16493_v27 = vld [vmem:[#allocation18_spill] sm:$0xff] }
 0x37a   :  { %v13282_v25 = vadd.f32 %v4178_v35, %v4129_v8  ;;  %v16494_v8 = vld [vmem:[#allocation19_spill] sm:$0xff] }
 0x37b   :  { %16489 = vst [vmem:[#allocation92_spill] sm:$0xff] %v13280_v11 }
 0x37e   :  { %v4031_v6 = vpop.f32.mrf.mxu2 }
 0x37f   :  { %v4032_v32 = vadd.f32 %v4031_v6, %v13007_v39  ;;  %v4080_v63 = vpop.f32.mrf.mxu3 }
 0x380   :  { %v4132_v46 = vpop.f32.mrf.mxu0 }
 0x381   :  { %v13285_v10 = vadd.f32 %v4080_v63, %v4032_v32  ;;  %v4181_v18 = vpop.f32.mrf.mxu1 }
 0x382   :  { %v13287_v23 = vadd.f32 %v4181_v18, %v4132_v46 }
 0x383   :  { %16490 = vst [vmem:[#allocation93_spill] sm:$0xff] %v13285_v10  ;;  %4229 = vmatmul.bf16.gmra.mxu2 %v16491_v42  ;;  %4327 = vmatmul.bf16.gmra.mxu0 %v16492_v15 }
 0x384   :  { %4278 = vmatmul.bf16.gmra.mxu3 %v16493_v27  ;;  %4376 = vmatmul.bf16.gmra.mxu1 %v16494_v8 }
 0x386   :  { %v4034_v35 = vpop.f32.mrf.mxu2 }
 0x387   :  { %v4035_v39 = vadd.f32 %v4034_v35, %v13010_v59  ;;  %v4083_v6 = vpop.f32.mrf.mxu3  ;;  %v16497_v35 = vld [vmem:[#allocation20_spill] sm:$0xff] }
 0x388   :  { %v4134_v32 = vpop.f32.mrf.mxu0 }
 0x389   :  { %v13296_v63 = vadd.f32 %v4083_v6, %v4035_v39  ;;  %v4183_v18 = vpop.f32.mrf.mxu1  ;;  %v16498_v39 = vld [vmem:[#allocation21_spill] sm:$0xff]  ;;  %v16499_v6 = vld [vmem:[#allocation22_spill] sm:$0xff] }
 0x38a   :  { %v13298_v46 = vadd.f32 %v4183_v18, %v4134_v32  ;;  %v16500_v32 = vld [vmem:[#allocation23_spill] sm:$0xff] }
 0x38b   :  { %16495 = vst [vmem:[#allocation94_spill] sm:$0xff] %v13296_v63 }
 0x38e   :  { %v4036_v3 = vpop.f32.mrf.mxu2 }
 0x38f   :  { %v4037_v0 = vadd.f32 %v4036_v3, %v13017_v26  ;;  %v4085_v42 = vpop.f32.mrf.mxu3 }
 0x390   :  { %v4137_v11 = vpop.f32.mrf.mxu0 }
 0x391   :  { %v13301_v15 = vadd.f32 %v4085_v42, %v4037_v0  ;;  %v4186_v27 = vpop.f32.mrf.mxu1 }
 0x392   :  { %v13303_v10 = vadd.f32 %v4186_v27, %v4137_v11 }
 0x393   :  { %16496 = vst [vmem:[#allocation95_spill] sm:$0xff] %v13301_v15  ;;  %4234 = vmatmul.bf16.gmra.mxu2 %v16497_v35  ;;  %4332 = vmatmul.bf16.gmra.mxu0 %v16498_v39 }
 0x394   :  { %4283 = vmatmul.bf16.gmra.mxu3 %v16499_v6  ;;  %4381 = vmatmul.bf16.gmra.mxu1 %v16500_v32 }
 0x396   :  { %v4039_v18 = vpop.f32.mrf.mxu2 }
 0x397   :  { %v4040_v26 = vadd.f32 %v4039_v18, %v13020_v41  ;;  %v4088_v3 = vpop.f32.mrf.mxu3  ;;  %v8801_v41 = vld [vmem:[%s16130_s2 + $0x6e8] sm:$0xf]  ;;  %v10158_v18 = vld [vmem:[%s16130_s2 + $0x6f4] sm:$0xf0] }
 0x398   :  { %v4139_v0 = vpop.f32.mrf.mxu0 }
 0x399   :  { %v13312_v42 = vadd.f32 %v4088_v3, %v4040_v26  ;;  %v4188_v11 = vpop.f32.mrf.mxu1  ;;  %v8929_v26 = vld [vmem:[%s16130_s2 + $0x7e8] sm:$0xf]  ;;  %v10222_v3 = vld [vmem:[%s16130_s2 + $0x8f4] sm:$0xf0] }
 0x39a   :  { %v13314_v27 = vadd.f32 %v4188_v11, %v4139_v0  ;;  %v16505_v0 = vld [vmem:[#allocation26_spill] sm:$0xff]  ;;  %v16506_v11 = vld [vmem:[#allocation27_spill] sm:$0xff] }
 0x39b   :  { %16501 = vst [vmem:[#allocation96_spill] sm:$0xff] %v13312_v42 }
 0x39e   :  { %v4041_v8 = vpop.f32.mrf.mxu2 }
 0x39f   :  { %v4042_v59 = vadd.f32 %v4041_v8, %v13051_v61  ;;  %v4090_v35 = vpop.f32.mrf.mxu3  ;;  %v16503_v8 = vld [vmem:[#allocation24_spill] sm:$0xff] }
 0x3a0   :  { %v4142_v63 = vpop.f32.mrf.mxu0 }
 0x3a1   :  { %v13317_v39 = vadd.f32 %v4090_v35, %v4042_v59  ;;  %v4191_v6 = vpop.f32.mrf.mxu1  ;;  %v16504_v59 = vld [vmem:[#allocation25_spill] sm:$0xff] }
 0x3a2   :  { %v13319_v15 = vadd.f32 %v4191_v6, %v4142_v63  ;;  %v8802_v63 = vor.u32 %v10158_v18, %v8801_v41  ;;  %v10190_v35 = vld [vmem:[%s16130_s2 + $0x7f4] sm:$0xf0]  ;;  %v9057_v6 = vld [vmem:[%s16130_s2 + $0x8e8] sm:$0xf] }
 0x3a3   :  { %16502 = vst [vmem:[#allocation97_spill] sm:$0xff] %v13317_v39  ;;  %4239 = vmatmul.bf16.gmra.mxu2 %v16503_v8  ;;  %4337 = vmatmul.bf16.gmra.mxu0 %v16504_v59  ;;  %v8930_v61 = vor.u32 %v10190_v35, %v8929_v26  ;;  %v9058_v8 = vor.u32 %v10222_v3, %v9057_v6  ;;  %v9185_v41 = vld [vmem:[%s16130_s2 + $0x9e8] sm:$0xf]  ;;  %v10254_v18 = vld [vmem:[%s16130_s2 + $0x9f4] sm:$0xf0] }
 0x3a4   :  { %4288 = vmatmul.bf16.gmra.mxu3 %v16505_v0  ;;  %4386 = vmatmul.bf16.gmra.mxu1 %v16506_v11  ;;  %v9186_v59 = vor.u32 %v10254_v18, %v9185_v41  ;;  %v8785_v0 = vld [vmem:[%s16130_s2 + $0x6c8] sm:$0xf]  ;;  %v10154_v26 = vld [vmem:[%s16130_s2 + $0x6d4] sm:$0xf0] }
 0x3a5   :  { %4407 = vmatpush.bf16.msra.mxu2 %v8802_v63  ;;  %4456 = vmatpush.bf16.msra.mxu3 %v8930_v61  ;;  %v8913_v35 = vld [vmem:[%s16130_s2 + $0x7c8] sm:$0xf]  ;;  %v8786_v63 = vor.u32 %v10154_v26, %v8785_v0  ;;  %v10186_v61 = vld [vmem:[%s16130_s2 + $0x7d4] sm:$0xf0] }
 0x3a6   :  { %v4044_v32 = vpop.f32.mrf.mxu2  ;;  %4505 = vmatpush.bf16.msra.mxu0 %v9058_v8  ;;  %4554 = vmatpush.bf16.msra.mxu1 %v9186_v59  ;;  %v9041_v8 = vld [vmem:[%s16130_s2 + $0x8c8] sm:$0xf]  ;;  %v10218_v41 = vld [vmem:[%s16130_s2 + $0x8d4] sm:$0xf0]  ;;  %v8914_v11 = vor.u32 %v10186_v61, %v8913_v35 }
 0x3a7   :  { %v4045_v6 = vadd.f32 %v4044_v32, %v13102_v57  ;;  %v4093_v3 = vpop.f32.mrf.mxu3  ;;  %v9042_v42 = vor.u32 %v10218_v41, %v9041_v8  ;;  %v9169_v57 = vld [vmem:[%s16130_s2 + $0x9c8] sm:$0xf]  ;;  %v10250_v32 = vld [vmem:[%s16130_s2 + $0x9d4] sm:$0xf0] }
 0x3a8   :  { %v4144_v18 = vpop.f32.mrf.mxu0  ;;  %v9170_v26 = vor.u32 %v10250_v32, %v9169_v57  ;;  %v8769_v39 = vld [vmem:[%s16130_s2 + $0x6a8] sm:$0xf]  ;;  %v10150_v35 = vld [vmem:[%s16130_s2 + $0x6b4] sm:$0xf0] }
 0x3a9   :  { %v13376_v59 = vadd.f32 %v4093_v3, %v4045_v6  ;;  %v4193_v0 = vpop.f32.mrf.mxu1  ;;  %4408 = vmatpush.bf16.msra.mxu2 %v8786_v63  ;;  %v8897_v61 = vld [vmem:[%s16130_s2 + $0x7a8] sm:$0xf]  ;;  %4457 = vmatpush.bf16.msra.mxu3 %v8914_v11  ;;  %v8770_v6 = vor.u32 %v10150_v35, %v8769_v39  ;;  %v10182_v3 = vld [vmem:[%s16130_s2 + $0x7b4] sm:$0xf0] }
 0x3aa   :  { %v13387_v8 = vadd.f32 %v4193_v0, %v4144_v18  ;;  %4506 = vmatpush.bf16.msra.mxu0 %v9042_v42  ;;  %v9025_v63 = vld [vmem:[%s16130_s2 + $0x8a8] sm:$0xf]  ;;  %v10214_v41 = vld [vmem:[%s16130_s2 + $0x8b4] sm:$0xf0]  ;;  %4555 = vmatpush.bf16.msra.mxu1 %v9170_v26  ;;  %v8898_v57 = vor.u32 %v10182_v3, %v8897_v61 }
 0x3ab   :  { %16507 = vst [vmem:[#allocation98_spill] sm:$0xff] %v13376_v59  ;;  %v9026_v32 = vor.u32 %v10214_v41, %v9025_v63  ;;  %v9153_v42 = vld [vmem:[%s16130_s2 + $0x9a8] sm:$0xf]  ;;  %v10246_v39 = vld [vmem:[%s16130_s2 + $0x9b4] sm:$0xf0] }
 0x3ac   :  { %v9154_v11 = vor.u32 %v10246_v39, %v9153_v42  ;;  %v8753_v0 = vld [vmem:[%s16130_s2 + $0x688] sm:$0xf]  ;;  %v10146_v26 = vld [vmem:[%s16130_s2 + $0x694] sm:$0xf0] }
 0x3ad   :  { %4409 = vmatpush.bf16.msra.mxu2 %v8770_v6  ;;  %4458 = vmatpush.bf16.msra.mxu3 %v8898_v57  ;;  %v8881_v35 = vld [vmem:[%s16130_s2 + $0x788] sm:$0xf]  ;;  %v8754_v6 = vor.u32 %v10146_v26, %v8753_v0  ;;  %v10178_v63 = vld [vmem:[%s16130_s2 + $0x794] sm:$0xf0] }
 0x3ae   :  { %v4046_v18 = vpop.f32.mrf.mxu2  ;;  %4507 = vmatpush.bf16.msra.mxu0 %v9026_v32  ;;  %4556 = vmatpush.bf16.msra.mxu1 %v9154_v11  ;;  %v9009_v41 = vld [vmem:[%s16130_s2 + $0x888] sm:$0xf]  ;;  %v10210_v57 = vld [vmem:[%s16130_s2 + $0x894] sm:$0xf0]  ;;  %v8882_v42 = vor.u32 %v10178_v63, %v8881_v35 }
 0x3af   :  { %v4047_v61 = vadd.f32 %v4046_v18, %v13157_v33  ;;  %v4095_v3 = vpop.f32.mrf.mxu3  ;;  %v9010_v39 = vor.u32 %v10210_v57, %v9009_v41  ;;  %v9137_v33 = vld [vmem:[%s16130_s2 + $0x988] sm:$0xf]  ;;  %v10242_v11 = vld [vmem:[%s16130_s2 + $0x994] sm:$0xf0] }
 0x3b0   :  { %v4147_v32 = vpop.f32.mrf.mxu0  ;;  %v9138_v26 = vor.u32 %v10242_v11, %v9137_v33  ;;  %v8737_v35 = vld [vmem:[%s16130_s2 + $0x668] sm:$0xf]  ;;  %v10142_v63 = vld [vmem:[%s16130_s2 + $0x674] sm:$0xf0]  ;;  %v16511_v33 = vld [vmem:[#allocation30_spill] sm:$0xff] }
 0x3b1   :  { %v13429_v18 = vadd.f32 %v4095_v3, %v4047_v61  ;;  %v4196_v0 = vpop.f32.mrf.mxu1  ;;  %4410 = vmatpush.bf16.msra.mxu2 %v8754_v6  ;;  %4459 = vmatpush.bf16.msra.mxu3 %v8882_v42  ;;  %v8865_v61 = vld [vmem:[%s16130_s2 + $0x768] sm:$0xf]  ;;  %v16509_v6 = vld [vmem:[#allocation28_spill] sm:$0xff]  ;;  %v16510_v41 = vld [vmem:[#allocation29_spill] sm:$0xff]  ;;  %v8738_v57 = vor.u32 %v10142_v63, %v8737_v35 }
 0x3b2   :  { %v13431_v54 = vadd.f32 %v4196_v0, %v4147_v32  ;;  %4508 = vmatpush.bf16.msra.mxu0 %v9010_v39  ;;  %v10174_v32 = vld [vmem:[%s16130_s2 + $0x774] sm:$0xf0]  ;;  %v8993_v42 = vld [vmem:[%s16130_s2 + $0x868] sm:$0xf]  ;;  %4557 = vmatpush.bf16.msra.mxu1 %v9138_v26 }
 0x3b3   :  { %16508 = vst [vmem:[#allocation99_spill] sm:$0xff] %v13429_v18  ;;  %4244 = vmatmul.bf16.gmra.mxu2 %v16509_v6  ;;  %4342 = vmatmul.bf16.gmra.mxu0 %v16510_v41  ;;  %v10206_v39 = vld [vmem:[%s16130_s2 + $0x874] sm:$0xf0]  ;;  %v16512_v11 = vld [vmem:[#allocation31_spill] sm:$0xff]  ;;  %v8866_v0 = vor.u32 %v10174_v32, %v8865_v61 }
 0x3b4   :  { %4293 = vmatmul.bf16.gmra.mxu3 %v16511_v33  ;;  %4391 = vmatmul.bf16.gmra.mxu1 %v16512_v11  ;;  %v8994_v3 = vor.u32 %v10206_v39, %v8993_v42  ;;  %v9121_v35 = vld [vmem:[%s16130_s2 + $0x968] sm:$0xf]  ;;  %v10238_v63 = vld [vmem:[%s16130_s2 + $0x974] sm:$0xf0] }
 0x3b5   :  { %4411 = vmatpush.bf16.msra.mxu2 %v8738_v57  ;;  %v9122_v41 = vor.u32 %v10238_v63, %v9121_v35  ;;  %4460 = vmatpush.bf16.msra.mxu3 %v8866_v0  ;;  %v8721_v11 = vld [vmem:[%s16130_s2 + $0x648] sm:$0xf]  ;;  %v10138_v61 = vld [vmem:[%s16130_s2 + $0x654] sm:$0xf0] }
 0x3b6   :  { %v4049_v6 = vpop.f32.mrf.mxu2  ;;  %4509 = vmatpush.bf16.msra.mxu0 %v8994_v3  ;;  %v8849_v32 = vld [vmem:[%s16130_s2 + $0x748] sm:$0xf]  ;;  %v8722_v57 = vor.u32 %v10138_v61, %v8721_v11  ;;  %v10170_v3 = vld [vmem:[%s16130_s2 + $0x754] sm:$0xf0] }
 0x3b7   :  { %v4050_v42 = vadd.f32 %v4049_v6, %v13208_v31  ;;  %v4098_v26 = vpop.f32.mrf.mxu3  ;;  %v8977_v39 = vld [vmem:[%s16130_s2 + $0x848] sm:$0xf]  ;;  %v10202_v0 = vld [vmem:[%s16130_s2 + $0x854] sm:$0xf0]  ;;  %v8850_v63 = vor.u32 %v10170_v3, %v8849_v32  ;;  %4558 = vmatpush.bf16.msra.mxu1 %v9122_v41 }
 0x3b8   :  { %v4149_v35 = vpop.f32.mrf.mxu0  ;;  %v8978_v33 = vor.u32 %v10202_v0, %v8977_v39  ;;  %v9105_v31 = vld [vmem:[%s16130_s2 + $0x948] sm:$0xf]  ;;  %v10234_v6 = vld [vmem:[%s16130_s2 + $0x954] sm:$0xf0] }
 0x3b9   :  { %v13488_v11 = vadd.f32 %v4098_v26, %v4050_v42  ;;  %v4198_v61 = vpop.f32.mrf.mxu1  ;;  %4412 = vmatpush.bf16.msra.mxu2 %v8722_v57  ;;  %v9106_v48 = vor.u32 %v10234_v6, %v9105_v31  ;;  %v8705_v59 = vld [vmem:[%s16130_s2 + $0x628] sm:$0xf]  ;;  %v10134_v32 = vld [vmem:[%s16130_s2 + $0x634] sm:$0xf0]  ;;  %4461 = vmatpush.bf16.msra.mxu3 %v8850_v63 }
 0x3ba   :  { %v8833_v3 = vld [vmem:[%s16130_s2 + $0x728] sm:$0xf]  ;;  %v13499_v39 = vadd.f32 %v4198_v61, %v4149_v35  ;;  %4510 = vmatpush.bf16.msra.mxu0 %v8978_v33  ;;  %v8706_v42 = vor.u32 %v10134_v32, %v8705_v59  ;;  %v10166_v41 = vld [vmem:[%s16130_s2 + $0x734] sm:$0xf0] }
 0x3bb   :  { %16513 = vst [vmem:[#allocation100_spill] sm:$0xff] %v13488_v11  ;;  %v8961_v26 = vld [vmem:[%s16130_s2 + $0x828] sm:$0xf]  ;;  %v10198_v57 = vld [vmem:[%s16130_s2 + $0x834] sm:$0xf0]  ;;  %v8834_v0 = vor.u32 %v10166_v41, %v8833_v3  ;;  %4559 = vmatpush.bf16.msra.mxu1 %v9106_v48  ;;  %v16527_v11 = vld [vmem:[#allocation40_spill] sm:$0xff] }
 0x3bc   :  { %v8962_v31 = vor.u32 %v10198_v57, %v8961_v26  ;;  %v9089_v35 = vld [vmem:[%s16130_s2 + $0x928] sm:$0xf]  ;;  %v10230_v59 = vld [vmem:[%s16130_s2 + $0x934] sm:$0xf0] }
 0x3bd   :  { %4413 = vmatpush.bf16.msra.mxu2 %v8706_v42  ;;  %v9090_v33 = vor.u32 %v10230_v59, %v9089_v35  ;;  %4462 = vmatpush.bf16.msra.mxu3 %v8834_v0  ;;  %v8689_v6 = vld [vmem:[%s16130_s2 + $0x608] sm:$0xf]  ;;  %v10130_v61 = vld [vmem:[%s16130_s2 + $0x614] sm:$0xf0] }
 0x3be   :  { %v4051_v63 = vpop.f32.mrf.mxu2  ;;  %4511 = vmatpush.bf16.msra.mxu0 %v8962_v31  ;;  %v8817_v32 = vld [vmem:[%s16130_s2 + $0x708] sm:$0xf]  ;;  %v8690_v42 = vor.u32 %v10130_v61, %v8689_v6  ;;  %v10162_v41 = vld [vmem:[%s16130_s2 + $0x714] sm:$0xf0] }
 0x3bf   :  { %v4052_v3 = vadd.f32 %v4051_v63, %v13239_v53  ;;  %v4100_v48 = vpop.f32.mrf.mxu3  ;;  %v8945_v26 = vld [vmem:[%s16130_s2 + $0x808] sm:$0xf]  ;;  %v10194_v57 = vld [vmem:[%s16130_s2 + $0x814] sm:$0xf0]  ;;  %v8818_v31 = vor.u32 %v10162_v41, %v8817_v32  ;;  %4560 = vmatpush.bf16.msra.mxu1 %v9090_v33  ;;  %v16515_v41 = vld [vmem:[#allocation32_spill] sm:$0xff] }
 0x3c0   :  { %v4152_v0 = vpop.f32.mrf.mxu0  ;;  %v8946_v35 = vor.u32 %v10194_v57, %v8945_v26  ;;  %v9073_v53 = vld [vmem:[%s16130_s2 + $0x908] sm:$0xf]  ;;  %v10226_v59 = vld [vmem:[%s16130_s2 + $0x914] sm:$0xf0]  ;;  %v16517_v57 = vld [vmem:[#allocation34_spill] sm:$0xff] }
 0x3c1   :  { %v13541_v63 = vadd.f32 %v4100_v48, %v4052_v3  ;;  %v4201_v6 = vpop.f32.mrf.mxu1  ;;  %4414 = vmatpush.bf16.msra.mxu2 %v8690_v42  ;;  %v9074_v61 = vor.u32 %v10226_v59, %v9073_v53  ;;  %4463 = vmatpush.bf16.msra.mxu3 %v8818_v31  ;;  %v16516_v26 = vld [vmem:[#allocation33_spill] sm:$0xff] }
 0x3c2   :  { %v13543_v18 = vadd.f32 %v4201_v6, %v4152_v0  ;;  %4512 = vmatpush.bf16.msra.mxu0 %v8946_v35 }
 0x3c3   :  { %16514 = vst [vmem:[#allocation101_spill] sm:$0xff] %v13541_v63  ;;  %4249 = vmatmul.bf16.gmra.mxu2 %v16515_v41  ;;  %4347 = vmatmul.bf16.gmra.mxu0 %v16516_v26 }
 0x3c4   :  { %4298 = vmatmul.bf16.gmra.mxu3 %v16517_v57  ;;  %4396 = vmatmul.bf16.gmra.mxu1 %v16518_v2 }
 0x3c5   :  { %4561 = vmatpush.bf16.msra.mxu1 %v9074_v61  ;;  %v16521_v61 = vld [vmem:[#allocation36_spill] sm:$0xff] }
 0x3c6   :  { %v4054_v3 = vpop.f32.mrf.mxu2 }
 0x3c7   :  { %v4055_v33 = vadd.f32 %v4054_v3, %v13242_v1  ;;  %v4103_v48 = vpop.f32.mrf.mxu3  ;;  %v16522_v3 = vld [vmem:[#allocation37_spill] sm:$0xff] }
 0x3c8   :  { %v4154_v42 = vpop.f32.mrf.mxu0 }
 0x3c9   :  { %v13552_v0 = vadd.f32 %v4103_v48, %v4055_v33  ;;  %v4203_v31 = vpop.f32.mrf.mxu1  ;;  %v16523_v33 = vld [vmem:[#allocation38_spill] sm:$0xff]  ;;  %v16524_v48 = vld [vmem:[#allocation39_spill] sm:$0xff] }
 0x3ca   :  { %v13554_v35 = vadd.f32 %v4203_v31, %v4154_v42 }
 0x3cb   :  { %16519 = vst [vmem:[#allocation102_spill] sm:$0xff] %v13552_v0 }
 0x3ce   :  { %v4056_v53 = vpop.f32.mrf.mxu2 }
 0x3cf   :  { %v4057_v59 = vadd.f32 %v4056_v53, %v13249_v4  ;;  %v4105_v6 = vpop.f32.mrf.mxu3 }
 0x3d0   :  { %v4157_v32 = vpop.f32.mrf.mxu0 }
 0x3d1   :  { %v13557_v26 = vadd.f32 %v4105_v6, %v4057_v59  ;;  %v4206_v57 = vpop.f32.mrf.mxu1 }
 0x3d2   :  { %v13559_v2 = vadd.f32 %v4206_v57, %v4157_v32 }
 0x3d3   :  { %16520 = vst [vmem:[#allocation103_spill] sm:$0xff] %v13557_v26  ;;  %4254 = vmatmul.bf16.gmra.mxu2 %v16521_v61  ;;  %4352 = vmatmul.bf16.gmra.mxu0 %v16522_v3 }
 0x3d4   :  { %4303 = vmatmul.bf16.gmra.mxu3 %v16523_v33  ;;  %4401 = vmatmul.bf16.gmra.mxu1 %v16524_v48 }
 0x3d6   :  { %v4059_v42 = vpop.f32.mrf.mxu2 }
 0x3d7   :  { %v4060_v4 = vadd.f32 %v4059_v42, %v13252_v62  ;;  %v4108_v31 = vpop.f32.mrf.mxu3  ;;  %v16528_v62 = vld [vmem:[#allocation41_spill] sm:$0xff]  ;;  %v16529_v42 = vld [vmem:[#allocation42_spill] sm:$0xff] }
 0x3d8   :  { %v4159_v53 = vpop.f32.mrf.mxu0 }
 0x3d9   :  { %v13568_v59 = vadd.f32 %v4108_v31, %v4060_v4  ;;  %v4208_v32 = vpop.f32.mrf.mxu1  ;;  %v16530_v4 = vld [vmem:[#allocation43_spill] sm:$0xff] }
 0x3da   :  { %v13570_v57 = vadd.f32 %v4208_v32, %v4159_v53 }
 0x3db   :  { %16525 = vst [vmem:[#allocation104_spill] sm:$0xff] %v13568_v59 }
 0x3de   :  { %v4061_v6 = vpop.f32.mrf.mxu2 }
 0x3df   :  { %v4062_v1 = vadd.f32 %v4061_v6, %v13261_v60  ;;  %v4110_v61 = vpop.f32.mrf.mxu3 }
 0x3e0   :  { %v4318_v41 = vpop.f32.mrf.mxu0 }
 0x3e1   :  { %v13573_v3 = vadd.f32 %v4110_v61, %v4062_v1  ;;  %v4367_v33 = vpop.f32.mrf.mxu1 }
 0x3e3   :  { %16526 = vst [vmem:[#allocation105_spill] sm:$0xff] %v13573_v3  ;;  %4415 = vmatmul.bf16.vlgmr.msra.gmra.mxu2 %v16527_v11  ;;  %4513 = vmatmul.bf16.vlgmr.msra.gmra.mxu0 %v16528_v62  ;;  %v16531_v3 = vld [vmem:[#allocation44_spill] sm:$0xff] }
 0x3e4   :  { %4464 = vmatmul.bf16.vlgmr.msra.gmra.mxu3 %v16529_v42  ;;  %4562 = vmatmul.bf16.vlgmr.msra.gmra.mxu1 %v16530_v4  ;;  %v16532_v4 = vld [vmem:[#allocation45_spill] sm:$0xff] }
 0x3e6   :  { %v4220_v31 = vpop.f32.mrf.mxu2 }
 0x3e7   :  { %v4221_v53 = vadd.f32 %v4220_v31, %v13255_v19  ;;  %v4269_v60 = vpop.f32.mrf.mxu3  ;;  %v16533_v19 = vld [vmem:[#allocation46_spill] sm:$0xff]  ;;  %v16534_v31 = vld [vmem:[#allocation47_spill] sm:$0xff] }
 0x3e8   :  { %v4320_v32 = vpop.f32.mrf.mxu0 }
 0x3e9   :  { %v4270_v6 = vadd.f32 %v4269_v60, %v4221_v53  ;;  %v4369_v1 = vpop.f32.mrf.mxu1 }
 0x3eb   :  { %v4319_v61 = vadd.f32 %v4318_v41, %v4270_v6 }
 0x3ed   :  { %v13582_v63 = vadd.f32 %v4367_v33, %v4319_v61 }
 0x3ee   :  { %v4222_v0 = vpop.f32.mrf.mxu2 }
 0x3ef   :  { %v4223_v48 = vadd.f32 %v4222_v0, %v13266_v55  ;;  %v4271_v11 = vpop.f32.mrf.mxu3 }
 0x3f0   :  { %v4323_v26 = vpop.f32.mrf.mxu0 }
 0x3f1   :  { %v4272_v62 = vadd.f32 %v4271_v11, %v4223_v48  ;;  %v4372_v59 = vpop.f32.mrf.mxu1 }
 0x3f3   :  { %v4321_v42 = vadd.f32 %v4320_v32, %v4272_v62  ;;  %4420 = vmatmul.bf16.gmra.mxu2 %v16531_v3  ;;  %4518 = vmatmul.bf16.gmra.mxu0 %v16532_v4 }
 0x3f4   :  { %4469 = vmatmul.bf16.gmra.mxu3 %v16533_v19  ;;  %4567 = vmatmul.bf16.gmra.mxu1 %v16534_v31 }
 0x3f5   :  { %v13589_v53 = vadd.f32 %v4369_v1, %v4321_v42  ;;  %v16535_v42 = vld [vmem:[#allocation48_spill] sm:$0xff]  ;;  %v16536_v1 = vld [vmem:[#allocation49_spill] sm:$0xff] }
 0x3f6   :  { %v4225_v41 = vpop.f32.mrf.mxu2 }
 0x3f7   :  { %v4226_v33 = vadd.f32 %v4225_v41, %v13271_v24  ;;  %v4274_v60 = vpop.f32.mrf.mxu3  ;;  %v16537_v24 = vld [vmem:[#allocation50_spill] sm:$0xff]  ;;  %v16538_v41 = vld [vmem:[#allocation51_spill] sm:$0xff] }
 0x3f8   :  { %v4325_v55 = vpop.f32.mrf.mxu0 }
 0x3f9   :  { %v4275_v0 = vadd.f32 %v4274_v60, %v4226_v33  ;;  %v4374_v6 = vpop.f32.mrf.mxu1 }
 0x3fb   :  { %v4324_v11 = vadd.f32 %v4323_v26, %v4275_v0 }
 0x3fd   :  { %v13592_v48 = vadd.f32 %v4372_v59, %v4324_v11 }
 0x3fe   :  { %v4227_v62 = vpop.f32.mrf.mxu2 }
 0x3ff   :  { %v4228_v32 = vadd.f32 %v4227_v62, %v13282_v25  ;;  %v4276_v61 = vpop.f32.mrf.mxu3 }
 0x400   :  { %v4328_v4 = vpop.f32.mrf.mxu0 }
 0x401   :  { %v4277_v19 = vadd.f32 %v4276_v61, %v4228_v32  ;;  %v4377_v3 = vpop.f32.mrf.mxu1 }
 0x403   :  { %v4326_v31 = vadd.f32 %v4325_v55, %v4277_v19  ;;  %4425 = vmatmul.bf16.gmra.mxu2 %v16535_v42  ;;  %4523 = vmatmul.bf16.gmra.mxu0 %v16536_v1 }
 0x404   :  { %4474 = vmatmul.bf16.gmra.mxu3 %v16537_v24  ;;  %4572 = vmatmul.bf16.gmra.mxu1 %v16538_v41 }
 0x405   :  { %v13599_v33 = vadd.f32 %v4374_v6, %v4326_v31  ;;  %v16539_v31 = vld [vmem:[#allocation52_spill] sm:$0xff]  ;;  %v16540_v6 = vld [vmem:[#allocation53_spill] sm:$0xff] }
 0x406   :  { %v4230_v26 = vpop.f32.mrf.mxu2 }
 0x407   :  { %v4231_v59 = vadd.f32 %v4230_v26, %v13287_v23  ;;  %v4279_v60 = vpop.f32.mrf.mxu3  ;;  %v16541_v23 = vld [vmem:[#allocation54_spill] sm:$0xff] }
 0x408   :  { %v4330_v25 = vpop.f32.mrf.mxu0 }
 0x409   :  { %v4280_v0 = vadd.f32 %v4279_v60, %v4231_v59  ;;  %v4379_v11 = vpop.f32.mrf.mxu1 }
 0x40b   :  { %v4329_v62 = vadd.f32 %v4328_v4, %v4280_v0 }
 0x40d   :  { %v13602_v32 = vadd.f32 %v4377_v3, %v4329_v62 }
 0x40e   :  { %v4232_v19 = vpop.f32.mrf.mxu2 }
 0x40f   :  { %v4233_v55 = vadd.f32 %v4232_v19, %v13298_v46  ;;  %v4281_v61 = vpop.f32.mrf.mxu3 }
 0x410   :  { %v4333_v1 = vpop.f32.mrf.mxu0 }
 0x411   :  { %v4282_v24 = vadd.f32 %v4281_v61, %v4233_v55  ;;  %v4382_v42 = vpop.f32.mrf.mxu1 }
 0x413   :  { %v4331_v41 = vadd.f32 %v4330_v25, %v4282_v24  ;;  %4430 = vmatmul.bf16.gmra.mxu2 %v16539_v31  ;;  %4528 = vmatmul.bf16.gmra.mxu0 %v16540_v6 }
 0x414   :  { %4479 = vmatmul.bf16.gmra.mxu3 %v16541_v23  ;;  %4577 = vmatmul.bf16.gmra.mxu1 %v16459_v43 }
 0x415   :  { %v13609_v26 = vadd.f32 %v4379_v11, %v4331_v41  ;;  %v9313_v41 = vld [vmem:[%s16130_s2 + $0xae8] sm:$0xf]  ;;  %v16542_v11 = vld [vmem:[#allocation56_spill] sm:$0xff] }
 0x416   :  { %v4235_v3 = vpop.f32.mrf.mxu2 }
 0x417   :  { %v4236_v4 = vadd.f32 %v4235_v3, %v13303_v10  ;;  %v4284_v59 = vpop.f32.mrf.mxu3  ;;  %v10286_v10 = vld [vmem:[%s16130_s2 + $0xaf4] sm:$0xf0] }
 0x418   :  { %v4335_v46 = vpop.f32.mrf.mxu0  ;;  %v9314_v3 = vor.u32 %v10286_v10, %v9313_v41 }
 0x419   :  { %v4285_v60 = vadd.f32 %v4284_v59, %v4236_v4  ;;  %v4384_v0 = vpop.f32.mrf.mxu1  ;;  %v10318_v4 = vld [vmem:[%s16130_s2 + $0xbf4] sm:$0xf0]  ;;  %v9964_v59 = vld [vmem:[%s16130_s2 + $0xec] sm:$0xf] }
 0x41a   :  { %4603 = vmatpush.bf16.msrb.mxu2 %v9314_v3 }
 0x41b   :  { %v4334_v62 = vadd.f32 %v4333_v1, %v4285_v60  ;;  %v8035_v60 = vld [vmem:[%s16130_s2 + $0xf8] sm:$0xf0] }
 0x41d   :  { %v13612_v19 = vadd.f32 %v4382_v42, %v4334_v62  ;;  %v9441_v42 = vld [vmem:[%s16130_s2 + $0xbe8] sm:$0xf]  ;;  %v16544_v62 = vld [vmem:[#allocation58_spill] sm:$0xff] }
 0x41e   :  { %v4237_v24 = vpop.f32.mrf.mxu2 }
 0x41f   :  { %v4238_v25 = vadd.f32 %v4237_v24, %v13314_v27  ;;  %v4286_v55 = vpop.f32.mrf.mxu3  ;;  %v16543_v27 = vld [vmem:[#allocation57_spill] sm:$0xff]  ;;  %v8038_v24 = vor.u32 %v9964_v59, %v8035_v60  ;;  %v9425_v59 = vld [vmem:[%s16130_s2 + $0xbc8] sm:$0xf] }
 0x420   :  { %v4338_v61 = vpop.f32.mrf.mxu0  ;;  %v10314_v60 = vld [vmem:[%s16130_s2 + $0xbd4] sm:$0xf0] }
 0x421   :  { %v4287_v23 = vadd.f32 %v4286_v55, %v4238_v25  ;;  %v4387_v6 = vpop.f32.mrf.mxu1  ;;  %v9996_v25 = vld [vmem:[%s16130_s2 + $0x1ec] sm:$0xf]  ;;  %v8163_v55 = vld [vmem:[%s16130_s2 + $0x1f8] sm:$0xf0]  ;;  %4701 = vmatpush.bf16.msrb.mxu0 %v8038_v24 }
 0x422   :  { %v8166_v10 = vor.u32 %v9996_v25, %v8163_v55  ;;  %v8019_v24 = vld [vmem:[%s16130_s2 + $0xd8] sm:$0xf0]  ;;  %v9426_v55 = vor.u32 %v10314_v60, %v9425_v59  ;;  %v10278_v59 = vld [vmem:[%s16130_s2 + $0xab4] sm:$0xf0]  ;;  %v9409_v60 = vld [vmem:[%s16130_s2 + $0xba8] sm:$0xf] }
 0x423   :  { %v4336_v1 = vadd.f32 %v4335_v46, %v4287_v23  ;;  %4435 = vmatmul.bf16.gmra.mxu2 %v16542_v11  ;;  %4533 = vmatmul.bf16.gmra.mxu0 %v16543_v27  ;;  %v16545_v23 = vld [vmem:[#allocation59_spill] sm:$0xff]  ;;  %v9442_v46 = vor.u32 %v10318_v4, %v9441_v42  ;;  %v10282_v4 = vld [vmem:[%s16130_s2 + $0xad4] sm:$0xf0] }
 0x424   :  { %4484 = vmatmul.bf16.gmra.mxu3 %v16544_v62  ;;  %4582 = vmatmul.bf16.gmra.mxu1 %v16545_v23  ;;  %v9297_v42 = vld [vmem:[%s16130_s2 + $0xac8] sm:$0xf] }
 0x425   :  { %v13643_v41 = vadd.f32 %v4384_v0, %v4336_v1  ;;  %4652 = vmatpush.bf16.msrb.mxu3 %v9442_v46  ;;  %4750 = vmatpush.bf16.msrb.mxu1 %v8166_v10  ;;  %v9298_v3 = vor.u32 %v10282_v4, %v9297_v42  ;;  %v9960_v46 = vld [vmem:[%s16130_s2 + $0xcc] sm:$0xf]  ;;  %v9281_v62 = vld [vmem:[%s16130_s2 + $0xaa8] sm:$0xf] }
 0x426   :  { %v4240_v27 = vpop.f32.mrf.mxu2  ;;  %v8022_v23 = vor.u32 %v9960_v46, %v8019_v24 }
 0x427   :  { %v4241_v0 = vadd.f32 %v4240_v27, %v13319_v15  ;;  %v4289_v1 = vpop.f32.mrf.mxu3  ;;  %v9992_v15 = vld [vmem:[%s16130_s2 + $0x1cc] sm:$0xf]  ;;  %v8147_v27 = vld [vmem:[%s16130_s2 + $0x1d8] sm:$0xf0]  ;;  %4604 = vmatpush.bf16.msrb.mxu2 %v9298_v3 }
 0x428   :  { %v4340_v25 = vpop.f32.mrf.mxu0  ;;  %v8150_v4 = vor.u32 %v9992_v15, %v8147_v27  ;;  %4702 = vmatpush.bf16.msrb.mxu0 %v8022_v23  ;;  %v9956_v23 = vld [vmem:[%s16130_s2 + $0xac] sm:$0xf]  ;;  %v8003_v3 = vld [vmem:[%s16130_s2 + $0xb8] sm:$0xf0] }
 0x429   :  { %v4290_v10 = vadd.f32 %v4289_v1, %v4241_v0  ;;  %v4389_v42 = vpop.f32.mrf.mxu1  ;;  %4653 = vmatpush.bf16.msrb.mxu3 %v9426_v55  ;;  %v9282_v0 = vor.u32 %v10278_v59, %v9281_v62  ;;  %v10310_v1 = vld [vmem:[%s16130_s2 + $0xbb4] sm:$0xf0]  ;;  %v8006_v55 = vor.u32 %v9956_v23, %v8003_v3  ;;  %v8131_v62 = vld [vmem:[%s16130_s2 + $0x1b8] sm:$0xf0]  ;;  %v9952_v23 = vld [vmem:[%s16130_s2 + $0x8c] sm:$0xf] }
 0x42a   :  { %4751 = vmatpush.bf16.msrb.mxu1 %v8150_v4  ;;  %v9410_v24 = vor.u32 %v10310_v1, %v9409_v60  ;;  %v9265_v4 = vld [vmem:[%s16130_s2 + $0xa88] sm:$0xf]  ;;  %v10274_v59 = vld [vmem:[%s16130_s2 + $0xa94] sm:$0xf0]  ;;  %v7987_v3 = vld [vmem:[%s16130_s2 + $0x98] sm:$0xf0] }
 0x42b   :  { %v4339_v46 = vadd.f32 %v4338_v61, %v4290_v10  ;;  %v9988_v61 = vld [vmem:[%s16130_s2 + $0x1ac] sm:$0xf]  ;;  %4605 = vmatpush.bf16.msrb.mxu2 %v9282_v0  ;;  %v9393_v60 = vld [vmem:[%s16130_s2 + $0xb88] sm:$0xf]  ;;  %v9266_v0 = vor.u32 %v10274_v59, %v9265_v4  ;;  %v10306_v1 = vld [vmem:[%s16130_s2 + $0xb94] sm:$0xf0] }
 0x42c   :  { %v8134_v27 = vor.u32 %v9988_v61, %v8131_v62  ;;  %4703 = vmatpush.bf16.msrb.mxu0 %v8006_v55  ;;  %v9394_v55 = vor.u32 %v10306_v1, %v9393_v60  ;;  %v7990_v61 = vor.u32 %v9952_v23, %v7987_v3  ;;  %v8115_v62 = vld [vmem:[%s16130_s2 + $0x198] sm:$0xf0]  ;;  %v9249_v59 = vld [vmem:[%s16130_s2 + $0xa68] sm:$0xf]  ;;  %v10270_v60 = vld [vmem:[%s16130_s2 + $0xa74] sm:$0xf0] }
 0x42d   :  { %v13694_v15 = vadd.f32 %v4387_v6, %v4339_v46  ;;  %4654 = vmatpush.bf16.msrb.mxu3 %v9410_v24  ;;  %v9377_v1 = vld [vmem:[%s16130_s2 + $0xb68] sm:$0xf]  ;;  %v16546_v3 = vld [vmem:[#allocation60_spill] sm:$0xff] }
 0x42e   :  { %v4242_v10 = vpop.f32.mrf.mxu2  ;;  %4752 = vmatpush.bf16.msrb.mxu1 %v8134_v27 }
 0x42f   :  { %v4243_v6 = vadd.f32 %v4242_v10, %v13387_v8  ;;  %v4291_v46 = vpop.f32.mrf.mxu3  ;;  %v9984_v8 = vld [vmem:[%s16130_s2 + $0x18c] sm:$0xf]  ;;  %4606 = vmatpush.bf16.msrb.mxu2 %v9266_v0  ;;  %v10302_v0 = vld [vmem:[%s16130_s2 + $0xb74] sm:$0xf0] }
 0x430   :  { %v4343_v24 = vpop.f32.mrf.mxu0  ;;  %v8118_v4 = vor.u32 %v9984_v8, %v8115_v62  ;;  %4704 = vmatpush.bf16.msrb.mxu0 %v7990_v61  ;;  %v7971_v61 = vld [vmem:[%s16130_s2 + $0x78] sm:$0xf0]  ;;  %v16548_v8 = vld [vmem:[#allocation62_spill] sm:$0xff]  ;;  %v9378_v62 = vor.u32 %v10302_v0, %v9377_v1  ;;  %v9233_v1 = vld [vmem:[%s16130_s2 + $0xa48] sm:$0xf] }
 0x431   :  { %v4292_v27 = vadd.f32 %v4291_v46, %v4243_v6  ;;  %v4392_v10 = vpop.f32.mrf.mxu1  ;;  %4655 = vmatpush.bf16.msrb.mxu3 %v9394_v55  ;;  %v16547_v6 = vld [vmem:[#allocation61_spill] sm:$0xff]  ;;  %v9250_v46 = vor.u32 %v10270_v60, %v9249_v59  ;;  %v9948_v55 = vld [vmem:[%s16130_s2 + $0x6c] sm:$0xf] }
 0x432   :  { %v9980_v59 = vld [vmem:[%s16130_s2 + $0x16c] sm:$0xf]  ;;  %v8099_v60 = vld [vmem:[%s16130_s2 + $0x178] sm:$0xf0]  ;;  %4753 = vmatpush.bf16.msrb.mxu1 %v8118_v4  ;;  %v10266_v0 = vld [vmem:[%s16130_s2 + $0xa54] sm:$0xf0] }
 0x433   :  { %v4341_v23 = vadd.f32 %v4340_v25, %v4292_v27  ;;  %4440 = vmatmul.bf16.gmra.mxu2 %v16546_v3  ;;  %4538 = vmatmul.bf16.gmra.mxu0 %v16547_v6  ;;  %v16549_v25 = vld [vmem:[#allocation63_spill] sm:$0xff]  ;;  %v7974_v27 = vor.u32 %v9948_v55, %v7971_v61  ;;  %v8102_v3 = vor.u32 %v9980_v59, %v8099_v60 }
 0x434   :  { %4489 = vmatmul.bf16.gmra.mxu3 %v16548_v8  ;;  %4587 = vmatmul.bf16.gmra.mxu1 %v16549_v25  ;;  %v9361_v55 = vld [vmem:[%s16130_s2 + $0xb48] sm:$0xf]  ;;  %v9944_v61 = vld [vmem:[%s16130_s2 + $0x4c] sm:$0xf] }
 0x435   :  { %v13749_v6 = vadd.f32 %v4389_v42, %v4341_v23  ;;  %4607 = vmatpush.bf16.msrb.mxu2 %v9250_v46  ;;  %4656 = vmatpush.bf16.msrb.mxu3 %v9378_v62  ;;  %v9234_v23 = vor.u32 %v10266_v0, %v9233_v1  ;;  %v10298_v46 = vld [vmem:[%s16130_s2 + $0xb54] sm:$0xf0]  ;;  %v7955_v62 = vld [vmem:[%s16130_s2 + $0x58] sm:$0xf0] }
 0x436   :  { %v4245_v11 = vpop.f32.mrf.mxu2  ;;  %4705 = vmatpush.bf16.msrb.mxu0 %v7974_v27  ;;  %v9362_v59 = vor.u32 %v10298_v46, %v9361_v55  ;;  %v7958_v60 = vor.u32 %v9944_v61, %v7955_v62  ;;  %4754 = vmatpush.bf16.msrb.mxu1 %v8102_v3  ;;  %v9217_v55 = vld [vmem:[%s16130_s2 + $0xa28] sm:$0xf]  ;;  %v10262_v46 = vld [vmem:[%s16130_s2 + $0xa34] sm:$0xf0] }
 0x437   :  { %v4246_v42 = vadd.f32 %v4245_v11, %v13431_v54  ;;  %v4294_v4 = vpop.f32.mrf.mxu3  ;;  %v9976_v54 = vld [vmem:[%s16130_s2 + $0x14c] sm:$0xf]  ;;  %v8083_v11 = vld [vmem:[%s16130_s2 + $0x158] sm:$0xf0]  ;;  %v9345_v61 = vld [vmem:[%s16130_s2 + $0xb28] sm:$0xf] }
 0x438   :  { %v4345_v27 = vpop.f32.mrf.mxu0  ;;  %v8086_v25 = vor.u32 %v9976_v54, %v8083_v11  ;;  %v10294_v3 = vld [vmem:[%s16130_s2 + $0xb34] sm:$0xf0]  ;;  %v9972_v54 = vld [vmem:[%s16130_s2 + $0x12c] sm:$0xf] }
 0x439   :  { %v4295_v1 = vadd.f32 %v4294_v4, %v4246_v42  ;;  %v4394_v0 = vpop.f32.mrf.mxu1  ;;  %4608 = vmatpush.bf16.msrb.mxu2 %v9234_v23  ;;  %4657 = vmatpush.bf16.msrb.mxu3 %v9362_v59  ;;  %v9218_v42 = vor.u32 %v10262_v46, %v9217_v55  ;;  %v9940_v4 = vld [vmem:[%s16130_s2 + $0x2c] sm:$0xf]  ;;  %v7939_v23 = vld [vmem:[%s16130_s2 + $0x38] sm:$0xf0]  ;;  %v9346_v59 = vor.u32 %v10294_v3, %v9345_v61  ;;  %v9201_v46 = vld [vmem:[%s16130_s2 + $0xa08] sm:$0xf] }
 0x43a   :  { %4706 = vmatpush.bf16.msrb.mxu0 %v7958_v60  ;;  %v7942_v60 = vor.u32 %v9940_v4, %v7939_v23  ;;  %4755 = vmatpush.bf16.msrb.mxu1 %v8086_v25  ;;  %v10258_v61 = vld [vmem:[%s16130_s2 + $0xa14] sm:$0xf0]  ;;  %v9329_v3 = vld [vmem:[%s16130_s2 + $0xb08] sm:$0xf]  ;;  %v9936_v4 = vld [vmem:[%s16130_s2 + $0xc] sm:$0xf] }
 0x43b   :  { %v4344_v62 = vadd.f32 %v4343_v24, %v4295_v1  ;;  %v8067_v24 = vld [vmem:[%s16130_s2 + $0x138] sm:$0xf0] }
 0x43c   :  { %v8070_v1 = vor.u32 %v9972_v54, %v8067_v24  ;;  %v7923_v23 = vld [vmem:[%s16130_s2 + $0x18] sm:$0xf0] }
 0x43d   :  { %v13800_v11 = vadd.f32 %v4392_v10, %v4344_v62  ;;  %4609 = vmatpush.bf16.msrb.mxu2 %v9218_v42  ;;  %4658 = vmatpush.bf16.msrb.mxu3 %v9346_v59  ;;  %v9202_v62 = vor.u32 %v10258_v61, %v9201_v46  ;;  %v10290_v42 = vld [vmem:[%s16130_s2 + $0xb14] sm:$0xf0]  ;;  %v7926_v54 = vor.u32 %v9936_v4, %v7923_v23  ;;  %v8051_v24 = vld [vmem:[%s16130_s2 + $0x118] sm:$0xf0] }
 0x43e   :  { %v4247_v55 = vpop.f32.mrf.mxu2  ;;  %4707 = vmatpush.bf16.msrb.mxu0 %v7942_v60  ;;  %v9330_v60 = vor.u32 %v10290_v42, %v9329_v3  ;;  %4756 = vmatpush.bf16.msrb.mxu1 %v8070_v1  ;;  %v16550_v3 = vld [vmem:[#allocation65_spill] sm:$0xff] }
 0x43f   :  { %v4248_v10 = vadd.f32 %v4247_v55, %v13499_v39  ;;  %v4296_v25 = vpop.f32.mrf.mxu3  ;;  %v9968_v39 = vld [vmem:[%s16130_s2 + $0x10c] sm:$0xf] }
 0x440   :  { %v4348_v59 = vpop.f32.mrf.mxu0  ;;  %v8054_v61 = vor.u32 %v9968_v39, %v8051_v24 }
 0x441   :  { %v4297_v55 = vadd.f32 %v4296_v25, %v4248_v10  ;;  %v4397_v46 = vpop.f32.mrf.mxu1  ;;  %4610 = vmatpush.bf16.msrb.mxu2 %v9202_v62  ;;  %4659 = vmatpush.bf16.msrb.mxu3 %v9330_v60 }
 0x442   :  { %4708 = vmatpush.bf16.msrb.mxu0 %v7926_v54  ;;  %4757 = vmatpush.bf16.msrb.mxu1 %v8054_v61 }
 0x443   :  { %v4346_v8 = vadd.f32 %v4345_v27, %v4297_v55  ;;  %4445 = vmatmul.bf16.gmra.mxu2 %v11911_v7  ;;  %4543 = vmatmul.bf16.gmra.mxu0 %v11913_v12 }
 0x444   :  { %4494 = vmatmul.bf16.gmra.mxu3 %v11924_v38  ;;  %4592 = vmatmul.bf16.gmra.mxu1 %v16550_v3 }
 0x445   :  { %v13831_v42 = vadd.f32 %v4394_v0, %v4346_v8 }
 0x446   :  { %v4250_v4 = vpop.f32.mrf.mxu2 }
 0x447   :  { %v4251_v10 = vadd.f32 %v4250_v4, %v13543_v18  ;;  %v4299_v1 = vpop.f32.mrf.mxu3 }
 0x448   :  { %v4350_v25 = vpop.f32.mrf.mxu0 }
 0x449   :  { %v4300_v62 = vadd.f32 %v4299_v1, %v4251_v10  ;;  %v4399_v23 = vpop.f32.mrf.mxu1 }
 0x44b   :  { %v4349_v60 = vadd.f32 %v4348_v59, %v4300_v62 }
 0x44d   :  { %v13834_v27 = vadd.f32 %v4397_v46, %v4349_v60 }
 0x44e   :  { %v4252_v54 = vpop.f32.mrf.mxu2 }
 0x44f   :  { %v4253_v39 = vadd.f32 %v4252_v54, %v13554_v35  ;;  %v4301_v24 = vpop.f32.mrf.mxu3 }
 0x450   :  { %v4353_v55 = vpop.f32.mrf.mxu0 }
 0x451   :  { %v4302_v38 = vadd.f32 %v4301_v24, %v4253_v39  ;;  %v4402_v3 = vpop.f32.mrf.mxu1 }
 0x453   :  { %v4351_v8 = vadd.f32 %v4350_v25, %v4302_v38  ;;  %4450 = vmatmul.bf16.gmra.mxu2 %v11970_v34  ;;  %4548 = vmatmul.bf16.gmra.mxu0 %v11972_v40 }
 0x454   :  { %4499 = vmatmul.bf16.gmra.mxu3 %v11974_v37  ;;  %4597 = vmatmul.bf16.gmra.mxu1 %v11976_v13 }
 0x455   :  { %v13841_v18 = vadd.f32 %v4399_v23, %v4351_v8 }
 0x456   :  { %v4255_v0 = vpop.f32.mrf.mxu2 }
 0x457   :  { %v4256_v59 = vadd.f32 %v4255_v0, %v13559_v2  ;;  %v4304_v46 = vpop.f32.mrf.mxu3 }
 0x458   :  { %v4355_v35 = vpop.f32.mrf.mxu0 }
 0x459   :  { %v4305_v61 = vadd.f32 %v4304_v46, %v4256_v59  ;;  %v4404_v4 = vpop.f32.mrf.mxu1 }
 0x45b   :  { %v4354_v10 = vadd.f32 %v4353_v55, %v4305_v61 }
 0x45d   :  { %v13844_v1 = vadd.f32 %v4402_v3, %v4354_v10 }
 0x45e   :  { %v4257_v38 = vpop.f32.mrf.mxu2 }
 0x45f   :  { %v4258_v25 = vadd.f32 %v4257_v38, %v13570_v57  ;;  %v4306_v62 = vpop.f32.mrf.mxu3 }
 0x460   :  { %v4514_v60 = vpop.f32.mrf.mxu0 }
 0x461   :  { %v4307_v54 = vadd.f32 %v4306_v62, %v4258_v25  ;;  %v4563_v39 = vpop.f32.mrf.mxu1 }
 0x463   :  { %v4356_v24 = vadd.f32 %v4355_v35, %v4307_v54  ;;  %4611 = vmatmul.bf16.vlgmr.msrb.gmra.mxu2 %v12000_v14  ;;  %4709 = vmatmul.bf16.vlgmr.msrb.gmra.mxu0 %v10623_v56 }
 0x464   :  { %4660 = vmatmul.bf16.vlgmr.msrb.gmra.mxu3 %v12002_v36  ;;  %4758 = vmatmul.bf16.vlgmr.msrb.gmra.mxu1 %v10627_v58 }
 0x465   :  { %v13851_v2 = vadd.f32 %v4404_v4, %v4356_v24 }
 0x466   :  { %v4416_v3 = vpop.f32.mrf.mxu2 }
 0x467   :  { %v4417_v23 = vadd.f32 %v4416_v3, %v13582_v63  ;;  %v4465_v55 = vpop.f32.mrf.mxu3 }
 0x468   :  { %v4516_v57 = vpop.f32.mrf.mxu0 }
 0x469   :  { %v4466_v8 = vadd.f32 %v4465_v55, %v4417_v23  ;;  %v4565_v0 = vpop.f32.mrf.mxu1 }
 0x46b   :  { %v4515_v59 = vadd.f32 %v4514_v60, %v4466_v8 }
 0x46d   :  { %v13854_v46 = vadd.f32 %v4563_v39, %v4515_v59 }
 0x46e   :  { %v4418_v35 = vpop.f32.mrf.mxu2 }
 0x46f   :  { %v4419_v61 = vadd.f32 %v4418_v35, %v13589_v53  ;;  %v4467_v56 = vpop.f32.mrf.mxu3 }
 0x470   :  { %v4519_v10 = vpop.f32.mrf.mxu0 }
 0x471   :  { %v4468_v38 = vadd.f32 %v4467_v56, %v4419_v61  ;;  %v4568_v25 = vpop.f32.mrf.mxu1 }
 0x473   :  { %v4517_v58 = vadd.f32 %v4516_v57, %v4468_v38  ;;  %4616 = vmatmul.bf16.gmra.mxu2 %v12026_v30  ;;  %4714 = vmatmul.bf16.gmra.mxu0 %v10749_v47 }
 0x474   :  { %4665 = vmatmul.bf16.gmra.mxu3 %v12028_v5  ;;  %4763 = vmatmul.bf16.gmra.mxu1 %v10759_v51 }
 0x475   :  { %v13861_v63 = vadd.f32 %v4565_v0, %v4517_v58  ;;  %v8675_v58 = vld [vmem:[%s16130_s2 + $0x5f8] sm:$0xf0] }
 0x476   :  { %v4421_v4 = vpop.f32.mrf.mxu2 }
 0x477   :  { %v4422_v62 = vadd.f32 %v4421_v4, %v13592_v48  ;;  %v4470_v60 = vpop.f32.mrf.mxu3  ;;  %v16551_v48 = vld [vmem:[#allocation6_spill] sm:$0xff] }
 0x478   :  { %v4521_v53 = vpop.f32.mrf.mxu0 }
 0x479   :  { %v4471_v54 = vadd.f32 %v4470_v60, %v4422_v62  ;;  %v4570_v39 = vpop.f32.mrf.mxu1 }
 0x47b   :  { %v4520_v24 = vadd.f32 %v4519_v10, %v4471_v54  ;;  %v8547_v10 = vld [vmem:[%s16130_s2 + $0x4f8] sm:$0xf0] }
 0x47c   :  { %v8531_v54 = vld [vmem:[%s16130_s2 + $0x4d8] sm:$0xf0] }
 0x47d   :  { %v13864_v3 = vadd.f32 %v4568_v25, %v4520_v24 }
 0x47e   :  { %v4423_v23 = vpop.f32.mrf.mxu2 }
 0x47f   :  { %v4424_v55 = vadd.f32 %v4423_v23, %v13599_v33  ;;  %v4472_v47 = vpop.f32.mrf.mxu3  ;;  %v10092_v33 = vld [vmem:[%s16130_s2 + $0x4ec] sm:$0xf]  ;;  %v8659_v23 = vld [vmem:[%s16130_s2 + $0x5d8] sm:$0xf0] }
 0x480   :  { %v4524_v57 = vpop.f32.mrf.mxu0  ;;  %v8550_v25 = vor.u32 %v10092_v33, %v8547_v10 }
 0x481   :  { %v4473_v8 = vadd.f32 %v4472_v47, %v4424_v55  ;;  %v4573_v59 = vpop.f32.mrf.mxu1 }
 0x482   :  { %4897 = vmatpush.bf16.msra.mxu0 %v8550_v25 }
 0x483   :  { %v4522_v51 = vadd.f32 %v4521_v53, %v4473_v8  ;;  %4621 = vmatmul.bf16.gmra.mxu2 %v12052_v17  ;;  %4719 = vmatmul.bf16.gmra.mxu0 %v10881_v49  ;;  %v10124_v49 = vld [vmem:[%s16130_s2 + $0x5ec] sm:$0xf] }
 0x484   :  { %4670 = vmatmul.bf16.gmra.mxu3 %v12054_v29  ;;  %4768 = vmatmul.bf16.gmra.mxu1 %v16551_v48  ;;  %v8678_v62 = vor.u32 %v10124_v49, %v8675_v58  ;;  %v10088_v53 = vld [vmem:[%s16130_s2 + $0x4cc] sm:$0xf]  ;;  %v16552_v58 = vld [vmem:[#allocation66_spill] sm:$0xff] }
 0x485   :  { %v13871_v0 = vadd.f32 %v4570_v39, %v4522_v51  ;;  %v10120_v39 = vld [vmem:[%s16130_s2 + $0x5cc] sm:$0xf]  ;;  %v8534_v24 = vor.u32 %v10088_v53, %v8531_v54 }
 0x486   :  { %v4426_v35 = vpop.f32.mrf.mxu2  ;;  %4946 = vmatpush.bf16.msra.mxu1 %v8678_v62  ;;  %v8662_v47 = vor.u32 %v10120_v39, %v8659_v23  ;;  %v10084_v48 = vld [vmem:[%s16130_s2 + $0x4ac] sm:$0xf]  ;;  %v8627_v39 = vld [vmem:[%s16130_s2 + $0x598] sm:$0xf0] }
 0x487   :  { %v4427_v61 = vadd.f32 %v4426_v35, %v13602_v32  ;;  %v4475_v56 = vpop.f32.mrf.mxu3  ;;  %4898 = vmatpush.bf16.msra.mxu0 %v8534_v24  ;;  %v8515_v35 = vld [vmem:[%s16130_s2 + $0x4b8] sm:$0xf0]  ;;  %v10080_v62 = vld [vmem:[%s16130_s2 + $0x48c] sm:$0xf] }
 0x488   :  { %v4526_v38 = vpop.f32.mrf.mxu0  ;;  %v10112_v53 = vld [vmem:[%s16130_s2 + $0x58c] sm:$0xf] }
 0x489   :  { %v4476_v32 = vadd.f32 %v4475_v56, %v4427_v61  ;;  %v4575_v4 = vpop.f32.mrf.mxu1  ;;  %v8518_v56 = vor.u32 %v10084_v48, %v8515_v35  ;;  %v16554_v54 = vld [vmem:[#allocation67_spill] sm:$0xff]  ;;  %v8630_v23 = vor.u32 %v10112_v53, %v8627_v39 }
 0x48a   :  { %4947 = vmatpush.bf16.msra.mxu1 %v8662_v47 }
 0x48b   :  { %v4525_v60 = vadd.f32 %v4524_v57, %v4476_v32  ;;  %4899 = vmatpush.bf16.msra.mxu0 %v8518_v56  ;;  %v16553_v32 = vld [vmem:[#allocation8_spill] sm:$0xff] }
 0x48d   :  { %v13898_v55 = vadd.f32 %v4573_v59, %v4525_v60  ;;  %v10116_v59 = vld [vmem:[%s16130_s2 + $0x5ac] sm:$0xf]  ;;  %v8499_v60 = vld [vmem:[%s16130_s2 + $0x498] sm:$0xf0] }
 0x48e   :  { %v4428_v57 = vpop.f32.mrf.mxu2 }
 0x48f   :  { %v4429_v8 = vadd.f32 %v4428_v57, %v13609_v26  ;;  %v4477_v51 = vpop.f32.mrf.mxu3  ;;  %v8643_v26 = vld [vmem:[%s16130_s2 + $0x5b8] sm:$0xf0] }
 0x490   :  { %v4529_v61 = vpop.f32.mrf.mxu0  ;;  %v8646_v49 = vor.u32 %v10116_v59, %v8643_v26  ;;  %v8611_v59 = vld [vmem:[%s16130_s2 + $0x578] sm:$0xf0] }
 0x491   :  { %v4478_v33 = vadd.f32 %v4477_v51, %v4429_v8  ;;  %v4578_v10 = vpop.f32.mrf.mxu1  ;;  %v10076_v51 = vld [vmem:[%s16130_s2 + $0x46c] sm:$0xf] }
 0x492   :  { %4948 = vmatpush.bf16.msra.mxu1 %v8646_v49  ;;  %v10072_v49 = vld [vmem:[%s16130_s2 + $0x44c] sm:$0xf] }
 0x493   :  { %v4527_v25 = vadd.f32 %v4526_v38, %v4478_v33  ;;  %4626 = vmatmul.bf16.gmra.mxu2 %v16552_v58  ;;  %4724 = vmatmul.bf16.gmra.mxu0 %v16553_v32  ;;  %v8502_v38 = vor.u32 %v10080_v62, %v8499_v60  ;;  %v10104_v32 = vld [vmem:[%s16130_s2 + $0x54c] sm:$0xf]  ;;  %v8595_v60 = vld [vmem:[%s16130_s2 + $0x558] sm:$0xf0] }
 0x494   :  { %4675 = vmatmul.bf16.gmra.mxu3 %v16554_v54  ;;  %4773 = vmatmul.bf16.gmra.mxu1 %v16472_v16  ;;  %v8483_v16 = vld [vmem:[%s16130_s2 + $0x478] sm:$0xf0] }
 0x495   :  { %v13929_v24 = vadd.f32 %v4575_v4, %v4527_v25  ;;  %4900 = vmatpush.bf16.msra.mxu0 %v8502_v38  ;;  %v10108_v4 = vld [vmem:[%s16130_s2 + $0x56c] sm:$0xf]  ;;  %v8486_v35 = vor.u32 %v10076_v51, %v8483_v16  ;;  %v8467_v25 = vld [vmem:[%s16130_s2 + $0x458] sm:$0xf0] }
 0x496   :  { %v4431_v47 = vpop.f32.mrf.mxu2  ;;  %4949 = vmatpush.bf16.msra.mxu1 %v8630_v23  ;;  %v8614_v26 = vor.u32 %v10108_v4, %v8611_v59  ;;  %v8470_v62 = vor.u32 %v10072_v49, %v8467_v25  ;;  %v8579_v16 = vld [vmem:[%s16130_s2 + $0x538] sm:$0xf0]  ;;  %v10028_v59 = vld [vmem:[%s16130_s2 + $0x2ec] sm:$0xf]  ;;  %v16555_v49 = vld [vmem:[#allocation68_spill] sm:$0xff] }
 0x497   :  { %v4432_v57 = vadd.f32 %v4431_v47, %v13612_v19  ;;  %v4480_v8 = vpop.f32.mrf.mxu3  ;;  %v10068_v47 = vld [vmem:[%s16130_s2 + $0x42c] sm:$0xf]  ;;  %v16556_v25 = vld [vmem:[#allocation2_spill] sm:$0xff] }
 0x498   :  { %v4531_v48 = vpop.f32.mrf.mxu0 }
 0x499   :  { %v4481_v19 = vadd.f32 %v4480_v8, %v4432_v57  ;;  %v4580_v56 = vpop.f32.mrf.mxu1  ;;  %4901 = vmatpush.bf16.msra.mxu0 %v8486_v35  ;;  %v8451_v57 = vld [vmem:[%s16130_s2 + $0x438] sm:$0xf0] }
 0x49a   :  { %4950 = vmatpush.bf16.msra.mxu1 %v8614_v26  ;;  %v8454_v51 = vor.u32 %v10068_v47, %v8451_v57  ;;  %v10060_v26 = vld [vmem:[%s16130_s2 + $0x3ec] sm:$0xf]  ;;  %v8563_v57 = vld [vmem:[%s16130_s2 + $0x518] sm:$0xf0] }
 0x49b   :  { %v4530_v33 = vadd.f32 %v4529_v61, %v4481_v19  ;;  %v8598_v61 = vor.u32 %v10104_v32, %v8595_v60  ;;  %v8291_v19 = vld [vmem:[%s16130_s2 + $0x2f8] sm:$0xf0]  ;;  %v10064_v60 = vld [vmem:[%s16130_s2 + $0x40c] sm:$0xf] }
 0x49c   :  { %v8294_v32 = vor.u32 %v10028_v59, %v8291_v19  ;;  %v10096_v47 = vld [vmem:[%s16130_s2 + $0x50c] sm:$0xf]  ;;  %v9187_v19 = vld [vmem:[%s16130_s2 + $0x9f8] sm:$0xf0] }
 0x49d   :  { %v13956_v53 = vadd.f32 %v4578_v10, %v4530_v33  ;;  %4902 = vmatpush.bf16.msra.mxu0 %v8470_v62  ;;  %v10100_v10 = vld [vmem:[%s16130_s2 + $0x52c] sm:$0xf]  ;;  %v8419_v62 = vld [vmem:[%s16130_s2 + $0x3f8] sm:$0xf0] }
 0x49e   :  { %v4433_v38 = vpop.f32.mrf.mxu2  ;;  %4951 = vmatpush.bf16.msra.mxu1 %v8598_v61  ;;  %v8582_v35 = vor.u32 %v10100_v10, %v8579_v16  ;;  %v8435_v61 = vld [vmem:[%s16130_s2 + $0x418] sm:$0xf0]  ;;  %v10220_v10 = vld [vmem:[%s16130_s2 + $0x8ec] sm:$0xf]  ;;  %4799 = vmatpush.bf16.msra.mxu2 %v8294_v32  ;;  %v8566_v16 = vor.u32 %v10096_v47, %v8563_v57 }
 0x49f   :  { %v4434_v39 = vadd.f32 %v4433_v38, %v13643_v41  ;;  %v4482_v23 = vpop.f32.mrf.mxu3  ;;  %v16557_v38 = vld [vmem:[#allocation69_spill] sm:$0xff]  ;;  %v10252_v59 = vld [vmem:[%s16130_s2 + $0x9ec] sm:$0xf] }
 0x4a0   :  { %v4534_v8 = vpop.f32.mrf.mxu0  ;;  %v10056_v32 = vld [vmem:[%s16130_s2 + $0x3cc] sm:$0xf]  ;;  %v9043_v57 = vld [vmem:[%s16130_s2 + $0x8d8] sm:$0xf0] }
 0x4a1   :  { %v4483_v41 = vadd.f32 %v4482_v23, %v4434_v39  ;;  %v13971_v4 = vpop.f32.mrf.mxu1  ;;  %4903 = vmatpush.bf16.msra.mxu0 %v8454_v51  ;;  %v8422_v39 = vor.u32 %v10060_v26, %v8419_v62  ;;  %v8438_v23 = vor.u32 %v10064_v60, %v8435_v61  ;;  %v10216_v47 = vld [vmem:[%s16130_s2 + $0x8cc] sm:$0xf] }
 0x4a2   :  { %4952 = vmatpush.bf16.msra.mxu1 %v8582_v35  ;;  %v10024_v35 = vld [vmem:[%s16130_s2 + $0x2cc] sm:$0xf] }
 0x4a3   :  { %v4532_v33 = vadd.f32 %v4531_v48, %v4483_v41  ;;  %4631 = vmatmul.bf16.gmra.mxu2 %v16555_v49  ;;  %4729 = vmatmul.bf16.gmra.mxu0 %v16556_v25  ;;  %v16558_v48 = vld [vmem:[#allocation3_spill] sm:$0xff]  ;;  %v9059_v41 = vld [vmem:[%s16130_s2 + $0x8f8] sm:$0xf0] }
 0x4a4   :  { %4680 = vmatmul.bf16.gmra.mxu3 %v16557_v38  ;;  %4778 = vmatmul.bf16.gmra.mxu1 %v16558_v48  ;;  %v8275_v25 = vld [vmem:[%s16130_s2 + $0x2d8] sm:$0xf0]  ;;  %v16645_v38 = vld [vmem:[#allocation43_spill] sm:$0xff] }
 0x4a5   :  { %v14004_v51 = vadd.f32 %v4580_v56, %v4532_v33  ;;  %4848 = vmatpush.bf16.msra.mxu3 %v8422_v39  ;;  %4904 = vmatpush.bf16.msra.mxu0 %v8438_v23  ;;  %v9062_v56 = vor.u32 %v10220_v10, %v9059_v41  ;;  %v9190_v33 = vor.u32 %v10252_v59, %v9187_v19  ;;  %v8403_v48 = vld [vmem:[%s16130_s2 + $0x3d8] sm:$0xf0] }
 0x4a6   :  { %v4436_v26 = vpop.f32.mrf.mxu2  ;;  %v8278_v61 = vor.u32 %v10024_v35, %v8275_v25  ;;  %v8406_v23 = vor.u32 %v10056_v32, %v8403_v48  ;;  %4953 = vmatpush.bf16.msra.mxu1 %v8566_v16  ;;  %v9046_v59 = vor.u32 %v10216_v47, %v9043_v57  ;;  %v9171_v19 = vld [vmem:[%s16130_s2 + $0x9d8] sm:$0xf0]  ;;  %v10052_v16 = vld [vmem:[%s16130_s2 + $0x3ac] sm:$0xf] }
 0x4a7   :  { %v4437_v62 = vadd.f32 %v4436_v26, %v13694_v15  ;;  %v4485_v60 = vpop.f32.mrf.mxu3  ;;  %v10248_v15 = vld [vmem:[%s16130_s2 + $0x9cc] sm:$0xf]  ;;  %v8259_v35 = vld [vmem:[%s16130_s2 + $0x2b8] sm:$0xf0] }
 0x4a8   :  { %v4536_v39 = vpop.f32.mrf.mxu0  ;;  %4800 = vmatpush.bf16.msra.mxu2 %v8278_v61  ;;  %v9174_v26 = vor.u32 %v10248_v15, %v9171_v19  ;;  %v9027_v61 = vld [vmem:[%s16130_s2 + $0x8b8] sm:$0xf0]  ;;  %v10244_v48 = vld [vmem:[%s16130_s2 + $0x9ac] sm:$0xf] }
 0x4a9   :  { %5093 = vmatpush.bf16.msrb.mxu0 %v9062_v56  ;;  %v4486_v10 = vadd.f32 %v4485_v60, %v4437_v62  ;;  %v4585_v41 = vpop.f32.mrf.mxu1  ;;  %4849 = vmatpush.bf16.msra.mxu3 %v8406_v23  ;;  %v10020_v56 = vld [vmem:[%s16130_s2 + $0x2ac] sm:$0xf]  ;;  %v9155_v47 = vld [vmem:[%s16130_s2 + $0x9b8] sm:$0xf0] }
 0x4aa   :  { %5142 = vmatpush.bf16.msrb.mxu1 %v9190_v33  ;;  %v8262_v32 = vor.u32 %v10020_v56, %v8259_v35  ;;  %v8387_v33 = vld [vmem:[%s16130_s2 + $0x3b8] sm:$0xf0]  ;;  %v10212_v60 = vld [vmem:[%s16130_s2 + $0x8ac] sm:$0xf]  ;;  %v9158_v15 = vor.u32 %v10244_v48, %v9155_v47 }
 0x4ab   :  { %v4535_v25 = vadd.f32 %v4534_v8, %v4486_v10  ;;  %v8390_v62 = vor.u32 %v10052_v16, %v8387_v33  ;;  %v9030_v23 = vor.u32 %v10212_v60, %v9027_v61  ;;  %v10016_v10 = vld [vmem:[%s16130_s2 + $0x28c] sm:$0xf]  ;;  %v9011_v33 = vld [vmem:[%s16130_s2 + $0x898] sm:$0xf0] }
 0x4ac   :  { %4801 = vmatpush.bf16.msra.mxu2 %v8262_v32  ;;  %v10208_v32 = vld [vmem:[%s16130_s2 + $0x88c] sm:$0xf]  ;;  %v9139_v48 = vld [vmem:[%s16130_s2 + $0x998] sm:$0xf0] }
 0x4ad   :  { %5094 = vmatpush.bf16.msrb.mxu0 %v9046_v59  ;;  %v14062_v8 = vadd.f32 %v13971_v4, %v4535_v25  ;;  %4850 = vmatpush.bf16.msra.mxu3 %v8390_v62  ;;  %v8243_v59 = vld [vmem:[%s16130_s2 + $0x298] sm:$0xf0]  ;;  %v10048_v4 = vld [vmem:[%s16130_s2 + $0x38c] sm:$0xf]  ;;  %v9014_v61 = vor.u32 %v10208_v32, %v9011_v33 }
 0x4ae   :  { %v4438_v57 = vpop.f32.mrf.mxu2  ;;  %5143 = vmatpush.bf16.msrb.mxu1 %v9174_v26  ;;  %v8246_v35 = vor.u32 %v10016_v10, %v8243_v59  ;;  %v8371_v26 = vld [vmem:[%s16130_s2 + $0x398] sm:$0xf0]  ;;  %v10012_v47 = vld [vmem:[%s16130_s2 + $0x26c] sm:$0xf] }
 0x4af   :  { %v4439_v19 = vadd.f32 %v4438_v57, %v13749_v6  ;;  %v4487_v56 = vpop.f32.mrf.mxu3  ;;  %v8374_v25 = vor.u32 %v10048_v4, %v8371_v26  ;;  %v10240_v6 = vld [vmem:[%s16130_s2 + $0x98c] sm:$0xf]  ;;  %v8227_v57 = vld [vmem:[%s16130_s2 + $0x278] sm:$0xf0]  ;;  %v16559_v4 = vld [vmem:[#allocation70_spill] sm:$0xff] }
 0x4b0   :  { %v4539_v16 = vpop.f32.mrf.mxu0  ;;  %4802 = vmatpush.bf16.msra.mxu2 %v8246_v35  ;;  %v10044_v10 = vld [vmem:[%s16130_s2 + $0x36c] sm:$0xf]  ;;  %v16562_v26 = vld [vmem:[#allocation5_spill] sm:$0xff] }
 0x4b1   :  { %5095 = vmatpush.bf16.msrb.mxu0 %v9030_v23  ;;  %v4488_v62 = vadd.f32 %v4487_v56, %v4439_v19  ;;  %v4588_v60 = vpop.f32.mrf.mxu1  ;;  %4851 = vmatpush.bf16.msra.mxu3 %v8374_v25  ;;  %v9142_v23 = vor.u32 %v10240_v6, %v9139_v48  ;;  %v16560_v19 = vld [vmem:[#allocation4_spill] sm:$0xff]  ;;  %v8355_v56 = vld [vmem:[%s16130_s2 + $0x378] sm:$0xf0]  ;;  %v16561_v35 = vld [vmem:[#allocation71_spill] sm:$0xff] }
 0x4b2   :  { %5144 = vmatpush.bf16.msrb.mxu1 %v9158_v15  ;;  %v8230_v15 = vor.u32 %v10012_v47, %v8227_v57  ;;  %v8358_v25 = vor.u32 %v10044_v10, %v8355_v56  ;;  %v10204_v32 = vld [vmem:[%s16130_s2 + $0x86c] sm:$0xf]  ;;  %v9123_v48 = vld [vmem:[%s16130_s2 + $0x978] sm:$0xf0] }
 0x4b3   :  { %v4537_v59 = vadd.f32 %v4536_v39, %v4488_v62  ;;  %4636 = vmatmul.bf16.gmra.mxu2 %v16559_v4  ;;  %4734 = vmatmul.bf16.gmra.mxu0 %v16560_v19  ;;  %v8995_v39 = vld [vmem:[%s16130_s2 + $0x878] sm:$0xf0]  ;;  %v10236_v33 = vld [vmem:[%s16130_s2 + $0x96c] sm:$0xf] }
 0x4b4   :  { %4685 = vmatmul.bf16.gmra.mxu3 %v16561_v35  ;;  %4783 = vmatmul.bf16.gmra.mxu1 %v16562_v26  ;;  %v8998_v62 = vor.u32 %v10204_v32, %v8995_v39  ;;  %v9126_v57 = vor.u32 %v10236_v33, %v9123_v48  ;;  %v10008_v10 = vld [vmem:[%s16130_s2 + $0x24c] sm:$0xf]  ;;  %v8979_v32 = vld [vmem:[%s16130_s2 + $0x858] sm:$0xf0] }
 0x4b5   :  { %v14117_v6 = vadd.f32 %v4585_v41, %v4537_v59  ;;  %5096 = vmatpush.bf16.msrb.mxu0 %v9014_v61  ;;  %4803 = vmatpush.bf16.msra.mxu2 %v8230_v15  ;;  %v8211_v41 = vld [vmem:[%s16130_s2 + $0x258] sm:$0xf0]  ;;  %v10040_v61 = vld [vmem:[%s16130_s2 + $0x34c] sm:$0xf] }
 0x4b6   :  { %v4441_v47 = vpop.f32.mrf.mxu2  ;;  %5145 = vmatpush.bf16.msrb.mxu1 %v9142_v23  ;;  %4852 = vmatpush.bf16.msra.mxu3 %v8358_v25  ;;  %v8214_v15 = vor.u32 %v10008_v10, %v8211_v41  ;;  %v8339_v23 = vld [vmem:[%s16130_s2 + $0x358] sm:$0xf0]  ;;  %v10200_v25 = vld [vmem:[%s16130_s2 + $0x84c] sm:$0xf] }
 0x4b7   :  { %v4442_v59 = vadd.f32 %v4441_v47, %v13800_v11  ;;  %v4490_v19 = vpop.f32.mrf.mxu3  ;;  %v8342_v26 = vor.u32 %v10040_v61, %v8339_v23  ;;  %v10232_v11 = vld [vmem:[%s16130_s2 + $0x94c] sm:$0xf]  ;;  %v8982_v48 = vor.u32 %v10200_v25, %v8979_v32  ;;  %v9107_v47 = vld [vmem:[%s16130_s2 + $0x958] sm:$0xf0] }
 0x4b8   :  { %v4541_v56 = vpop.f32.mrf.mxu0  ;;  %v9110_v10 = vor.u32 %v10232_v11, %v9107_v47  ;;  %v10004_v41 = vld [vmem:[%s16130_s2 + $0x22c] sm:$0xf]  ;;  %v8195_v61 = vld [vmem:[%s16130_s2 + $0x238] sm:$0xf0] }
 0x4b9   :  { %v4491_v39 = vadd.f32 %v4490_v19, %v4442_v59  ;;  %v4590_v33 = vpop.f32.mrf.mxu1  ;;  %5097 = vmatpush.bf16.msrb.mxu0 %v8998_v62  ;;  %4804 = vmatpush.bf16.msra.mxu2 %v8214_v15  ;;  %v10036_v62 = vld [vmem:[%s16130_s2 + $0x32c] sm:$0xf]  ;;  %v8198_v19 = vor.u32 %v10004_v41, %v8195_v61  ;;  %v9091_v11 = vld [vmem:[%s16130_s2 + $0x938] sm:$0xf0] }
 0x4ba   :  { %5146 = vmatpush.bf16.msrb.mxu1 %v9126_v57  ;;  %4853 = vmatpush.bf16.msra.mxu3 %v8342_v26  ;;  %v8323_v57 = vld [vmem:[%s16130_s2 + $0x338] sm:$0xf0]  ;;  %v10196_v23 = vld [vmem:[%s16130_s2 + $0x82c] sm:$0xf] }
 0x4bb   :  { %v4540_v59 = vadd.f32 %v4539_v16, %v4491_v39  ;;  %v8326_v15 = vor.u32 %v10036_v62, %v8323_v57  ;;  %v8963_v26 = vld [vmem:[%s16130_s2 + $0x838] sm:$0xf0]  ;;  %v10228_v25 = vld [vmem:[%s16130_s2 + $0x92c] sm:$0xf] }
 0x4bc   :  { %v8966_v16 = vor.u32 %v10196_v23, %v8963_v26  ;;  %v9094_v47 = vor.u32 %v10228_v25, %v9091_v11  ;;  %v10000_v41 = vld [vmem:[%s16130_s2 + $0x20c] sm:$0xf]  ;;  %v8947_v23 = vld [vmem:[%s16130_s2 + $0x818] sm:$0xf0] }
 0x4bd   :  { %v14168_v32 = vadd.f32 %v4588_v60, %v4540_v59  ;;  %5098 = vmatpush.bf16.msrb.mxu0 %v8982_v48  ;;  %4805 = vmatpush.bf16.msra.mxu2 %v8198_v19  ;;  %v8179_v60 = vld [vmem:[%s16130_s2 + $0x218] sm:$0xf0]  ;;  %v10032_v48 = vld [vmem:[%s16130_s2 + $0x30c] sm:$0xf] }
 0x4be   :  { %v4443_v39 = vpop.f32.mrf.mxu2  ;;  %5147 = vmatpush.bf16.msrb.mxu1 %v9110_v10  ;;  %4854 = vmatpush.bf16.msra.mxu3 %v8326_v15  ;;  %v8182_v59 = vor.u32 %v10000_v41, %v8179_v60  ;;  %v8307_v10 = vld [vmem:[%s16130_s2 + $0x318] sm:$0xf0]  ;;  %v10192_v15 = vld [vmem:[%s16130_s2 + $0x80c] sm:$0xf] }
 0x4bf   :  { %v4444_v61 = vadd.f32 %v4443_v39, %v13831_v42  ;;  %v4492_v62 = vpop.f32.mrf.mxu3  ;;  %v8310_v57 = vor.u32 %v10032_v48, %v8307_v10  ;;  %v10224_v42 = vld [vmem:[%s16130_s2 + $0x90c] sm:$0xf]  ;;  %v8950_v11 = vor.u32 %v10192_v15, %v8947_v23  ;;  %v9075_v39 = vld [vmem:[%s16130_s2 + $0x918] sm:$0xf0] }
 0x4c0   :  { %v4544_v19 = vpop.f32.mrf.mxu0  ;;  %v9078_v41 = vor.u32 %v10224_v42, %v9075_v39  ;;  %v16563_v48 = vld [vmem:[#allocation7_spill] sm:$0xff] }
 0x4c1   :  { %v4493_v26 = vadd.f32 %v4492_v62, %v4444_v61  ;;  %v4593_v25 = vpop.f32.mrf.mxu1  ;;  %5099 = vmatpush.bf16.msrb.mxu0 %v8966_v16  ;;  %4806 = vmatpush.bf16.msra.mxu2 %v8182_v59 }
 0x4c2   :  { %5148 = vmatpush.bf16.msrb.mxu1 %v9094_v47  ;;  %4855 = vmatpush.bf16.msra.mxu3 %v8310_v57 }
 0x4c3   :  { %v4542_v60 = vadd.f32 %v4541_v56, %v4493_v26  ;;  %4641 = vmatmul.bf16.gmra.mxu2 %v12336_v44  ;;  %4739 = vmatmul.bf16.gmra.mxu0 %v10883_v50  ;;  %v16634_v44 = vld [vmem:[#allocation32_spill] sm:$0xff] }
 0x4c4   :  { %4690 = vmatmul.bf16.gmra.mxu3 %v12347_v45  ;;  %4788 = vmatmul.bf16.gmra.mxu1 %v16563_v48 }
 0x4c5   :  { %v14202_v61 = vadd.f32 %v4590_v33, %v4542_v60  ;;  %5100 = vmatpush.bf16.msrb.mxu0 %v8950_v11 }
 0x4c6   :  { %v4446_v16 = vpop.f32.mrf.mxu2  ;;  %5149 = vmatpush.bf16.msrb.mxu1 %v9078_v41 }
 0x4c7   :  { %v4447_v62 = vadd.f32 %v4446_v16, %v13834_v27  ;;  %v4495_v59 = vpop.f32.mrf.mxu3  ;;  %v16564_v27 = vld [vmem:[#allocation10_spill] sm:$0xff] }
 0x4c8   :  { %v4546_v47 = vpop.f32.mrf.mxu0 }
 0x4c9   :  { %v4496_v10 = vadd.f32 %v4495_v59, %v4447_v62  ;;  %v4595_v57 = vpop.f32.mrf.mxu1 }
 0x4cb   :  { %v4545_v56 = vadd.f32 %v4544_v19, %v4496_v10 }
 0x4cd   :  { %v14205_v15 = vadd.f32 %v4593_v25, %v4545_v56 }
 0x4ce   :  { %v4448_v23 = vpop.f32.mrf.mxu2 }
 0x4cf   :  { %v4449_v50 = vadd.f32 %v4448_v23, %v13841_v18  ;;  %v4497_v42 = vpop.f32.mrf.mxu3 }
 0x4d0   :  { %v4549_v26 = vpop.f32.mrf.mxu0 }
 0x4d1   :  { %v4498_v39 = vadd.f32 %v4497_v42, %v4449_v50  ;;  %v4598_v33 = vpop.f32.mrf.mxu1 }
 0x4d3   :  { %v4547_v60 = vadd.f32 %v4546_v47, %v4498_v39  ;;  %4646 = vmatmul.bf16.gmra.mxu2 %v12377_v52  ;;  %4744 = vmatmul.bf16.gmra.mxu0 %v10925_v9  ;;  %v16567_v39 = vld [vmem:[#allocation90_spill] sm:$0xff] }
 0x4d4   :  { %4695 = vmatmul.bf16.gmra.mxu3 %v12379_v28  ;;  %4793 = vmatmul.bf16.gmra.mxu1 %v16564_v27 }
 0x4d5   :  { %v14212_v11 = vadd.f32 %v4595_v57, %v4547_v60  ;;  %v16570_v60 = vld [vmem:[#allocation104_spill] sm:$0xff] }
 0x4d6   :  { %v4451_v19 = vpop.f32.mrf.mxu2 }
 0x4d7   :  { %v4452_v25 = vadd.f32 %v4451_v19, %v13844_v1  ;;  %v4500_v41 = vpop.f32.mrf.mxu3  ;;  %v16565_v1 = vld [vmem:[#allocation11_spill] sm:$0xff] }
 0x4d8   :  { %v4551_v18 = vpop.f32.mrf.mxu0 }
 0x4d9   :  { %v4501_v48 = vadd.f32 %v4500_v41, %v4452_v25  ;;  %v4600_v16 = vpop.f32.mrf.mxu1 }
 0x4db   :  { %v4550_v62 = vadd.f32 %v4549_v26, %v4501_v48  ;;  %v16566_v26 = vld [vmem:[#allocation91_spill] sm:$0xff]  ;;  %v16573_v48 = vld [vmem:[#allocation88_spill] sm:$0xff] }
 0x4dd   :  { %v14215_v59 = vadd.f32 %v4598_v33, %v4550_v62  ;;  %v16568_v33 = vpack.c.bf16 %v16566_v26, %v16567_v39 }
 0x4de   :  { %v4453_v47 = vpop.f32.mrf.mxu2 }
 0x4df   :  { %v4454_v10 = vadd.f32 %v4453_v47, %v13851_v2  ;;  %v4502_v9 = vpop.f32.mrf.mxu3  ;;  %v16569_v2 = vld [vmem:[#allocation105_spill] sm:$0xff]  ;;  %v16575_v47 = vld [vmem:[#allocation103_spill] sm:$0xff] }
 0x4e0   :  { %v4710_v56 = vpop.f32.mrf.mxu0  ;;  %v16571_v27 = vpack.c.bf16 %v16569_v2, %v16570_v60 }
 0x4e1   :  { %v4503_v23 = vadd.f32 %v4502_v9, %v4454_v10  ;;  %v4759_v50 = vpop.f32.mrf.mxu1  ;;  %v16576_v10 = vld [vmem:[#allocation102_spill] sm:$0xff] }
 0x4e2   :  { %v14218_v42 = vadd.f32 %v4759_v50, %v4710_v56  ;;  %v16577_v9 = vpack.c.bf16 %v16575_v47, %v16576_v10  ;;  %v16579_v50 = vld [vmem:[#allocation86_spill] sm:$0xff] }
 0x4e3   :  { %v4552_v57 = vadd.f32 %v4551_v18, %v4503_v23  ;;  %4807 = vmatmul.bf16.vlgmr.msra.gmra.mxu2 %v10959_v20  ;;  %4905 = vmatmul.bf16.vlgmr.msra.gmra.mxu0 %v10961_v21 }
 0x4e4   :  { %4856 = vmatmul.bf16.vlgmr.msra.gmra.mxu3 %v10963_v22  ;;  %4954 = vmatmul.bf16.vlgmr.msra.gmra.mxu1 %v16565_v1  ;;  %v16572_v22 = vld [vmem:[#allocation89_spill] sm:$0xff]  ;;  %v16582_v1 = vld [vmem:[#allocation100_spill] sm:$0xff] }
 0x4e5   :  { %5369 = vmatpush.bf16.msra.mxu0 %v16568_v33  ;;  %5418 = vmatpush.bf16.msra.mxu1 %v16571_v27  ;;  %v14230_v19 = vadd.f32 %v4600_v16, %v4552_v57  ;;  %v16574_v62 = vpack.c.bf16 %v16572_v22, %v16573_v48  ;;  %v16578_v16 = vld [vmem:[#allocation87_spill] sm:$0xff]  ;;  %v16588_v22 = vld [vmem:[#allocation98_spill] sm:$0xff] }
 0x4e6   :  { %v4612_v25 = vpop.f32.mrf.mxu2  ;;  %v16580_v57 = vpack.c.bf16 %v16578_v16, %v16579_v50  ;;  %v16593_v16 = vld [vmem:[#allocation15_spill] sm:$0xff] }
 0x4e7   :  { %v4613_v41 = vadd.f32 %v4612_v25, %v13854_v46  ;;  %v4661_v20 = vpop.f32.mrf.mxu3  ;;  %v16581_v46 = vld [vmem:[#allocation101_spill] sm:$0xff]  ;;  %v16594_v50 = vld [vmem:[#allocation83_spill] sm:$0xff] }
 0x4e8   :  { %v4712_v18 = vpop.f32.mrf.mxu0  ;;  %v16583_v26 = vpack.c.bf16 %v16581_v46, %v16582_v1  ;;  %v16584_v25 = vld [vmem:[#allocation85_spill] sm:$0xff] }
 0x4e9   :  { %v14233_v21 = vadd.f32 %v4661_v20, %v4613_v41  ;;  %5370 = vmatpush.bf16.msra.mxu0 %v16574_v62  ;;  %5419 = vmatpush.bf16.msra.mxu1 %v16577_v9  ;;  %v4761_v56 = vpop.f32.mrf.mxu1  ;;  %v16585_v41 = vld [vmem:[#allocation84_spill] sm:$0xff]  ;;  %v16597_v1 = vld [vmem:[#allocation97_spill] sm:$0xff] }
 0x4ea   :  { %v14241_v23 = vadd.f32 %v4761_v56, %v4712_v18  ;;  %v16586_v20 = vpack.c.bf16 %v16584_v25, %v16585_v41  ;;  %v16587_v18 = vld [vmem:[#allocation99_spill] sm:$0xff]  ;;  %v16590_v9 = vld [vmem:[#allocation12_spill] sm:$0xff]  ;;  %v16592_v56 = vld [vmem:[#allocation14_spill] sm:$0xff] }
 0x4eb   :  { %v16589_v48 = vpack.c.bf16 %v16587_v18, %v16588_v22  ;;  %v16601_v18 = vld [vmem:[#allocation80_spill] sm:$0xff] }
 0x4ed   :  { %5371 = vmatpush.bf16.msra.mxu0 %v16580_v57  ;;  %5420 = vmatpush.bf16.msra.mxu1 %v16583_v26  ;;  %v16595_v57 = vld [vmem:[#allocation82_spill] sm:$0xff]  ;;  %v16598_v26 = vld [vmem:[#allocation96_spill] sm:$0xff] }
 0x4ee   :  { %v4614_v39 = vpop.f32.mrf.mxu2  ;;  %v16596_v46 = vpack.c.bf16 %v16594_v50, %v16595_v57  ;;  %v16607_v50 = vld [vmem:[#allocation78_spill] sm:$0xff] }
 0x4ef   :  { %v4615_v33 = vadd.f32 %v4614_v39, %v13861_v63  ;;  %v4663_v2 = vpop.f32.mrf.mxu3  ;;  %v16591_v63 = vld [vmem:[#allocation13_spill] sm:$0xff]  ;;  %v16599_v39 = vpack.c.bf16 %v16597_v1, %v16598_v26 }
 0x4f0   :  { %v4715_v60 = vpop.f32.mrf.mxu0 }
 0x4f1   :  { %v14250_v27 = vadd.f32 %v4663_v2, %v4615_v33  ;;  %5372 = vmatpush.bf16.msra.mxu0 %v16586_v20  ;;  %5421 = vmatpush.bf16.msra.mxu1 %v16589_v48  ;;  %v4764_v62 = vpop.f32.mrf.mxu1  ;;  %v16600_v20 = vld [vmem:[#allocation81_spill] sm:$0xff]  ;;  %v16603_v48 = vld [vmem:[#allocation95_spill] sm:$0xff] }
 0x4f2   :  { %v14258_v47 = vadd.f32 %v4764_v62, %v4715_v60  ;;  %v16602_v22 = vpack.c.bf16 %v16600_v20, %v16601_v18  ;;  %v16604_v62 = vld [vmem:[#allocation94_spill] sm:$0xff]  ;;  %v16612_v20 = vld [vmem:[#allocation77_spill] sm:$0xff]  ;;  %v16613_v18 = vld [vmem:[#allocation76_spill] sm:$0xff] }
 0x4f3   :  { %4812 = vmatmul.bf16.gmra.mxu2 %v16590_v9  ;;  %4910 = vmatmul.bf16.gmra.mxu0 %v16591_v63  ;;  %v16605_v9 = vpack.c.bf16 %v16603_v48, %v16604_v62  ;;  %v16616_v48 = vld [vmem:[#allocation55_spill] sm:$0xff] }
 0x4f4   :  { %4861 = vmatmul.bf16.gmra.mxu3 %v16592_v56  ;;  %4959 = vmatmul.bf16.gmra.mxu1 %v16593_v16  ;;  %v16606_v16 = vld [vmem:[#allocation79_spill] sm:$0xff] }
 0x4f5   :  { %5373 = vmatpush.bf16.msra.mxu0 %v16596_v46  ;;  %5422 = vmatpush.bf16.msra.mxu1 %v16599_v39  ;;  %v16608_v57 = vpack.c.bf16 %v16606_v16, %v16607_v50  ;;  %v16610_v46 = vld [vmem:[#allocation92_spill] sm:$0xff]  ;;  %v8899_v16 = vld [vmem:[%s16130_s2 + $0x7b8] sm:$0xf0] }
 0x4f6   :  { %v4617_v33 = vpop.f32.mrf.mxu2  ;;  %v16618_v50 = vld [vmem:[#allocation16_spill] sm:$0xff] }
 0x4f7   :  { %v4618_v2 = vadd.f32 %v4617_v33, %v13864_v3  ;;  %v4666_v60 = vpop.f32.mrf.mxu3  ;;  %v16609_v3 = vld [vmem:[#allocation93_spill] sm:$0xff] }
 0x4f8   :  { %v4717_v25 = vpop.f32.mrf.mxu0  ;;  %v16611_v1 = vpack.c.bf16 %v16609_v3, %v16610_v46  ;;  %v16621_v3 = vld [vmem:[#allocation19_spill] sm:$0xff] }
 0x4f9   :  { %v14273_v41 = vadd.f32 %v4666_v60, %v4618_v2  ;;  %5374 = vmatpush.bf16.msra.mxu0 %v16602_v22  ;;  %5423 = vmatpush.bf16.msra.mxu1 %v16605_v9  ;;  %v4766_v63 = vpop.f32.mrf.mxu1  ;;  %v16614_v22 = vpack.c.bf16 %v16612_v20, %v16613_v18  ;;  %v10156_v20 = vld [vmem:[%s16130_s2 + $0x6ec] sm:$0xf]  ;;  %v8803_v18 = vld [vmem:[%s16130_s2 + $0x6f8] sm:$0xf0] }
 0x4fa   :  { %v14281_v56 = vadd.f32 %v4766_v63, %v4717_v25  ;;  %v16615_v25 = vld [vmem:[#allocation9_spill] sm:$0xff] }
 0x4fb   :  { %v16617_v62 = vpack.c.bf16 %v16615_v25, %v16616_v48  ;;  %v8806_v25 = vor.u32 %v10156_v20, %v8803_v18  ;;  %v16623_v20 = vld [vmem:[#allocation21_spill] sm:$0xff] }
 0x4fd   :  { %5375 = vmatpush.bf16.msra.mxu0 %v16608_v57  ;;  %5424 = vmatpush.bf16.msra.mxu1 %v16611_v1  ;;  %v16620_v57 = vld [vmem:[#allocation18_spill] sm:$0xff] }
 0x4fe   :  { %v4619_v26 = vpop.f32.mrf.mxu2  ;;  %4995 = vmatpush.bf16.msrb.mxu2 %v8806_v25  ;;  %v16624_v25 = vld [vmem:[#allocation22_spill] sm:$0xff] }
 0x4ff   :  { %v4620_v39 = vadd.f32 %v4619_v26, %v13871_v0  ;;  %v4668_v33 = vpop.f32.mrf.mxu3  ;;  %v16619_v0 = vld [vmem:[#allocation17_spill] sm:$0xff] }
 0x500   :  { %v4720_v2 = vpop.f32.mrf.mxu0 }
 0x501   :  { %v14290_v60 = vadd.f32 %v4668_v33, %v4620_v39  ;;  %5376 = vmatpush.bf16.msra.mxu0 %v16614_v22  ;;  %5425 = vmatpush.bf16.msra.mxu1 %v16617_v62  ;;  %v4769_v9 = vpop.f32.mrf.mxu1  ;;  %v8787_v62 = vld [vmem:[%s16130_s2 + $0x6d8] sm:$0xf0] }
 0x502   :  { %v14298_v63 = vadd.f32 %v4769_v9, %v4720_v2 }
 0x503   :  { %4817 = vmatmul.bf16.gmra.mxu2 %v16618_v50  ;;  %4915 = vmatmul.bf16.gmra.mxu0 %v16619_v0 }
 0x504   :  { %4866 = vmatmul.bf16.gmra.mxu3 %v16620_v57  ;;  %4964 = vmatmul.bf16.gmra.mxu1 %v16621_v3 }
 0x506   :  { %v4622_v46 = vpop.f32.mrf.mxu2 }
 0x507   :  { %v4623_v1 = vadd.f32 %v4622_v46, %v13898_v55  ;;  %v4671_v26 = vpop.f32.mrf.mxu3  ;;  %v10152_v55 = vld [vmem:[%s16130_s2 + $0x6cc] sm:$0xf] }
 0x508   :  { %v4722_v39 = vpop.f32.mrf.mxu0  ;;  %v8790_v0 = vor.u32 %v10152_v55, %v8787_v62  ;;  %v10144_v62 = vld [vmem:[%s16130_s2 + $0x68c] sm:$0xf] }
 0x509   :  { %v14307_v33 = vadd.f32 %v4671_v26, %v4623_v1  ;;  %v4771_v2 = vpop.f32.mrf.mxu1  ;;  %v10148_v26 = vld [vmem:[%s16130_s2 + $0x6ac] sm:$0xf] }
 0x50a   :  { %v14315_v22 = vadd.f32 %v4771_v2, %v4722_v39  ;;  %4996 = vmatpush.bf16.msrb.mxu2 %v8790_v0  ;;  %v8771_v39 = vld [vmem:[%s16130_s2 + $0x6b8] sm:$0xf0]  ;;  %v16622_v2 = vld [vmem:[#allocation20_spill] sm:$0xff] }
 0x50b   :  { %v8774_v18 = vor.u32 %v10148_v26, %v8771_v39 }
 0x50e   :  { %v4624_v48 = vpop.f32.mrf.mxu2  ;;  %4997 = vmatpush.bf16.msrb.mxu2 %v8774_v18 }
 0x50f   :  { %v4625_v9 = vadd.f32 %v4624_v48, %v13929_v24  ;;  %v4673_v50 = vpop.f32.mrf.mxu3  ;;  %v16625_v48 = vld [vmem:[#allocation23_spill] sm:$0xff] }
 0x510   :  { %v4725_v57 = vpop.f32.mrf.mxu0 }
 0x511   :  { %v14324_v3 = vadd.f32 %v4673_v50, %v4625_v9  ;;  %v4774_v46 = vpop.f32.mrf.mxu1  ;;  %v8755_v9 = vld [vmem:[%s16130_s2 + $0x698] sm:$0xf0] }
 0x512   :  { %v14326_v1 = vadd.f32 %v4774_v46, %v4725_v57  ;;  %v8758_v57 = vor.u32 %v10144_v62, %v8755_v9 }
 0x513   :  { %4822 = vmatmul.bf16.gmra.mxu2 %v16622_v2  ;;  %4920 = vmatmul.bf16.gmra.mxu0 %v16623_v20  ;;  %v10140_v2 = vld [vmem:[%s16130_s2 + $0x66c] sm:$0xf]  ;;  %v8739_v20 = vld [vmem:[%s16130_s2 + $0x678] sm:$0xf0] }
 0x514   :  { %4871 = vmatmul.bf16.gmra.mxu3 %v16624_v25  ;;  %4969 = vmatmul.bf16.gmra.mxu1 %v16625_v48  ;;  %v8742_v25 = vor.u32 %v10140_v2, %v8739_v20  ;;  %v10136_v48 = vld [vmem:[%s16130_s2 + $0x64c] sm:$0xf]  ;;  %v8707_v20 = vld [vmem:[%s16130_s2 + $0x638] sm:$0xf0] }
 0x515   :  { %4998 = vmatpush.bf16.msrb.mxu2 %v8758_v57  ;;  %v10132_v2 = vld [vmem:[%s16130_s2 + $0x62c] sm:$0xf] }
 0x516   :  { %v4627_v55 = vpop.f32.mrf.mxu2 }
 0x517   :  { %v4628_v50 = vadd.f32 %v4627_v55, %v13956_v53  ;;  %v4676_v0 = vpop.f32.mrf.mxu3  ;;  %v8723_v55 = vld [vmem:[%s16130_s2 + $0x658] sm:$0xf0] }
 0x518   :  { %v4727_v46 = vpop.f32.mrf.mxu0 }
 0x519   :  { %v14347_v26 = vadd.f32 %v4676_v0, %v4628_v50  ;;  %v4776_v39 = vpop.f32.mrf.mxu1  ;;  %4999 = vmatpush.bf16.msrb.mxu2 %v8742_v25  ;;  %v8726_v50 = vor.u32 %v10136_v48, %v8723_v55  ;;  %v16626_v25 = vld [vmem:[#allocation24_spill] sm:$0xff]  ;;  %v8710_v48 = vor.u32 %v10132_v2, %v8707_v20  ;;  %v10188_v55 = vld [vmem:[%s16130_s2 + $0x7ec] sm:$0xf]  ;;  %v8691_v20 = vld [vmem:[%s16130_s2 + $0x618] sm:$0xf0] }
 0x51a   :  { %v14355_v18 = vadd.f32 %v4776_v39, %v4727_v46  ;;  %v10128_v2 = vld [vmem:[%s16130_s2 + $0x60c] sm:$0xf] }
 0x51b   :  { %v8694_v10 = vor.u32 %v10128_v2, %v8691_v20  ;;  %v10180_v20 = vld [vmem:[%s16130_s2 + $0x7ac] sm:$0xf] }
 0x51d   :  { %5000 = vmatpush.bf16.msrb.mxu2 %v8726_v50  ;;  %v16629_v50 = vld [vmem:[#allocation27_spill] sm:$0xff] }
 0x51e   :  { %v4629_v53 = vpop.f32.mrf.mxu2 }
 0x51f   :  { %v4630_v62 = vadd.f32 %v4629_v53, %v14004_v51  ;;  %v4678_v9 = vpop.f32.mrf.mxu3  ;;  %v16627_v53 = vld [vmem:[#allocation25_spill] sm:$0xff]  ;;  %v10176_v51 = vld [vmem:[%s16130_s2 + $0x78c] sm:$0xf] }
 0x520   :  { %v4730_v0 = vpop.f32.mrf.mxu0 }
 0x521   :  { %v14364_v57 = vadd.f32 %v4678_v9, %v4630_v62  ;;  %v4779_v46 = vpop.f32.mrf.mxu1  ;;  %v8931_v62 = vld [vmem:[%s16130_s2 + $0x7f8] sm:$0xf0]  ;;  %v16628_v9 = vld [vmem:[#allocation26_spill] sm:$0xff]  ;;  %5001 = vmatpush.bf16.msrb.mxu2 %v8710_v48 }
 0x522   :  { %v14366_v39 = vadd.f32 %v4779_v46, %v4730_v0  ;;  %v8934_v0 = vor.u32 %v10188_v55, %v8931_v62  ;;  %v8915_v48 = vld [vmem:[%s16130_s2 + $0x7d8] sm:$0xf0]  ;;  %v10284_v55 = vld [vmem:[%s16130_s2 + $0xaec] sm:$0xf] }
 0x523   :  { %4827 = vmatmul.bf16.gmra.mxu2 %v16626_v25  ;;  %4925 = vmatmul.bf16.gmra.mxu0 %v16627_v53 }
 0x524   :  { %4876 = vmatmul.bf16.gmra.mxu3 %v16628_v9  ;;  %4974 = vmatmul.bf16.gmra.mxu1 %v16629_v50  ;;  %v10184_v9 = vld [vmem:[%s16130_s2 + $0x7cc] sm:$0xf] }
 0x525   :  { %5044 = vmatpush.bf16.msrb.mxu3 %v8934_v0  ;;  %v8918_v50 = vor.u32 %v10184_v9, %v8915_v48  ;;  %5002 = vmatpush.bf16.msrb.mxu2 %v8694_v10  ;;  %v10280_v9 = vld [vmem:[%s16130_s2 + $0xacc] sm:$0xf]  ;;  %v9299_v10 = vld [vmem:[%s16130_s2 + $0xad8] sm:$0xf0] }
 0x526   :  { %v4632_v46 = vpop.f32.mrf.mxu2 }
 0x527   :  { %v4633_v25 = vadd.f32 %v4632_v46, %v14062_v8  ;;  %v4681_v53 = vpop.f32.mrf.mxu3  ;;  %v9315_v8 = vld [vmem:[%s16130_s2 + $0xaf8] sm:$0xf0] }
 0x528   :  { %v4732_v62 = vpop.f32.mrf.mxu0  ;;  %v9318_v2 = vor.u32 %v10284_v55, %v9315_v8 }
 0x529   :  { %v14405_v0 = vadd.f32 %v4681_v53, %v4633_v25  ;;  %v4781_v46 = vpop.f32.mrf.mxu1  ;;  %5045 = vmatpush.bf16.msrb.mxu3 %v8918_v50  ;;  %v8902_v25 = vor.u32 %v10180_v20, %v8899_v16  ;;  %v9302_v53 = vor.u32 %v10280_v9, %v9299_v10  ;;  %v8883_v16 = vld [vmem:[%s16130_s2 + $0x798] sm:$0xf0] }
 0x52a   :  { %v14416_v48 = vadd.f32 %v4781_v46, %v4732_v62  ;;  %5191 = vmatpush.bf16.msra.mxu2 %v9318_v2  ;;  %v10276_v62 = vld [vmem:[%s16130_s2 + $0xaac] sm:$0xf]  ;;  %v8886_v46 = vor.u32 %v10176_v51, %v8883_v16  ;;  %v16632_v16 = vld [vmem:[#allocation30_spill] sm:$0xff]  ;;  %v8835_v10 = vld [vmem:[%s16130_s2 + $0x738] sm:$0xf0] }
 0x52b   :  { %v10172_v51 = vld [vmem:[%s16130_s2 + $0x76c] sm:$0xf] }
 0x52d   :  { %5046 = vmatpush.bf16.msrb.mxu3 %v8902_v25 }
 0x52e   :  { %v4634_v55 = vpop.f32.mrf.mxu2  ;;  %5192 = vmatpush.bf16.msra.mxu2 %v9302_v53  ;;  %v16630_v53 = vld [vmem:[#allocation28_spill] sm:$0xff] }
 0x52f   :  { %v4635_v8 = vadd.f32 %v4634_v55, %v14117_v6  ;;  %v4683_v24 = vpop.f32.mrf.mxu3  ;;  %v9283_v6 = vld [vmem:[%s16130_s2 + $0xab8] sm:$0xf0] }
 0x530   :  { %v4735_v50 = vpop.f32.mrf.mxu0  ;;  %v9286_v9 = vor.u32 %v10276_v62, %v9283_v6  ;;  %v16631_v55 = vld [vmem:[#allocation29_spill] sm:$0xff]  ;;  %v16633_v62 = vld [vmem:[#allocation31_spill] sm:$0xff] }
 0x531   :  { %v14434_v2 = vadd.f32 %v4683_v24, %v4635_v8  ;;  %v4784_v20 = vpop.f32.mrf.mxu1  ;;  %5047 = vmatpush.bf16.msrb.mxu3 %v8886_v46  ;;  %v8867_v24 = vld [vmem:[%s16130_s2 + $0x778] sm:$0xf0]  ;;  %v10272_v8 = vld [vmem:[%s16130_s2 + $0xa8c] sm:$0xf] }
 0x532   :  { %v14436_v25 = vadd.f32 %v4784_v20, %v4735_v50  ;;  %v8870_v50 = vor.u32 %v10172_v51, %v8867_v24  ;;  %v9267_v46 = vld [vmem:[%s16130_s2 + $0xa98] sm:$0xf0]  ;;  %5193 = vmatpush.bf16.msra.mxu2 %v9286_v9  ;;  %v10268_v51 = vld [vmem:[%s16130_s2 + $0xa6c] sm:$0xf] }
 0x533   :  { %4832 = vmatmul.bf16.gmra.mxu2 %v16630_v53  ;;  %4930 = vmatmul.bf16.gmra.mxu0 %v16631_v55  ;;  %v9270_v6 = vor.u32 %v10272_v8, %v9267_v46  ;;  %v10168_v55 = vld [vmem:[%s16130_s2 + $0x74c] sm:$0xf]  ;;  %v9251_v9 = vld [vmem:[%s16130_s2 + $0xa78] sm:$0xf0] }
 0x534   :  { %4881 = vmatmul.bf16.gmra.mxu3 %v16632_v16  ;;  %4979 = vmatmul.bf16.gmra.mxu1 %v16633_v62  ;;  %v8851_v16 = vld [vmem:[%s16130_s2 + $0x758] sm:$0xf0]  ;;  %v10164_v46 = vld [vmem:[%s16130_s2 + $0x72c] sm:$0xf] }
 0x535   :  { %5048 = vmatpush.bf16.msrb.mxu3 %v8870_v50  ;;  %v8854_v62 = vor.u32 %v10168_v55, %v8851_v16  ;;  %v9254_v50 = vor.u32 %v10268_v51, %v9251_v9  ;;  %v8838_v52 = vor.u32 %v10164_v46, %v8835_v10  ;;  %v10264_v55 = vld [vmem:[%s16130_s2 + $0xa4c] sm:$0xf] }
 0x536   :  { %v4637_v20 = vpop.f32.mrf.mxu2  ;;  %5194 = vmatpush.bf16.msra.mxu2 %v9270_v6  ;;  %v9235_v6 = vld [vmem:[%s16130_s2 + $0xa58] sm:$0xf0]  ;;  %v10160_v10 = vld [vmem:[%s16130_s2 + $0x70c] sm:$0xf] }
 0x537   :  { %v4686_v53 = vpop.f32.mrf.mxu3  ;;  %v4638_v16 = vadd.f32 %v4637_v20, %v14168_v32  ;;  %v9238_v51 = vor.u32 %v10264_v55, %v9235_v6 }
 0x538   :  { %v4737_v24 = vpop.f32.mrf.mxu0 }
 0x539   :  { %v4786_v8 = vpop.f32.mrf.mxu1  ;;  %5049 = vmatpush.bf16.msrb.mxu3 %v8854_v62  ;;  %v8819_v62 = vld [vmem:[%s16130_s2 + $0x718] sm:$0xf0] }
 0x53a   :  { %v14474_v28 = vadd.f32 %v4786_v8, %v4737_v24  ;;  %5195 = vmatpush.bf16.msra.mxu2 %v9254_v50  ;;  %v10260_v8 = vld [vmem:[%s16130_s2 + $0xa2c] sm:$0xf]  ;;  %v8822_v20 = vor.u32 %v10160_v10, %v8819_v62  ;;  %v16635_v10 = vld [vmem:[#allocation33_spill] sm:$0xff] }
 0x53d   :  { %5050 = vmatpush.bf16.msrb.mxu3 %v8838_v52  ;;  %v9219_v52 = vld [vmem:[%s16130_s2 + $0xa38] sm:$0xf0] }
 0x53e   :  { %v4639_v9 = vpop.f32.mrf.mxu2  ;;  %5196 = vmatpush.bf16.msra.mxu2 %v9238_v51  ;;  %v9222_v55 = vor.u32 %v10260_v8, %v9219_v52  ;;  %v16637_v51 = vld [vmem:[#allocation35_spill] sm:$0xff] }
 0x53f   :  { %v4640_v45 = vadd.f32 %v4639_v9, %v14202_v61  ;;  %v4688_v24 = vpop.f32.mrf.mxu3  ;;  %v14496_v61 = vadd.f32 %v4686_v53, %v4638_v16  ;;  %v10256_v53 = vld [vmem:[%s16130_s2 + $0xa0c] sm:$0xf]  ;;  %v16636_v16 = vld [vmem:[#allocation34_spill] sm:$0xff] }
 0x540   :  { %v4740_v32 = vpop.f32.mrf.mxu0 }
 0x541   :  { %v14498_v50 = vadd.f32 %v4688_v24, %v4640_v45  ;;  %v4789_v46 = vpop.f32.mrf.mxu1  ;;  %5051 = vmatpush.bf16.msrb.mxu3 %v8822_v20  ;;  %v9203_v45 = vld [vmem:[%s16130_s2 + $0xa18] sm:$0xf0] }
 0x542   :  { %v14500_v6 = vadd.f32 %v4789_v46, %v4740_v32  ;;  %5197 = vmatpush.bf16.msra.mxu2 %v9222_v55  ;;  %v9206_v24 = vor.u32 %v10256_v53, %v9203_v45  ;;  %v16638_v53 = vld [vmem:[#allocation36_spill] sm:$0xff]  ;;  %v16639_v45 = vld [vmem:[#allocation37_spill] sm:$0xff] }
 0x543   :  { %v5311_v9 = vpack.c.bf16 %v14498_v50, %v14496_v61  ;;  %4837 = vmatmul.bf16.gmra.mxu2 %v16634_v44  ;;  %4935 = vmatmul.bf16.gmra.mxu0 %v16635_v10 }
 0x544   :  { %4886 = vmatmul.bf16.gmra.mxu3 %v16636_v16  ;;  %4984 = vmatmul.bf16.gmra.mxu1 %v16637_v51 }
 0x546   :  { %v4642_v62 = vpop.f32.mrf.mxu2  ;;  %5198 = vmatpush.bf16.msra.mxu2 %v9206_v24  ;;  %v16640_v24 = vld [vmem:[#allocation38_spill] sm:$0xff] }
 0x547   :  { %v4691_v8 = vpop.f32.mrf.mxu3  ;;  %v4643_v52 = vadd.f32 %v4642_v62, %v14205_v15 }
 0x548   :  { %v4742_v32 = vpop.f32.mrf.mxu0 }
 0x549   :  { %v4791_v44 = vpop.f32.mrf.mxu1  ;;  %v4692_v35 = vadd.f32 %v4691_v8, %v4643_v52 }
 0x54a   :  { %v14514_v20 = vadd.f32 %v4791_v44, %v4742_v32  ;;  %v16641_v32 = vld [vmem:[#allocation39_spill] sm:$0xff] }
 0x54e   :  { %v4644_v61 = vpop.f32.mrf.mxu2 }
 0x54f   :  { %v4645_v50 = vadd.f32 %v4644_v61, %v14212_v11  ;;  %v4693_v46 = vpop.f32.mrf.mxu3 }
 0x550   :  { %v4745_v10 = vpop.f32.mrf.mxu0 }
 0x551   :  { %v4694_v16 = vadd.f32 %v4693_v46, %v4645_v50  ;;  %v4794_v4 = vpop.f32.mrf.mxu1 }
 0x552   :  { %v14518_v51 = vadd.f32 %v4794_v4, %v4745_v10 }
 0x553   :  { %v5315_v55 = vpack.c.bf16 %v4694_v16, %v4692_v35  ;;  %4842 = vmatmul.bf16.gmra.mxu2 %v16638_v53  ;;  %4940 = vmatmul.bf16.gmra.mxu0 %v16639_v45  ;;  %v16642_v45 = vld [vmem:[#allocation40_spill] sm:$0xff] }
 0x554   :  { %4891 = vmatmul.bf16.gmra.mxu3 %v16640_v24  ;;  %4989 = vmatmul.bf16.gmra.mxu1 %v16641_v32  ;;  %v16643_v24 = vld [vmem:[#allocation41_spill] sm:$0xff]  ;;  %v16644_v32 = vld [vmem:[#allocation42_spill] sm:$0xff] }
 0x556   :  { %v4647_v15 = vpop.f32.mrf.mxu2 }
 0x557   :  { %v4696_v62 = vpop.f32.mrf.mxu3  ;;  %v4648_v8 = vadd.f32 %v4647_v15, %v14215_v59 }
 0x558   :  { %v4747_v44 = vpop.f32.mrf.mxu0 }
 0x559   :  { %v4796_v11 = vpop.f32.mrf.mxu1  ;;  %v4697_v46 = vadd.f32 %v4696_v62, %v4648_v8 }
 0x55a   :  { %v14524_v61 = vadd.f32 %v4796_v11, %v4747_v44 }
 0x55e   :  { %v4649_v52 = vpop.f32.mrf.mxu2 }
 0x55f   :  { %v4650_v4 = vadd.f32 %v4649_v52, %v14230_v19  ;;  %v4698_v35 = vpop.f32.mrf.mxu3 }
 0x560   :  { %v4906_v50 = vpop.f32.mrf.mxu0 }
 0x561   :  { %v4699_v10 = vadd.f32 %v4698_v35, %v4650_v4  ;;  %v4955_v16 = vpop.f32.mrf.mxu1 }
 0x563   :  { %v5319_v53 = vpack.c.bf16 %v4699_v10, %v4697_v46  ;;  %5003 = vmatmul.bf16.vlgmr.msrb.gmra.mxu2 %v16642_v45  ;;  %5101 = vmatmul.bf16.vlgmr.msrb.gmra.mxu0 %v16643_v24  ;;  %v16647_v24 = vld [vmem:[#allocation44_spill] sm:$0xff] }
 0x564   :  { %5052 = vmatmul.bf16.vlgmr.msrb.gmra.mxu3 %v16644_v32  ;;  %5150 = vmatmul.bf16.vlgmr.msrb.gmra.mxu1 %v16645_v38  ;;  %v16646_v38 = vpack.c.bf16 %v14434_v2, %v14405_v0 }
 0x565   :  { %5467 = vmatpush.bf16.msrb.mxu2 %v5319_v53 }
 0x566   :  { %v4808_v44 = vpop.f32.mrf.mxu2 }
 0x567   :  { %v4809_v59 = vadd.f32 %v4808_v44, %v14218_v42  ;;  %v4857_v15 = vpop.f32.mrf.mxu3 }
 0x568   :  { %v4908_v19 = vpop.f32.mrf.mxu0 }
 0x569   :  { %v4858_v11 = vadd.f32 %v4857_v15, %v4809_v59  ;;  %5468 = vmatpush.bf16.msrb.mxu2 %v5315_v55  ;;  %v4957_v62 = vpop.f32.mrf.mxu1  ;;  %v16648_v55 = vld [vmem:[#allocation45_spill] sm:$0xff]  ;;  %v16652_v15 = vpack.c.bf16 %v14324_v3, %v14307_v33 }
 0x56b   :  { %v4907_v8 = vadd.f32 %v4906_v50, %v4858_v11  ;;  %v16649_v50 = vld [vmem:[#allocation46_spill] sm:$0xff] }
 0x56d   :  { %v14533_v52 = vadd.f32 %v4955_v16, %v4907_v8  ;;  %5469 = vmatpush.bf16.msrb.mxu2 %v5311_v9  ;;  %v16650_v16 = vld [vmem:[#allocation47_spill] sm:$0xff] }
 0x56e   :  { %v4810_v4 = vpop.f32.mrf.mxu2 }
 0x56f   :  { %v4811_v35 = vadd.f32 %v4810_v4, %v14241_v23  ;;  %v4859_v46 = vpop.f32.mrf.mxu3  ;;  %v16651_v23 = vpack.c.bf16 %v14364_v57, %v14347_v26 }
 0x570   :  { %v4911_v10 = vpop.f32.mrf.mxu0 }
 0x571   :  { %v4860_v45 = vadd.f32 %v4859_v46, %v4811_v35  ;;  %5470 = vmatpush.bf16.msrb.mxu2 %v16646_v38  ;;  %v4960_v42 = vpop.f32.mrf.mxu1  ;;  %v16654_v46 = vpack.c.bf16 %v14250_v27, %v14233_v21  ;;  %v16657_v38 = vld [vmem:[#allocation50_spill] sm:$0xff] }
 0x573   :  { %v4909_v53 = vadd.f32 %v4908_v19, %v4860_v45  ;;  %5008 = vmatmul.bf16.gmra.mxu2 %v16647_v24  ;;  %5106 = vmatmul.bf16.gmra.mxu0 %v16648_v55  ;;  %v16655_v45 = vld [vmem:[#allocation48_spill] sm:$0xff] }
 0x574   :  { %5057 = vmatmul.bf16.gmra.mxu3 %v16649_v50  ;;  %5155 = vmatmul.bf16.gmra.mxu1 %v16650_v16 }
 0x575   :  { %v14543_v9 = vadd.f32 %v4957_v62, %v4909_v53  ;;  %5471 = vmatpush.bf16.msrb.mxu2 %v16651_v23  ;;  %v16653_v62 = vpack.c.bf16 %v14290_v60, %v14273_v41  ;;  %v16658_v41 = vld [vmem:[#allocation51_spill] sm:$0xff] }
 0x576   :  { %v4813_v32 = vpop.f32.mrf.mxu2 }
 0x577   :  { %v4814_v0 = vadd.f32 %v4813_v32, %v14258_v47  ;;  %v4862_v2 = vpop.f32.mrf.mxu3 }
 0x578   :  { %v4913_v44 = vpop.f32.mrf.mxu0 }
 0x579   :  { %v4863_v59 = vadd.f32 %v4862_v2, %v4814_v0  ;;  %5472 = vmatpush.bf16.msrb.mxu2 %v16652_v15  ;;  %v4962_v19 = vpop.f32.mrf.mxu1  ;;  %v16659_v15 = vld [vmem:[#allocation53_spill] sm:$0xff] }
 0x57b   :  { %v4912_v11 = vadd.f32 %v4911_v10, %v4863_v59  ;;  %v16656_v10 = vld [vmem:[#allocation49_spill] sm:$0xff] }
 0x57d   :  { %v14552_v8 = vadd.f32 %v4960_v42, %v4912_v11  ;;  %5473 = vmatpush.bf16.msrb.mxu2 %v16653_v62 }
 0x57e   :  { %v4815_v26 = vpop.f32.mrf.mxu2 }
 0x57f   :  { %v4816_v57 = vadd.f32 %v4815_v26, %v14281_v56  ;;  %v4864_v4 = vpop.f32.mrf.mxu3 }
 0x580   :  { %v4916_v47 = vpop.f32.mrf.mxu0 }
 0x581   :  { %v4865_v35 = vadd.f32 %v4864_v4, %v4816_v57  ;;  %5474 = vmatpush.bf16.msrb.mxu2 %v16654_v46  ;;  %v4965_v33 = vpop.f32.mrf.mxu1 }
 0x583   :  { %v4914_v3 = vadd.f32 %v4913_v44, %v4865_v35  ;;  %5013 = vmatmul.bf16.gmra.mxu2 %v16655_v45  ;;  %5111 = vmatmul.bf16.gmra.mxu0 %v16656_v10 }
 0x584   :  { %5062 = vmatmul.bf16.gmra.mxu3 %v16657_v38  ;;  %5160 = vmatmul.bf16.gmra.mxu1 %v16658_v41  ;;  %v16661_v38 = vld [vmem:[#allocation56_spill] sm:$0xff]  ;;  %v16662_v41 = vld [vmem:[#allocation57_spill] sm:$0xff] }
 0x585   :  { %v14565_v60 = vadd.f32 %v4962_v19, %v4914_v3 }
 0x586   :  { %v4818_v56 = vpop.f32.mrf.mxu2 }
 0x587   :  { %v4819_v42 = vadd.f32 %v4818_v56, %v14298_v63  ;;  %v4867_v53 = vpop.f32.mrf.mxu3  ;;  %v16660_v63 = vld [vmem:[#allocation54_spill] sm:$0xff]  ;;  %v9443_v56 = vld [vmem:[%s16130_s2 + $0xbf8] sm:$0xf0] }
 0x588   :  { %v4918_v24 = vpop.f32.mrf.mxu0 }
 0x589   :  { %v4868_v55 = vadd.f32 %v4867_v53, %v4819_v42  ;;  %v4967_v21 = vpop.f32.mrf.mxu1  ;;  %v16663_v42 = vld [vmem:[#allocation58_spill] sm:$0xff] }
 0x58b   :  { %v4917_v27 = vadd.f32 %v4916_v47, %v4868_v55 }
 0x58d   :  { %v14568_v50 = vadd.f32 %v4965_v33, %v4917_v27 }
 0x58e   :  { %v4820_v16 = vpop.f32.mrf.mxu2 }
 0x58f   :  { %v4821_v23 = vadd.f32 %v4820_v16, %v14315_v22  ;;  %v4869_v32 = vpop.f32.mrf.mxu3  ;;  %v10312_v16 = vld [vmem:[%s16130_s2 + $0xbcc] sm:$0xf] }
 0x590   :  { %v4921_v0 = vpop.f32.mrf.mxu0 }
 0x591   :  { %v4870_v2 = vadd.f32 %v4869_v32, %v4821_v23  ;;  %v4970_v44 = vpop.f32.mrf.mxu1  ;;  %v9427_v23 = vld [vmem:[%s16130_s2 + $0xbd8] sm:$0xf0] }
 0x593   :  { %v4919_v59 = vadd.f32 %v4918_v24, %v4870_v2  ;;  %5018 = vmatmul.bf16.gmra.mxu2 %v16539_v31  ;;  %5116 = vmatmul.bf16.gmra.mxu0 %v16659_v15  ;;  %v9411_v15 = vld [vmem:[%s16130_s2 + $0xbb8] sm:$0xf0] }
 0x594   :  { %5067 = vmatmul.bf16.gmra.mxu3 %v16660_v63  ;;  %5165 = vmatmul.bf16.gmra.mxu1 %v16459_v43 }
 0x595   :  { %v14575_v19 = vadd.f32 %v4967_v21, %v4919_v59 }
 0x596   :  { %v4823_v11 = vpop.f32.mrf.mxu2 }
 0x597   :  { %v4824_v62 = vadd.f32 %v4823_v11, %v14326_v1  ;;  %v4872_v26 = vpop.f32.mrf.mxu3  ;;  %v10316_v1 = vld [vmem:[%s16130_s2 + $0xbec] sm:$0xf] }
 0x598   :  { %v4923_v22 = vpop.f32.mrf.mxu0  ;;  %v9446_v53 = vor.u32 %v10316_v1, %v9443_v56 }
 0x599   :  { %v4873_v57 = vadd.f32 %v4872_v26, %v4824_v62  ;;  %v4972_v4 = vpop.f32.mrf.mxu1 }
 0x59a   :  { %5240 = vmatpush.bf16.msra.mxu3 %v9446_v53  ;;  %v9363_v53 = vld [vmem:[%s16130_s2 + $0xb58] sm:$0xf0] }
 0x59b   :  { %v4922_v47 = vadd.f32 %v4921_v0, %v4873_v57  ;;  %v9430_v0 = vor.u32 %v10312_v16, %v9427_v23  ;;  %v10304_v57 = vld [vmem:[%s16130_s2 + $0xb8c] sm:$0xf] }
 0x59d   :  { %v14578_v35 = vadd.f32 %v4970_v44, %v4922_v47 }
 0x59e   :  { %v4825_v46 = vpop.f32.mrf.mxu2  ;;  %5241 = vmatpush.bf16.msra.mxu3 %v9430_v0  ;;  %v9347_v0 = vld [vmem:[%s16130_s2 + $0xb38] sm:$0xf0] }
 0x59f   :  { %v4826_v31 = vadd.f32 %v4825_v46, %v14355_v18  ;;  %v4874_v33 = vpop.f32.mrf.mxu3  ;;  %v16664_v18 = vld [vmem:[#allocation59_spill] sm:$0xff] }
 0x5a0   :  { %v4926_v3 = vpop.f32.mrf.mxu0 }
 0x5a1   :  { %v4875_v45 = vadd.f32 %v4874_v33, %v4826_v31  ;;  %v4975_v10 = vpop.f32.mrf.mxu1 }
 0x5a3   :  { %v4924_v43 = vadd.f32 %v4923_v22, %v4875_v45  ;;  %5023 = vmatmul.bf16.gmra.mxu2 %v16661_v38  ;;  %5121 = vmatmul.bf16.gmra.mxu0 %v16662_v41  ;;  %v16666_v45 = vld [vmem:[#allocation61_spill] sm:$0xff]  ;;  %v16668_v38 = vld [vmem:[#allocation63_spill] sm:$0xff] }
 0x5a4   :  { %5072 = vmatmul.bf16.gmra.mxu3 %v16663_v42  ;;  %5170 = vmatmul.bf16.gmra.mxu1 %v16664_v18  ;;  %v10296_v18 = vld [vmem:[%s16130_s2 + $0xb4c] sm:$0xf] }
 0x5a5   :  { %v14591_v24 = vadd.f32 %v4972_v4, %v4924_v43  ;;  %v9395_v4 = vld [vmem:[%s16130_s2 + $0xb98] sm:$0xf0]  ;;  %v16667_v43 = vld [vmem:[#allocation62_spill] sm:$0xff] }
 0x5a6   :  { %v4828_v55 = vpop.f32.mrf.mxu2  ;;  %v9398_v46 = vor.u32 %v10304_v57, %v9395_v4 }
 0x5a7   :  { %v4829_v21 = vadd.f32 %v4828_v55, %v14366_v39  ;;  %v4877_v27 = vpop.f32.mrf.mxu3  ;;  %v10308_v39 = vld [vmem:[%s16130_s2 + $0xbac] sm:$0xf] }
 0x5a8   :  { %v14600_v32 = vpop.f32.mrf.mxu0  ;;  %v9414_v63 = vor.u32 %v10308_v39, %v9411_v15 }
 0x5a9   :  { %v4878_v2 = vadd.f32 %v4877_v27, %v4829_v21  ;;  %v14602_v44 = vpop.f32.mrf.mxu1  ;;  %v9366_v21 = vor.u32 %v10296_v18, %v9363_v53 }
 0x5aa   :  { %5242 = vmatpush.bf16.msra.mxu3 %v9414_v63 }
 0x5ab   :  { %v4927_v59 = vadd.f32 %v4926_v3, %v4878_v2  ;;  %v16665_v3 = vld [vmem:[#allocation60_spill] sm:$0xff] }
 0x5ad   :  { %v14610_v11 = vadd.f32 %v4975_v10, %v4927_v59  ;;  %v9379_v10 = vld [vmem:[%s16130_s2 + $0xb78] sm:$0xf0] }
 0x5ae   :  { %v4830_v62 = vpop.f32.mrf.mxu2  ;;  %5243 = vmatpush.bf16.msra.mxu3 %v9398_v46  ;;  %v16670_v46 = vld [vmem:[#allocation65_spill] sm:$0xff] }
 0x5af   :  { %v4831_v26 = vadd.f32 %v4830_v62, %v14416_v48  ;;  %v4879_v22 = vpop.f32.mrf.mxu3  ;;  %v10300_v48 = vld [vmem:[%s16130_s2 + $0xb6c] sm:$0xf] }
 0x5b0   :  { %v4931_v47 = vpop.f32.mrf.mxu0  ;;  %v9382_v41 = vor.u32 %v10300_v48, %v9379_v10  ;;  %v10288_v62 = vld [vmem:[%s16130_s2 + $0xb0c] sm:$0xf] }
 0x5b1   :  { %v14619_v31 = vadd.f32 %v4879_v22, %v4831_v26  ;;  %v4980_v33 = vpop.f32.mrf.mxu1  ;;  %v9331_v26 = vld [vmem:[%s16130_s2 + $0xb18] sm:$0xf0] }
 0x5b2   :  { %5244 = vmatpush.bf16.msra.mxu3 %v9382_v41  ;;  %v9334_v57 = vor.u32 %v10288_v62, %v9331_v26 }
 0x5b3   :  { %5028 = vmatmul.bf16.gmra.mxu2 %v16665_v3  ;;  %5126 = vmatmul.bf16.gmra.mxu0 %v16666_v45 }
 0x5b4   :  { %5077 = vmatmul.bf16.gmra.mxu3 %v16667_v43  ;;  %5175 = vmatmul.bf16.gmra.mxu1 %v16668_v38 }
 0x5b6   :  { %v4833_v1 = vpop.f32.mrf.mxu2  ;;  %5245 = vmatpush.bf16.msra.mxu3 %v9366_v21 }
 0x5b7   :  { %v4834_v56 = vadd.f32 %v4833_v1, %v14436_v25  ;;  %v4882_v42 = vpop.f32.mrf.mxu3  ;;  %v10292_v25 = vld [vmem:[%s16130_s2 + $0xb2c] sm:$0xf] }
 0x5b8   :  { %v14638_v55 = vpop.f32.mrf.mxu0  ;;  %v9350_v2 = vor.u32 %v10292_v25, %v9347_v0 }
 0x5b9   :  { %v4883_v27 = vadd.f32 %v4882_v42, %v4834_v56  ;;  %v14640_v16 = vpop.f32.mrf.mxu1 }
 0x5ba   :  { %5246 = vmatpush.bf16.msra.mxu3 %v9350_v2 }
 0x5bb   :  { %v4932_v23 = vadd.f32 %v4931_v47, %v4883_v27 }
 0x5bd   :  { %v14648_v59 = vadd.f32 %v4980_v33, %v4932_v23 }
 0x5be   :  { %v4835_v39 = vpop.f32.mrf.mxu2  ;;  %5247 = vmatpush.bf16.msra.mxu3 %v9334_v57 }
 0x5bf   :  { %v4836_v15 = vadd.f32 %v4835_v39, %v14474_v28  ;;  %v4884_v63 = vpop.f32.mrf.mxu3  ;;  %v16669_v28 = vld [vmem:[#allocation64_spill] sm:$0xff] }
 0x5c0   :  { %v4936_v22 = vpop.f32.mrf.mxu0 }
 0x5c1   :  { %v14657_v4 = vadd.f32 %v4884_v63, %v4836_v15  ;;  %v4985_v47 = vpop.f32.mrf.mxu1 }
 0x5c3   :  { %5033 = vmatmul.bf16.gmra.mxu2 %v11911_v7  ;;  %5131 = vmatmul.bf16.gmra.mxu0 %v11913_v12 }
 0x5c4   :  { %5082 = vmatmul.bf16.gmra.mxu3 %v16669_v28  ;;  %5180 = vmatmul.bf16.gmra.mxu1 %v16670_v46 }
 0x5c6   :  { %v4838_v33 = vpop.f32.mrf.mxu2 }
 0x5c7   :  { %v4839_v3 = vadd.f32 %v4838_v33, %v14500_v6  ;;  %v4887_v45 = vpop.f32.mrf.mxu3 }
 0x5c8   :  { %v14664_v48 = vpop.f32.mrf.mxu0 }
 0x5c9   :  { %v4888_v10 = vadd.f32 %v4887_v45, %v4839_v3  ;;  %v14666_v43 = vpop.f32.mrf.mxu1 }
 0x5cb   :  { %v4937_v38 = vadd.f32 %v4936_v22, %v4888_v10 }
 0x5cd   :  { %v14668_v41 = vadd.f32 %v4985_v47, %v4937_v38 }
 0x5ce   :  { %v4840_v1 = vpop.f32.mrf.mxu2 }
 0x5cf   :  { %v4841_v7 = vadd.f32 %v4840_v1, %v14514_v20  ;;  %v4889_v12 = vpop.f32.mrf.mxu3 }
 0x5d0   :  { %v4941_v56 = vpop.f32.mrf.mxu0 }
 0x5d1   :  { %v14671_v42 = vadd.f32 %v4889_v12, %v4841_v7  ;;  %v4990_v18 = vpop.f32.mrf.mxu1 }
 0x5d3   :  { %5038 = vmatmul.bf16.gmra.mxu2 %v11970_v34  ;;  %5136 = vmatmul.bf16.gmra.mxu0 %v11972_v40 }
 0x5d4   :  { %5087 = vmatmul.bf16.gmra.mxu3 %v11974_v37  ;;  %5185 = vmatmul.bf16.gmra.mxu1 %v11976_v13 }
 0x5d6   :  { %v4843_v6 = vpop.f32.mrf.mxu2 }
 0x5d7   :  { %v4844_v53 = vadd.f32 %v4843_v6, %v14518_v51  ;;  %v4892_v21 = vpop.f32.mrf.mxu3 }
 0x5d8   :  { %v14678_v27 = vpop.f32.mrf.mxu0 }
 0x5d9   :  { %v4893_v20 = vadd.f32 %v4892_v21, %v4844_v53  ;;  %v14680_v23 = vpop.f32.mrf.mxu1 }
 0x5db   :  { %v4942_v25 = vadd.f32 %v4941_v56, %v4893_v20 }
 0x5dd   :  { %v14682_v0 = vadd.f32 %v4990_v18, %v4942_v25 }
 0x5de   :  { %v4845_v2 = vpop.f32.mrf.mxu2 }
 0x5df   :  { %v4846_v34 = vadd.f32 %v4845_v2, %v14524_v61  ;;  %v4894_v40 = vpop.f32.mrf.mxu3 }
 0x5e0   :  { %v5102_v39 = vpop.f32.mrf.mxu0 }
 0x5e1   :  { %v14685_v37 = vadd.f32 %v4894_v40, %v4846_v34  ;;  %v5151_v13 = vpop.f32.mrf.mxu1 }
 0x5e3   :  { %5199 = vmatmul.bf16.vlgmr.msra.gmra.mxu2 %v12000_v14 }
 0x5e4   :  { %5248 = vmatmul.bf16.vlgmr.msra.gmra.mxu3 %v12002_v36 }
 0x5e6   :  { %v5004_v51 = vpop.f32.mrf.mxu2 }
 0x5e7   :  { %v5005_v15 = vadd.f32 %v5004_v51, %v14533_v52  ;;  %v5053_v63 = vpop.f32.mrf.mxu3 }
 0x5e8   :  { %v14690_v62 = vpop.f32.mrf.mxu0 }
 0x5e9   :  { %v5054_v26 = vadd.f32 %v5053_v63, %v5005_v15  ;;  %v14692_v22 = vpop.f32.mrf.mxu1 }
 0x5eb   :  { %v5103_v57 = vadd.f32 %v5102_v39, %v5054_v26 }
 0x5ed   :  { %v14694_v61 = vadd.f32 %v5151_v13, %v5103_v57 }
 0x5ee   :  { %v5006_v47 = vpop.f32.mrf.mxu2 }
 0x5ef   :  { %v5007_v28 = vadd.f32 %v5006_v47, %v14543_v9  ;;  %v5055_v46 = vpop.f32.mrf.mxu3 }
 0x5f0   :  { %v5107_v33 = vpop.f32.mrf.mxu0 }
 0x5f1   :  { %v14697_v14 = vadd.f32 %v5055_v46, %v5007_v28  ;;  %v5156_v36 = vpop.f32.mrf.mxu1 }
 0x5f3   :  { %5204 = vmatmul.bf16.gmra.mxu2 %v12026_v30 }
 0x5f4   :  { %5253 = vmatmul.bf16.gmra.mxu3 %v12028_v5 }
 0x5f6   :  { %v5009_v52 = vpop.f32.mrf.mxu2 }
 0x5f7   :  { %v5010_v3 = vadd.f32 %v5009_v52, %v14552_v8  ;;  %v5058_v45 = vpop.f32.mrf.mxu3 }
 0x5f8   :  { %v14702_v10 = vpop.f32.mrf.mxu0 }
 0x5f9   :  { %v5059_v38 = vadd.f32 %v5058_v45, %v5010_v3  ;;  %v14704_v1 = vpop.f32.mrf.mxu1 }
 0x5fb   :  { %v5108_v7 = vadd.f32 %v5107_v33, %v5059_v38  ;;  %v4929_v38 = vadd.f32 %v14600_v32, %v14619_v31  ;;  %v4934_v31 = vadd.f32 %v14638_v55, %v14657_v4  ;;  %v4939_v55 = vadd.f32 %v14664_v48, %v14671_v42  ;;  %v16677_v48 = vld [vmem:[#allocation75_spill] sm:$0xff] }
 0x5fd   :  { %v14706_v9 = vadd.f32 %v5156_v36, %v5108_v7 }
 0x5fe   :  { %v5011_v12 = vpop.f32.mrf.mxu2 }
 0x5ff   :  { %v5012_v56 = vadd.f32 %v5011_v12, %v14565_v60  ;;  %v5060_v18 = vpop.f32.mrf.mxu3 }
 0x600   :  { %v5112_v6 = vpop.f32.mrf.mxu0 }
 0x601   :  { %v14709_v30 = vadd.f32 %v5060_v18, %v5012_v56  ;;  %v5161_v5 = vpop.f32.mrf.mxu1  ;;  %v4978_v56 = vadd.f32 %v14602_v44, %v4929_v38  ;;  %v4983_v44 = vadd.f32 %v14640_v16, %v4934_v31  ;;  %v4988_v16 = vadd.f32 %v14666_v43, %v4939_v55 }
 0x603   :  { %5209 = vmatmul.bf16.gmra.mxu2 %v12052_v17 }
 0x604   :  { %5258 = vmatmul.bf16.gmra.mxu3 %v12054_v29 }
 0x606   :  { %v5014_v8 = vpop.f32.mrf.mxu2 }
 0x607   :  { %v5015_v53 = vadd.f32 %v5014_v8, %v14568_v50  ;;  %v5063_v21 = vpop.f32.mrf.mxu3  ;;  %v16672_v8 = vld [vmem:[#allocation70_spill] sm:$0xff] }
 0x608   :  { %v14714_v25 = vpop.f32.mrf.mxu0 }
 0x609   :  { %v5064_v20 = vadd.f32 %v5063_v21, %v5015_v53  ;;  %v14716_v34 = vpop.f32.mrf.mxu1 }
 0x60b   :  { %v5113_v2 = vadd.f32 %v5112_v6, %v5064_v20 }
 0x60d   :  { %v14718_v60 = vadd.f32 %v5161_v5, %v5113_v2 }
 0x60e   :  { %v5016_v40 = vpop.f32.mrf.mxu2 }
 0x60f   :  { %v5017_v39 = vadd.f32 %v5016_v40, %v14575_v19  ;;  %v5065_v13 = vpop.f32.mrf.mxu3 }
 0x610   :  { %v5117_v17 = vpop.f32.mrf.mxu0 }
 0x611   :  { %v14721_v51 = vadd.f32 %v5065_v13, %v5017_v39  ;;  %v5166_v50 = vpop.f32.mrf.mxu1  ;;  %v16674_v13 = vld [vmem:[#allocation72_spill] sm:$0xff] }
 0x613   :  { %5214 = vmatmul.bf16.gmra.mxu2 %v16552_v58 }
 0x614   :  { %5263 = vmatmul.bf16.gmra.mxu3 %v16554_v54  ;;  %v16671_v54 = vld [vmem:[#allocation69_spill] sm:$0xff] }
 0x616   :  { %v5019_v29 = vpop.f32.mrf.mxu2 }
 0x617   :  { %v5020_v15 = vadd.f32 %v5019_v29, %v14578_v35  ;;  %v5068_v63 = vpop.f32.mrf.mxu3 }
 0x618   :  { %v14728_v46 = vpop.f32.mrf.mxu0 }
 0x619   :  { %v5069_v26 = vadd.f32 %v5068_v63, %v5020_v15  ;;  %v14731_v36 = vpop.f32.mrf.mxu1 }
 0x61b   :  { %v5118_v57 = vadd.f32 %v5117_v17, %v5069_v26  ;;  %v16675_v17 = vld [vmem:[#allocation73_spill] sm:$0xff] }
 0x61d   :  { %v14726_v47 = vadd.f32 %v5166_v50, %v5118_v57  ;;  %v14774_v57 = vld [vmem:[%s16132_s1] sm:$0xff] }
 0x61e   :  { %v5021_v28 = vpop.f32.mrf.mxu2  ;;  %5377 = vmatmul.bf16.vlgmr.msra.gmra.mxu0 %v14774_v57  ;;  %5426 = vmatmul.bf16.vlgmr.msra.gmra.mxu1 %v14774_v57 }
 0x61f   :  { %v5022_v19 = vadd.f32 %v5021_v28, %v14591_v24  ;;  %v5070_v33 = vpop.f32.mrf.mxu3 }
 0x620   :  { %v5122_v45 = vpop.f32.mrf.mxu0 }
 0x621   :  { %v14733_v58 = vadd.f32 %v5070_v33, %v5022_v19  ;;  %v5171_v12 = vpop.f32.mrf.mxu1  ;;  %v4944_v19 = vadd.f32 %v14678_v27, %v14685_v37  ;;  %v5105_v37 = vadd.f32 %v14690_v62, %v14697_v14 }
 0x623   :  { %5219 = vmatmul.bf16.gmra.mxu2 %v16555_v49 }
 0x624   :  { %5268 = vmatmul.bf16.gmra.mxu3 %v16671_v54  ;;  %v4993_v54 = vadd.f32 %v14680_v23, %v4944_v19 }
 0x626   :  { %v5024_v35 = vpop.f32.mrf.mxu2 }
 0x627   :  { %v5025_v52 = vadd.f32 %v5024_v35, %v14610_v11  ;;  %v5073_v3 = vpop.f32.mrf.mxu3  ;;  %v16673_v11 = vld [vmem:[#allocation71_spill] sm:$0xff] }
 0x629   :  { %v5074_v7 = vadd.f32 %v5073_v3, %v5025_v52 }
 0x62b   :  { %v5123_v24 = vadd.f32 %v5122_v45, %v5074_v7  ;;  %v14793_v45 = vld [vmem:[%s16132_s1 + $0x8] sm:$0xff]  ;;  %v5154_v7 = vadd.f32 %v14692_v22, %v5105_v37 }
 0x62c   :  { %v9836_v37 = vld [vmem:[%s16132_s1 + $0x28] sm:$0xff] }
 0x62d   :  { %v14741_v18 = vadd.f32 %v5171_v12, %v5123_v24 }
 0x62e   :  { %v5026_v6 = vpop.f32.mrf.mxu2  ;;  %5382 = vmatmul.bf16.gmra.mxu0 %v14793_v45  ;;  %5431 = vmatmul.bf16.gmra.mxu1 %v14793_v45 }
 0x62f   :  { %v14743_v5 = vadd.f32 %v5026_v6, %v4978_v56  ;;  %v14745_v49 = vpop.f32.mrf.mxu3  ;;  %v14807_v6 = vld [vmem:[%s16132_s1 + $0x10] sm:$0xff] }
 0x633   :  { %5224 = vmatmul.bf16.gmra.mxu2 %v16672_v8 }
 0x634   :  { %5273 = vmatmul.bf16.gmra.mxu3 %v16673_v11  ;;  %v5110_v11 = vadd.f32 %v14702_v10, %v14709_v30 }
 0x636   :  { %v5029_v53 = vpop.f32.mrf.mxu2 }
 0x637   :  { %v5030_v21 = vadd.f32 %v5029_v53, %v14648_v59  ;;  %v5078_v32 = vpop.f32.mrf.mxu3 }
 0x639   :  { %v14752_v20 = vadd.f32 %v5078_v32, %v5030_v21  ;;  %v5159_v21 = vadd.f32 %v14704_v1, %v5110_v11 }
 0x63e   :  { %v5031_v2 = vpop.f32.mrf.mxu2  ;;  %5387 = vmatmul.bf16.gmra.mxu0 %v14807_v6  ;;  %5436 = vmatmul.bf16.gmra.mxu1 %v14807_v6 }
 0x63f   :  { %v14755_v40 = vadd.f32 %v5031_v2, %v4983_v44  ;;  %v14757_v39 = vpop.f32.mrf.mxu3  ;;  %v14825_v2 = vld [vmem:[%s16132_s1 + $0x18] sm:$0xff] }
 0x643   :  { %5229 = vmatmul.bf16.gmra.mxu2 %v16674_v13 }
 0x644   :  { %5278 = vmatmul.bf16.gmra.mxu3 %v16675_v17  ;;  %v5115_v17 = vadd.f32 %v14714_v25, %v14721_v51 }
 0x646   :  { %v5034_v29 = vpop.f32.mrf.mxu2 }
 0x647   :  { %v5035_v59 = vadd.f32 %v5034_v29, %v14668_v41  ;;  %v5083_v50 = vpop.f32.mrf.mxu3  ;;  %v16676_v41 = vld [vmem:[#allocation74_spill] sm:$0xff] }
 0x649   :  { %v14764_v4 = vadd.f32 %v5083_v50, %v5035_v59  ;;  %v5164_v59 = vadd.f32 %v14716_v34, %v5115_v17 }
 0x64e   :  { %v5036_v15 = vpop.f32.mrf.mxu2  ;;  %5392 = vmatmul.bf16.gmra.mxu0 %v14825_v2  ;;  %5441 = vmatmul.bf16.gmra.mxu1 %v14825_v2 }
 0x64f   :  { %v14767_v63 = vadd.f32 %v5036_v15, %v4988_v16  ;;  %v14769_v26 = vpop.f32.mrf.mxu3  ;;  %v5124_v15 = vpop.f32.mrf.mxu0 }
 0x653   :  { %5234 = vmatmul.bf16.gmra.mxu2 %v16676_v41  ;;  %v14843_v41 = vld [vmem:[%s16132_s1 + $0x20] sm:$0xff] }
 0x654   :  { %5283 = vmatmul.bf16.gmra.mxu3 %v16677_v48  ;;  %v5173_v48 = vpop.f32.mrf.mxu1 }
 0x656   :  { %v5039_v42 = vpop.f32.mrf.mxu2 }
 0x657   :  { %v5040_v43 = vadd.f32 %v5039_v42, %v14682_v0  ;;  %v5088_v28 = vpop.f32.mrf.mxu3  ;;  %v5127_v19 = vpop.f32.mrf.mxu0 }
 0x659   :  { %v14783_v33 = vadd.f32 %v5088_v28, %v5040_v43  ;;  %v5120_v43 = vadd.f32 %v14728_v46, %v14733_v58 }
 0x65e   :  { %v5041_v35 = vpop.f32.mrf.mxu2  ;;  %5397 = vmatmul.bf16.gmra.mxu0 %v14843_v41  ;;  %5446 = vmatmul.bf16.gmra.mxu1 %v14843_v41 }
 0x65f   :  { %v14786_v52 = vadd.f32 %v5041_v35, %v4993_v54  ;;  %v14788_v3 = vpop.f32.mrf.mxu3  ;;  %v5176_v54 = vpop.f32.mrf.mxu1  ;;  %v5169_v35 = vadd.f32 %v14731_v36, %v5120_v43  ;;  %v5076_v36 = vadd.f32 %v14745_v49, %v14743_v5  ;;  %v5081_v5 = vadd.f32 %v14757_v39, %v14755_v40  ;;  %v9838_v43 = vld [vmem:[%s16132_s1 + $0x38] sm:$0xff] }
 0x660   :  { %v5129_v46 = vpop.f32.mrf.mxu0 }
 0x663   :  { %5475 = vmatmul.bf16.vlgmr.msrb.gmra.mxu2 %v14774_v57 }
 0x666   :  { %v5200_v27 = vpop.f32.mrf.mxu2 }
 0x667   :  { %v5201_v0 = vadd.f32 %v5200_v27, %v14694_v61  ;;  %v5249_v23 = vpop.f32.mrf.mxu3  ;;  %v5178_v58 = vpop.f32.mrf.mxu1 }
 0x668   :  { %v5132_v11 = vpop.f32.mrf.mxu0 }
 0x669   :  { %v14801_v38 = vadd.f32 %v5249_v23, %v5201_v0 }
 0x66e   :  { %v5202_v12 = vpop.f32.mrf.mxu2  ;;  %5402 = vmatmul.bf16.gmra.mxu0 %v9836_v37  ;;  %5451 = vmatmul.bf16.gmra.mxu1 %v9836_v37 }
 0x66f   :  { %v5203_v24 = vadd.f32 %v5202_v12, %v5154_v7  ;;  %v5251_v56 = vpop.f32.mrf.mxu3 }
 0x671   :  { %v14809_v8 = vadd.f32 %v5251_v56, %v5203_v24 }
 0x673   :  { %v5292_v62 = vpack.c.bf16 %v14809_v8, %v14801_v38  ;;  %5480 = vmatmul.bf16.gmra.mxu2 %v14793_v45 }
 0x676   :  { %v5205_v22 = vpop.f32.mrf.mxu2 }
 0x677   :  { %v5206_v61 = vadd.f32 %v5205_v22, %v14706_v9  ;;  %v5254_v14 = vpop.f32.mrf.mxu3  ;;  %v5125_v22 = vadd.f32 %v5124_v15, %v5076_v36 }
 0x679   :  { %v14819_v53 = vadd.f32 %v5254_v14, %v5206_v61  ;;  %v5174_v14 = vadd.f32 %v5173_v48, %v5125_v22  ;;  %v10364_v22 = vld [vmem:[%s16133_s5 + $0x164] sm:$0xf0] }
 0x67e   :  { %v5207_v32 = vpop.f32.mrf.mxu2 }
 0x67f   :  { %v5208_v31 = vadd.f32 %v5207_v32, %v5159_v21  ;;  %v5256_v44 = vpop.f32.mrf.mxu3  ;;  %v5181_v32 = vpop.f32.mrf.mxu1 }
 0x681   :  { %v14827_v13 = vadd.f32 %v5256_v44, %v5208_v31 }
 0x683   :  { %v5296_v10 = vpack.c.bf16 %v14827_v13, %v14819_v53  ;;  %5485 = vmatmul.bf16.gmra.mxu2 %v14807_v6 }
 0x686   :  { %v5210_v1 = vpop.f32.mrf.mxu2 }
 0x687   :  { %v5211_v9 = vadd.f32 %v5210_v1, %v14718_v60  ;;  %v5259_v30 = vpop.f32.mrf.mxu3  ;;  %v9837_v1 = vld [vmem:[%s16132_s1 + $0x30] sm:$0xff] }
 0x688   :  { %5407 = vmatmul.bf16.gmra.mxu0 %v9837_v1  ;;  %5456 = vmatmul.bf16.gmra.mxu1 %v9837_v1 }
 0x689   :  { %v14837_v29 = vadd.f32 %v5259_v30, %v5211_v9  ;;  %v5128_v30 = vadd.f32 %v5127_v19, %v14752_v20 }
 0x68e   :  { %v5212_v50 = vpop.f32.mrf.mxu2 }
 0x68f   :  { %v5213_v55 = vadd.f32 %v5212_v50, %v5164_v59  ;;  %v5261_v16 = vpop.f32.mrf.mxu3  ;;  %v5130_v59 = vadd.f32 %v5129_v46, %v5081_v5  ;;  %v5134_v50 = vpop.f32.mrf.mxu0  ;;  %v5133_v46 = vadd.f32 %v5132_v11, %v14764_v4  ;;  %v10350_v4 = vld [vmem:[%s16133_s5 + $0xf4] sm:$0xf0] }
 0x691   :  { %v14845_v42 = vadd.f32 %v5261_v16, %v5213_v55  ;;  %v5183_v55 = vpop.f32.mrf.mxu1  ;;  %v5177_v16 = vadd.f32 %v5176_v54, %v5128_v30  ;;  %v5179_v15 = vadd.f32 %v5178_v58, %v5130_v59  ;;  %v5086_v54 = vadd.f32 %v14769_v26, %v14767_v63  ;;  %v10334_v63 = vld [vmem:[%s16133_s5 + $0x74] sm:$0xf0]  ;;  %v9601_v26 = vld [vmem:[%s16133_s5 + $0xf0] sm:$0xf]  ;;  %v10332_v30 = vld [vmem:[%s16133_s5 + $0x64] sm:$0xf0] }
 0x692   :  { %v9602_v11 = vor.u32 %v10350_v4, %v9601_v26  ;;  %v5091_v4 = vadd.f32 %v14788_v3, %v14786_v52  ;;  %v10344_v52 = vld [vmem:[%s16133_s5 + $0xc4] sm:$0xf0]  ;;  %v9633_v3 = vld [vmem:[%s16133_s5 + $0x130] sm:$0xf] }
 0x693   :  { %v5300_v25 = vpack.c.bf16 %v14845_v42, %v14837_v29  ;;  %5490 = vmatmul.bf16.gmra.mxu2 %v14825_v2  ;;  %v5135_v58 = vadd.f32 %v5134_v50, %v5086_v54  ;;  %v10348_v50 = vld [vmem:[%s16133_s5 + $0xe4] sm:$0xf0] }
 0x694   :  { %6370 = vmatpush.bf16.msrb.mxu1 %v9602_v11 }
 0x696   :  { %v5215_v34 = vpop.f32.mrf.mxu2 }
 0x697   :  { %v5216_v60 = vadd.f32 %v5215_v34, %v14726_v47  ;;  %v5264_v51 = vpop.f32.mrf.mxu3  ;;  %v14888_v20 = vpop.f32.mrf.mxu0 }
 0x698   :  { %5412 = vmatmul.bf16.gmra.mxu0 %v9838_v43  ;;  %5461 = vmatmul.bf16.gmra.mxu1 %v9838_v43 }
 0x699   :  { %v14855_v28 = vadd.f32 %v5264_v51, %v5216_v60  ;;  %v14890_v39 = vpop.f32.mrf.mxu1 }
 0x69e   :  { %v5217_v27 = vpop.f32.mrf.mxu2 }
 0x69f   :  { %v5218_v0 = vadd.f32 %v5217_v27, %v5169_v35  ;;  %v5266_v23 = vpop.f32.mrf.mxu3  ;;  %v9665_v27 = vld [vmem:[%s16133_s5 + $0x170] sm:$0xf] }
 0x6a1   :  { %v14861_v7 = vadd.f32 %v5266_v23, %v5218_v0  ;;  %v10366_v0 = vld [vmem:[%s16133_s5 + $0x174] sm:$0xf0] }
 0x6a3   :  { %v5304_v47 = vpack.c.bf16 %v14861_v7, %v14855_v28  ;;  %5495 = vmatmul.bf16.gmra.mxu2 %v14843_v41 }
 0x6a6   :  { %v5220_v12 = vpop.f32.mrf.mxu2 }
 0x6a7   :  { %v5221_v24 = vadd.f32 %v5220_v12, %v14741_v18  ;;  %v5269_v56 = vpop.f32.mrf.mxu3  ;;  %v9537_v12 = vld [vmem:[%s16133_s5 + $0x70] sm:$0xf] }
 0x6a9   :  { %v14869_v61 = vadd.f32 %v5269_v56, %v5221_v24  ;;  %v9538_v24 = vor.u32 %v10334_v63, %v9537_v12  ;;  %v9657_v56 = vld [vmem:[%s16133_s5 + $0x160] sm:$0xf] }
 0x6ab   :  { %6321 = vmatpush.bf16.msrb.mxu0 %v9538_v24  ;;  %v5565_v24 = vld [vmem:[%s16134_s3] sm:$0xf] }
 0x6ae   :  { %v5222_v21 = vpop.f32.mrf.mxu2 }
 0x6af   :  { %v5223_v31 = vadd.f32 %v5222_v21, %v5174_v14  ;;  %v5271_v44 = vpop.f32.mrf.mxu3  ;;  %v5182_v14 = vadd.f32 %v5181_v32, %v5133_v46  ;;  %v9658_v21 = vor.u32 %v10364_v22, %v9657_v56  ;;  %v9593_v32 = vld [vmem:[%s16133_s5 + $0xe0] sm:$0xf]  ;;  %v10346_v46 = vld [vmem:[%s16133_s5 + $0xd4] sm:$0xf0] }
 0x6b0   :  { %v9513_v56 = vld [vmem:[%s16133_s5 + $0x40] sm:$0xf] }
 0x6b1   :  { %v14874_v9 = vadd.f32 %v5271_v44, %v5223_v31  ;;  %v5184_v31 = vadd.f32 %v5183_v55, %v5135_v58  ;;  %v5139_v44 = vpop.f32.mrf.mxu0  ;;  %v9649_v55 = vld [vmem:[%s16133_s5 + $0x150] sm:$0xf]  ;;  %v10360_v58 = vld [vmem:[%s16133_s5 + $0x144] sm:$0xf0]  ;;  %v9577_v22 = vld [vmem:[%s16133_s5 + $0xc0] sm:$0xf] }
 0x6b3   :  { %v5308_v18 = vpack.c.bf16 %v14874_v9, %v14869_v61  ;;  %5500 = vmatmul.bf16.gmra.mxu2 %v9836_v37  ;;  %v9666_v37 = vor.u32 %v10366_v0, %v9665_v27  ;;  %v9521_v27 = vld [vmem:[%s16133_s5 + $0x50] sm:$0xf]  ;;  %v10330_v0 = vld [vmem:[%s16133_s5 + $0x54] sm:$0xf0] }
 0x6b5   :  { %6419 = vmatpush.bf16.msra.mxu2 %v9666_v37  ;;  %v9522_v37 = vor.u32 %v10330_v0, %v9521_v27 }
 0x6b6   :  { %v5225_v49 = vpop.f32.mrf.mxu2 }
 0x6b7   :  { %v5274_v17 = vpop.f32.mrf.mxu3  ;;  %v5226_v48 = vadd.f32 %v5225_v49, %v5177_v16  ;;  %v9529_v49 = vld [vmem:[%s16133_s5 + $0x60] sm:$0xf]  ;;  %v10362_v16 = vld [vmem:[%s16133_s5 + $0x154] sm:$0xf0] }
 0x6b8   :  { %v9530_v59 = vor.u32 %v10332_v30, %v9529_v49  ;;  %v5138_v49 = vadd.f32 %v14888_v20, %v14783_v33  ;;  %v5140_v33 = vadd.f32 %v5139_v44, %v5091_v4  ;;  %v10342_v44 = vld [vmem:[%s16133_s5 + $0xb4] sm:$0xf0] }
 0x6b9   :  { %v14884_v35 = vadd.f32 %v5274_v17, %v5226_v48  ;;  %6420 = vmatpush.bf16.msra.mxu2 %v9658_v21 }
 0x6ba   :  { %6322 = vmatpush.bf16.msrb.mxu0 %v9530_v59 }
 0x6be   :  { %v5227_v34 = vpop.f32.mrf.mxu2  ;;  %6323 = vmatpush.bf16.msrb.mxu0 %v9522_v37  ;;  %v10356_v37 = vld [vmem:[%s16133_s5 + $0x124] sm:$0xf0] }
 0x6bf   :  { %v5228_v60 = vadd.f32 %v5227_v34, %v5179_v15  ;;  %v5276_v51 = vpop.f32.mrf.mxu3  ;;  %v9594_v34 = vor.u32 %v10348_v50, %v9593_v32  ;;  %v14993_v32 = vld [vmem:[%s16135_s4] sm:$0xf]  ;;  %v14995_v50 = vperm.slane %v5565_v24, 0 }
 0x6c1   :  { %v14886_v40 = vadd.f32 %v5276_v51, %v5228_v60  ;;  %v9650_v60 = vor.u32 %v10362_v16, %v9649_v55  ;;  %6371 = vmatpush.bf16.msrb.mxu1 %v9594_v34  ;;  %v14998_v55 = vperm.slane %v14993_v32, 0  ;;  %v15000_v16 = vperm.slane %v5565_v24, 1  ;;  %v10326_v34 = vld [vmem:[%s16133_s5 + $0x34] sm:$0xf0] }
 0x6c3   :  { %v5312_v19 = vpack.c.bf16 %v14886_v40, %v14884_v35  ;;  %5505 = vmatmul.bf16.gmra.mxu2 %v9837_v1  ;;  %v14921_v1 = vpop.f32.mrf.mxu1 }
 0x6c4   :  { %6421 = vmatpush.bf16.msra.mxu2 %v9650_v60  ;;  %v9569_v60 = vld [vmem:[%s16133_s5 + $0xb0] sm:$0xf]  ;;  %v5189_v4 = vadd.f32 %v14921_v1, %v5140_v33 }
 0x6c6   :  { %v5230_v23 = vpop.f32.mrf.mxu2 }
 0x6c7   :  { %v5279_v36 = vpop.f32.mrf.mxu3  ;;  %v5231_v5 = vadd.f32 %v5230_v23, %v5182_v14  ;;  %v9585_v23 = vld [vmem:[%s16133_s5 + $0xd0] sm:$0xf]  ;;  %v5378_v14 = vpop.f32.mrf.mxu0 }
 0x6c8   :  { %v9586_v63 = vor.u32 %v10346_v46, %v9585_v23  ;;  %v5575_v20 = vmul.f32 %v14995_v50, %v5378_v14  ;;  %v9625_v23 = vld [vmem:[%s16133_s5 + $0x120] sm:$0xf]  ;;  %v5187_v46 = vadd.f32 %v14890_v39, %v5138_v49  ;;  %v10340_v49 = vld [vmem:[%s16133_s5 + $0xa4] sm:$0xf0] }
 0x6c9   :  { %v14941_v51 = vadd.f32 %v5279_v36, %v5231_v5  ;;  %v9641_v36 = vld [vmem:[%s16133_s5 + $0x140] sm:$0xf]  ;;  %v10358_v5 = vld [vmem:[%s16133_s5 + $0x134] sm:$0xf0] }
 0x6ca   :  { %v9642_v26 = vor.u32 %v10360_v58, %v9641_v36  ;;  %6372 = vmatpush.bf16.msrb.mxu1 %v9586_v63  ;;  %v9634_v59 = vor.u32 %v10358_v5, %v9633_v3  ;;  %v5649_v36 = vadd.f32 %v14998_v55, %v5575_v20  ;;  %v9570_v58 = vor.u32 %v10342_v44, %v9569_v60  ;;  %v9561_v5 = vld [vmem:[%s16133_s5 + $0xa0] sm:$0xf] }
 0x6cb   :  { %v5427_v11 = vpop.f32.mrf.mxu1  ;;  %v9626_v63 = vor.u32 %v10356_v37, %v9625_v23  ;;  %v9562_v20 = vor.u32 %v10340_v49, %v9561_v5  ;;  %v9489_v23 = vld [vmem:[%s16133_s5 + $0x10] sm:$0xf]  ;;  %v10322_v37 = vld [vmem:[%s16133_s5 + $0x14] sm:$0xf0]  ;;  %v10336_v49 = vld [vmem:[%s16133_s5 + $0x84] sm:$0xf0] }
 0x6cc   :  { %6422 = vmatpush.bf16.msra.mxu2 %v9642_v26  ;;  %v5576_v27 = vmul.f32 %v15000_v16, %v5427_v11  ;;  %vm5713_vm0 = vcmp.gt.f32.partialorder %v5649_v36, 0.0 }
 0x6ce   :  { %v5232_v17 = vpop.f32.mrf.mxu2 }
 0x6cf   :  { %v5233_v15 = vadd.f32 %v5232_v17, %v5184_v31  ;;  %v5281_v48 = vpop.f32.mrf.mxu3  ;;  %v9578_v17 = vor.u32 %v10344_v52, %v9577_v22  ;;  %v9497_v22 = vld [vmem:[%s16133_s5 + $0x20] sm:$0xf]  ;;  %v5380_v39 = vpop.f32.mrf.mxu0  ;;  %v10324_v52 = vld [vmem:[%s16133_s5 + $0x24] sm:$0xf0] }
 0x6d0   :  { %6423 = vmatpush.bf16.msra.mxu2 %v9634_v59  ;;  %v5579_v1 = vmul.f32 %v14995_v50, %v5380_v39  ;;  %v9498_v3 = vor.u32 %v10324_v52, %v9497_v22  ;;  %v9609_v22 = vld [vmem:[%s16133_s5 + $0x100] sm:$0xf]  ;;  %v10352_v39 = vld [vmem:[%s16133_s5 + $0x104] sm:$0xf0] }
 0x6d1   :  { %v14943_v54 = vadd.f32 %v5281_v48, %v5233_v15  ;;  %v15003_v15 = vperm.slane %v14993_v32, 1  ;;  %6373 = vmatpush.bf16.msrb.mxu1 %v9578_v17  ;;  %v9505_v48 = vld [vmem:[%s16133_s5 + $0x30] sm:$0xf]  ;;  %v9481_v52 = vld [vmem:[%s16133_s5] sm:$0xf] }
 0x6d2   :  { %v9506_v0 = vor.u32 %v10326_v34, %v9505_v48  ;;  %v9617_v17 = vld [vmem:[%s16133_s5 + $0x110] sm:$0xf]  ;;  %v10354_v48 = vld [vmem:[%s16133_s5 + $0x114] sm:$0xf0]  ;;  %v5653_v34 = vadd.f32 %v14998_v55, %v5579_v1  ;;  %v10320_v1 = vld [vmem:[%s16133_s5 + $0x4] sm:$0xf0] }
 0x6d3   :  { %v5316_v12 = vpack.c.bf16 %v14943_v54, %v14941_v51  ;;  %5510 = vmatmul.bf16.gmra.mxu2 %v9838_v43  ;;  %v10328_v43 = vld [vmem:[%s16133_s5 + $0x44] sm:$0xf0]  ;;  %v5650_v26 = vadd.f32 %v15003_v15, %v5576_v27  ;;  %v5429_v14 = vpop.f32.mrf.mxu1  ;;  %v9618_v44 = vor.u32 %v10354_v48, %v9617_v17  ;;  %v9482_v5 = vor.u32 %v10320_v1, %v9481_v52 }
 0x6d4   :  { %v9514_v31 = vor.u32 %v10328_v43, %v9513_v56  ;;  %v15029_v43 = vperm.slane %v5565_v24, 2  ;;  %6424 = vmatpush.bf16.msra.mxu2 %v9626_v63  ;;  %v5580_v24 = vmul.f32 %v15000_v16, %v5429_v14  ;;  %vm5717_vm2 = vcmp.gt.f32.partialorder %v5653_v34, 0.0 }
 0x6d5   :  { %6374 = vmatpush.bf16.msrb.mxu1 %v9570_v58  ;;  %vm5714_vm1 = vcmp.gt.f32.partialorder %v5650_v26, 0.0  ;;  %v5778_v33 = vmul.f32 0.01, %v5650_v26  ;;  %v5781_v58 = vmul.f32 0.01, %v5653_v34 }
 0x6d6   :  { %v5235_v21 = vpop.f32.mrf.mxu2  ;;  %6324 = vmatpush.bf16.msrb.mxu0 %v9514_v31  ;;  %v5777_v31 = vmul.f32 0.01, %v5649_v36  ;;  %v5654_v60 = vadd.f32 %v15003_v15, %v5580_v24  ;;  %v9545_v24 = vld [vmem:[%s16133_s5 + $0x80] sm:$0xf] }
 0x6d7   :  { %v5284_v30 = vpop.f32.mrf.mxu3  ;;  %v5236_v56 = vadd.f32 %v5235_v21, %v5187_v46  ;;  %v9553_v46 = vld [vmem:[%s16133_s5 + $0x90] sm:$0xf]  ;;  %v5383_v17 = vpop.f32.mrf.mxu0  ;;  %v5842_v48 = vsel %vm5714_vm1, %v5650_v26, %v5778_v33 }
 0x6d8   :  { %vm5718_vm3 = vcmp.gt.f32.partialorder %v5654_v60, 0.0  ;;  %6425 = vmatpush.bf16.msra.mxu2 %v9618_v44  ;;  %v5583_v26 = vmul.f32 %v14995_v50, %v5383_v17 }
 0x6d9   :  { %v5285_v27 = vadd.f32 %v5284_v30, %v5236_v56  ;;  %6375 = vmatpush.bf16.msrb.mxu1 %v9562_v20  ;;  %v5782_v30 = vmul.f32 0.01, %v5654_v60  ;;  %v10338_v56 = vld [vmem:[%s16133_s5 + $0x94] sm:$0xf0] }
 0x6da   :  { %6325 = vmatpush.bf16.msrb.mxu0 %v9506_v0  ;;  %v9554_v14 = vor.u32 %v10338_v56, %v9553_v46 }
 0x6dd   :  { %6376 = vmatpush.bf16.msrb.mxu1 %v9554_v14 }
 0x6de   :  { %v5237_v11 = vpop.f32.mrf.mxu2  ;;  %6326 = vmatpush.bf16.msrb.mxu0 %v9498_v3  ;;  %v5845_v3 = vsel %vm5717_vm2, %v5653_v34, %v5781_v58 }
 0x6df   :  { %v5238_v21 = vadd.f32 %v5237_v11, %v5189_v4  ;;  %v5286_v59 = vpop.f32.mrf.mxu3  ;;  %v9490_v4 = vor.u32 %v10322_v37, %v9489_v23  ;;  %v9610_v11 = vor.u32 %v10352_v39, %v9609_v22  ;;  %v5385_v51 = vpop.f32.mrf.mxu0 }
 0x6e0   :  { %v5587_v37 = vmul.f32 %v14995_v50, %v5385_v51 }
 0x6e1   :  { %v5287_v0 = vadd.f32 %v5286_v59, %v5238_v21  ;;  %v5841_v21 = vsel %vm5713_vm0, %v5649_v36, %v5777_v31  ;;  %v5432_v59 = vpop.f32.mrf.mxu1  ;;  %v15089_v36 = vperm.slane %v14993_v32, 2  ;;  %6426 = vmatpush.bf16.msra.mxu2 %v9610_v11  ;;  %v5657_v32 = vadd.f32 %v14998_v55, %v5583_v26 }
 0x6e2   :  { %6327 = vmatpush.bf16.msrb.mxu0 %v9490_v4  ;;  %v15091_v31 = vpack.c.bf16 %v5845_v3, %v5841_v21  ;;  %v5584_v33 = vmul.f32 %v15000_v16, %v5432_v59  ;;  %v5661_v35 = vadd.f32 %v14998_v55, %v5587_v37 }
 0x6e3   :  { %v5320_v63 = vpack.c.bf16 %v5287_v0, %v5285_v27  ;;  %v5846_v27 = vsel %vm5718_vm3, %v5654_v60, %v5782_v30  ;;  %v9546_v0 = vor.u32 %v10336_v49, %v9545_v24  ;;  %vm5721_vm5 = vcmp.gt.f32.partialorder %v5657_v32, 0.0 }
 0x6e4   :  { %v15096_v34 = vpack.c.bf16 %v5846_v27, %v5842_v48  ;;  %v5658_v23 = vadd.f32 %v15003_v15, %v5584_v33  ;;  %v5789_v56 = vmul.f32 0.01, %v5661_v35  ;;  %vm5725_vm8 = vcmp.gt.f32.partialorder %v5661_v35, 0.0 }
 0x6e5   :  { %5516 = vmatpush.bf16.msrb.mxu3 %v5320_v63  ;;  %6377 = vmatpush.bf16.msrb.mxu1 %v9546_v0  ;;  %v5785_v63 = vmul.f32 0.01, %v5657_v32 }
 0x6e6   :  { %v5476_v20 = vpop.f32.mrf.mxu2  ;;  %6328 = vmatpush.bf16.msrb.mxu0 %v9482_v5  ;;  %v5786_v4 = vmul.f32 0.01, %v5658_v23  ;;  %vm5722_vm7 = vcmp.gt.f32.partialorder %v5658_v23, 0.0  ;;  %v5853_v52 = vsel %vm5725_vm8, %v5661_v35, %v5789_v56 }
 0x6e7   :  { %v5577_v44 = vmul.f32 %v15029_v43, %v5476_v20  ;;  %v5388_v61 = vpop.f32.mrf.mxu0 }
 0x6e8   :  { %6378 = vmatmul.bf16.vlgmr.msrb.gmra.mxu1 %v15096_v34  ;;  %v5850_v21 = vsel %vm5722_vm7, %v5658_v23, %v5786_v4  ;;  %v5591_v28 = vmul.f32 %v14995_v50, %v5388_v61 }
 0x6e9   :  { %5517 = vmatpush.bf16.msrb.mxu3 %v5316_v12  ;;  %v5651_v60 = vadd.f32 %v15089_v36, %v5577_v44  ;;  %6329 = vmatmul.bf16.vlgmr.msrb.gmra.mxu0 %v15091_v31  ;;  %v5434_v54 = vpop.f32.mrf.mxu1 }
 0x6ea   :  { %v5588_v46 = vmul.f32 %v15000_v16, %v5434_v54  ;;  %v5665_v59 = vadd.f32 %v14998_v55, %v5591_v28 }
 0x6eb   :  { %v5779_v58 = vmul.f32 0.01, %v5651_v60  ;;  %vm5715_vm4 = vcmp.gt.f32.partialorder %v5651_v60, 0.0 }
 0x6ec   :  { %v5662_v40 = vadd.f32 %v15003_v15, %v5588_v46  ;;  %vm5729_vm11 = vcmp.gt.f32.partialorder %v5665_v59, 0.0  ;;  %v5793_v26 = vmul.f32 0.01, %v5665_v59 }
 0x6ed   :  { %5518 = vmatpush.bf16.msrb.mxu3 %v5312_v19  ;;  %v5843_v39 = vsel %vm5715_vm4, %v5651_v60, %v5779_v58 }
 0x6ee   :  { %v5478_v12 = vpop.f32.mrf.mxu2  ;;  %v5790_v22 = vmul.f32 0.01, %v5662_v40  ;;  %vm5726_vm9 = vcmp.gt.f32.partialorder %v5662_v40, 0.0  ;;  %v5857_v38 = vsel %vm5729_vm11, %v5665_v59, %v5793_v26 }
 0x6ef   :  { %v5581_v30 = vmul.f32 %v15029_v43, %v5478_v12  ;;  %v5390_v29 = vpop.f32.mrf.mxu0 }
 0x6f0   :  { %v5854_v3 = vsel %vm5726_vm9, %v5662_v40, %v5790_v22  ;;  %v5595_v48 = vmul.f32 %v14995_v50, %v5390_v29 }
 0x6f1   :  { %5519 = vmatpush.bf16.msrb.mxu3 %v5308_v18  ;;  %v5655_v19 = vadd.f32 %v15089_v36, %v5581_v30  ;;  %v5437_v9 = vpop.f32.mrf.mxu1  ;;  %v5849_v18 = vsel %vm5721_vm5, %v5657_v32, %v5785_v63  ;;  %v15130_v7 = vpack.c.bf16 %v5854_v3, %v5850_v21 }
 0x6f2   :  { %v15124_v49 = vpack.c.bf16 %v5853_v52, %v5849_v18  ;;  %v5669_v53 = vadd.f32 %v14998_v55, %v5595_v48 }
 0x6f3   :  { %vm5719_vm6 = vcmp.gt.f32.partialorder %v5655_v19, 0.0  ;;  %v5783_v14 = vmul.f32 0.01, %v5655_v19 }
 0x6f4   :  { %v5797_v60 = vmul.f32 0.01, %v5669_v53  ;;  %vm5733_vm14 = vcmp.gt.f32.partialorder %v5669_v53, 0.0 }
 0x6f5   :  { %5520 = vmatpush.bf16.msrb.mxu3 %v5304_v47  ;;  %v5847_v11 = vsel %vm5719_vm6, %v5655_v19, %v5783_v14  ;;  %v5592_v47 = vmul.f32 %v15000_v16, %v5437_v9 }
 0x6f6   :  { %v15120_v1 = vpack.c.bf16 %v5847_v11, %v5843_v39  ;;  %v5481_v24 = vpop.f32.mrf.mxu2  ;;  %v5861_v8 = vsel %vm5733_vm14, %v5669_v53, %v5797_v60 }
 0x6f7   :  { %v5585_v5 = vmul.f32 %v15029_v43, %v5481_v24  ;;  %v5666_v20 = vadd.f32 %v15003_v15, %v5592_v47  ;;  %v5393_v23 = vpop.f32.mrf.mxu0  ;;  %v15155_v40 = vpack.c.bf16 %v5861_v8, %v5857_v38 }
 0x6f8   :  { %6427 = vmatmul.bf16.vlgmr.msra.gmra.mxu2 %v15120_v1  ;;  %6383 = vmatmul.bf16.gmra.mxu1 %v15130_v7 }
 0x6f9   :  { %5521 = vmatpush.bf16.msrb.mxu3 %v5300_v25  ;;  %v5659_v17 = vadd.f32 %v15089_v36, %v5585_v5  ;;  %6334 = vmatmul.bf16.gmra.mxu0 %v15124_v49  ;;  %v5439_v42 = vpop.f32.mrf.mxu1  ;;  %v5794_v33 = vmul.f32 0.01, %v5666_v20  ;;  %vm5730_vm13 = vcmp.gt.f32.partialorder %v5666_v20, 0.0 }
 0x6fa   :  { %v5596_v27 = vmul.f32 %v15000_v16, %v5439_v42 }
 0x6fb   :  { %v5787_v0 = vmul.f32 0.01, %v5659_v17  ;;  %vm5723_vm10 = vcmp.gt.f32.partialorder %v5659_v17, 0.0  ;;  %v5858_v58 = vsel %vm5730_vm13, %v5666_v20, %v5794_v33 }
 0x6fc   :  { %v5670_v13 = vadd.f32 %v15003_v15, %v5596_v27 }
 0x6fd   :  { %5522 = vmatpush.bf16.msrb.mxu3 %v5296_v10  ;;  %v5851_v54 = vsel %vm5723_vm10, %v5659_v17, %v5787_v0 }
 0x6fe   :  { %v5483_v25 = vpop.f32.mrf.mxu2  ;;  %v5798_v32 = vmul.f32 0.01, %v5670_v13  ;;  %vm5734_vm15 = vcmp.gt.f32.partialorder %v5670_v13, 0.0 }
 0x6ff   :  { %v5589_v44 = vmul.f32 %v15029_v43, %v5483_v25  ;;  %v5395_v22 = vpop.f32.mrf.mxu0 }
 0x700   :  { %v5862_v30 = vsel %vm5734_vm15, %v5670_v13, %v5798_v32  ;;  %v5603_v61 = vmul.f32 %v14995_v50, %v5395_v22 }
 0x701   :  { %5523 = vmatpush.bf16.msrb.mxu3 %v5292_v62  ;;  %v5663_v10 = vadd.f32 %v15089_v36, %v5589_v44  ;;  %v5442_v37 = vpop.f32.mrf.mxu1  ;;  %v15158_v19 = vpack.c.bf16 %v5862_v30, %v5858_v58 }
 0x702   :  { %v5600_v63 = vmul.f32 %v15000_v16, %v5442_v37  ;;  %v5677_v24 = vadd.f32 %v14998_v55, %v5603_v61 }
 0x703   :  { %v5791_v51 = vmul.f32 0.01, %v5663_v10  ;;  %vm5727_vm12 = vcmp.gt.f32.partialorder %v5663_v10, 0.0 }
 0x704   :  { %5524 = vmatmul.bf16.vlgmr.msrb.gmra.mxu3 %v14774_v57  ;;  %v5599_v57 = vmul.f32 %v14995_v50, %v5393_v23  ;;  %v5674_v11 = vadd.f32 %v15003_v15, %v5600_v63  ;;  %v5805_v47 = vmul.f32 0.01, %v5677_v24  ;;  %vm5741_vm4 = vcmp.gt.f32.partialorder %v5677_v24, 0.0 }
 0x705   :  { %v5855_v12 = vsel %vm5727_vm12, %v5663_v10, %v5791_v51 }
 0x706   :  { %v5486_v62 = vpop.f32.mrf.mxu2  ;;  %v15151_v46 = vpack.c.bf16 %v5855_v12, %v5851_v54  ;;  %v5673_v56 = vadd.f32 %v14998_v55, %v5599_v57  ;;  %v5802_v28 = vmul.f32 0.01, %v5674_v11  ;;  %vm5738_vm3 = vcmp.gt.f32.partialorder %v5674_v11, 0.0 }
 0x707   :  { %v5593_v35 = vmul.f32 %v15029_v43, %v5486_v62  ;;  %v5398_v25 = vpop.f32.mrf.mxu0  ;;  %v5869_v27 = vsel %vm5741_vm4, %v5677_v24, %v5805_v47 }
 0x708   :  { %6432 = vmatmul.bf16.gmra.mxu2 %v15151_v46  ;;  %6388 = vmatmul.bf16.gmra.mxu1 %v15158_v19  ;;  %vm5737_vm1 = vcmp.gt.f32.partialorder %v5673_v56, 0.0  ;;  %v5801_v5 = vmul.f32 0.01, %v5673_v56  ;;  %v5866_v53 = vsel %vm5738_vm3, %v5674_v11, %v5802_v28 }
 0x709   :  { %v5667_v4 = vadd.f32 %v15089_v36, %v5593_v35  ;;  %6339 = vmatmul.bf16.gmra.mxu0 %v15155_v40  ;;  %v5444_v39 = vpop.f32.mrf.mxu1 }
 0x70a   :  { %v5604_v9 = vmul.f32 %v15000_v16, %v5444_v39  ;;  %v5865_v48 = vsel %vm5737_vm1, %v5673_v56, %v5801_v5 }
 0x70b   :  { %v5795_v18 = vmul.f32 0.01, %v5667_v4  ;;  %vm5731_vm0 = vcmp.gt.f32.partialorder %v5667_v4, 0.0  ;;  %v15177_v26 = vpack.c.bf16 %v5869_v27, %v5865_v48 }
 0x70c   :  { %v5678_v21 = vadd.f32 %v15003_v15, %v5604_v9 }
 0x70d   :  { %v5859_v29 = vsel %vm5731_vm0, %v5667_v4, %v5795_v18 }
 0x70e   :  { %v5488_v14 = vpop.f32.mrf.mxu2  ;;  %v5806_v17 = vmul.f32 0.01, %v5678_v21  ;;  %vm5742_vm5 = vcmp.gt.f32.partialorder %v5678_v21, 0.0 }
 0x70f   :  { %v5597_v52 = vmul.f32 %v15029_v43, %v5488_v14  ;;  %v5400_v54 = vpop.f32.mrf.mxu0 }
 0x710   :  { %v5870_v13 = vsel %vm5742_vm5, %v5678_v21, %v5806_v17  ;;  %v5611_v38 = vmul.f32 %v14995_v50, %v5400_v54 }
 0x711   :  { %v5671_v3 = vadd.f32 %v15089_v36, %v5597_v52  ;;  %v5447_v20 = vpop.f32.mrf.mxu1  ;;  %v15180_v33 = vpack.c.bf16 %v5870_v13, %v5866_v53 }
 0x712   :  { %v5608_v60 = vmul.f32 %v15000_v16, %v5447_v20  ;;  %v5685_v30 = vadd.f32 %v14998_v55, %v5611_v38 }
 0x713   :  { %v5799_v59 = vmul.f32 0.01, %v5671_v3  ;;  %vm5735_vm2 = vcmp.gt.f32.partialorder %v5671_v3, 0.0 }
 0x714   :  { %5529 = vmatmul.bf16.gmra.mxu3 %v14793_v45  ;;  %v5607_v45 = vmul.f32 %v14995_v50, %v5398_v25  ;;  %v5682_v37 = vadd.f32 %v15003_v15, %v5608_v60  ;;  %v5813_v56 = vmul.f32 0.01, %v5685_v30  ;;  %vm5749_vm10 = vcmp.gt.f32.partialorder %v5685_v30, 0.0 }
 0x715   :  { %v5863_v42 = vsel %vm5735_vm2, %v5671_v3, %v5799_v59 }
 0x716   :  { %v5491_v0 = vpop.f32.mrf.mxu2  ;;  %v15173_v44 = vpack.c.bf16 %v5863_v42, %v5859_v29  ;;  %v5681_v51 = vadd.f32 %v14998_v55, %v5607_v45  ;;  %v5810_v4 = vmul.f32 0.01, %v5682_v37  ;;  %vm5746_vm9 = vcmp.gt.f32.partialorder %v5682_v37, 0.0 }
 0x717   :  { %v5601_v10 = vmul.f32 %v15029_v43, %v5491_v0  ;;  %v5403_v61 = vpop.f32.mrf.mxu0  ;;  %v5877_v52 = vsel %vm5749_vm10, %v5685_v30, %v5813_v56 }
 0x718   :  { %6437 = vmatmul.bf16.gmra.mxu2 %v15173_v44  ;;  %6393 = vmatmul.bf16.gmra.mxu1 %v15180_v33  ;;  %vm5745_vm7 = vcmp.gt.f32.partialorder %v5681_v51, 0.0  ;;  %v5809_v63 = vmul.f32 0.01, %v5681_v51  ;;  %v5874_v3 = vsel %vm5746_vm9, %v5682_v37, %v5810_v4 }
 0x719   :  { %v5675_v32 = vadd.f32 %v15089_v36, %v5601_v10  ;;  %6344 = vmatmul.bf16.gmra.mxu0 %v15177_v26  ;;  %v5449_v12 = vpop.f32.mrf.mxu1 }
 0x71a   :  { %v5612_v8 = vmul.f32 %v15000_v16, %v5449_v12  ;;  %v5873_v18 = vsel %vm5745_vm7, %v5681_v51, %v5809_v63 }
 0x71b   :  { %v5803_v62 = vmul.f32 0.01, %v5675_v32  ;;  %vm5739_vm6 = vcmp.gt.f32.partialorder %v5675_v32, 0.0  ;;  %v15199_v47 = vpack.c.bf16 %v5877_v52, %v5873_v18 }
 0x71c   :  { %v5686_v35 = vadd.f32 %v15003_v15, %v5612_v8 }
 0x71d   :  { %v5867_v14 = vsel %vm5739_vm6, %v5675_v32, %v5803_v62 }
 0x71e   :  { %v5493_v23 = vpop.f32.mrf.mxu2  ;;  %v5814_v22 = vmul.f32 0.01, %v5686_v35  ;;  %vm5750_vm11 = vcmp.gt.f32.partialorder %v5686_v35, 0.0 }
 0x71f   :  { %v5605_v58 = vmul.f32 %v15029_v43, %v5493_v23  ;;  %v5405_v25 = vpop.f32.mrf.mxu0 }
 0x720   :  { %v5878_v5 = vsel %vm5750_vm11, %v5686_v35, %v5814_v22  ;;  %v5619_v0 = vmul.f32 %v14995_v50, %v5405_v25 }
 0x721   :  { %v5679_v57 = vadd.f32 %v15089_v36, %v5605_v58  ;;  %v5452_v9 = vpop.f32.mrf.mxu1  ;;  %v15202_v17 = vpack.c.bf16 %v5878_v5, %v5874_v3 }
 0x722   :  { %v5616_v59 = vmul.f32 %v15000_v16, %v5452_v9  ;;  %v5693_v45 = vadd.f32 %v14998_v55, %v5619_v0 }
 0x723   :  { %v5807_v39 = vmul.f32 0.01, %v5679_v57  ;;  %vm5743_vm8 = vcmp.gt.f32.partialorder %v5679_v57, 0.0 }
 0x724   :  { %5534 = vmatmul.bf16.gmra.mxu3 %v14807_v6  ;;  %v5615_v6 = vmul.f32 %v14995_v50, %v5403_v61  ;;  %v5690_v27 = vadd.f32 %v15003_v15, %v5616_v59  ;;  %v5821_v12 = vmul.f32 0.01, %v5693_v45  ;;  %vm5757_vm0 = vcmp.gt.f32.partialorder %v5693_v45, 0.0 }
 0x725   :  { %v5871_v11 = vsel %vm5743_vm8, %v5679_v57, %v5807_v39 }
 0x726   :  { %v5496_v24 = vpop.f32.mrf.mxu2  ;;  %v15195_v21 = vpack.c.bf16 %v5871_v11, %v5867_v14  ;;  %v5689_v42 = vadd.f32 %v14998_v55, %v5615_v6  ;;  %v5818_v54 = vmul.f32 0.01, %v5690_v27  ;;  %vm5754_vm15 = vcmp.gt.f32.partialorder %v5690_v27, 0.0 }
 0x727   :  { %v5609_v28 = vmul.f32 %v15029_v43, %v5496_v24  ;;  %v5408_v62 = vpop.f32.mrf.mxu0  ;;  %v5885_v35 = vsel %vm5757_vm0, %v5693_v45, %v5821_v12  ;;  %v9667_v45 = vld [vmem:[%s16133_s5 + $0x178] sm:$0xf0] }
 0x728   :  { %6442 = vmatmul.bf16.gmra.mxu2 %v15195_v21  ;;  %6398 = vmatmul.bf16.gmra.mxu1 %v15202_v17  ;;  %vm5753_vm13 = vcmp.gt.f32.partialorder %v5689_v42, 0.0  ;;  %v5817_v51 = vmul.f32 0.01, %v5689_v42  ;;  %v5882_v4 = vsel %vm5754_vm15, %v5690_v27, %v5818_v54 }
 0x729   :  { %v5683_v29 = vadd.f32 %v15089_v36, %v5609_v28  ;;  %6349 = vmatmul.bf16.gmra.mxu0 %v15199_v47  ;;  %v5454_v20 = vpop.f32.mrf.mxu1 }
 0x72a   :  { %v5620_v53 = vmul.f32 %v15000_v16, %v5454_v20  ;;  %v5881_v30 = vsel %vm5753_vm13, %v5689_v42, %v5817_v51 }
 0x72b   :  { %v5811_v13 = vmul.f32 0.01, %v5683_v29  ;;  %vm5747_vm12 = vcmp.gt.f32.partialorder %v5683_v29, 0.0  ;;  %v15221_v39 = vpack.c.bf16 %v5885_v35, %v5881_v30  ;;  %v9603_v35 = vld [vmem:[%s16133_s5 + $0xf8] sm:$0xf0] }
 0x72c   :  { %v5694_v60 = vadd.f32 %v15003_v15, %v5620_v53 }
 0x72d   :  { %v5875_v38 = vsel %vm5747_vm12, %v5683_v29, %v5811_v13 }
 0x72e   :  { %v5498_v48 = vpop.f32.mrf.mxu2  ;;  %v5822_v23 = vmul.f32 0.01, %v5694_v60  ;;  %vm5758_vm1 = vcmp.gt.f32.partialorder %v5694_v60, 0.0 }
 0x72f   :  { %v5613_v10 = vmul.f32 %v15029_v43, %v5498_v48  ;;  %v5410_v18 = vpop.f32.mrf.mxu0 }
 0x730   :  { %v5886_v56 = vsel %vm5758_vm1, %v5694_v60, %v5822_v23  ;;  %v5627_v5 = vmul.f32 %v14995_v50, %v5410_v18 }
 0x731   :  { %v5687_v32 = vadd.f32 %v15089_v36, %v5613_v10  ;;  %v5457_v58 = vpop.f32.mrf.mxu1  ;;  %v15224_v14 = vpack.c.bf16 %v5886_v56, %v5882_v4  ;;  %v10365_v10 = vld [vmem:[%s16133_s5 + $0x174] sm:$0xf]  ;;  %v9659_v4 = vld [vmem:[%s16133_s5 + $0x168] sm:$0xf0] }
 0x732   :  { %v5624_v11 = vmul.f32 %v15000_v16, %v5457_v58  ;;  %v5701_v29 = vadd.f32 %v14998_v55, %v5627_v5  ;;  %v10361_v5 = vld [vmem:[%s16133_s5 + $0x154] sm:$0xf] }
 0x733   :  { %v5815_v37 = vmul.f32 0.01, %v5687_v32  ;;  %vm5751_vm14 = vcmp.gt.f32.partialorder %v5687_v32, 0.0 }
 0x734   :  { %5539 = vmatmul.bf16.gmra.mxu3 %v14825_v2  ;;  %v5623_v2 = vmul.f32 %v14995_v50, %v5408_v62  ;;  %v5698_v3 = vadd.f32 %v15003_v15, %v5624_v11  ;;  %v5829_v27 = vmul.f32 0.01, %v5701_v29  ;;  %vm5765_vm6 = vcmp.gt.f32.partialorder %v5701_v29, 0.0  ;;  %v10331_v11 = vld [vmem:[%s16133_s5 + $0x64] sm:$0xf] }
 0x735   :  { %v5879_v8 = vsel %vm5751_vm14, %v5687_v32, %v5815_v37  ;;  %v9670_v32 = vor.u32 %v10365_v10, %v9667_v45  ;;  %v9539_v37 = vld [vmem:[%s16133_s5 + $0x78] sm:$0xf0]  ;;  %v9643_v10 = vld [vmem:[%s16133_s5 + $0x148] sm:$0xf0] }
 0x736   :  { %v5501_v57 = vpop.f32.mrf.mxu2  ;;  %v15217_v63 = vpack.c.bf16 %v5879_v8, %v5875_v38  ;;  %v5697_v9 = vadd.f32 %v14998_v55, %v5623_v2  ;;  %v5826_v48 = vmul.f32 0.01, %v5698_v3  ;;  %vm5762_vm5 = vcmp.gt.f32.partialorder %v5698_v3, 0.0  ;;  %v10349_v38 = vld [vmem:[%s16133_s5 + $0xf4] sm:$0xf] }
 0x737   :  { %v5617_v22 = vmul.f32 %v15029_v43, %v5501_v57  ;;  %v5413_v51 = vpop.f32.mrf.mxu0  ;;  %v5893_v23 = vsel %vm5765_vm6, %v5701_v29, %v5829_v27  ;;  %v10363_v57 = vld [vmem:[%s16133_s5 + $0x164] sm:$0xf]  ;;  %6615 = vmatpush.bf16.msrb.mxu2 %v9670_v32  ;;  %v9606_v2 = vor.u32 %v10349_v38, %v9603_v35 }
 0x738   :  { %6447 = vmatmul.bf16.gmra.mxu2 %v15217_v63  ;;  %6403 = vmatmul.bf16.gmra.mxu1 %v15224_v14  ;;  %vm5761_vm3 = vcmp.gt.f32.partialorder %v5697_v9, 0.0  ;;  %v5825_v20 = vmul.f32 0.01, %v5697_v9  ;;  %v5890_v58 = vsel %vm5762_vm5, %v5698_v3, %v5826_v48  ;;  %v5631_v18 = vmul.f32 %v14995_v50, %v5413_v51  ;;  %v9595_v3 = vld [vmem:[%s16133_s5 + $0xe8] sm:$0xf0] }
 0x739   :  { %v5691_v61 = vadd.f32 %v15089_v36, %v5617_v22  ;;  %6354 = vmatmul.bf16.gmra.mxu0 %v15221_v39  ;;  %v5459_v52 = vpop.f32.mrf.mxu1  ;;  %6566 = vmatpush.bf16.msra.mxu1 %v9606_v2 }
 0x73a   :  { %v5628_v28 = vmul.f32 %v15000_v16, %v5459_v52  ;;  %v5889_v12 = vsel %vm5761_vm3, %v5697_v9, %v5825_v20  ;;  %v10347_v9 = vld [vmem:[%s16133_s5 + $0xe4] sm:$0xf]  ;;  %v9523_v20 = vld [vmem:[%s16133_s5 + $0x58] sm:$0xf0]  ;;  %v5705_v45 = vadd.f32 %v14998_v55, %v5631_v18 }
 0x73b   :  { %v5819_v6 = vmul.f32 0.01, %v5691_v61  ;;  %vm5755_vm2 = vcmp.gt.f32.partialorder %v5691_v61, 0.0  ;;  %v15279_v52 = vpack.c.bf16 %v5893_v23, %v5889_v12 }
 0x73c   :  { %v5702_v42 = vadd.f32 %v15003_v15, %v5628_v28  ;;  %v9651_v28 = vld [vmem:[%s16133_s5 + $0x158] sm:$0xf0]  ;;  %vm5769_vm9 = vcmp.gt.f32.partialorder %v5705_v45, 0.0 }
 0x73d   :  { %v5883_v13 = vsel %vm5755_vm2, %v5691_v61, %v5819_v6  ;;  %v9531_v61 = vld [vmem:[%s16133_s5 + $0x68] sm:$0xf0]  ;;  %v9654_v27 = vor.u32 %v10361_v5, %v9651_v28  ;;  %v9635_v5 = vld [vmem:[%s16133_s5 + $0x138] sm:$0xf0] }
 0x73e   :  { %v5503_v24 = vpop.f32.mrf.mxu2  ;;  %v5830_v0 = vmul.f32 0.01, %v5702_v42  ;;  %vm5766_vm7 = vcmp.gt.f32.partialorder %v5702_v42, 0.0  ;;  %v9534_v29 = vor.u32 %v10331_v11, %v9531_v61  ;;  %v9515_v11 = vld [vmem:[%s16133_s5 + $0x48] sm:$0xf0] }
 0x73f   :  { %v5621_v59 = vmul.f32 %v15029_v43, %v5503_v24  ;;  %v9662_v24 = vor.u32 %v10363_v57, %v9659_v4  ;;  %v5415_v32 = vpop.f32.mrf.mxu0  ;;  %v5833_v4 = vmul.f32 0.01, %v5705_v45  ;;  %v10343_v61 = vld [vmem:[%s16133_s5 + $0xc4] sm:$0xf] }
 0x740   :  { %v5894_v30 = vsel %vm5766_vm7, %v5702_v42, %v5830_v0  ;;  %v9598_v42 = vor.u32 %v10347_v9, %v9595_v3  ;;  %v10345_v0 = vld [vmem:[%s16133_s5 + $0xd4] sm:$0xf]  ;;  %v5635_v23 = vmul.f32 %v14995_v50, %v5415_v32 }
 0x741   :  { %v5695_v25 = vadd.f32 %v15089_v36, %v5621_v59  ;;  %v5462_v54 = vpop.f32.mrf.mxu1  ;;  %v15291_v59 = vpack.c.bf16 %v5894_v30, %v5890_v58  ;;  %6616 = vmatpush.bf16.msrb.mxu2 %v9662_v24  ;;  %v9579_v24 = vld [vmem:[%s16133_s5 + $0xc8] sm:$0xf0]  ;;  %v10357_v3 = vld [vmem:[%s16133_s5 + $0x134] sm:$0xf]  ;;  %v5897_v28 = vsel %vm5769_vm9, %v5705_v45, %v5833_v4  ;;  %v9507_v45 = vld [vmem:[%s16133_s5 + $0x38] sm:$0xf0] }
 0x742   :  { %v5632_v6 = vmul.f32 %v15000_v16, %v5462_v54  ;;  %6567 = vmatpush.bf16.msra.mxu1 %v9598_v42  ;;  %v5709_v30 = vadd.f32 %v14998_v55, %v5635_v23  ;;  %v15325_v55 = vld [vmem:[%s16132_s1 + $0x28] sm:$0xff]  ;;  %v10355_v23 = vld [vmem:[%s16133_s5 + $0x124] sm:$0xf] }
 0x743   :  { %v5823_v53 = vmul.f32 0.01, %v5695_v25  ;;  %vm5759_vm4 = vcmp.gt.f32.partialorder %v5695_v25, 0.0  ;;  %v10323_v4 = vld [vmem:[%s16133_s5 + $0x24] sm:$0xf] }
 0x744   :  { %5544 = vmatmul.bf16.gmra.mxu3 %v14843_v41  ;;  %v10333_v41 = vld [vmem:[%s16133_s5 + $0x74] sm:$0xf]  ;;  %v5837_v50 = vmul.f32 0.01, %v5709_v30  ;;  %vm5773_vm12 = vcmp.gt.f32.partialorder %v5709_v30, 0.0 }
 0x745   :  { %v5887_v60 = vsel %vm5759_vm4, %v5695_v25, %v5823_v53  ;;  %v9542_v22 = vor.u32 %v10333_v41, %v9539_v37  ;;  %v10329_v25 = vld [vmem:[%s16133_s5 + $0x54] sm:$0xf]  ;;  %v9587_v53 = vld [vmem:[%s16133_s5 + $0xd8] sm:$0xf0]  ;;  %6617 = vmatpush.bf16.msrb.mxu2 %v9654_v27  ;;  %v10382_v27 = vld [vmem:[%s16133_s5 + $0x1f4] sm:$0xf0] }
 0x746   :  { %v5506_v8 = vpop.f32.mrf.mxu2  ;;  %v15255_v62 = vpack.c.bf16 %v5887_v60, %v5883_v13  ;;  %v10359_v13 = vld [vmem:[%s16133_s5 + $0x144] sm:$0xf]  ;;  %v5706_v60 = vadd.f32 %v15003_v15, %v5632_v6  ;;  %v9526_v54 = vor.u32 %v10329_v25, %v9523_v20  ;;  %v9590_v37 = vor.u32 %v10345_v0, %v9587_v53 }
 0x747   :  { %v5625_v56 = vmul.f32 %v15029_v43, %v5506_v8  ;;  %6517 = vmatpush.bf16.msra.mxu0 %v9542_v22  ;;  %v9646_v58 = vor.u32 %v10359_v13, %v9643_v10  ;;  %v9582_v25 = vor.u32 %v10343_v61, %v9579_v24  ;;  %v9638_v20 = vor.u32 %v10357_v3, %v9635_v5  ;;  %v10325_v10 = vld [vmem:[%s16133_s5 + $0x34] sm:$0xf]  ;;  %v9619_v61 = vld [vmem:[%s16133_s5 + $0x118] sm:$0xf0]  ;;  %v10378_v24 = vld [vmem:[%s16133_s5 + $0x1d4] sm:$0xf0] }
 0x748   :  { %6452 = vmatmul.bf16.gmra.mxu2 %v15255_v62  ;;  %6408 = vmatmul.bf16.gmra.mxu1 %v15291_v59  ;;  %vm5770_vm10 = vcmp.gt.f32.partialorder %v5706_v60, 0.0  ;;  %v5901_v53 = vsel %vm5773_vm12, %v5709_v30, %v5837_v50  ;;  %v10380_v30 = vld [vmem:[%s16133_s5 + $0x1e4] sm:$0xf0]  ;;  %v10339_v50 = vld [vmem:[%s16133_s5 + $0xa4] sm:$0xf] }
 0x749   :  { %v5699_v48 = vadd.f32 %v15089_v36, %v5625_v56  ;;  %6359 = vmatmul.bf16.gmra.mxu0 %v15279_v52  ;;  %v5464_v51 = vpop.f32.mrf.mxu1  ;;  %v5834_v56 = vmul.f32 0.01, %v5706_v60  ;;  %6568 = vmatpush.bf16.msra.mxu1 %v9590_v37  ;;  %v10321_v3 = vld [vmem:[%s16133_s5 + $0x14] sm:$0xf]  ;;  %v9491_v5 = vld [vmem:[%s16133_s5 + $0x18] sm:$0xf0] }
 0x74a   :  { %v5636_v41 = vmul.f32 %v15000_v16, %v5464_v51  ;;  %6618 = vmatpush.bf16.msrb.mxu2 %v9646_v58  ;;  %v9510_v51 = vor.u32 %v10325_v10, %v9507_v45  ;;  %v9721_v58 = vld [vmem:[%s16133_s5 + $0x1e0] sm:$0xf]  ;;  %v9483_v45 = vld [vmem:[%s16133_s5 + $0x8] sm:$0xf0] }
 0x74b   :  { %6518 = vmatpush.bf16.msra.mxu0 %v9534_v29  ;;  %v5827_v38 = vmul.f32 0.01, %v5699_v48  ;;  %vm5763_vm8 = vcmp.gt.f32.partialorder %v5699_v48, 0.0  ;;  %v5898_v6 = vsel %vm5770_vm10, %v5706_v60, %v5834_v56  ;;  %v15364_v60 = vpack.c.bf16 %v5901_v53, %v5897_v28  ;;  %v9499_v56 = vld [vmem:[%s16133_s5 + $0x28] sm:$0xf0] }
 0x74c   :  { %v5710_v35 = vadd.f32 %v15003_v15, %v5636_v41  ;;  %v10327_v15 = vld [vmem:[%s16133_s5 + $0x44] sm:$0xf]  ;;  %v9705_v53 = vld [vmem:[%s16133_s5 + $0x1c0] sm:$0xf] }
 0x74d   :  { %v5891_v22 = vsel %vm5763_vm8, %v5699_v48, %v5827_v38  ;;  %v9518_v18 = vor.u32 %v10327_v15, %v9515_v11  ;;  %v9729_v48 = vld [vmem:[%s16133_s5 + $0x1f0] sm:$0xf]  ;;  %6569 = vmatpush.bf16.msra.mxu1 %v9582_v25  ;;  %v10353_v11 = vld [vmem:[%s16133_s5 + $0x114] sm:$0xf]  ;;  %v9555_v25 = vld [vmem:[%s16133_s5 + $0x98] sm:$0xf0] }
 0x74e   :  { %v5508_v12 = vpop.f32.mrf.mxu2  ;;  %v5838_v2 = vmul.f32 0.01, %v5710_v35  ;;  %vm5774_vm13 = vcmp.gt.f32.partialorder %v5710_v35, 0.0  ;;  %v9730_v13 = vor.u32 %v10382_v27, %v9729_v48  ;;  %6619 = vmatpush.bf16.msrb.mxu2 %v9638_v20  ;;  %v10351_v20 = vld [vmem:[%s16133_s5 + $0x104] sm:$0xf]  ;;  %v9494_v27 = vor.u32 %v10321_v3, %v9491_v5  ;;  %v15483_v3 = vld [vmem:[%s16132_s1 + $0x38] sm:$0xff] }
 0x74f   :  { %v5629_v8 = vmul.f32 %v15029_v43, %v5508_v12  ;;  %6519 = vmatpush.bf16.msra.mxu0 %v9526_v54  ;;  %v10341_v54 = vld [vmem:[%s16133_s5 + $0xb4] sm:$0xf]  ;;  %v9571_v12 = vld [vmem:[%s16133_s5 + $0xb8] sm:$0xf0]  ;;  %v9673_v5 = vld [vmem:[%s16133_s5 + $0x180] sm:$0xf] }
 0x750   :  { %v5902_v32 = vsel %vm5774_vm13, %v5710_v35, %v5838_v2  ;;  %6468 = vmatpush.bf16.msra.mxu3 %v9730_v13  ;;  %v9574_v38 = vor.u32 %v10341_v54, %v9571_v12  ;;  %v9563_v2 = vld [vmem:[%s16133_s5 + $0xa8] sm:$0xf0]  ;;  %v10376_v13 = vld [vmem:[%s16133_s5 + $0x1c4] sm:$0xf0]  ;;  %v10335_v54 = vld [vmem:[%s16133_s5 + $0x84] sm:$0xf] }
 0x751   :  { %v5703_v57 = vadd.f32 %v15089_v36, %v5629_v8  ;;  %v15376_v37 = vpack.c.bf16 %v5902_v32, %v5898_v6  ;;  %v9627_v8 = vld [vmem:[%s16133_s5 + $0x128] sm:$0xf0]  ;;  %v9566_v15 = vor.u32 %v10339_v50, %v9563_v2  ;;  %v9689_v2 = vld [vmem:[%s16133_s5 + $0x1a0] sm:$0xf] }
 0x752   :  { %v9630_v35 = vor.u32 %v10355_v23, %v9627_v8  ;;  %6570 = vmatpush.bf16.msra.mxu1 %v9574_v38  ;;  %v9547_v12 = vld [vmem:[%s16133_s5 + $0x88] sm:$0xf0]  ;;  %v9706_v23 = vor.u32 %v10376_v13, %v9705_v53 }
 0x753   :  { %v5831_v16 = vmul.f32 0.01, %v5703_v57  ;;  %vm5767_vm11 = vcmp.gt.f32.partialorder %v5703_v57, 0.0  ;;  %6520 = vmatpush.bf16.msra.mxu0 %v9518_v18  ;;  %v9622_v18 = vor.u32 %v10353_v11, %v9619_v61 }
 0x754   :  { %5549 = vmatmul.bf16.gmra.mxu3 %v15325_v55  ;;  %6620 = vmatpush.bf16.msrb.mxu2 %v9630_v35 }
 0x755   :  { %v5895_v9 = vsel %vm5767_vm11, %v5703_v57, %v5831_v16  ;;  %v9722_v57 = vor.u32 %v10380_v30, %v9721_v58  ;;  %v9550_v30 = vor.u32 %v10335_v54, %v9547_v12 }
 0x756   :  { %v5511_v29 = vpop.f32.mrf.mxu2  ;;  %v15348_v42 = vpack.c.bf16 %v5895_v9, %v5891_v22  ;;  %v9502_v22 = vor.u32 %v10323_v4, %v9499_v56  ;;  %v9713_v9 = vld [vmem:[%s16133_s5 + $0x1d0] sm:$0xf]  ;;  %6571 = vmatpush.bf16.msra.mxu1 %v9566_v15  ;;  %v10374_v56 = vld [vmem:[%s16133_s5 + $0x1b4] sm:$0xf0]  ;;  %v10372_v15 = vld [vmem:[%s16133_s5 + $0x1a4] sm:$0xf0] }
 0x757   :  { %v5633_v0 = vmul.f32 %v15029_v43, %v5511_v29  ;;  %6521 = vmatpush.bf16.msra.mxu0 %v9510_v51  ;;  %6469 = vmatpush.bf16.msra.mxu3 %v9722_v57  ;;  %v9714_v6 = vor.u32 %v10378_v24, %v9713_v9  ;;  %v10337_v29 = vld [vmem:[%s16133_s5 + $0x94] sm:$0xf]  ;;  %v9697_v4 = vld [vmem:[%s16133_s5 + $0x1b0] sm:$0xf]  ;;  %v9690_v11 = vor.u32 %v10372_v15, %v9689_v2 }
 0x758   :  { %6457 = vmatmul.bf16.gmra.mxu2 %v15348_v42  ;;  %6413 = vmatmul.bf16.gmra.mxu1 %v15376_v37  ;;  %v9558_v10 = vor.u32 %v10337_v29, %v9555_v25  ;;  %v9681_v9 = vld [vmem:[%s16133_s5 + $0x190] sm:$0xf] }
 0x759   :  { %v5707_v41 = vadd.f32 %v15089_v36, %v5633_v0  ;;  %6364 = vmatmul.bf16.gmra.mxu0 %v15364_v60  ;;  %v9611_v0 = vld [vmem:[%s16133_s5 + $0x108] sm:$0xf0]  ;;  %6621 = vmatpush.bf16.msrb.mxu2 %v9622_v18 }
 0x75a   :  { %v9614_v51 = vor.u32 %v10351_v20, %v9611_v0  ;;  %6572 = vmatpush.bf16.msra.mxu1 %v9558_v10 }
 0x75b   :  { %v5835_v16 = vmul.f32 0.01, %v5707_v41  ;;  %6522 = vmatpush.bf16.msra.mxu0 %v9502_v22  ;;  %vm5771_vm14 = vcmp.gt.f32.partialorder %v5707_v41, 0.0  ;;  %6470 = vmatpush.bf16.msra.mxu3 %v9714_v6 }
 0x75d   :  { %v5899_v8 = vsel %vm5771_vm14, %v5707_v41, %v5835_v16  ;;  %6622 = vmatpush.bf16.msrb.mxu2 %v9614_v51  ;;  %v9698_v16 = vor.u32 %v10374_v56, %v9697_v4 }
 0x75e   :  { %v5513_v28 = vpop.f32.mrf.mxu2  ;;  %6573 = vmatpush.bf16.msra.mxu1 %v9550_v30 }
 0x75f   :  { %v5637_v48 = vmul.f32 %v15029_v43, %v5513_v28  ;;  %v10319_v43 = vld [vmem:[%s16133_s5 + $0x4] sm:$0xf]  ;;  %6523 = vmatpush.bf16.msra.mxu0 %v9494_v27  ;;  %6471 = vmatpush.bf16.msra.mxu3 %v9706_v23  ;;  %v10368_v28 = vld [vmem:[%s16133_s5 + $0x184] sm:$0xf0] }
 0x760   :  { %v9486_v58 = vor.u32 %v10319_v43, %v9483_v45  ;;  %v9674_v6 = vor.u32 %v10368_v28, %v9673_v5 }
 0x761   :  { %v5711_v32 = vadd.f32 %v15089_v36, %v5637_v48  ;;  %v15454_v36 = vld [vmem:[%s16132_s1 + $0x30] sm:$0xff] }
 0x763   :  { %v5839_v38 = vmul.f32 0.01, %v5711_v32  ;;  %vm5775_vm15 = vcmp.gt.f32.partialorder %v5711_v32, 0.0  ;;  %6524 = vmatpush.bf16.msra.mxu0 %v9486_v58  ;;  %6472 = vmatpush.bf16.msra.mxu3 %v9698_v16 }
 0x764   :  { %5554 = vmatmul.bf16.gmra.mxu3 %v15454_v36 }
 0x765   :  { %v5903_v35 = vsel %vm5775_vm15, %v5711_v32, %v5839_v38  ;;  %v6379_v50 = vpop.f32.mrf.mxu1 }
 0x766   :  { %v15457_v57 = vpack.c.bf16 %v5903_v35, %v5899_v8  ;;  %v6330_v41 = vpop.f32.mrf.mxu0 }
 0x767   :  { %v6380_v22 = vadd.f32 %v6379_v50, %v6330_v41  ;;  %6473 = vmatpush.bf16.msra.mxu3 %v9690_v11 }
 0x768   :  { %6462 = vmatmul.bf16.gmra.mxu2 %v15457_v57  ;;  %6574 = vmatmul.bf16.vlgmr.msra.gmra.mxu1 %v15096_v34 }
 0x769   :  { %6525 = vmatmul.bf16.vlgmr.msra.gmra.mxu0 %v15091_v31  ;;  %v10370_v31 = vld [vmem:[%s16133_s5 + $0x194] sm:$0xf0] }
 0x76a   :  { %v9682_v18 = vor.u32 %v10370_v31, %v9681_v9 }
 0x76c   :  { %6474 = vmatpush.bf16.msra.mxu3 %v9682_v18 }
 0x76d   :  { %v6381_v34 = vpop.f32.mrf.mxu1 }
 0x76e   :  { %v6332_v61 = vpop.f32.mrf.mxu0 }
 0x76f   :  { %v6382_v24 = vadd.f32 %v6381_v34, %v6332_v61 }
 0x770   :  { %6475 = vmatpush.bf16.msra.mxu3 %v9674_v6 }
 0x774   :  { %5559 = vmatmul.bf16.gmra.mxu3 %v15483_v3 }
 0x775   :  { %v6384_v25 = vpop.f32.mrf.mxu1 }
 0x776   :  { %v6335_v29 = vpop.f32.mrf.mxu0 }
 0x777   :  { %v6385_v48 = vadd.f32 %v6384_v25, %v6335_v29 }
 0x778   :  { %6623 = vmatmul.bf16.vlgmr.msrb.gmra.mxu2 %v15120_v1  ;;  %6579 = vmatmul.bf16.gmra.mxu1 %v15130_v7  ;;  %v10428_v1 = vld [vmem:[%s16134_s3] sm:$0xf] }
 0x779   :  { %6530 = vmatmul.bf16.gmra.mxu0 %v15124_v49  ;;  %v15502_v45 = vperm.slane %v10428_v1, 3  ;;  %v10429_v7 = vld [vmem:[%s16135_s4] sm:$0xf] }
 0x77a   :  { %v15509_v54 = vperm.slane %v10429_v7, 3 }
 0x77b   :  { %v6428_v20 = vpop.f32.mrf.mxu2 }
 0x77c   :  { %v15493_v27 = vadd.f32 %v6428_v20, %v6380_v22 }
 0x77d   :  { %v6386_v53 = vpop.f32.mrf.mxu1 }
 0x77e   :  { %v6337_v0 = vpop.f32.mrf.mxu0 }
 0x77f   :  { %v6387_v10 = vadd.f32 %v6386_v53, %v6337_v0 }
 0x783   :  { %v6430_v13 = vpop.f32.mrf.mxu2 }
 0x784   :  { %v15497_v43 = vadd.f32 %v6430_v13, %v6382_v24 }
 0x785   :  { %v6389_v12 = vpop.f32.mrf.mxu1 }
 0x786   :  { %v6340_v51 = vpop.f32.mrf.mxu0 }
 0x787   :  { %v5525_v32 = vpop.f32.mrf.mxu3  ;;  %v6390_v38 = vadd.f32 %v6389_v12, %v6340_v51 }
 0x788   :  { %6628 = vmatmul.bf16.gmra.mxu2 %v15151_v46  ;;  %v5578_v49 = vmul.f32 %v15502_v45, %v5525_v32  ;;  %6584 = vmatmul.bf16.gmra.mxu1 %v15158_v19 }
 0x789   :  { %6535 = vmatmul.bf16.gmra.mxu0 %v15155_v40 }
 0x78a   :  { %v5652_v46 = vadd.f32 %v15509_v54, %v5578_v49 }
 0x78b   :  { %v6433_v23 = vpop.f32.mrf.mxu2 }
 0x78c   :  { %v15511_v8 = vadd.f32 %v6433_v23, %v6385_v48  ;;  %v5780_v41 = vmul.f32 0.01, %v5652_v46  ;;  %vm5716_vm0 = vcmp.gt.f32.partialorder %v5652_v46, 0.0 }
 0x78d   :  { %v6391_v56 = vpop.f32.mrf.mxu1 }
 0x78e   :  { %v6342_v35 = vpop.f32.mrf.mxu0  ;;  %v5844_v40 = vsel %vm5716_vm0, %v5652_v46, %v5780_v41 }
 0x78f   :  { %v5527_v58 = vpop.f32.mrf.mxu3  ;;  %v6392_v16 = vadd.f32 %v6391_v56, %v6342_v35 }
 0x790   :  { %v5582_v30 = vmul.f32 %v15502_v45, %v5527_v58 }
 0x792   :  { %v5656_v4 = vadd.f32 %v15509_v54, %v5582_v30 }
 0x793   :  { %v6435_v50 = vpop.f32.mrf.mxu2 }
 0x794   :  { %vm5720_vm1 = vcmp.gt.f32.partialorder %v5656_v4, 0.0  ;;  %v5784_v22 = vmul.f32 0.01, %v5656_v4  ;;  %v15518_v2 = vadd.f32 %v6435_v50, %v6387_v10 }
 0x795   :  { %v6394_v31 = vpop.f32.mrf.mxu1 }
 0x796   :  { %v5848_v15 = vsel %vm5720_vm1, %v5656_v4, %v5784_v22  ;;  %v6345_v61 = vpop.f32.mrf.mxu0 }
 0x797   :  { %v15520_v19 = vpack.c.bf16 %v5848_v15, %v5844_v40  ;;  %v5530_v11 = vpop.f32.mrf.mxu3  ;;  %v6395_v18 = vadd.f32 %v6394_v31, %v6345_v61 }
 0x798   :  { %6633 = vmatmul.bf16.gmra.mxu2 %v15173_v44  ;;  %v5586_v9 = vmul.f32 %v15502_v45, %v5530_v11  ;;  %6589 = vmatmul.bf16.gmra.mxu1 %v15180_v33 }
 0x799   :  { %6476 = vmatmul.bf16.vlgmr.msra.gmra.mxu3 %v15520_v19  ;;  %6540 = vmatmul.bf16.gmra.mxu0 %v15177_v26 }
 0x79a   :  { %v5660_v5 = vadd.f32 %v15509_v54, %v5586_v9 }
 0x79b   :  { %v6438_v34 = vpop.f32.mrf.mxu2 }
 0x79c   :  { %v15525_v24 = vadd.f32 %v6438_v34, %v6390_v38  ;;  %v5788_v29 = vmul.f32 0.01, %v5660_v5  ;;  %vm5724_vm2 = vcmp.gt.f32.partialorder %v5660_v5, 0.0 }
 0x79d   :  { %v6396_v20 = vpop.f32.mrf.mxu1 }
 0x79e   :  { %v6347_v44 = vpop.f32.mrf.mxu0  ;;  %v5852_v26 = vsel %vm5724_vm2, %v5660_v5, %v5788_v29 }
 0x79f   :  { %v5532_v28 = vpop.f32.mrf.mxu3  ;;  %v6397_v0 = vadd.f32 %v6396_v20, %v6347_v44 }
 0x7a0   :  { %v5590_v6 = vmul.f32 %v15502_v45, %v5532_v28 }
 0x7a2   :  { %v5664_v25 = vadd.f32 %v15509_v54, %v5590_v6 }
 0x7a3   :  { %v6440_v48 = vpop.f32.mrf.mxu2 }
 0x7a4   :  { %v5792_v53 = vmul.f32 0.01, %v5664_v25  ;;  %vm5728_vm3 = vcmp.gt.f32.partialorder %v5664_v25, 0.0  ;;  %v15532_v13 = vadd.f32 %v6440_v48, %v6392_v16 }
 0x7a5   :  { %v6399_v49 = vpop.f32.mrf.mxu1 }
 0x7a6   :  { %v5856_v10 = vsel %vm5728_vm3, %v5664_v25, %v5792_v53  ;;  %v6350_v32 = vpop.f32.mrf.mxu0 }
 0x7a7   :  { %v5535_v33 = vpop.f32.mrf.mxu3  ;;  %v15534_v1 = vpack.c.bf16 %v5856_v10, %v5852_v26  ;;  %v6400_v12 = vadd.f32 %v6399_v49, %v6350_v32 }
 0x7a8   :  { %6638 = vmatmul.bf16.gmra.mxu2 %v15195_v21  ;;  %v5594_v51 = vmul.f32 %v15502_v45, %v5535_v33  ;;  %6594 = vmatmul.bf16.gmra.mxu1 %v15202_v17 }
 0x7a9   :  { %6481 = vmatmul.bf16.gmra.mxu3 %v15534_v1  ;;  %6545 = vmatmul.bf16.gmra.mxu0 %v15199_v47 }
 0x7aa   :  { %v5668_v38 = vadd.f32 %v15509_v54, %v5594_v51 }
 0x7ab   :  { %v6443_v7 = vpop.f32.mrf.mxu2 }
 0x7ac   :  { %v15539_v23 = vadd.f32 %v6443_v7, %v6395_v18  ;;  %v5796_v30 = vmul.f32 0.01, %v5668_v38  ;;  %vm5732_vm4 = vcmp.gt.f32.partialorder %v5668_v38, 0.0 }
 0x7ad   :  { %v15548_v41 = vpop.f32.mrf.mxu1 }
 0x7ae   :  { %v15545_v21 = vpop.f32.mrf.mxu0  ;;  %v5860_v47 = vsel %vm5732_vm4, %v5668_v38, %v5796_v30 }
 0x7af   :  { %v5537_v46 = vpop.f32.mrf.mxu3 }
 0x7b0   :  { %v5598_v58 = vmul.f32 %v15502_v45, %v5537_v46 }
 0x7b2   :  { %v5672_v35 = vadd.f32 %v15509_v54, %v5598_v58 }
 0x7b3   :  { %v6445_v4 = vpop.f32.mrf.mxu2 }
 0x7b4   :  { %v5800_v56 = vmul.f32 0.01, %v5672_v35  ;;  %vm5736_vm5 = vcmp.gt.f32.partialorder %v5672_v35, 0.0  ;;  %v15550_v50 = vadd.f32 %v6445_v4, %v6397_v0  ;;  %v9731_v4 = vld [vmem:[%s16133_s5 + $0x1f8] sm:$0xf0] }
 0x7b5   :  { %v15559_v11 = vpop.f32.mrf.mxu1 }
 0x7b6   :  { %v5864_v17 = vsel %vm5736_vm5, %v5672_v35, %v5800_v56  ;;  %v15556_v40 = vpop.f32.mrf.mxu0  ;;  %v10381_v35 = vld [vmem:[%s16133_s5 + $0x1f4] sm:$0xf] }
 0x7b7   :  { %v5540_v16 = vpop.f32.mrf.mxu3  ;;  %v15552_v22 = vpack.c.bf16 %v5864_v17, %v5860_v47  ;;  %v9734_v17 = vor.u32 %v10381_v35, %v9731_v4  ;;  %v9699_v35 = vld [vmem:[%s16133_s5 + $0x1b8] sm:$0xf0]  ;;  %v10371_v4 = vld [vmem:[%s16133_s5 + $0x1a4] sm:$0xf] }
 0x7b8   :  { %6643 = vmatmul.bf16.gmra.mxu2 %v15217_v63  ;;  %v5602_v15 = vmul.f32 %v15502_v45, %v5540_v16  ;;  %6599 = vmatmul.bf16.gmra.mxu1 %v15224_v14 }
 0x7b9   :  { %6486 = vmatmul.bf16.gmra.mxu3 %v15552_v22  ;;  %6550 = vmatmul.bf16.gmra.mxu0 %v15221_v39 }
 0x7ba   :  { %v5676_v31 = vadd.f32 %v15509_v54, %v5602_v15  ;;  %6664 = vmatpush.bf16.msrb.mxu3 %v9734_v17  ;;  %v9723_v15 = vld [vmem:[%s16133_s5 + $0x1e8] sm:$0xf0] }
 0x7bb   :  { %v6448_v61 = vpop.f32.mrf.mxu2 }
 0x7bc   :  { %v15561_v9 = vadd.f32 %v6448_v61, %v6400_v12  ;;  %v5804_v5 = vmul.f32 0.01, %v5676_v31  ;;  %vm5740_vm6 = vcmp.gt.f32.partialorder %v5676_v31, 0.0 }
 0x7bd   :  { %v15570_v6 = vpop.f32.mrf.mxu1 }
 0x7be   :  { %v15567_v18 = vpop.f32.mrf.mxu0  ;;  %v5868_v39 = vsel %vm5740_vm6, %v5676_v31, %v5804_v5 }
 0x7bf   :  { %v5542_v34 = vpop.f32.mrf.mxu3 }
 0x7c0   :  { %v5606_v63 = vmul.f32 %v15502_v45, %v5542_v34 }
 0x7c2   :  { %v5680_v28 = vadd.f32 %v15509_v54, %v5606_v63 }
 0x7c3   :  { %v15572_v44 = vpop.f32.mrf.mxu2 }
 0x7c4   :  { %v5808_v29 = vmul.f32 0.01, %v5680_v28  ;;  %vm5744_vm7 = vcmp.gt.f32.partialorder %v5680_v28, 0.0 }
 0x7c5   :  { %v15581_v53 = vpop.f32.mrf.mxu1 }
 0x7c6   :  { %v5872_v25 = vsel %vm5744_vm7, %v5680_v28, %v5808_v29  ;;  %v15578_v48 = vpop.f32.mrf.mxu0 }
 0x7c7   :  { %v5545_v14 = vpop.f32.mrf.mxu3  ;;  %v15574_v20 = vpack.c.bf16 %v5872_v25, %v5868_v39 }
 0x7c8   :  { %6648 = vmatmul.bf16.gmra.mxu2 %v15255_v62  ;;  %v5610_v0 = vmul.f32 %v15502_v45, %v5545_v14  ;;  %6604 = vmatmul.bf16.gmra.mxu1 %v15291_v59 }
 0x7c9   :  { %6491 = vmatmul.bf16.gmra.mxu3 %v15574_v20  ;;  %6555 = vmatmul.bf16.gmra.mxu0 %v15279_v52 }
 0x7ca   :  { %v5684_v10 = vadd.f32 %v15509_v54, %v5610_v0 }
 0x7cb   :  { %v15583_v26 = vpop.f32.mrf.mxu2 }
 0x7cc   :  { %v5812_v51 = vmul.f32 0.01, %v5684_v10  ;;  %vm5748_vm8 = vcmp.gt.f32.partialorder %v5684_v10, 0.0 }
 0x7cd   :  { %v15592_v7 = vpop.f32.mrf.mxu1 }
 0x7ce   :  { %v15589_v62 = vpop.f32.mrf.mxu0  ;;  %v5876_v52 = vsel %vm5748_vm8, %v5684_v10, %v5812_v51  ;;  %v10375_v10 = vld [vmem:[%s16133_s5 + $0x1c4] sm:$0xf] }
 0x7cf   :  { %v5547_v33 = vpop.f32.mrf.mxu3 }
 0x7d0   :  { %v5614_v32 = vmul.f32 %v15502_v45, %v5547_v33  ;;  %v9707_v33 = vld [vmem:[%s16133_s5 + $0x1c8] sm:$0xf0] }
 0x7d2   :  { %v5688_v49 = vadd.f32 %v15509_v54, %v5614_v32 }
 0x7d3   :  { %v15594_v12 = vpop.f32.mrf.mxu2 }
 0x7d4   :  { %v5816_v38 = vmul.f32 0.01, %v5688_v49  ;;  %vm5752_vm9 = vcmp.gt.f32.partialorder %v5688_v49, 0.0 }
 0x7d5   :  { %v15609_v47 = vpop.f32.mrf.mxu1 }
 0x7d6   :  { %v5880_v46 = vsel %vm5752_vm9, %v5688_v49, %v5816_v38  ;;  %v15600_v30 = vpop.f32.mrf.mxu0  ;;  %v9710_v49 = vor.u32 %v10375_v10, %v9707_v33  ;;  %v9675_v10 = vld [vmem:[%s16133_s5 + $0x188] sm:$0xf0] }
 0x7d7   :  { %v5550_v59 = vpop.f32.mrf.mxu3  ;;  %v15596_v58 = vpack.c.bf16 %v5880_v46, %v5876_v52 }
 0x7d8   :  { %6653 = vmatmul.bf16.gmra.mxu2 %v15348_v42  ;;  %v5618_v56 = vmul.f32 %v15502_v45, %v5550_v59  ;;  %v10379_v42 = vld [vmem:[%s16133_s5 + $0x1e4] sm:$0xf]  ;;  %6609 = vmatmul.bf16.gmra.mxu1 %v15376_v37  ;;  %v9715_v37 = vld [vmem:[%s16133_s5 + $0x1d8] sm:$0xf0]  ;;  %v10373_v59 = vld [vmem:[%s16133_s5 + $0x1b4] sm:$0xf] }
 0x7d9   :  { %6496 = vmatmul.bf16.gmra.mxu3 %v15596_v58  ;;  %6560 = vmatmul.bf16.gmra.mxu0 %v15364_v60  ;;  %v9726_v31 = vor.u32 %v10379_v42, %v9723_v15  ;;  %v10377_v60 = vld [vmem:[%s16133_s5 + $0x1d4] sm:$0xf]  ;;  %v9691_v42 = vld [vmem:[%s16133_s5 + $0x1a8] sm:$0xf0] }
 0x7da   :  { %v5692_v61 = vadd.f32 %v15509_v54, %v5618_v56  ;;  %v9718_v25 = vor.u32 %v10377_v60, %v9715_v37 }
 0x7db   :  { %v15611_v16 = vpop.f32.mrf.mxu2  ;;  %6665 = vmatpush.bf16.msrb.mxu3 %v9726_v31  ;;  %v9694_v31 = vor.u32 %v10371_v4, %v9691_v42 }
 0x7dc   :  { %v5820_v28 = vmul.f32 0.01, %v5692_v61  ;;  %vm5756_vm10 = vcmp.gt.f32.partialorder %v5692_v61, 0.0 }
 0x7dd   :  { %v15632_v39 = vpop.f32.mrf.mxu1 }
 0x7de   :  { %v15623_v5 = vpop.f32.mrf.mxu0  ;;  %v5884_v32 = vsel %vm5756_vm10, %v5692_v61, %v5820_v28 }
 0x7df   :  { %v5552_v34 = vpop.f32.mrf.mxu3  ;;  %6666 = vmatpush.bf16.msrb.mxu3 %v9718_v25 }
 0x7e0   :  { %v5622_v63 = vmul.f32 %v15502_v45, %v5552_v34  ;;  %v10369_v34 = vld [vmem:[%s16133_s5 + $0x194] sm:$0xf] }
 0x7e2   :  { %v5696_v29 = vadd.f32 %v15509_v54, %v5622_v63  ;;  %v9683_v63 = vld [vmem:[%s16133_s5 + $0x198] sm:$0xf0] }
 0x7e3   :  { %v15634_v14 = vpop.f32.mrf.mxu2  ;;  %6667 = vmatpush.bf16.msrb.mxu3 %v9710_v49 }
 0x7e4   :  { %v5824_v0 = vmul.f32 0.01, %v5696_v29  ;;  %vm5760_vm11 = vcmp.gt.f32.partialorder %v5696_v29, 0.0 }
 0x7e5   :  { %v6575_v17 = vpop.f32.mrf.mxu1 }
 0x7e6   :  { %v5888_v51 = vsel %vm5760_vm11, %v5696_v29, %v5824_v0  ;;  %v6526_v46 = vpop.f32.mrf.mxu0  ;;  %v9686_v29 = vor.u32 %v10369_v34, %v9683_v63  ;;  %v10367_v0 = vld [vmem:[%s16133_s5 + $0x184] sm:$0xf] }
 0x7e7   :  { %v5555_v38 = vpop.f32.mrf.mxu3  ;;  %v15642_v52 = vpack.c.bf16 %v5888_v51, %v5884_v32  ;;  %v6576_v61 = vadd.f32 %v6575_v17, %v6526_v46  ;;  %v9678_v46 = vor.u32 %v10367_v0, %v9675_v10 }
 0x7e8   :  { %6658 = vmatmul.bf16.gmra.mxu2 %v15457_v57  ;;  %v5626_v56 = vmul.f32 %v15502_v45, %v5555_v38  ;;  %v9702_v57 = vor.u32 %v10373_v59, %v9699_v35 }
 0x7e9   :  { %6501 = vmatmul.bf16.gmra.mxu3 %v15642_v52 }
 0x7ea   :  { %6668 = vmatpush.bf16.msrb.mxu3 %v9702_v57  ;;  %v5700_v60 = vadd.f32 %v15509_v54, %v5626_v56 }
 0x7eb   :  { %v15659_v15 = vpop.f32.mrf.mxu2 }
 0x7ec   :  { %v5828_v33 = vmul.f32 0.01, %v5700_v60  ;;  %vm5764_vm12 = vcmp.gt.f32.partialorder %v5700_v60, 0.0 }
 0x7ed   :  { %v15678_v51 = vpop.f32.mrf.mxu1 }
 0x7ee   :  { %6669 = vmatpush.bf16.msrb.mxu3 %v9694_v31  ;;  %v15669_v25 = vpop.f32.mrf.mxu0  ;;  %16679 = vst [vmem:[#allocation6_spill] sm:$0xff] %v15678_v51  ;;  %v5892_v59 = vsel %vm5764_vm12, %v5700_v60, %v5828_v33 }
 0x7ef   :  { %v5557_v37 = vpop.f32.mrf.mxu3  ;;  %16678 = vst [vmem:[#allocation52_spill] sm:$0xff] %v15669_v25 }
 0x7f0   :  { %v5630_v28 = vmul.f32 %v15502_v45, %v5557_v37 }
 0x7f2   :  { %v5704_v32 = vadd.f32 %v15509_v54, %v5630_v28  ;;  %6670 = vmatpush.bf16.msrb.mxu3 %v9686_v29 }
 0x7f3   :  { %v15680_v49 = vpop.f32.mrf.mxu2 }
 0x7f4   :  { %v5832_v38 = vmul.f32 0.01, %v5704_v32  ;;  %vm5768_vm13 = vcmp.gt.f32.partialorder %v5704_v32, 0.0 }
 0x7f5   :  { %v6580_v42 = vpop.f32.mrf.mxu1 }
 0x7f6   :  { %v5896_v35 = vsel %vm5768_vm13, %v5704_v32, %v5832_v38  ;;  %6671 = vmatpush.bf16.msrb.mxu3 %v9678_v46  ;;  %v6531_v17 = vpop.f32.mrf.mxu0 }
 0x7f7   :  { %v5560_v4 = vpop.f32.mrf.mxu3  ;;  %v15682_v56 = vpack.c.bf16 %v5896_v35, %v5892_v59  ;;  %v6581_v34 = vadd.f32 %v6580_v42, %v6531_v17 }
 0x7f8   :  { %v5634_v57 = vmul.f32 %v15502_v45, %v5560_v4 }
 0x7f9   :  { %6506 = vmatmul.bf16.gmra.mxu3 %v15682_v56 }
 0x7fa   :  { %v5708_v37 = vadd.f32 %v15509_v54, %v5634_v57 }
 0x7fb   :  { %v6624_v31 = vpop.f32.mrf.mxu2 }
 0x7fc   :  { %v15686_v63 = vadd.f32 %v6624_v31, %v6576_v61  ;;  %v5836_v0 = vmul.f32 0.01, %v5708_v37  ;;  %vm5772_vm14 = vcmp.gt.f32.partialorder %v5708_v37, 0.0 }
 0x7fd   :  { %v15693_v33 = vpop.f32.mrf.mxu1 }
 0x7fe   :  { %v15690_v29 = vpop.f32.mrf.mxu0  ;;  %v5900_v46 = vsel %vm5772_vm14, %v5708_v37, %v5836_v0 }
 0x7ff   :  { %v5562_v28 = vpop.f32.mrf.mxu3 }
 0x800   :  { %v5638_v60 = vmul.f32 %v15502_v45, %v5562_v28 }
 0x802   :  { %v5712_v10 = vadd.f32 %v15509_v54, %v5638_v60 }
 0x803   :  { %v15695_v32 = vpop.f32.mrf.mxu2 }
 0x804   :  { %16680 = vst [vmem:[#allocation66_spill] sm:$0xff] %v15695_v32  ;;  %v5840_v38 = vmul.f32 0.01, %v5712_v10  ;;  %vm5776_vm15 = vcmp.gt.f32.partialorder %v5712_v10, 0.0 }
 0x805   :  { %v6585_v4 = vpop.f32.mrf.mxu1 }
 0x806   :  { %v5904_v61 = vsel %vm5776_vm15, %v5712_v10, %v5840_v38  ;;  %v6536_v35 = vpop.f32.mrf.mxu0 }
 0x807   :  { %v5936_v59 = vpack.c.bf16 %v5904_v61, %v5900_v46  ;;  %v6586_v45 = vadd.f32 %v6585_v4, %v6536_v35 }
 0x809   :  { %6511 = vmatmul.bf16.gmra.mxu3 %v5936_v59 }
 0x80b   :  { %v6629_v17 = vpop.f32.mrf.mxu2 }
 0x80c   :  { %v15697_v57 = vadd.f32 %v6629_v17, %v6581_v34 }
 0x80d   :  { %v15701_v54 = vpop.f32.mrf.mxu1 }
 0x80e   :  { %v15699_v42 = vpop.f32.mrf.mxu0 }
 0x813   :  { %v15703_v31 = vpop.f32.mrf.mxu2 }
 0x814   :  { %16681 = vst [vmem:[#allocation8_spill] sm:$0xff] %v15703_v31 }
 0x815   :  { %v6590_v60 = vpop.f32.mrf.mxu1 }
 0x816   :  { %v6541_v28 = vpop.f32.mrf.mxu0 }
 0x817   :  { %v6591_v0 = vadd.f32 %v6590_v60, %v6541_v28 }
 0x819   :  { %6672 = vmatmul.bf16.vlgmr.msrb.gmra.mxu3 %v15520_v19 }
 0x81b   :  { %v6634_v37 = vpop.f32.mrf.mxu2 }
 0x81c   :  { %v6477_v10 = vpop.f32.mrf.mxu3  ;;  %v15706_v38 = vadd.f32 %v6634_v37, %v6586_v45 }
 0x81d   :  { %v15709_v46 = vadd.f32 %v6477_v10, %v15493_v27  ;;  %v15713_v61 = vpop.f32.mrf.mxu1 }
 0x81e   :  { %v15711_v34 = vpop.f32.mrf.mxu0 }
 0x823   :  { %v15715_v35 = vpop.f32.mrf.mxu2 }
 0x824   :  { %v6479_v4 = vpop.f32.mrf.mxu3 }
 0x825   :  { %v15718_v17 = vadd.f32 %v6479_v4, %v15497_v43  ;;  %v6595_v28 = vpop.f32.mrf.mxu1 }
 0x826   :  { %v6546_v45 = vpop.f32.mrf.mxu0 }
 0x827   :  { %v6596_v27 = vadd.f32 %v6595_v28, %v6546_v45 }
 0x829   :  { %6677 = vmatmul.bf16.gmra.mxu3 %v15534_v1 }
 0x82b   :  { %v6639_v60 = vpop.f32.mrf.mxu2 }
 0x82c   :  { %v6482_v37 = vpop.f32.mrf.mxu3  ;;  %v15723_v10 = vadd.f32 %v6639_v60, %v6591_v0 }
 0x82d   :  { %v15726_v32 = vadd.f32 %v6482_v37, %v15511_v8 }
 0x833   :  { %v15728_v31 = vpop.f32.mrf.mxu2 }
 0x834   :  { %v6484_v51 = vpop.f32.mrf.mxu3 }
 0x835   :  { %v15731_v43 = vadd.f32 %v6484_v51, %v15518_v2 }
 0x839   :  { %6682 = vmatmul.bf16.gmra.mxu3 %v15552_v22 }
 0x83b   :  { %v6644_v1 = vpop.f32.mrf.mxu2 }
 0x83c   :  { %v6487_v19 = vpop.f32.mrf.mxu3  ;;  %v15736_v45 = vadd.f32 %v6644_v1, %v6596_v27 }
 0x83d   :  { %v6488_v0 = vadd.f32 %v6487_v19, %v15525_v24 }
 0x844   :  { %v6489_v28 = vpop.f32.mrf.mxu3 }
 0x845   :  { %v6490_v8 = vadd.f32 %v6489_v28, %v15532_v13 }
 0x847   :  { %v6717_v60 = vpack.c.bf16 %v6490_v8, %v6488_v0 }
 0x849   :  { %6687 = vmatmul.bf16.gmra.mxu3 %v15574_v20 }
 0x84c   :  { %v6492_v37 = vpop.f32.mrf.mxu3 }
 0x84d   :  { %v6493_v2 = vadd.f32 %v6492_v37, %v15539_v23 }
 0x854   :  { %v6494_v51 = vpop.f32.mrf.mxu3 }
 0x855   :  { %v6495_v4 = vadd.f32 %v6494_v51, %v15550_v50  ;;  %v6415_v50 = vadd.f32 %v15609_v47, %v15600_v30  ;;  %v15787_v51 = vld [vmem:[%s16132_s1] sm:$0xff] }
 0x857   :  { %v6719_v25 = vpack.c.bf16 %v6495_v4, %v6493_v2  ;;  %v6464_v4 = vadd.f32 %v15659_v15, %v6415_v50  ;;  %v16683_v2 = vpack.c.bf16 %v15718_v17, %v15709_v46 }
 0x859   :  { %6692 = vmatmul.bf16.gmra.mxu3 %v15596_v58  ;;  %v6417_v58 = vadd.f32 %v15632_v39, %v15623_v5  ;;  %v6405_v5 = vadd.f32 %v15559_v11, %v15556_v40 }
 0x85c   :  { %v6497_v22 = vpop.f32.mrf.mxu3 }
 0x85d   :  { %v6498_v27 = vadd.f32 %v6497_v22, %v15561_v9  ;;  %v6412_v9 = vadd.f32 %v15592_v7, %v15589_v62  ;;  %v6597_v22 = vpop.f32.mrf.mxu1 }
 0x85f   :  { %v6461_v28 = vadd.f32 %v15634_v14, %v6412_v9 }
 0x864   :  { %v6499_v1 = vpop.f32.mrf.mxu3 }
 0x869   :  { %6697 = vmatmul.bf16.gmra.mxu3 %v15642_v52  ;;  %v6410_v52 = vadd.f32 %v15581_v53, %v15578_v48  ;;  %v6402_v48 = vadd.f32 %v15548_v41, %v15545_v21 }
 0x86b   :  { %v6459_v62 = vadd.f32 %v15611_v16, %v6410_v52  ;;  %v6451_v8 = vadd.f32 %v15572_v44, %v6402_v48  ;;  %v16682_v44 = vpack.c.bf16 %v15731_v43, %v15726_v32  ;;  %v15798_v32 = vld [vmem:[%s16132_s1 + $0x8] sm:$0xff]  ;;  %v6548_v43 = vpop.f32.mrf.mxu0  ;;  %v15818_v52 = vld [vmem:[%s16132_s1 + $0x18] sm:$0xff] }
 0x86c   :  { %v6502_v24 = vpop.f32.mrf.mxu3  ;;  %16684 = vst [vmem:[#allocation67_spill] sm:$0xff] %v15798_v32 }
 0x86d   :  { %v6500_v11 = vadd.f32 %v6499_v1, %v6451_v8  ;;  %16686 = vst [vmem:[#allocation2_spill] sm:$0xff] %v15818_v52 }
 0x86f   :  { %v6721_v21 = vpack.c.bf16 %v6500_v11, %v6498_v27  ;;  %v6646_v27 = vpop.f32.mrf.mxu2 }
 0x874   :  { %v6504_v13 = vpop.f32.mrf.mxu3 }
 0x879   :  { %6702 = vmatmul.bf16.gmra.mxu3 %v15682_v56  ;;  %v6466_v56 = vadd.f32 %v15680_v49, %v6417_v58 }
 0x87c   :  { %v6507_v20 = vpop.f32.mrf.mxu3 }
 0x87d   :  { %v6508_v15 = vadd.f32 %v6507_v20, %v6459_v62 }
 0x884   :  { %v6509_v19 = vpop.f32.mrf.mxu3 }
 0x885   :  { %v6510_v7 = vadd.f32 %v6509_v19, %v6461_v28 }
 0x887   :  { %v6725_v14 = vpack.c.bf16 %v6510_v7, %v6508_v15 }
 0x889   :  { %6707 = vmatmul.bf16.gmra.mxu3 %v5936_v59  ;;  %v6407_v59 = vadd.f32 %v15570_v6, %v15567_v18  ;;  %v6454_v18 = vadd.f32 %v15583_v26, %v6405_v5 }
 0x88b   :  { %v6456_v53 = vadd.f32 %v15594_v12, %v6407_v59  ;;  %v6503_v37 = vadd.f32 %v6502_v24, %v6454_v18  ;;  %v6551_v24 = vpop.f32.mrf.mxu0 }
 0x88c   :  { %v6512_v23 = vpop.f32.mrf.mxu3 }
 0x88d   :  { %v6513_v30 = vadd.f32 %v6512_v23, %v6464_v4  ;;  %v6505_v6 = vadd.f32 %v6504_v13, %v6456_v53  ;;  %v6600_v13 = vpop.f32.mrf.mxu1 }
 0x88f   :  { %v6723_v16 = vpack.c.bf16 %v6505_v6, %v6503_v37 }
 0x893   :  { %v6553_v23 = vpop.f32.mrf.mxu0 }
 0x894   :  { %v6514_v0 = vpop.f32.mrf.mxu3 }
 0x895   :  { %v6515_v47 = vadd.f32 %v6514_v0, %v6466_v56  ;;  %v6602_v50 = vpop.f32.mrf.mxu1 }
 0x897   :  { %v6727_v39 = vpack.c.bf16 %v6515_v47, %v6513_v30  ;;  %v15824_v47 = vld [vmem:[%s16132_s1 + $0x20] sm:$0xff] }
 0x898   :  { %16687 = vst [vmem:[#allocation3_spill] sm:$0xff] %v15824_v47 }
 0x899   :  { %6729 = vmatpush.bf16.msrb.mxu0 %v6727_v39 }
 0x89b   :  { %v6556_v56 = vpop.f32.mrf.mxu0 }
 0x89c   :  { %v6673_v49 = vpop.f32.mrf.mxu3 }
 0x89d   :  { %v15769_v40 = vadd.f32 %v6673_v49, %v15686_v63  ;;  %6730 = vmatpush.bf16.msrb.mxu0 %v6725_v14  ;;  %v6605_v0 = vpop.f32.mrf.mxu1 }
 0x89e   :  { %v6606_v11 = vadd.f32 %v6605_v0, %v6556_v56  ;;  %v6593_v0 = vadd.f32 %v15713_v61, %v15711_v34 }
 0x8a1   :  { %6731 = vmatpush.bf16.msrb.mxu0 %v6723_v16 }
 0x8a3   :  { %v6558_v30 = vpop.f32.mrf.mxu0 }
 0x8a4   :  { %v15771_v41 = vpop.f32.mrf.mxu3 }
 0x8a5   :  { %6732 = vmatpush.bf16.msrb.mxu0 %v6721_v21 }
 0x8a9   :  { %6733 = vmatpush.bf16.msrb.mxu0 %v6719_v25 }
 0x8ab   :  { %v6561_v7 = vpop.f32.mrf.mxu0 }
 0x8ac   :  { %v6678_v12 = vpop.f32.mrf.mxu3 }
 0x8ad   :  { %v15774_v26 = vadd.f32 %v6678_v12, %v15697_v57  ;;  %6734 = vmatpush.bf16.msrb.mxu0 %v6717_v60 }
 0x8b1   :  { %6735 = vmatpush.bf16.msrb.mxu0 %v16682_v44  ;;  %v6603_v44 = vadd.f32 %v6602_v50, %v6553_v23 }
 0x8b3   :  { %v6563_v15 = vpop.f32.mrf.mxu0 }
 0x8b4   :  { %v15779_v63 = vpop.f32.mrf.mxu3 }
 0x8b5   :  { %6736 = vmatpush.bf16.msrb.mxu0 %v16683_v2 }
 0x8b8   :  { %6737 = vmatmul.bf16.vlgmr.msrb.gmra.mxu0 %v15787_v51 }
 0x8bc   :  { %v6683_v25 = vpop.f32.mrf.mxu3 }
 0x8bd   :  { %v15791_v57 = vadd.f32 %v6683_v25, %v15706_v38  ;;  %v15809_v38 = vld [vmem:[%s16132_s1 + $0x10] sm:$0xff] }
 0x8be   :  { %16685 = vst [vmem:[#allocation68_spill] sm:$0xff] %v15809_v38 }
 0x8c4   :  { %v15793_v60 = vpop.f32.mrf.mxu3 }
 0x8c8   :  { %6742 = vmatmul.bf16.gmra.mxu0 %v15798_v32 }
 0x8cc   :  { %v6688_v46 = vpop.f32.mrf.mxu3 }
 0x8cd   :  { %v15802_v17 = vadd.f32 %v6688_v46, %v15723_v10  ;;  %v6649_v10 = vpop.f32.mrf.mxu2 }
 0x8d4   :  { %v15804_v1 = vpop.f32.mrf.mxu3 }
 0x8d5   :  { %v6651_v9 = vpop.f32.mrf.mxu2 }
 0x8d6   :  { %v6652_v32 = vadd.f32 %v6651_v9, %v6603_v44  ;;  %v15868_v9 = vld [vmem:[%s16137_s6] sm:$0x3] }
 0x8d7   :  { %v10383_v44 = vld [vmem:[%s16136_s8] sm:$0xff] }
 0x8d8   :  { %6747 = vmatmul.bf16.gmra.mxu0 %v15809_v38 }
 0x8dc   :  { %v6693_v20 = vpop.f32.mrf.mxu3 }
 0x8dd   :  { %v15813_v19 = vadd.f32 %v6693_v20, %v15736_v45  ;;  %v6654_v59 = vpop.f32.mrf.mxu2  ;;  %v6607_v45 = vpop.f32.mrf.mxu1  ;;  %v6601_v20 = vadd.f32 %v6600_v13, %v6551_v24  ;;  %v6588_v13 = vadd.f32 %v15701_v54, %v15699_v42  ;;  %v16688_v42 = vld [vmem:[#allocation52_spill] sm:$0xff]  ;;  %v16689_v54 = vld [vmem:[#allocation6_spill] sm:$0xff] }
 0x8de   :  { %v6608_v37 = vadd.f32 %v6607_v45, %v6558_v30 }
 0x8df   :  { %v6637_v34 = vadd.f32 %v15715_v35, %v6588_v13 }
 0x8e1   :  { %v6686_v61 = vadd.f32 %v15793_v60, %v6637_v34 }
 0x8e4   :  { %v6695_v58 = vpop.f32.mrf.mxu3 }
 0x8e5   :  { %v6656_v5 = vpop.f32.mrf.mxu2  ;;  %v6610_v39 = vpop.f32.mrf.mxu1 }
 0x8e6   :  { %v6611_v14 = vadd.f32 %v6610_v39, %v6561_v7  ;;  %v6657_v2 = vadd.f32 %v6656_v5, %v6608_v37  ;;  %v6650_v39 = vadd.f32 %v6649_v10, %v6601_v20  ;;  %v10384_v37 = vld [vmem:[%s16136_s8 + $0x8] sm:$0xff]  ;;  %v10395_v20 = vld [vmem:[%s16136_s8 + $0x60] sm:$0xff] }
 0x8e8   :  { %6752 = vmatmul.bf16.gmra.mxu0 %v15818_v52 }
 0x8ec   :  { %v6698_v4 = vpop.f32.mrf.mxu3 }
 0x8ed   :  { %v6659_v53 = vpop.f32.mrf.mxu2  ;;  %v6612_v18 = vpop.f32.mrf.mxu1  ;;  %v6699_v50 = vadd.f32 %v6698_v4, %v6650_v39  ;;  %v10394_v39 = vld [vmem:[%s16136_s8 + $0x58] sm:$0xff] }
 0x8ee   :  { %v6613_v49 = vadd.f32 %v6612_v18, %v6563_v15  ;;  %v6660_v16 = vadd.f32 %v6659_v53, %v6611_v14  ;;  %v15892_v53 = vld [vmem:[%s16132_s1 + $0x28] sm:$0xff]  ;;  %v10398_v15 = vld [vmem:[%s16136_s8 + $0x78] sm:$0xff]  ;;  %v10385_v18 = vld [vmem:[%s16136_s8 + $0x10] sm:$0xff] }
 0x8ef   :  { %7192 = vmatpush.bf16.msra.mxu3 %v10398_v15 }
 0x8f4   :  { %v6700_v28 = vpop.f32.mrf.mxu3 }
 0x8f5   :  { %v6661_v8 = vpop.f32.mrf.mxu2  ;;  %v6701_v30 = vadd.f32 %v6700_v28, %v6652_v32  ;;  %v6583_v32 = vadd.f32 %v15693_v33, %v15690_v29  ;;  %v16691_v29 = vld [vmem:[#allocation66_spill] sm:$0xff] }
 0x8f6   :  { %v6662_v21 = vadd.f32 %v6661_v8, %v6613_v49  ;;  %v15879_v28 = vld [vmem:[%s16138_s7] sm:$0x3]  ;;  %v10397_v8 = vld [vmem:[%s16136_s8 + $0x70] sm:$0xff] }
 0x8f7   :  { %v6724_v24 = vpack.c.bf16 %v6701_v30, %v6699_v50  ;;  %v15883_v5 = vperm.slane %v15879_v28, 0  ;;  %7193 = vmatpush.bf16.msra.mxu3 %v10397_v8 }
 0x8f8   :  { %6757 = vmatmul.bf16.gmra.mxu0 %v15824_v47  ;;  %v6655_v47 = vadd.f32 %v6654_v59, %v6606_v11  ;;  %v15874_v59 = vperm.slane %v15868_v9, 0 }
 0x8fc   :  { %v6703_v62 = vpop.f32.mrf.mxu3 }
 0x8fd   :  { %v6704_v7 = vadd.f32 %v6703_v62, %v6655_v47  ;;  %v10386_v62 = vld [vmem:[%s16136_s8 + $0x18] sm:$0xff] }
 0x904   :  { %v6705_v48 = vpop.f32.mrf.mxu3 }
 0x905   :  { %v6706_v52 = vadd.f32 %v6705_v48, %v6657_v2 }
 0x907   :  { %v6726_v56 = vpack.c.bf16 %v6706_v52, %v6704_v7  ;;  %v10387_v52 = vld [vmem:[%s16136_s8 + $0x20] sm:$0xff] }
 0x908   :  { %6762 = vmatmul.bf16.gmra.mxu0 %v15325_v55  ;;  %v6598_v55 = vadd.f32 %v6597_v22, %v6548_v43 }
 0x90a   :  { %v6647_v23 = vadd.f32 %v6646_v27, %v6598_v55  ;;  %v15921_v55 = vld [vmem:[%s16132_s1 + $0x30] sm:$0xff] }
 0x90c   :  { %v6708_v6 = vpop.f32.mrf.mxu3  ;;  %v6696_v45 = vadd.f32 %v6695_v58, %v6647_v23  ;;  %v16693_v58 = vld [vmem:[#allocation68_spill] sm:$0xff] }
 0x90d   :  { %v6709_v25 = vadd.f32 %v6708_v6, %v6660_v16 }
 0x90e   :  { %v6722_v22 = vpack.c.bf16 %v6696_v45, %v15813_v19  ;;  %v6718_v19 = vpack.c.bf16 %v6686_v61, %v15791_v57  ;;  %v10390_v57 = vld [vmem:[%s16136_s8 + $0x38] sm:$0xff] }
 0x90f   :  { %7143 = vmatpush.bf16.msra.mxu2 %v10390_v57  ;;  %v15943_v61 = vld [vmem:[%s16132_s1 + $0x38] sm:$0xff] }
 0x914   :  { %v6710_v12 = vpop.f32.mrf.mxu3 }
 0x915   :  { %v6711_v46 = vadd.f32 %v6710_v12, %v6662_v21  ;;  %v10396_v12 = vld [vmem:[%s16136_s8 + $0x68] sm:$0xff] }
 0x916   :  { %7194 = vmatpush.bf16.msra.mxu3 %v10396_v12 }
 0x917   :  { %v6728_v38 = vpack.c.bf16 %v6711_v46, %v6709_v25 }
 0x918   :  { %6767 = vmatmul.bf16.gmra.mxu0 %v15454_v36  ;;  %v6642_v36 = vadd.f32 %v15728_v31, %v6593_v0  ;;  %v6578_v31 = vadd.f32 %v16689_v54, %v16688_v42  ;;  %v10393_v0 = vld [vmem:[%s16136_s8 + $0x50] sm:$0xff] }
 0x919   :  { %6778 = vmatpush.bf16.msrb.mxu1 %v6728_v38  ;;  %v16690_v38 = vld [vmem:[#allocation8_spill] sm:$0xff] }
 0x91a   :  { %v6691_v43 = vadd.f32 %v15804_v1, %v6642_v36  ;;  %v6632_v10 = vadd.f32 %v16690_v38, %v6583_v32  ;;  %v6627_v33 = vadd.f32 %v16691_v29, %v6578_v31  ;;  %7195 = vmatpush.bf16.msra.mxu3 %v10395_v20  ;;  %v10391_v36 = vld [vmem:[%s16136_s8 + $0x40] sm:$0xff] }
 0x91c   :  { %v6720_v27 = vpack.c.bf16 %v6691_v43, %v15802_v17  ;;  %v6681_v1 = vadd.f32 %v15779_v63, %v6632_v10  ;;  %v6676_v35 = vadd.f32 %v15771_v41, %v6627_v33  ;;  %v16692_v17 = vld [vmem:[#allocation67_spill] sm:$0xff]  ;;  %v16694_v63 = vld [vmem:[#allocation2_spill] sm:$0xff] }
 0x91d   :  { %6779 = vmatpush.bf16.msrb.mxu1 %v6726_v56  ;;  %v16695_v41 = vld [vmem:[#allocation3_spill] sm:$0xff] }
 0x91e   :  { %v6716_v60 = vpack.c.bf16 %v6681_v1, %v15774_v26  ;;  %v10388_v26 = vld [vmem:[%s16136_s8 + $0x28] sm:$0xff]  ;;  %7196 = vmatpush.bf16.msra.mxu3 %v10394_v39 }
 0x921   :  { %6780 = vmatpush.bf16.msrb.mxu1 %v6724_v24  ;;  %v10392_v24 = vld [vmem:[%s16136_s8 + $0x48] sm:$0xff] }
 0x922   :  { %7197 = vmatpush.bf16.msra.mxu3 %v10393_v0 }
 0x925   :  { %6781 = vmatpush.bf16.msrb.mxu1 %v6722_v22 }
 0x926   :  { %7198 = vmatpush.bf16.msra.mxu3 %v10392_v24 }
 0x928   :  { %6772 = vmatmul.bf16.gmra.mxu0 %v15483_v3  ;;  %v6714_v3 = vpack.c.bf16 %v6676_v35, %v15769_v40  ;;  %v10389_v40 = vld [vmem:[%s16136_s8 + $0x30] sm:$0xff] }
 0x929   :  { %6782 = vmatpush.bf16.msrb.mxu1 %v6720_v27  ;;  %7144 = vmatpush.bf16.msra.mxu2 %v10389_v40  ;;  %v15955_v40 = vperm.slane %v15879_v28, 1 }
 0x92a   :  { %7199 = vmatpush.bf16.msra.mxu3 %v10391_v36 }
 0x92d   :  { %6783 = vmatpush.bf16.msrb.mxu1 %v6718_v19  ;;  %7145 = vmatpush.bf16.msra.mxu2 %v10388_v26  ;;  %v15951_v19 = vperm.slane %v15868_v9, 1 }
 0x931   :  { %6784 = vmatpush.bf16.msrb.mxu1 %v6716_v60  ;;  %7146 = vmatpush.bf16.msra.mxu2 %v10387_v52 }
 0x935   :  { %6785 = vmatpush.bf16.msrb.mxu1 %v6714_v3  ;;  %v6738_v4 = vpop.f32.mrf.mxu0  ;;  %7147 = vmatpush.bf16.msra.mxu2 %v10386_v62 }
 0x936   :  { %v6833_v47 = vmul.f32 %v15874_v59, %v6738_v4 }
 0x938   :  { %6786 = vmatmul.bf16.vlgmr.msrb.gmra.mxu1 %v15787_v51  ;;  %v6871_v48 = vadd.f32 %v15883_v5, %v6833_v47 }
 0x939   :  { %7148 = vmatpush.bf16.msra.mxu2 %v10385_v18 }
 0x93a   :  { %v6935_v49 = vmul.f32 0.01, %v6871_v48  ;;  %vm6903_vm0 = vcmp.gt.f32.partialorder %v6871_v48, 0.0 }
 0x93c   :  { %v6967_v21 = vsel %vm6903_vm0, %v6871_v48, %v6935_v49 }
 0x93d   :  { %v6740_v6 = vpop.f32.mrf.mxu0  ;;  %7149 = vmatpush.bf16.msra.mxu2 %v10384_v37 }
 0x93e   :  { %v6835_v14 = vmul.f32 %v15874_v59, %v6740_v6 }
 0x940   :  { %v6873_v11 = vadd.f32 %v15883_v5, %v6835_v14 }
 0x941   :  { %7150 = vmatpush.bf16.msra.mxu2 %v10383_v44 }
 0x942   :  { %vm6905_vm1 = vcmp.gt.f32.partialorder %v6873_v11, 0.0  ;;  %v6937_v16 = vmul.f32 0.01, %v6873_v11 }
 0x944   :  { %v6969_v2 = vsel %vm6905_vm1, %v6873_v11, %v6937_v16 }
 0x945   :  { %v6999_v25 = vpack.c.bf16 %v6969_v2, %v6967_v21  ;;  %v6743_v46 = vpop.f32.mrf.mxu0 }
 0x946   :  { %v6837_v7 = vmul.f32 %v15874_v59, %v6743_v46 }
 0x947   :  { %7151 = vmatmul.bf16.vlgmr.msra.gmra.mxu2 %v6999_v25 }
 0x948   :  { %6791 = vmatmul.bf16.gmra.mxu1 %v16692_v17  ;;  %v6875_v30 = vadd.f32 %v15883_v5, %v6837_v7 }
 0x94a   :  { %v6939_v45 = vmul.f32 0.01, %v6875_v30  ;;  %vm6907_vm2 = vcmp.gt.f32.partialorder %v6875_v30, 0.0 }
 0x94c   :  { %v6971_v43 = vsel %vm6907_vm2, %v6875_v30, %v6939_v45 }
 0x94d   :  { %v6745_v56 = vpop.f32.mrf.mxu0 }
 0x94e   :  { %v6839_v23 = vmul.f32 %v15874_v59, %v6745_v56 }
 0x950   :  { %v6877_v50 = vadd.f32 %v15883_v5, %v6839_v23 }
 0x952   :  { %v6941_v13 = vmul.f32 0.01, %v6877_v50  ;;  %vm6909_vm3 = vcmp.gt.f32.partialorder %v6877_v50, 0.0 }
 0x954   :  { %v6973_v22 = vsel %vm6909_vm3, %v6877_v50, %v6941_v13 }
 0x955   :  { %v6748_v32 = vpop.f32.mrf.mxu0  ;;  %v7001_v34 = vpack.c.bf16 %v6973_v22, %v6971_v43 }
 0x956   :  { %v6841_v27 = vmul.f32 %v15874_v59, %v6748_v32 }
 0x957   :  { %7156 = vmatmul.bf16.gmra.mxu2 %v7001_v34 }
 0x958   :  { %6796 = vmatmul.bf16.gmra.mxu1 %v16693_v58  ;;  %v6879_v42 = vadd.f32 %v15883_v5, %v6841_v27 }
 0x95a   :  { %v6943_v38 = vmul.f32 0.01, %v6879_v42  ;;  %vm6911_vm4 = vcmp.gt.f32.partialorder %v6879_v42, 0.0 }
 0x95c   :  { %v6975_v29 = vsel %vm6911_vm4, %v6879_v42, %v6943_v38 }
 0x95d   :  { %v6750_v54 = vpop.f32.mrf.mxu0 }
 0x95e   :  { %v6843_v31 = vmul.f32 %v15874_v59, %v6750_v54 }
 0x960   :  { %v6881_v10 = vadd.f32 %v15883_v5, %v6843_v31 }
 0x962   :  { %v6945_v1 = vmul.f32 0.01, %v6881_v10  ;;  %vm6913_vm5 = vcmp.gt.f32.partialorder %v6881_v10, 0.0 }
 0x964   :  { %v6977_v33 = vsel %vm6913_vm5, %v6881_v10, %v6945_v1 }
 0x965   :  { %v6753_v60 = vpop.f32.mrf.mxu0  ;;  %v7003_v3 = vpack.c.bf16 %v6977_v33, %v6975_v29 }
 0x966   :  { %v6845_v26 = vmul.f32 %v15874_v59, %v6753_v60 }
 0x967   :  { %7161 = vmatmul.bf16.gmra.mxu2 %v7003_v3 }
 0x968   :  { %6801 = vmatmul.bf16.gmra.mxu1 %v16694_v63  ;;  %v6883_v4 = vadd.f32 %v15883_v5, %v6845_v26 }
 0x96a   :  { %v6947_v6 = vmul.f32 0.01, %v6883_v4  ;;  %vm6915_vm7 = vcmp.gt.f32.partialorder %v6883_v4, 0.0 }
 0x96c   :  { %v6979_v11 = vsel %vm6915_vm7, %v6883_v4, %v6947_v6 }
 0x96d   :  { %v6755_v9 = vpop.f32.mrf.mxu0 }
 0x96e   :  { %v6847_v48 = vmul.f32 %v15874_v59, %v6755_v9 }
 0x970   :  { %v6885_v14 = vadd.f32 %v15883_v5, %v6847_v48 }
 0x972   :  { %v6949_v49 = vmul.f32 0.01, %v6885_v14  ;;  %vm6917_vm9 = vcmp.gt.f32.partialorder %v6885_v14, 0.0 }
 0x974   :  { %v6981_v16 = vsel %vm6917_vm9, %v6885_v14, %v6949_v49 }
 0x975   :  { %v6758_v44 = vpop.f32.mrf.mxu0  ;;  %v7005_v2 = vpack.c.bf16 %v6981_v16, %v6979_v11 }
 0x976   :  { %v6849_v46 = vmul.f32 %v15874_v59, %v6758_v44 }
 0x977   :  { %7166 = vmatmul.bf16.gmra.mxu2 %v7005_v2 }
 0x978   :  { %6806 = vmatmul.bf16.gmra.mxu1 %v16695_v41  ;;  %v6887_v7 = vadd.f32 %v15883_v5, %v6849_v46 }
 0x97a   :  { %v6951_v45 = vmul.f32 0.01, %v6887_v7  ;;  %vm6919_vm11 = vcmp.gt.f32.partialorder %v6887_v7, 0.0 }
 0x97c   :  { %v6983_v32 = vsel %vm6919_vm11, %v6887_v7, %v6951_v45 }
 0x97d   :  { %v6760_v30 = vpop.f32.mrf.mxu0 }
 0x97e   :  { %v6851_v0 = vmul.f32 %v15874_v59, %v6760_v30 }
 0x980   :  { %v6889_v24 = vadd.f32 %v15883_v5, %v6851_v0 }
 0x982   :  { %vm6921_vm13 = vcmp.gt.f32.partialorder %v6889_v24, 0.0  ;;  %v6953_v36 = vmul.f32 0.01, %v6889_v24 }
 0x984   :  { %v6985_v34 = vsel %vm6921_vm13, %v6889_v24, %v6953_v36 }
 0x985   :  { %v6763_v54 = vpop.f32.mrf.mxu0  ;;  %v7007_v31 = vpack.c.bf16 %v6985_v34, %v6983_v32 }
 0x986   :  { %v6853_v10 = vmul.f32 %v15874_v59, %v6763_v54 }
 0x987   :  { %7171 = vmatmul.bf16.gmra.mxu2 %v7007_v31 }
 0x988   :  { %6811 = vmatmul.bf16.gmra.mxu1 %v15892_v53  ;;  %v6891_v29 = vadd.f32 %v15883_v5, %v6853_v10 }
 0x98a   :  { %vm6923_vm15 = vcmp.gt.f32.partialorder %v6891_v29, 0.0 }
 0x998   :  { %6816 = vmatmul.bf16.gmra.mxu1 %v15921_v55 }
 0x9a8   :  { %6821 = vmatmul.bf16.gmra.mxu1 %v15943_v61 }
 0x9b5   :  { %v6787_v35 = vpop.f32.mrf.mxu1 }
 0x9b6   :  { %v6834_v57 = vmul.f32 %v15951_v19, %v6787_v35  ;;  %v6765_v35 = vpop.f32.mrf.mxu0 }
 0x9b7   :  { %v6855_v3 = vmul.f32 %v15874_v59, %v6765_v35 }
 0x9b8   :  { %v6872_v52 = vadd.f32 %v15955_v40, %v6834_v57 }
 0x9b9   :  { %v6893_v4 = vadd.f32 %v15883_v5, %v6855_v3 }
 0x9ba   :  { %v6936_v15 = vmul.f32 0.01, %v6872_v52  ;;  %vm6904_vm6 = vcmp.gt.f32.partialorder %v6872_v52, 0.0 }
 0x9bb   :  { %vm6925_vm1 = vcmp.gt.f32.partialorder %v6893_v4, 0.0  ;;  %v6957_v9 = vmul.f32 0.01, %v6893_v4 }
 0x9bc   :  { %v6968_v8 = vsel %vm6904_vm6, %v6872_v52, %v6936_v15  ;;  %v6955_v52 = vmul.f32 0.01, %v6891_v29 }
 0x9bd   :  { %v6789_v47 = vpop.f32.mrf.mxu1 }
 0x9be   :  { %v6836_v62 = vmul.f32 %v15951_v19, %v6789_v47  ;;  %v6987_v15 = vsel %vm6923_vm15, %v6891_v29, %v6955_v52 }
 0x9c0   :  { %v6874_v18 = vadd.f32 %v15955_v40, %v6836_v62 }
 0x9c2   :  { %vm6906_vm8 = vcmp.gt.f32.partialorder %v6874_v18, 0.0  ;;  %v6938_v28 = vmul.f32 0.01, %v6874_v18 }
 0x9c4   :  { %v6970_v37 = vsel %vm6906_vm8, %v6874_v18, %v6938_v28  ;;  %v6989_v18 = vsel %vm6925_vm1, %v6893_v4, %v6957_v9  ;;  %v6768_v28 = vpop.f32.mrf.mxu0 }
 0x9c5   :  { %v7000_v21 = vpack.c.bf16 %v6970_v37, %v6968_v8  ;;  %v6792_v12 = vpop.f32.mrf.mxu1  ;;  %v7009_v49 = vpack.c.bf16 %v6989_v18, %v6987_v15  ;;  %v6857_v37 = vmul.f32 %v15874_v59, %v6768_v28 }
 0x9c6   :  { %v6838_v25 = vmul.f32 %v15951_v19, %v6792_v12 }
 0x9c7   :  { %7200 = vmatmul.bf16.vlgmr.msra.gmra.mxu3 %v7000_v21  ;;  %7176 = vmatmul.bf16.gmra.mxu2 %v7009_v49  ;;  %v6895_v16 = vadd.f32 %v15883_v5, %v6857_v37 }
 0x9c8   :  { %v6876_v20 = vadd.f32 %v15955_v40, %v6838_v25 }
 0x9c9   :  { %vm6927_vm3 = vcmp.gt.f32.partialorder %v6895_v16, 0.0 }
 0x9ca   :  { %v6940_v23 = vmul.f32 0.01, %v6876_v20  ;;  %vm6908_vm10 = vcmp.gt.f32.partialorder %v6876_v20, 0.0 }
 0x9cc   :  { %v6972_v43 = vsel %vm6908_vm10, %v6876_v20, %v6940_v23  ;;  %v6770_v12 = vpop.f32.mrf.mxu0  ;;  %v6959_v20 = vmul.f32 0.01, %v6895_v16 }
 0x9cd   :  { %v6794_v39 = vpop.f32.mrf.mxu1  ;;  %v6859_v2 = vmul.f32 %v15874_v59, %v6770_v12 }
 0x9ce   :  { %v6840_v56 = vmul.f32 %v15951_v19, %v6794_v39  ;;  %v6991_v23 = vsel %vm6927_vm3, %v6895_v16, %v6959_v20 }
 0x9cf   :  { %v6897_v7 = vadd.f32 %v15883_v5, %v6859_v2 }
 0x9d0   :  { %v6878_v50 = vadd.f32 %v15955_v40, %v6840_v56 }
 0x9d1   :  { %vm6929_vm5 = vcmp.gt.f32.partialorder %v6897_v7, 0.0  ;;  %v6961_v30 = vmul.f32 0.01, %v6897_v7 }
 0x9d2   :  { %v6942_v13 = vmul.f32 0.01, %v6878_v50  ;;  %vm6910_vm12 = vcmp.gt.f32.partialorder %v6878_v50, 0.0 }
 0x9d4   :  { %v6974_v22 = vsel %vm6910_vm12, %v6878_v50, %v6942_v13  ;;  %v6993_v50 = vsel %vm6929_vm5, %v6897_v7, %v6961_v30  ;;  %v6773_v13 = vpop.f32.mrf.mxu0  ;;  %v7152_v30 = vpop.f32.mrf.mxu2 }
 0x9d5   :  { %v6797_v27 = vpop.f32.mrf.mxu1  ;;  %v7002_v42 = vpack.c.bf16 %v6974_v22, %v6972_v43  ;;  %v7011_v36 = vpack.c.bf16 %v6993_v50, %v6991_v23  ;;  %v6861_v22 = vmul.f32 %v15874_v59, %v6773_v13 }
 0x9d6   :  { %v6842_v38 = vmul.f32 %v15951_v19, %v6797_v27 }
 0x9d7   :  { %7205 = vmatmul.bf16.gmra.mxu3 %v7002_v42  ;;  %7181 = vmatmul.bf16.gmra.mxu2 %v7011_v36  ;;  %v6899_v34 = vadd.f32 %v15883_v5, %v6861_v22 }
 0x9d8   :  { %v6880_v1 = vadd.f32 %v15955_v40, %v6842_v38 }
 0x9d9   :  { %vm6931_vm7 = vcmp.gt.f32.partialorder %v6899_v34, 0.0 }
 0x9da   :  { %v6944_v57 = vmul.f32 0.01, %v6880_v1  ;;  %vm6912_vm14 = vcmp.gt.f32.partialorder %v6880_v1, 0.0 }
 0x9dc   :  { %v6976_v62 = vsel %vm6912_vm14, %v6880_v1, %v6944_v57  ;;  %v6775_v42 = vpop.f32.mrf.mxu0  ;;  %v6963_v1 = vmul.f32 0.01, %v6899_v34 }
 0x9dd   :  { %v6799_v33 = vpop.f32.mrf.mxu1  ;;  %v6863_v31 = vmul.f32 %v15874_v59, %v6775_v42 }
 0x9de   :  { %v6844_v60 = vmul.f32 %v15951_v19, %v6799_v33  ;;  %v6995_v57 = vsel %vm6931_vm7, %v6899_v34, %v6963_v1 }
 0x9df   :  { %v6901_v29 = vadd.f32 %v15883_v5, %v6863_v31 }
 0x9e0   :  { %v6882_v26 = vadd.f32 %v15955_v40, %v6844_v60 }
 0x9e1   :  { %vm6933_vm9 = vcmp.gt.f32.partialorder %v6901_v29, 0.0  ;;  %v6965_v35 = vmul.f32 0.01, %v6901_v29 }
 0x9e2   :  { %v6946_v47 = vmul.f32 0.01, %v6882_v26  ;;  %vm6914_vm0 = vcmp.gt.f32.partialorder %v6882_v26, 0.0 }
 0x9e4   :  { %v6978_v48 = vsel %vm6914_vm0, %v6882_v26, %v6946_v47  ;;  %v6997_v26 = vsel %vm6933_vm9, %v6901_v29, %v6965_v35 }
 0x9e5   :  { %v6802_v6 = vpop.f32.mrf.mxu1  ;;  %v7004_v14 = vpack.c.bf16 %v6978_v48, %v6976_v62  ;;  %v7013_v47 = vpack.c.bf16 %v6997_v26, %v6995_v57 }
 0x9e6   :  { %v6846_v8 = vmul.f32 %v15951_v19, %v6802_v6 }
 0x9e7   :  { %7210 = vmatmul.bf16.gmra.mxu3 %v7004_v14  ;;  %7186 = vmatmul.bf16.gmra.mxu2 %v7013_v47 }
 0x9e8   :  { %v6884_v11 = vadd.f32 %v15955_v40, %v6846_v8 }
 0x9ea   :  { %v6948_v25 = vmul.f32 0.01, %v6884_v11  ;;  %vm6916_vm2 = vcmp.gt.f32.partialorder %v6884_v11, 0.0 }
 0x9ec   :  { %v6980_v56 = vsel %vm6916_vm2, %v6884_v11, %v6948_v25 }
 0x9ed   :  { %v6804_v21 = vpop.f32.mrf.mxu1 }
 0x9ee   :  { %v6848_v44 = vmul.f32 %v15951_v19, %v6804_v21 }
 0x9f0   :  { %v6886_v46 = vadd.f32 %v15955_v40, %v6848_v44 }
 0x9f2   :  { %v6950_v39 = vmul.f32 0.01, %v6886_v46  ;;  %vm6918_vm4 = vcmp.gt.f32.partialorder %v6886_v46, 0.0 }
 0x9f4   :  { %v6982_v0 = vsel %vm6918_vm4, %v6886_v46, %v6950_v39 }
 0x9f5   :  { %v6807_v45 = vpop.f32.mrf.mxu1  ;;  %v7006_v24 = vpack.c.bf16 %v6982_v0, %v6980_v56 }
 0x9f6   :  { %v6850_v43 = vmul.f32 %v15951_v19, %v6807_v45 }
 0x9f7   :  { %7215 = vmatmul.bf16.gmra.mxu3 %v7006_v24 }
 0x9f8   :  { %v6888_v32 = vadd.f32 %v15955_v40, %v6850_v43  ;;  %v7154_v43 = vpop.f32.mrf.mxu2 }
 0x9fa   :  { %v6952_v38 = vmul.f32 0.01, %v6888_v32  ;;  %vm6920_vm6 = vcmp.gt.f32.partialorder %v6888_v32, 0.0 }
 0x9fc   :  { %v6984_v60 = vsel %vm6920_vm6, %v6888_v32, %v6952_v38 }
 0x9fd   :  { %v6809_v27 = vpop.f32.mrf.mxu1 }
 0x9fe   :  { %v6852_v54 = vmul.f32 %v15951_v19, %v6809_v27 }
 0xa00   :  { %v6890_v10 = vadd.f32 %v15955_v40, %v6852_v54  ;;  %v7157_v22 = vpop.f32.mrf.mxu2 }
 0xa02   :  { %vm6922_vm8 = vcmp.gt.f32.partialorder %v6890_v10, 0.0  ;;  %v6954_v33 = vmul.f32 0.01, %v6890_v10 }
 0xa04   :  { %v6986_v3 = vsel %vm6922_vm8, %v6890_v10, %v6954_v33 }
 0xa05   :  { %v6812_v52 = vpop.f32.mrf.mxu1  ;;  %v7008_v4 = vpack.c.bf16 %v6986_v3, %v6984_v60 }
 0xa06   :  { %v6854_v59 = vmul.f32 %v15951_v19, %v6812_v52 }
 0xa07   :  { %7220 = vmatmul.bf16.gmra.mxu3 %v7008_v4 }
 0xa08   :  { %v6892_v9 = vadd.f32 %v15955_v40, %v6854_v59  ;;  %v7159_v34 = vpop.f32.mrf.mxu2 }
 0xa0a   :  { %v6956_v48 = vmul.f32 0.01, %v6892_v9  ;;  %vm6924_vm10 = vcmp.gt.f32.partialorder %v6892_v9, 0.0 }
 0xa0c   :  { %v6988_v6 = vsel %vm6924_vm10, %v6892_v9, %v6956_v48 }
 0xa0d   :  { %v6814_v5 = vpop.f32.mrf.mxu1 }
 0xa0e   :  { %v6856_v62 = vmul.f32 %v15951_v19, %v6814_v5 }
 0xa10   :  { %v6894_v15 = vadd.f32 %v15955_v40, %v6856_v62  ;;  %v7162_v31 = vpop.f32.mrf.mxu2 }
 0xa12   :  { %vm6926_vm11 = vcmp.gt.f32.partialorder %v6894_v15, 0.0  ;;  %v6958_v18 = vmul.f32 0.01, %v6894_v15 }
 0xa14   :  { %v6990_v14 = vsel %vm6926_vm11, %v6894_v15, %v6958_v18 }
 0xa15   :  { %v6817_v28 = vpop.f32.mrf.mxu1  ;;  %v7010_v49 = vpack.c.bf16 %v6990_v14, %v6988_v6 }
 0xa16   :  { %v6858_v8 = vmul.f32 %v15951_v19, %v6817_v28 }
 0xa17   :  { %7225 = vmatmul.bf16.gmra.mxu3 %v7010_v49 }
 0xa18   :  { %v6896_v37 = vadd.f32 %v15955_v40, %v6858_v8  ;;  %v7164_v1 = vpop.f32.mrf.mxu2 }
 0xa1a   :  { %v6960_v21 = vmul.f32 0.01, %v6896_v37  ;;  %vm6928_vm12 = vcmp.gt.f32.partialorder %v6896_v37, 0.0 }
 0xa1c   :  { %v6992_v2 = vsel %vm6928_vm12, %v6896_v37, %v6960_v21 }
 0xa1d   :  { %v6819_v11 = vpop.f32.mrf.mxu1 }
 0xa1e   :  { %v6860_v16 = vmul.f32 %v15951_v19, %v6819_v11 }
 0xa20   :  { %v6898_v12 = vadd.f32 %v15955_v40, %v6860_v16  ;;  %v7167_v35 = vpop.f32.mrf.mxu2 }
 0xa22   :  { %vm6930_vm13 = vcmp.gt.f32.partialorder %v6898_v12, 0.0  ;;  %v6962_v44 = vmul.f32 0.01, %v6898_v12 }
 0xa24   :  { %v6994_v25 = vsel %vm6930_vm13, %v6898_v12, %v6962_v44 }
 0xa25   :  { %v6822_v46 = vpop.f32.mrf.mxu1  ;;  %v7012_v20 = vpack.c.bf16 %v6994_v25, %v6992_v2 }
 0xa26   :  { %v6862_v7 = vmul.f32 %v15951_v19, %v6822_v46 }
 0xa27   :  { %7230 = vmatmul.bf16.gmra.mxu3 %v7012_v20 }
 0xa28   :  { %v6900_v39 = vadd.f32 %v15955_v40, %v6862_v7  ;;  %v7169_v57 = vpop.f32.mrf.mxu2 }
 0xa2a   :  { %v6964_v23 = vmul.f32 0.01, %v6900_v39  ;;  %vm6932_vm14 = vcmp.gt.f32.partialorder %v6900_v39, 0.0 }
 0xa2c   :  { %v6996_v24 = vsel %vm6932_vm14, %v6900_v39, %v6964_v23 }
 0xa2d   :  { %v6824_v56 = vpop.f32.mrf.mxu1 }
 0xa2e   :  { %v6864_v0 = vmul.f32 %v15951_v19, %v6824_v56 }
 0xa30   :  { %v6902_v50 = vadd.f32 %v15955_v40, %v6864_v0  ;;  %v7172_v9 = vpop.f32.mrf.mxu2 }
 0xa32   :  { %vm6934_vm15 = vcmp.gt.f32.partialorder %v6902_v50, 0.0  ;;  %v6966_v45 = vmul.f32 0.01, %v6902_v50 }
 0xa34   :  { %v6998_v13 = vsel %vm6934_vm15, %v6902_v50, %v6966_v45 }
 0xa35   :  { %v7014_v36 = vpack.c.bf16 %v6998_v13, %v6996_v24 }
 0xa37   :  { %7235 = vmatmul.bf16.gmra.mxu3 %v7014_v36  ;;  %v10406_v36 = vld [vmem:[%s16141_s11 + $0x38] sm:$0xff] }
 0xa38   :  { %v7174_v15 = vpop.f32.mrf.mxu2  ;;  %7458 = vmatpush.bf16.msra.mxu1 %v10406_v36 }
 0xa4a   :  { %v7201_v32 = vpop.f32.mrf.mxu3  ;;  %v7177_v14 = vpop.f32.mrf.mxu2 }
 0xa4b   :  { %v7202_v27 = vadd.f32 %v7201_v32, %v7152_v30 }
 0xa52   :  { %v7203_v42 = vpop.f32.mrf.mxu3  ;;  %v7179_v49 = vpop.f32.mrf.mxu2 }
 0xa53   :  { %v7204_v54 = vadd.f32 %v7203_v42, %v7154_v43  ;;  %v10405_v43 = vld [vmem:[%s16141_s11 + $0x30] sm:$0xff] }
 0xa54   :  { %7459 = vmatpush.bf16.msra.mxu1 %v10405_v43 }
 0xa55   :  { %v7241_v38 = vpack.c.bf16 %v7204_v54, %v7202_v27 }
 0xa5a   :  { %v7206_v19 = vpop.f32.mrf.mxu3  ;;  %v7182_v11 = vpop.f32.mrf.mxu2 }
 0xa5b   :  { %v7207_v10 = vadd.f32 %v7206_v19, %v7157_v22  ;;  %v10404_v22 = vld [vmem:[%s16141_s11 + $0x28] sm:$0xff] }
 0xa5c   :  { %7460 = vmatpush.bf16.msra.mxu1 %v10404_v22 }
 0xa62   :  { %v7208_v40 = vpop.f32.mrf.mxu3  ;;  %v7184_v21 = vpop.f32.mrf.mxu2 }
 0xa63   :  { %v7209_v29 = vadd.f32 %v7208_v40, %v7159_v34  ;;  %v16049_v34 = vld [vmem:[%s16140_s10] ss:$0 sm:$0xff] }
 0xa65   :  { %v7242_v33 = vpack.c.bf16 %v7209_v29, %v7207_v10 }
 0xa6a   :  { %v7211_v60 = vpop.f32.mrf.mxu3  ;;  %v7187_v44 = vpop.f32.mrf.mxu2 }
 0xa6b   :  { %v7212_v3 = vadd.f32 %v7211_v60, %v7162_v31 }
 0xa72   :  { %v7213_v26 = vpop.f32.mrf.mxu3  ;;  %v7189_v25 = vpop.f32.mrf.mxu2 }
 0xa73   :  { %v7214_v52 = vadd.f32 %v7213_v26, %v7164_v1 }
 0xa75   :  { %v7243_v4 = vpack.c.bf16 %v7214_v52, %v7212_v3 }
 0xa7a   :  { %v7216_v47 = vpop.f32.mrf.mxu3 }
 0xa7b   :  { %v7217_v59 = vadd.f32 %v7216_v47, %v7167_v35 }
 0xa82   :  { %v7218_v5 = vpop.f32.mrf.mxu3 }
 0xa83   :  { %v7219_v62 = vadd.f32 %v7218_v5, %v7169_v57 }
 0xa85   :  { %v7244_v48 = vpack.c.bf16 %v7219_v62, %v7217_v59 }
 0xa8a   :  { %v7221_v18 = vpop.f32.mrf.mxu3 }
 0xa8b   :  { %v7222_v6 = vadd.f32 %v7221_v18, %v7172_v9 }
 0xa92   :  { %v7223_v28 = vpop.f32.mrf.mxu3 }
 0xa93   :  { %v7224_v45 = vadd.f32 %v7223_v28, %v7174_v15 }
 0xa95   :  { %v7245_v13 = vpack.c.bf16 %v7224_v45, %v7222_v6 }
 0xa9a   :  { %v7226_v8 = vpop.f32.mrf.mxu3 }
 0xa9b   :  { %v7227_v50 = vadd.f32 %v7226_v8, %v7177_v14 }
 0xaa2   :  { %v7228_v37 = vpop.f32.mrf.mxu3 }
 0xaa3   :  { %v7229_v0 = vadd.f32 %v7228_v37, %v7179_v49 }
 0xaa5   :  { %v7246_v24 = vpack.c.bf16 %v7229_v0, %v7227_v50 }
 0xaaa   :  { %v7231_v16 = vpop.f32.mrf.mxu3 }
 0xaab   :  { %v7232_v56 = vadd.f32 %v7231_v16, %v7182_v11 }
 0xab2   :  { %v7233_v12 = vpop.f32.mrf.mxu3 }
 0xab3   :  { %v7234_v39 = vadd.f32 %v7233_v12, %v7184_v21 }
 0xab5   :  { %v7247_v23 = vpack.c.bf16 %v7234_v39, %v7232_v56 }
 0xaba   :  { %v7236_v2 = vpop.f32.mrf.mxu3 }
 0xabb   :  { %v7237_v20 = vadd.f32 %v7236_v2, %v7187_v44 }
 0xac2   :  { %v7238_v46 = vpop.f32.mrf.mxu3 }
 0xac3   :  { %v7239_v7 = vadd.f32 %v7238_v46, %v7189_v25 }
 0xac5   :  { %v7248_v30 = vpack.c.bf16 %v7239_v7, %v7237_v20 }
 0xac7   :  { %7249 = vmatpush.bf16.msra.mxu0 %v7248_v30 }
 0xacb   :  { %7250 = vmatpush.bf16.msra.mxu0 %v7247_v23 }
 0xacf   :  { %7251 = vmatpush.bf16.msra.mxu0 %v7246_v24 }
 0xad3   :  { %7252 = vmatpush.bf16.msra.mxu0 %v7245_v13 }
 0xad7   :  { %7253 = vmatpush.bf16.msra.mxu0 %v7244_v48 }
 0xadb   :  { %7254 = vmatpush.bf16.msra.mxu0 %v7243_v4 }
 0xadf   :  { %7255 = vmatpush.bf16.msra.mxu0 %v7242_v33 }
 0xae3   :  { %7256 = vmatpush.bf16.msra.mxu0 %v7241_v38 }
 0xae6   :  { %7257 = vmatmul.bf16.vlgmr.msra.gmra.mxu0 %v15787_v51  ;;  %v10403_v51 = vld [vmem:[%s16141_s11 + $0x20] sm:$0xff] }
 0xae7   :  { %7461 = vmatpush.bf16.msra.mxu1 %v10403_v51 }
 0xaf6   :  { %7262 = vmatmul.bf16.gmra.mxu0 %v16692_v17  ;;  %v10402_v17 = vld [vmem:[%s16141_s11 + $0x18] sm:$0xff] }
 0xaf7   :  { %7462 = vmatpush.bf16.msra.mxu1 %v10402_v17 }
 0xb06   :  { %7267 = vmatmul.bf16.gmra.mxu0 %v16693_v58  ;;  %v10401_v58 = vld [vmem:[%s16141_s11 + $0x10] sm:$0xff] }
 0xb07   :  { %7463 = vmatpush.bf16.msra.mxu1 %v10401_v58 }
 0xb16   :  { %7272 = vmatmul.bf16.gmra.mxu0 %v16694_v63  ;;  %v10400_v63 = vld [vmem:[%s16141_s11 + $0x8] sm:$0xff] }
 0xb17   :  { %7464 = vmatpush.bf16.msra.mxu1 %v10400_v63 }
 0xb26   :  { %7277 = vmatmul.bf16.gmra.mxu0 %v16695_v41  ;;  %v10399_v41 = vld [vmem:[%s16141_s11] sm:$0xff] }
 0xb27   :  { %7465 = vmatpush.bf16.msra.mxu1 %v10399_v41 }
 0xb36   :  { %7282 = vmatmul.bf16.gmra.mxu0 %v15892_v53  ;;  %v16043_v53 = vld [vmem:[%s16139_s9] ss:$0 sm:$0xff] }
 0xb46   :  { %7287 = vmatmul.bf16.gmra.mxu0 %v15921_v55 }
 0xb56   :  { %7292 = vmatmul.bf16.gmra.mxu0 %v15943_v61 }
 0xb63   :  { %v7258_v32 = vpop.f32.mrf.mxu0 }
 0xb64   :  { %v7302_v55 = vmul.f32 %v16043_v53, %v7258_v32 }
 0xb66   :  { %v7322_v27 = vadd.f32 %v16049_v34, %v7302_v55 }
 0xb68   :  { %v7354_v31 = vmul.f32 0.01, %v7322_v27  ;;  %vm7338_vm0 = vcmp.gt.f32.partialorder %v7322_v27, 0.0 }
 0xb6a   :  { %v7370_v19 = vsel %vm7338_vm0, %v7322_v27, %v7354_v31 }
 0xb6b   :  { %v7260_v42 = vpop.f32.mrf.mxu0 }
 0xb6c   :  { %v7303_v54 = vmul.f32 %v16043_v53, %v7260_v42 }
 0xb6e   :  { %v7323_v61 = vadd.f32 %v16049_v34, %v7303_v54 }
 0xb70   :  { %vm7339_vm1 = vcmp.gt.f32.partialorder %v7323_v61, 0.0  ;;  %v7355_v38 = vmul.f32 0.01, %v7323_v61 }
 0xb72   :  { %v7371_v10 = vsel %vm7339_vm1, %v7323_v61, %v7355_v38 }
 0xb73   :  { %v7386_v1 = vpack.c.bf16 %v7371_v10, %v7370_v19  ;;  %v7263_v40 = vpop.f32.mrf.mxu0 }
 0xb74   :  { %v7304_v29 = vmul.f32 %v16043_v53, %v7263_v40 }
 0xb75   :  { %7466 = vmatmul.bf16.vlgmr.msra.gmra.mxu1 %v7386_v1 }
 0xb76   :  { %v7324_v33 = vadd.f32 %v16049_v34, %v7304_v29 }
 0xb78   :  { %v7356_v3 = vmul.f32 0.01, %v7324_v33  ;;  %vm7340_vm2 = vcmp.gt.f32.partialorder %v7324_v33, 0.0 }
 0xb7a   :  { %v7372_v52 = vsel %vm7340_vm2, %v7324_v33, %v7356_v3 }
 0xb7b   :  { %v7265_v35 = vpop.f32.mrf.mxu0 }
 0xb7c   :  { %v7305_v60 = vmul.f32 %v16043_v53, %v7265_v35 }
 0xb7e   :  { %v7325_v57 = vadd.f32 %v16049_v34, %v7305_v60 }
 0xb80   :  { %vm7341_vm3 = vcmp.gt.f32.partialorder %v7325_v57, 0.0  ;;  %v7357_v26 = vmul.f32 0.01, %v7325_v57 }
 0xb82   :  { %v7373_v4 = vsel %vm7341_vm3, %v7325_v57, %v7357_v26 }
 0xb83   :  { %v7268_v47 = vpop.f32.mrf.mxu0  ;;  %v7387_v59 = vpack.c.bf16 %v7373_v4, %v7372_v52 }
 0xb84   :  { %v7306_v9 = vmul.f32 %v16043_v53, %v7268_v47 }
 0xb85   :  { %7471 = vmatmul.bf16.gmra.mxu1 %v7387_v59 }
 0xb86   :  { %v7326_v5 = vadd.f32 %v16049_v34, %v7306_v9 }
 0xb88   :  { %v7358_v15 = vmul.f32 0.01, %v7326_v5  ;;  %vm7342_vm4 = vcmp.gt.f32.partialorder %v7326_v5, 0.0 }
 0xb8a   :  { %v7374_v14 = vsel %vm7342_vm4, %v7326_v5, %v7358_v15 }
 0xb8b   :  { %v7270_v62 = vpop.f32.mrf.mxu0 }
 0xb8c   :  { %v7307_v48 = vmul.f32 %v16043_v53, %v7270_v62 }
 0xb8e   :  { %v7327_v18 = vadd.f32 %v16049_v34, %v7307_v48 }
 0xb90   :  { %vm7343_vm5 = vcmp.gt.f32.partialorder %v7327_v18, 0.0  ;;  %v7359_v6 = vmul.f32 0.01, %v7327_v18 }
 0xb92   :  { %v7375_v28 = vsel %vm7343_vm5, %v7327_v18, %v7359_v6 }
 0xb93   :  { %v7273_v49 = vpop.f32.mrf.mxu0  ;;  %v7388_v8 = vpack.c.bf16 %v7375_v28, %v7374_v14 }
 0xb94   :  { %v7308_v37 = vmul.f32 %v16043_v53, %v7273_v49 }
 0xb95   :  { %7476 = vmatmul.bf16.gmra.mxu1 %v7388_v8 }
 0xb96   :  { %v7328_v11 = vadd.f32 %v16049_v34, %v7308_v37 }
 0xb98   :  { %v7360_v12 = vmul.f32 0.01, %v7328_v11  ;;  %vm7344_vm6 = vcmp.gt.f32.partialorder %v7328_v11, 0.0 }
 0xb9a   :  { %v7376_v25 = vsel %vm7344_vm6, %v7328_v11, %v7360_v12 }
 0xb9b   :  { %v7275_v16 = vpop.f32.mrf.mxu0 }
 0xb9c   :  { %v7309_v21 = vmul.f32 %v16043_v53, %v7275_v16 }
 0xb9e   :  { %v7329_v44 = vadd.f32 %v16049_v34, %v7309_v21 }
 0xba0   :  { %vm7345_vm7 = vcmp.gt.f32.partialorder %v7329_v44, 0.0  ;;  %v7361_v2 = vmul.f32 0.01, %v7329_v44 }
 0xba2   :  { %v7377_v46 = vsel %vm7345_vm7, %v7329_v44, %v7361_v2 }
 0xba3   :  { %v7278_v20 = vpop.f32.mrf.mxu0  ;;  %v7389_v7 = vpack.c.bf16 %v7377_v46, %v7376_v25 }
 0xba4   :  { %v7310_v39 = vmul.f32 %v16043_v53, %v7278_v20 }
 0xba5   :  { %7481 = vmatmul.bf16.gmra.mxu1 %v7389_v7 }
 0xba6   :  { %v7330_v30 = vadd.f32 %v16049_v34, %v7310_v39 }
 0xba8   :  { %v7362_v23 = vmul.f32 0.01, %v7330_v30  ;;  %vm7346_vm8 = vcmp.gt.f32.partialorder %v7330_v30, 0.0 }
 0xbaa   :  { %v7378_v24 = vsel %vm7346_vm8, %v7330_v30, %v7362_v23 }
 0xbab   :  { %v7280_v56 = vpop.f32.mrf.mxu0 }
 0xbac   :  { %v7311_v0 = vmul.f32 %v16043_v53, %v7280_v56 }
 0xbae   :  { %v7331_v50 = vadd.f32 %v16049_v34, %v7311_v0 }
 0xbb0   :  { %vm7347_vm9 = vcmp.gt.f32.partialorder %v7331_v50, 0.0  ;;  %v7363_v45 = vmul.f32 0.01, %v7331_v50 }
 0xbb2   :  { %v7379_v13 = vsel %vm7347_vm9, %v7331_v50, %v7363_v45 }
 0xbb3   :  { %v7283_v36 = vpop.f32.mrf.mxu0  ;;  %v7390_v43 = vpack.c.bf16 %v7379_v13, %v7378_v24 }
 0xbb4   :  { %v7312_v22 = vmul.f32 %v16043_v53, %v7283_v36 }
 0xbb5   :  { %7486 = vmatmul.bf16.gmra.mxu1 %v7390_v43 }
 0xbb6   :  { %v7332_v51 = vadd.f32 %v16049_v34, %v7312_v22 }
 0xbb8   :  { %v7364_v63 = vmul.f32 0.01, %v7332_v51  ;;  %vm7348_vm10 = vcmp.gt.f32.partialorder %v7332_v51, 0.0 }
 0xbba   :  { %v7380_v55 = vsel %vm7348_vm10, %v7332_v51, %v7364_v63 }
 0xbbb   :  { %v7285_v17 = vpop.f32.mrf.mxu0 }
 0xbbc   :  { %v7313_v58 = vmul.f32 %v16043_v53, %v7285_v17 }
 0xbbe   :  { %v7333_v41 = vadd.f32 %v16049_v34, %v7313_v58 }
 0xbc0   :  { %vm7349_vm11 = vcmp.gt.f32.partialorder %v7333_v41, 0.0  ;;  %v7365_v32 = vmul.f32 0.01, %v7333_v41 }
 0xbc2   :  { %v7381_v27 = vsel %vm7349_vm11, %v7333_v41, %v7365_v32 }
 0xbc3   :  { %v7288_v42 = vpop.f32.mrf.mxu0  ;;  %v7391_v54 = vpack.c.bf16 %v7381_v27, %v7380_v55 }
 0xbc4   :  { %v7314_v31 = vmul.f32 %v16043_v53, %v7288_v42 }
 0xbc5   :  { %7491 = vmatmul.bf16.gmra.mxu1 %v7391_v54 }
 0xbc6   :  { %v7334_v61 = vadd.f32 %v16049_v34, %v7314_v31 }
 0xbc8   :  { %v7366_v10 = vmul.f32 0.01, %v7334_v61  ;;  %vm7350_vm12 = vcmp.gt.f32.partialorder %v7334_v61, 0.0 }
 0xbca   :  { %v7382_v29 = vsel %vm7350_vm12, %v7334_v61, %v7366_v10 }
 0xbcb   :  { %v7290_v38 = vpop.f32.mrf.mxu0 }
 0xbcc   :  { %v7315_v19 = vmul.f32 %v16043_v53, %v7290_v38 }
 0xbce   :  { %v7335_v1 = vadd.f32 %v16049_v34, %v7315_v19 }
 0xbd0   :  { %vm7351_vm13 = vcmp.gt.f32.partialorder %v7335_v1, 0.0  ;;  %v7367_v40 = vmul.f32 0.01, %v7335_v1 }
 0xbd2   :  { %v7383_v33 = vsel %vm7351_vm13, %v7335_v1, %v7367_v40 }
 0xbd3   :  { %v7293_v35 = vpop.f32.mrf.mxu0  ;;  %v7392_v60 = vpack.c.bf16 %v7383_v33, %v7382_v29 }
 0xbd4   :  { %v7316_v3 = vmul.f32 %v16043_v53, %v7293_v35 }
 0xbd5   :  { %7496 = vmatmul.bf16.gmra.mxu1 %v7392_v60 }
 0xbd6   :  { %v7336_v57 = vadd.f32 %v16049_v34, %v7316_v3 }
 0xbd8   :  { %v7368_v4 = vmul.f32 0.01, %v7336_v57  ;;  %vm7352_vm14 = vcmp.gt.f32.partialorder %v7336_v57, 0.0 }
 0xbda   :  { %v7384_v9 = vsel %vm7352_vm14, %v7336_v57, %v7368_v4 }
 0xbdb   :  { %v7295_v26 = vpop.f32.mrf.mxu0 }
 0xbdc   :  { %v7317_v52 = vmul.f32 %v16043_v53, %v7295_v26 }
 0xbde   :  { %v7337_v47 = vadd.f32 %v16049_v34, %v7317_v52 }
 0xbe0   :  { %vm7353_vm15 = vcmp.gt.f32.partialorder %v7337_v47, 0.0  ;;  %v7369_v59 = vmul.f32 0.01, %v7337_v47 }
 0xbe2   :  { %v7385_v5 = vsel %vm7353_vm15, %v7337_v47, %v7369_v59 }
 0xbe3   :  { %v7393_v62 = vpack.c.bf16 %v7385_v5, %v7384_v9 }
 0xbe5   :  { %7501 = vmatmul.bf16.gmra.mxu1 %v7393_v62 }
 0xbf2   :  { %v7467_v48 = vpop.f32.mrf.mxu1 }
 0xbf3   :  { %7507 = vst [vmem:[%s16142_s12] sm:$0xff] %v7467_v48 }
 0xbfa   :  { %v7469_v15 = vpop.f32.mrf.mxu1 }
 0xbfb   :  { %7508 = vst [vmem:[%s16142_s12 + $0x8] sm:$0xff] %v7469_v15 }
 0xc02   :  { %v7472_v53 = vpop.f32.mrf.mxu1 }
 0xc03   :  { %7509 = vst [vmem:[%s16142_s12 + $0x10] sm:$0xff] %v7472_v53 }
 0xc0a   :  { %v7474_v34 = vpop.f32.mrf.mxu1 }
 0xc0b   :  { %7510 = vst [vmem:[%s16142_s12 + $0x18] sm:$0xff] %v7474_v34 }
 0xc12   :  { %v7477_v18 = vpop.f32.mrf.mxu1 }
 0xc13   :  { %7511 = vst [vmem:[%s16142_s12 + $0x20] sm:$0xff] %v7477_v18 }
 0xc1a   :  { %v7479_v6 = vpop.f32.mrf.mxu1 }
 0xc1b   :  { %7512 = vst [vmem:[%s16142_s12 + $0x28] sm:$0xff] %v7479_v6 }
 0xc22   :  { %v7482_v14 = vpop.f32.mrf.mxu1 }
 0xc23   :  { %7513 = vst [vmem:[%s16142_s12 + $0x30] sm:$0xff] %v7482_v14 }
 0xc2a   :  { %v7484_v28 = vpop.f32.mrf.mxu1 }
 0xc2b   :  { %7514 = vst [vmem:[%s16142_s12 + $0x38] sm:$0xff] %v7484_v28 }
 0xc32   :  { %v7487_v49 = vpop.f32.mrf.mxu1 }
 0xc33   :  { %7515 = vst [vmem:[%s16142_s12 + $0x40] sm:$0xff] %v7487_v49 }
 0xc3a   :  { %v7489_v8 = vpop.f32.mrf.mxu1 }
 0xc3b   :  { %7516 = vst [vmem:[%s16142_s12 + $0x48] sm:$0xff] %v7489_v8 }
 0xc42   :  { %v7492_v37 = vpop.f32.mrf.mxu1 }
 0xc43   :  { %7517 = vst [vmem:[%s16142_s12 + $0x50] sm:$0xff] %v7492_v37 }
 0xc4a   :  { %v7494_v11 = vpop.f32.mrf.mxu1 }
 0xc4b   :  { %7518 = vst [vmem:[%s16142_s12 + $0x58] sm:$0xff] %v7494_v11 }
 0xc52   :  { %v7497_v16 = vpop.f32.mrf.mxu1 }
 0xc53   :  { %7519 = vst [vmem:[%s16142_s12 + $0x60] sm:$0xff] %v7497_v16 }
 0xc5a   :  { %v7499_v21 = vpop.f32.mrf.mxu1 }
 0xc5b   :  { %7520 = vst [vmem:[%s16142_s12 + $0x68] sm:$0xff] %v7499_v21 }
 0xc62   :  { %v7502_v12 = vpop.f32.mrf.mxu1 }
 0xc63   :  { %7521 = vst [vmem:[%s16142_s12 + $0x70] sm:$0xff] %v7502_v12 }
 0xc6a   :  { %v7504_v44 = vpop.f32.mrf.mxu1 }
 0xc6b   :  { %7522 = vst [vmem:[%s16142_s12 + $0x78] sm:$0xff] %v7504_v44 }

</bundles_post_ra>
